<compile_context>
chip_gen: v5e
topology: v5e:2x2
jax: 0.10.0
libtpu: 0.0.40
codegen_flags: <defaults>
</compile_context>

<pallas_src>
import functools

import jax
import jax.numpy as jnp
import numpy as np
from jax.experimental import pallas as pl
from jax.experimental.pallas import tpu as pltpu

HIDDEN_SIZE = 768
NUM_HEADS = 12
HEAD_DIM = HIDDEN_SIZE // NUM_HEADS   # 64
SCALE = HEAD_DIM ** (-0.5)


def _clip_attn_kernel(x_ref, wqkv_ref, bqkv_ref, wo_ref, bo_ref, o_ref, ctx_ref):
    b_blk, seq, dim = x_ref.shape
    m = b_blk * seq
    cdt = x_ref.dtype                      # MXU operand dtype (f32 or bf16)

    # Flatten the batch block so the projection matmuls have M = b_blk*seq rows.
    x2d = x_ref[...].reshape(m, dim)

    # Fused q/k/v projection: (m, 768) @ (768, 2304) -> (m, 2304), f32 accumulation.
    # Scale is already folded into the q columns / q bias.
    qkv = jnp.dot(x2d, wqkv_ref[...], preferred_element_type=jnp.float32)
    qkv = qkv + bqkv_ref[...]
    q = qkv[:, 0 * dim:1 * dim]
    k = qkv[:, 1 * dim:2 * dim]
    v = qkv[:, 2 * dim:3 * dim]

    # Per-head attention (12 heads, static unroll).  Each head's temporaries die after its
    # scratch write, so live ranges stay bounded to one head.
    for h in range(NUM_HEADS):
        lo = h * HEAD_DIM
        hi = lo + HEAD_DIM
        q_h = q[:, lo:hi].astype(cdt).reshape(b_blk, seq, HEAD_DIM)
        k_h = k[:, lo:hi].astype(cdt).reshape(b_blk, seq, HEAD_DIM)
        v_h = v[:, lo:hi].astype(cdt).reshape(b_blk, seq, HEAD_DIM)

        # scores: (b_blk, seq, seq), f32
        s = jnp.einsum('bqd,bkd->bqk', q_h, k_h, preferred_element_type=jnp.float32)
        # numerically stable softmax in f32; reciprocal goes to the EUP slot
        s = s - jnp.max(s, axis=-1, keepdims=True)
        e = jnp.exp(s)
        p = e * pl.reciprocal(jnp.sum(e, axis=-1, keepdims=True), approx=True)

        ctx_h = jnp.einsum('bqk,bkd->bqd', p.astype(cdt), v_h,
                           preferred_element_type=jnp.float32)
        # lane-offset write into the (m, 768) context scratch (no concatenate)
        ctx_ref[:, lo:hi] = ctx_h.reshape(m, HEAD_DIM)

    # Output projection: one full-width (768x768) matmul on the lane-dense context.
    out = jnp.dot(ctx_ref[...].astype(cdt), wo_ref[...],
                  preferred_element_type=jnp.float32)
    out = out + bo_ref[...]
    o_ref[...] = out.reshape(b_blk, seq, dim).astype(o_ref.dtype)


def _pick_b_blk(batch, seq, target_rows=512):
    """Largest divisor of `batch` with b_blk*seq <= target_rows (MXU M-fill vs VMEM)."""
    best = 1
    for cand in range(1, batch + 1):
        if batch % cand == 0 and cand * seq <= max(target_rows, seq):
            best = cand
    return best


@functools.partial(jax.jit, static_argnames=("b_blk",))
def clip_attention_pallas(hidden_states, w_qkv, b_qkv, w_o, b_o, *, b_blk=None):
    """hidden_states: (B, S, 768).  w_qkv: (768, 2304) [scale folded into q cols],
    b_qkv: (1, 2304), w_o: (768, 768), b_o: (1, 768).  Use prepare_clip_attention_params."""
    B, S, D = hidden_states.shape
    assert D == HIDDEN_SIZE
    if b_blk is None:
        b_blk = _pick_b_blk(B, S)
    grid = (B // b_blk,)
    m = b_blk * S

    return pl.pallas_call(
        _clip_attn_kernel,
        out_shape=jax.ShapeDtypeStruct((B, S, D), hidden_states.dtype),
        grid_spec=pltpu.PrefetchScalarGridSpec(
            num_scalar_prefetch=0,
            grid=grid,
            in_specs=[
                pl.BlockSpec((b_blk, S, D), lambda i: (i, 0, 0)),     # hidden_states
                pl.BlockSpec((D, 3 * D), lambda i: (0, 0)),           # fused qkv weight
                pl.BlockSpec((1, 3 * D), lambda i: (0, 0)),           # fused qkv bias
                pl.BlockSpec((D, D), lambda i: (0, 0)),               # out_proj weight
                pl.BlockSpec((1, D), lambda i: (0, 0)),               # out_proj bias
            ],
            out_specs=pl.BlockSpec((b_blk, S, D), lambda i: (i, 0, 0)),
            scratch_shapes=[pltpu.VMEM((m, D), jnp.float32)],         # per-block context
        ),
        compiler_params=pltpu.CompilerParams(
            dimension_semantics=("parallel",),   # megacore-shards batch blocks on v7x
            vmem_limit_bytes=48 << 20,           # <= v7x 64 MiB physical VMEM
        ),
    )(hidden_states, w_qkv, b_qkv, w_o, b_o)


def prepare_clip_attention_params(wq, bq, wk, bk, wv, bv, wo, bo, dtype=jnp.float32):
    """One-time host-side parameter prep.
    Inputs use PyTorch nn.Linear layout: weight (out, in), bias (out,).
    Transposes to (in, out), folds SCALE into the q projection, fuses q/k/v, and casts
    to `dtype` (pass jnp.bfloat16 on v6e/v7x for bf16 MXU operands)."""
    wq = np.asarray(wq, np.float32); wk = np.asarray(wk, np.float32)
    wv = np.asarray(wv, np.float32); wo = np.asarray(wo, np.float32)
    bq = np.asarray(bq, np.float32); bk = np.asarray(bk, np.float32)
    bv = np.asarray(bv, np.float32); bo = np.asarray(bo, np.float32)

    w_qkv = np.concatenate([wq.T * SCALE, wk.T, wv.T], axis=1)            # (768, 2304)
    b_qkv = np.concatenate([bq * SCALE, bk, bv], axis=0).reshape(1, -1)   # (1, 2304)
    w_o = wo.T                                                            # (768, 768)
    b_o = bo.reshape(1, -1)                                               # (1, 768)
    return (jnp.asarray(w_qkv, dtype), jnp.asarray(b_qkv, dtype),
            jnp.asarray(w_o, dtype), jnp.asarray(b_o, dtype))


def _reference(hidden_states, wq, bq, wk, bk, wv, bv, wo, bo):
    """Pure-JAX mirror of the PyTorch forward (masks=None, dropout=0), original layout."""
    B, S, D = hidden_states.shape
    q = (hidden_states @ wq.T + bq) * SCALE
    k = hidden_states @ wk.T + bk
    v = hidden_states @ wv.T + bv

    def split_heads(t):  # (B, S, D) -> (B, H, S, Dh)
        return t.reshape(B, S, NUM_HEADS, HEAD_DIM).transpose(0, 2, 1, 3)

    qh, kh, vh = split_heads(q), split_heads(k), split_heads(v)
    scores = jnp.einsum('bhqd,bhkd->bhqk', qh, kh)
    probs = jax.nn.softmax(scores, axis=-1)
    ctx = jnp.einsum('bhqk,bhkd->bhqd', probs, vh)
    ctx = ctx.transpose(0, 2, 1, 3).reshape(B, S, D)
    return ctx @ wo.T + bo


if __name__ == "__main__":
    B, S, D = 2, 8, HIDDEN_SIZE

    key = jax.random.PRNGKey(0)
    keys = jax.random.split(key, 9)

    # Deterministic synthetic parameters in PyTorch Linear layout: weight (out, in), bias (out,)
    def linear_params(kw, kb):
        w = jax.random.normal(kw, (D, D), dtype=jnp.float32) * 0.02
        b = jax.random.normal(kb, (D,), dtype=jnp.float32) * 0.02
        return w, b

    wq, bq = linear_params(keys[0], keys[1])
    wk, bk = linear_params(keys[2], keys[3])
    wv, bv = linear_params(keys[4], keys[5])
    wo, bo = linear_params(keys[6], keys[7])
    hidden_states = jax.random.normal(keys[8], (B, S, D), dtype=jnp.float32)

    ref = _reference(hidden_states, wq, bq, wk, bk, wv, bv, wo, bo)

    # f32 path (matches the PyTorch module's precision)
    p32 = prepare_clip_attention_params(wq, bq, wk, bk, wv, bv, wo, bo, dtype=jnp.float32)
    out32 = jax.block_until_ready(clip_attention_pallas(hidden_states, *p32))
    assert out32.shape == (B, S, D)
    err32 = float(jnp.max(jnp.abs(out32 - ref)))
    assert err32 < 2e-3, f"f32 mismatch vs reference: {err32}"

    # bf16 MXU-operand path (v6e/v7x throughput optimization; f32 accumulation + f32 softmax)
    p16 = prepare_clip_attention_params(wq, bq, wk, bk, wv, bv, wo, bo, dtype=jnp.bfloat16)
    out16 = jax.block_until_ready(
        clip_attention_pallas(hidden_states.astype(jnp.bfloat16), *p16))
    err16 = float(jnp.max(jnp.abs(out16.astype(jnp.float32) - ref)))
    assert err16 < 7e-2, f"bf16 mismatch vs reference: {err16}"

    # module returns (attn_output, attn_weights_reshaped=None) since output_attentions=False
    print("KERNEL_OK")
</pallas_src>

<mosaic_0001>
module attributes {stable_mosaic.version = 11 : i64} {
  func.func @_clip_attn_kernel(%arg0: i32, %arg1: memref<2x8x768xf32, #tpu.memory_space<vmem>>, %arg2: memref<768x2304xf32, #tpu.memory_space<vmem>>, %arg3: memref<1x2304xf32, #tpu.memory_space<vmem>>, %arg4: memref<768x768xf32, #tpu.memory_space<vmem>>, %arg5: memref<1x768xf32, #tpu.memory_space<vmem>>, %arg6: memref<2x8x768xf32, #tpu.memory_space<vmem>>, %arg7: memref<16x768xf32, #tpu.memory_space<vmem>>) attributes {dimension_semantics = [#tpu.dimension_semantics<parallel>], iteration_bounds = array<i64: 1>, scalar_prefetch = 0 : i64, scratch_operands = 1 : i64, tpu.core_type = #tpu.core_type<tc>, window_params = [{transform_indices = @transform_0, window_bounds = array<i64: 2, 8, 768>}, {pipeline_mode = #tpu.pipeline_mode<synchronous>, transform_indices = @transform_1, window_bounds = array<i64: 768, 2304>}, {pipeline_mode = #tpu.pipeline_mode<synchronous>, transform_indices = @transform_2, window_bounds = array<i64: 1, 2304>}, {pipeline_mode = #tpu.pipeline_mode<synchronous>, transform_indices = @transform_3, window_bounds = array<i64: 768, 768>}, {pipeline_mode = #tpu.pipeline_mode<synchronous>, transform_indices = @transform_4, window_bounds = array<i64: 1, 768>}, {transform_indices = @transform_5, window_bounds = array<i64: 2, 8, 768>}]} {
    %c0 = arith.constant 0 : index
    %c0_0 = arith.constant 0 : index
    %c0_1 = arith.constant 0 : index
    %0 = vector.load %arg1[%c0, %c0_0, %c0_1] : memref<2x8x768xf32, #tpu.memory_space<vmem>>, vector<2x8x768xf32>
    %1 = vector.shape_cast %0 : vector<2x8x768xf32> to vector<16x768xf32>
    %c0_2 = arith.constant 0 : index
    %c0_3 = arith.constant 0 : index
    %2 = vector.load %arg2[%c0_2, %c0_3] : memref<768x2304xf32, #tpu.memory_space<vmem>>, vector<768x2304xf32>
    %cst = arith.constant dense<0.000000e+00> : vector<16x2304xf32>
    %3 = tpu.matmul %1, %2, %cst {dimension_numbers = #tpu.dot_dimension_numbers<[1], [0], [0], [1], [0, 0, 1, 1], [], []>} : vector<16x768xf32>, vector<768x2304xf32>, vector<16x2304xf32> -> vector<16x2304xf32>
    %c0_4 = arith.constant 0 : index
    %c0_5 = arith.constant 0 : index
    %4 = vector.load %arg3[%c0_4, %c0_5] : memref<1x2304xf32, #tpu.memory_space<vmem>>, vector<1x2304xf32>
    %5 = vector.broadcast %4 : vector<1x2304xf32> to vector<16x2304xf32>
    %6 = arith.addf %3, %5 : vector<16x2304xf32>
    %7 = vector.extract_strided_slice %6 {offsets = [0, 0], sizes = [16, 768], strides = [1, 1]} : vector<16x2304xf32> to vector<16x768xf32>
    %8 = vector.extract_strided_slice %6 {offsets = [0, 768], sizes = [16, 768], strides = [1, 1]} : vector<16x2304xf32> to vector<16x768xf32>
    %9 = vector.extract_strided_slice %6 {offsets = [0, 1536], sizes = [16, 768], strides = [1, 1]} : vector<16x2304xf32> to vector<16x768xf32>
    %10 = vector.extract_strided_slice %7 {offsets = [0, 0], sizes = [16, 64], strides = [1, 1]} : vector<16x768xf32> to vector<16x64xf32>
    %11 = vector.shape_cast %10 : vector<16x64xf32> to vector<2x8x64xf32>
    %12 = vector.extract_strided_slice %8 {offsets = [0, 0], sizes = [16, 64], strides = [1, 1]} : vector<16x768xf32> to vector<16x64xf32>
    %13 = vector.shape_cast %12 : vector<16x64xf32> to vector<2x8x64xf32>
    %14 = vector.extract_strided_slice %9 {offsets = [0, 0], sizes = [16, 64], strides = [1, 1]} : vector<16x768xf32> to vector<16x64xf32>
    %15 = vector.shape_cast %14 : vector<16x64xf32> to vector<2x8x64xf32>
    "tpu.trace_start"() <{level = 10 : i32, message = "bqd,bkd->bqk"}> : () -> ()
    %cst_6 = arith.constant dense<0.000000e+00> : vector<2x8x8xf32>
    %16 = tpu.matmul %11, %13, %cst_6 {dimension_numbers = #tpu.dot_dimension_numbers<[2], [2], [1], [1], [0, 0, 0, 1, 1, 1], [0], [0]>} : vector<2x8x64xf32>, vector<2x8x64xf32>, vector<2x8x8xf32> -> vector<2x8x8xf32>
    "tpu.trace_stop"() : () -> ()
    %cst_7 = arith.constant dense<0xFF800000> : vector<2x8xf32>
    %17 = vector.multi_reduction <maximumf>, %16, %cst_7 [2] : vector<2x8x8xf32> to vector<2x8xf32>
    %18 = vector.shape_cast %17 : vector<2x8xf32> to vector<2x8x1xf32>
    %19 = vector.broadcast %18 : vector<2x8x1xf32> to vector<2x8x8xf32>
    %20 = arith.subf %16, %19 : vector<2x8x8xf32>
    %21 = math.exp %20 : vector<2x8x8xf32>
    %cst_8 = arith.constant dense<0.000000e+00> : vector<2x8xf32>
    %22 = vector.multi_reduction <add>, %21, %cst_8 [2] : vector<2x8x8xf32> to vector<2x8xf32>
    %23 = vector.shape_cast %22 : vector<2x8xf32> to vector<2x8x1xf32>
    %24 = tpu.reciprocal %23 {approx = true} : vector<2x8x1xf32> -> vector<2x8x1xf32>
    %25 = vector.broadcast %24 : vector<2x8x1xf32> to vector<2x8x8xf32>
    %26 = arith.mulf %21, %25 : vector<2x8x8xf32>
    "tpu.trace_start"() <{level = 10 : i32, message = "bqk,bkd->bqd"}> : () -> ()
    %cst_9 = arith.constant dense<0.000000e+00> : vector<2x8x64xf32>
    %27 = tpu.matmul %26, %15, %cst_9 {dimension_numbers = #tpu.dot_dimension_numbers<[2], [1], [1], [2], [0, 0, 0, 1, 1, 2], [0], [0]>} : vector<2x8x8xf32>, vector<2x8x64xf32>, vector<2x8x64xf32> -> vector<2x8x64xf32>
    "tpu.trace_stop"() : () -> ()
    %28 = vector.shape_cast %27 : vector<2x8x64xf32> to vector<16x64xf32>
    %c0_10 = arith.constant 0 : index
    %c0_11 = arith.constant 0 : index
    %29 = vector.load %arg7[%c0_10, %c0_11] : memref<16x768xf32, #tpu.memory_space<vmem>>, vector<16x64xf32>
    tpu.vector_store %arg7[%c0_10, %c0_11], %28 {strides = array<i32>} : memref<16x768xf32, #tpu.memory_space<vmem>>, vector<16x64xf32>,
    %30 = vector.extract_strided_slice %7 {offsets = [0, 64], sizes = [16, 64], strides = [1, 1]} : vector<16x768xf32> to vector<16x64xf32>
    %31 = vector.shape_cast %30 : vector<16x64xf32> to vector<2x8x64xf32>
    %32 = vector.extract_strided_slice %8 {offsets = [0, 64], sizes = [16, 64], strides = [1, 1]} : vector<16x768xf32> to vector<16x64xf32>
    %33 = vector.shape_cast %32 : vector<16x64xf32> to vector<2x8x64xf32>
    %34 = vector.extract_strided_slice %9 {offsets = [0, 64], sizes = [16, 64], strides = [1, 1]} : vector<16x768xf32> to vector<16x64xf32>
    %35 = vector.shape_cast %34 : vector<16x64xf32> to vector<2x8x64xf32>
    "tpu.trace_start"() <{level = 10 : i32, message = "bqd,bkd->bqk"}> : () -> ()
    %cst_12 = arith.constant dense<0.000000e+00> : vector<2x8x8xf32>
    %36 = tpu.matmul %31, %33, %cst_12 {dimension_numbers = #tpu.dot_dimension_numbers<[2], [2], [1], [1], [0, 0, 0, 1, 1, 1], [0], [0]>} : vector<2x8x64xf32>, vector<2x8x64xf32>, vector<2x8x8xf32> -> vector<2x8x8xf32>
    "tpu.trace_stop"() : () -> ()
    %cst_13 = arith.constant dense<0xFF800000> : vector<2x8xf32>
    %37 = vector.multi_reduction <maximumf>, %36, %cst_13 [2] : vector<2x8x8xf32> to vector<2x8xf32>
    %38 = vector.shape_cast %37 : vector<2x8xf32> to vector<2x8x1xf32>
    %39 = vector.broadcast %38 : vector<2x8x1xf32> to vector<2x8x8xf32>
    %40 = arith.subf %36, %39 : vector<2x8x8xf32>
    %41 = math.exp %40 : vector<2x8x8xf32>
    %cst_14 = arith.constant dense<0.000000e+00> : vector<2x8xf32>
    %42 = vector.multi_reduction <add>, %41, %cst_14 [2] : vector<2x8x8xf32> to vector<2x8xf32>
    %43 = vector.shape_cast %42 : vector<2x8xf32> to vector<2x8x1xf32>
    %44 = tpu.reciprocal %43 {approx = true} : vector<2x8x1xf32> -> vector<2x8x1xf32>
    %45 = vector.broadcast %44 : vector<2x8x1xf32> to vector<2x8x8xf32>
    %46 = arith.mulf %41, %45 : vector<2x8x8xf32>
    "tpu.trace_start"() <{level = 10 : i32, message = "bqk,bkd->bqd"}> : () -> ()
    %cst_15 = arith.constant dense<0.000000e+00> : vector<2x8x64xf32>
    %47 = tpu.matmul %46, %35, %cst_15 {dimension_numbers = #tpu.dot_dimension_numbers<[2], [1], [1], [2], [0, 0, 0, 1, 1, 2], [0], [0]>} : vector<2x8x8xf32>, vector<2x8x64xf32>, vector<2x8x64xf32> -> vector<2x8x64xf32>
    "tpu.trace_stop"() : () -> ()
    %48 = vector.shape_cast %47 : vector<2x8x64xf32> to vector<16x64xf32>
    %c0_16 = arith.constant 0 : index
    %c64 = arith.constant 64 : index
    %49 = vector.load %arg7[%c0_16, %c64] : memref<16x768xf32, #tpu.memory_space<vmem>>, vector<16x64xf32>
    tpu.vector_store %arg7[%c0_16, %c64], %48 {strides = array<i32>} : memref<16x768xf32, #tpu.memory_space<vmem>>, vector<16x64xf32>,
    %50 = vector.extract_strided_slice %7 {offsets = [0, 128], sizes = [16, 64], strides = [1, 1]} : vector<16x768xf32> to vector<16x64xf32>
    %51 = vector.shape_cast %50 : vector<16x64xf32> to vector<2x8x64xf32>
    %52 = vector.extract_strided_slice %8 {offsets = [0, 128], sizes = [16, 64], strides = [1, 1]} : vector<16x768xf32> to vector<16x64xf32>
    %53 = vector.shape_cast %52 : vector<16x64xf32> to vector<2x8x64xf32>
    %54 = vector.extract_strided_slice %9 {offsets = [0, 128], sizes = [16, 64], strides = [1, 1]} : vector<16x768xf32> to vector<16x64xf32>
    %55 = vector.shape_cast %54 : vector<16x64xf32> to vector<2x8x64xf32>
    "tpu.trace_start"() <{level = 10 : i32, message = "bqd,bkd->bqk"}> : () -> ()
    %cst_17 = arith.constant dense<0.000000e+00> : vector<2x8x8xf32>
    %56 = tpu.matmul %51, %53, %cst_17 {dimension_numbers = #tpu.dot_dimension_numbers<[2], [2], [1], [1], [0, 0, 0, 1, 1, 1], [0], [0]>} : vector<2x8x64xf32>, vector<2x8x64xf32>, vector<2x8x8xf32> -> vector<2x8x8xf32>
    "tpu.trace_stop"() : () -> ()
    %cst_18 = arith.constant dense<0xFF800000> : vector<2x8xf32>
    %57 = vector.multi_reduction <maximumf>, %56, %cst_18 [2] : vector<2x8x8xf32> to vector<2x8xf32>
    %58 = vector.shape_cast %57 : vector<2x8xf32> to vector<2x8x1xf32>
    %59 = vector.broadcast %58 : vector<2x8x1xf32> to vector<2x8x8xf32>
    %60 = arith.subf %56, %59 : vector<2x8x8xf32>
    %61 = math.exp %60 : vector<2x8x8xf32>
    %cst_19 = arith.constant dense<0.000000e+00> : vector<2x8xf32>
    %62 = vector.multi_reduction <add>, %61, %cst_19 [2] : vector<2x8x8xf32> to vector<2x8xf32>
    %63 = vector.shape_cast %62 : vector<2x8xf32> to vector<2x8x1xf32>
    %64 = tpu.reciprocal %63 {approx = true} : vector<2x8x1xf32> -> vector<2x8x1xf32>
    %65 = vector.broadcast %64 : vector<2x8x1xf32> to vector<2x8x8xf32>
    %66 = arith.mulf %61, %65 : vector<2x8x8xf32>
    "tpu.trace_start"() <{level = 10 : i32, message = "bqk,bkd->bqd"}> : () -> ()
    %cst_20 = arith.constant dense<0.000000e+00> : vector<2x8x64xf32>
    %67 = tpu.matmul %66, %55, %cst_20 {dimension_numbers = #tpu.dot_dimension_numbers<[2], [1], [1], [2], [0, 0, 0, 1, 1, 2], [0], [0]>} : vector<2x8x8xf32>, vector<2x8x64xf32>, vector<2x8x64xf32> -> vector<2x8x64xf32>
    "tpu.trace_stop"() : () -> ()
    %68 = vector.shape_cast %67 : vector<2x8x64xf32> to vector<16x64xf32>
    %c0_21 = arith.constant 0 : index
    %c128 = arith.constant 128 : index
    %69 = vector.load %arg7[%c0_21, %c128] : memref<16x768xf32, #tpu.memory_space<vmem>>, vector<16x64xf32>
    tpu.vector_store %arg7[%c0_21, %c128], %68 {strides = array<i32>} : memref<16x768xf32, #tpu.memory_space<vmem>>, vector<16x64xf32>,
    %70 = vector.extract_strided_slice %7 {offsets = [0, 192], sizes = [16, 64], strides = [1, 1]} : vector<16x768xf32> to vector<16x64xf32>
    %71 = vector.shape_cast %70 : vector<16x64xf32> to vector<2x8x64xf32>
    %72 = vector.extract_strided_slice %8 {offsets = [0, 192], sizes = [16, 64], strides = [1, 1]} : vector<16x768xf32> to vector<16x64xf32>
    %73 = vector.shape_cast %72 : vector<16x64xf32> to vector<2x8x64xf32>
    %74 = vector.extract_strided_slice %9 {offsets = [0, 192], sizes = [16, 64], strides = [1, 1]} : vector<16x768xf32> to vector<16x64xf32>
    %75 = vector.shape_cast %74 : vector<16x64xf32> to vector<2x8x64xf32>
    "tpu.trace_start"() <{level = 10 : i32, message = "bqd,bkd->bqk"}> : () -> ()
    %cst_22 = arith.constant dense<0.000000e+00> : vector<2x8x8xf32>
    %76 = tpu.matmul %71, %73, %cst_22 {dimension_numbers = #tpu.dot_dimension_numbers<[2], [2], [1], [1], [0, 0, 0, 1, 1, 1], [0], [0]>} : vector<2x8x64xf32>, vector<2x8x64xf32>, vector<2x8x8xf32> -> vector<2x8x8xf32>
    "tpu.trace_stop"() : () -> ()
    %cst_23 = arith.constant dense<0xFF800000> : vector<2x8xf32>
    %77 = vector.multi_reduction <maximumf>, %76, %cst_23 [2] : vector<2x8x8xf32> to vector<2x8xf32>
    %78 = vector.shape_cast %77 : vector<2x8xf32> to vector<2x8x1xf32>
    %79 = vector.broadcast %78 : vector<2x8x1xf32> to vector<2x8x8xf32>
    %80 = arith.subf %76, %79 : vector<2x8x8xf32>
    %81 = math.exp %80 : vector<2x8x8xf32>
    %cst_24 = arith.constant dense<0.000000e+00> : vector<2x8xf32>
    %82 = vector.multi_reduction <add>, %81, %cst_24 [2] : vector<2x8x8xf32> to vector<2x8xf32>
    %83 = vector.shape_cast %82 : vector<2x8xf32> to vector<2x8x1xf32>
    %84 = tpu.reciprocal %83 {approx = true} : vector<2x8x1xf32> -> vector<2x8x1xf32>
    %85 = vector.broadcast %84 : vector<2x8x1xf32> to vector<2x8x8xf32>
    %86 = arith.mulf %81, %85 : vector<2x8x8xf32>
    "tpu.trace_start"() <{level = 10 : i32, message = "bqk,bkd->bqd"}> : () -> ()
    %cst_25 = arith.constant dense<0.000000e+00> : vector<2x8x64xf32>
    %87 = tpu.matmul %86, %75, %cst_25 {dimension_numbers = #tpu.dot_dimension_numbers<[2], [1], [1], [2], [0, 0, 0, 1, 1, 2], [0], [0]>} : vector<2x8x8xf32>, vector<2x8x64xf32>, vector<2x8x64xf32> -> vector<2x8x64xf32>
    "tpu.trace_stop"() : () -> ()
    %88 = vector.shape_cast %87 : vector<2x8x64xf32> to vector<16x64xf32>
    %c0_26 = arith.constant 0 : index
    %c192 = arith.constant 192 : index
    %89 = vector.load %arg7[%c0_26, %c192] : memref<16x768xf32, #tpu.memory_space<vmem>>, vector<16x64xf32>
    tpu.vector_store %arg7[%c0_26, %c192], %88 {strides = array<i32>} : memref<16x768xf32, #tpu.memory_space<vmem>>, vector<16x64xf32>,
    %90 = vector.extract_strided_slice %7 {offsets = [0, 256], sizes = [16, 64], strides = [1, 1]} : vector<16x768xf32> to vector<16x64xf32>
    %91 = vector.shape_cast %90 : vector<16x64xf32> to vector<2x8x64xf32>
    %92 = vector.extract_strided_slice %8 {offsets = [0, 256], sizes = [16, 64], strides = [1, 1]} : vector<16x768xf32> to vector<16x64xf32>
    %93 = vector.shape_cast %92 : vector<16x64xf32> to vector<2x8x64xf32>
    %94 = vector.extract_strided_slice %9 {offsets = [0, 256], sizes = [16, 64], strides = [1, 1]} : vector<16x768xf32> to vector<16x64xf32>
    %95 = vector.shape_cast %94 : vector<16x64xf32> to vector<2x8x64xf32>
    "tpu.trace_start"() <{level = 10 : i32, message = "bqd,bkd->bqk"}> : () -> ()
    %cst_27 = arith.constant dense<0.000000e+00> : vector<2x8x8xf32>
    %96 = tpu.matmul %91, %93, %cst_27 {dimension_numbers = #tpu.dot_dimension_numbers<[2], [2], [1], [1], [0, 0, 0, 1, 1, 1], [0], [0]>} : vector<2x8x64xf32>, vector<2x8x64xf32>, vector<2x8x8xf32> -> vector<2x8x8xf32>
    "tpu.trace_stop"() : () -> ()
    %cst_28 = arith.constant dense<0xFF800000> : vector<2x8xf32>
    %97 = vector.multi_reduction <maximumf>, %96, %cst_28 [2] : vector<2x8x8xf32> to vector<2x8xf32>
    %98 = vector.shape_cast %97 : vector<2x8xf32> to vector<2x8x1xf32>
    %99 = vector.broadcast %98 : vector<2x8x1xf32> to vector<2x8x8xf32>
    %100 = arith.subf %96, %99 : vector<2x8x8xf32>
    %101 = math.exp %100 : vector<2x8x8xf32>
    %cst_29 = arith.constant dense<0.000000e+00> : vector<2x8xf32>
    %102 = vector.multi_reduction <add>, %101, %cst_29 [2] : vector<2x8x8xf32> to vector<2x8xf32>
    %103 = vector.shape_cast %102 : vector<2x8xf32> to vector<2x8x1xf32>
    %104 = tpu.reciprocal %103 {approx = true} : vector<2x8x1xf32> -> vector<2x8x1xf32>
    %105 = vector.broadcast %104 : vector<2x8x1xf32> to vector<2x8x8xf32>
    %106 = arith.mulf %101, %105 : vector<2x8x8xf32>
    "tpu.trace_start"() <{level = 10 : i32, message = "bqk,bkd->bqd"}> : () -> ()
    %cst_30 = arith.constant dense<0.000000e+00> : vector<2x8x64xf32>
    %107 = tpu.matmul %106, %95, %cst_30 {dimension_numbers = #tpu.dot_dimension_numbers<[2], [1], [1], [2], [0, 0, 0, 1, 1, 2], [0], [0]>} : vector<2x8x8xf32>, vector<2x8x64xf32>, vector<2x8x64xf32> -> vector<2x8x64xf32>
    "tpu.trace_stop"() : () -> ()
    %108 = vector.shape_cast %107 : vector<2x8x64xf32> to vector<16x64xf32>
    %c0_31 = arith.constant 0 : index
    %c256 = arith.constant 256 : index
    %109 = vector.load %arg7[%c0_31, %c256] : memref<16x768xf32, #tpu.memory_space<vmem>>, vector<16x64xf32>
    tpu.vector_store %arg7[%c0_31, %c256], %108 {strides = array<i32>} : memref<16x768xf32, #tpu.memory_space<vmem>>, vector<16x64xf32>,
    %110 = vector.extract_strided_slice %7 {offsets = [0, 320], sizes = [16, 64], strides = [1, 1]} : vector<16x768xf32> to vector<16x64xf32>
    %111 = vector.shape_cast %110 : vector<16x64xf32> to vector<2x8x64xf32>
    %112 = vector.extract_strided_slice %8 {offsets = [0, 320], sizes = [16, 64], strides = [1, 1]} : vector<16x768xf32> to vector<16x64xf32>
    %113 = vector.shape_cast %112 : vector<16x64xf32> to vector<2x8x64xf32>
    %114 = vector.extract_strided_slice %9 {offsets = [0, 320], sizes = [16, 64], strides = [1, 1]} : vector<16x768xf32> to vector<16x64xf32>
    %115 = vector.shape_cast %114 : vector<16x64xf32> to vector<2x8x64xf32>
    "tpu.trace_start"() <{level = 10 : i32, message = "bqd,bkd->bqk"}> : () -> ()
    %cst_32 = arith.constant dense<0.000000e+00> : vector<2x8x8xf32>
    %116 = tpu.matmul %111, %113, %cst_32 {dimension_numbers = #tpu.dot_dimension_numbers<[2], [2], [1], [1], [0, 0, 0, 1, 1, 1], [0], [0]>} : vector<2x8x64xf32>, vector<2x8x64xf32>, vector<2x8x8xf32> -> vector<2x8x8xf32>
    "tpu.trace_stop"() : () -> ()
    %cst_33 = arith.constant dense<0xFF800000> : vector<2x8xf32>
    %117 = vector.multi_reduction <maximumf>, %116, %cst_33 [2] : vector<2x8x8xf32> to vector<2x8xf32>
    %118 = vector.shape_cast %117 : vector<2x8xf32> to vector<2x8x1xf32>
    %119 = vector.broadcast %118 : vector<2x8x1xf32> to vector<2x8x8xf32>
    %120 = arith.subf %116, %119 : vector<2x8x8xf32>
    %121 = math.exp %120 : vector<2x8x8xf32>
    %cst_34 = arith.constant dense<0.000000e+00> : vector<2x8xf32>
    %122 = vector.multi_reduction <add>, %121, %cst_34 [2] : vector<2x8x8xf32> to vector<2x8xf32>
    %123 = vector.shape_cast %122 : vector<2x8xf32> to vector<2x8x1xf32>
    %124 = tpu.reciprocal %123 {approx = true} : vector<2x8x1xf32> -> vector<2x8x1xf32>
    %125 = vector.broadcast %124 : vector<2x8x1xf32> to vector<2x8x8xf32>
    %126 = arith.mulf %121, %125 : vector<2x8x8xf32>
    "tpu.trace_start"() <{level = 10 : i32, message = "bqk,bkd->bqd"}> : () -> ()
    %cst_35 = arith.constant dense<0.000000e+00> : vector<2x8x64xf32>
    %127 = tpu.matmul %126, %115, %cst_35 {dimension_numbers = #tpu.dot_dimension_numbers<[2], [1], [1], [2], [0, 0, 0, 1, 1, 2], [0], [0]>} : vector<2x8x8xf32>, vector<2x8x64xf32>, vector<2x8x64xf32> -> vector<2x8x64xf32>
    "tpu.trace_stop"() : () -> ()
    %128 = vector.shape_cast %127 : vector<2x8x64xf32> to vector<16x64xf32>
    %c0_36 = arith.constant 0 : index
    %c320 = arith.constant 320 : index
    %129 = vector.load %arg7[%c0_36, %c320] : memref<16x768xf32, #tpu.memory_space<vmem>>, vector<16x64xf32>
    tpu.vector_store %arg7[%c0_36, %c320], %128 {strides = array<i32>} : memref<16x768xf32, #tpu.memory_space<vmem>>, vector<16x64xf32>,
    %130 = vector.extract_strided_slice %7 {offsets = [0, 384], sizes = [16, 64], strides = [1, 1]} : vector<16x768xf32> to vector<16x64xf32>
    %131 = vector.shape_cast %130 : vector<16x64xf32> to vector<2x8x64xf32>
    %132 = vector.extract_strided_slice %8 {offsets = [0, 384], sizes = [16, 64], strides = [1, 1]} : vector<16x768xf32> to vector<16x64xf32>
    %133 = vector.shape_cast %132 : vector<16x64xf32> to vector<2x8x64xf32>
    %134 = vector.extract_strided_slice %9 {offsets = [0, 384], sizes = [16, 64], strides = [1, 1]} : vector<16x768xf32> to vector<16x64xf32>
    %135 = vector.shape_cast %134 : vector<16x64xf32> to vector<2x8x64xf32>
    "tpu.trace_start"() <{level = 10 : i32, message = "bqd,bkd->bqk"}> : () -> ()
    %cst_37 = arith.constant dense<0.000000e+00> : vector<2x8x8xf32>
    %136 = tpu.matmul %131, %133, %cst_37 {dimension_numbers = #tpu.dot_dimension_numbers<[2], [2], [1], [1], [0, 0, 0, 1, 1, 1], [0], [0]>} : vector<2x8x64xf32>, vector<2x8x64xf32>, vector<2x8x8xf32> -> vector<2x8x8xf32>
    "tpu.trace_stop"() : () -> ()
    %cst_38 = arith.constant dense<0xFF800000> : vector<2x8xf32>
    %137 = vector.multi_reduction <maximumf>, %136, %cst_38 [2] : vector<2x8x8xf32> to vector<2x8xf32>
    %138 = vector.shape_cast %137 : vector<2x8xf32> to vector<2x8x1xf32>
    %139 = vector.broadcast %138 : vector<2x8x1xf32> to vector<2x8x8xf32>
    %140 = arith.subf %136, %139 : vector<2x8x8xf32>
    %141 = math.exp %140 : vector<2x8x8xf32>
    %cst_39 = arith.constant dense<0.000000e+00> : vector<2x8xf32>
    %142 = vector.multi_reduction <add>, %141, %cst_39 [2] : vector<2x8x8xf32> to vector<2x8xf32>
    %143 = vector.shape_cast %142 : vector<2x8xf32> to vector<2x8x1xf32>
    %144 = tpu.reciprocal %143 {approx = true} : vector<2x8x1xf32> -> vector<2x8x1xf32>
    %145 = vector.broadcast %144 : vector<2x8x1xf32> to vector<2x8x8xf32>
    %146 = arith.mulf %141, %145 : vector<2x8x8xf32>
    "tpu.trace_start"() <{level = 10 : i32, message = "bqk,bkd->bqd"}> : () -> ()
    %cst_40 = arith.constant dense<0.000000e+00> : vector<2x8x64xf32>
    %147 = tpu.matmul %146, %135, %cst_40 {dimension_numbers = #tpu.dot_dimension_numbers<[2], [1], [1], [2], [0, 0, 0, 1, 1, 2], [0], [0]>} : vector<2x8x8xf32>, vector<2x8x64xf32>, vector<2x8x64xf32> -> vector<2x8x64xf32>
    "tpu.trace_stop"() : () -> ()
    %148 = vector.shape_cast %147 : vector<2x8x64xf32> to vector<16x64xf32>
    %c0_41 = arith.constant 0 : index
    %c384 = arith.constant 384 : index
    %149 = vector.load %arg7[%c0_41, %c384] : memref<16x768xf32, #tpu.memory_space<vmem>>, vector<16x64xf32>
    tpu.vector_store %arg7[%c0_41, %c384], %148 {strides = array<i32>} : memref<16x768xf32, #tpu.memory_space<vmem>>, vector<16x64xf32>,
    %150 = vector.extract_strided_slice %7 {offsets = [0, 448], sizes = [16, 64], strides = [1, 1]} : vector<16x768xf32> to vector<16x64xf32>
    %151 = vector.shape_cast %150 : vector<16x64xf32> to vector<2x8x64xf32>
    %152 = vector.extract_strided_slice %8 {offsets = [0, 448], sizes = [16, 64], strides = [1, 1]} : vector<16x768xf32> to vector<16x64xf32>
    %153 = vector.shape_cast %152 : vector<16x64xf32> to vector<2x8x64xf32>
    %154 = vector.extract_strided_slice %9 {offsets = [0, 448], sizes = [16, 64], strides = [1, 1]} : vector<16x768xf32> to vector<16x64xf32>
    %155 = vector.shape_cast %154 : vector<16x64xf32> to vector<2x8x64xf32>
    "tpu.trace_start"() <{level = 10 : i32, message = "bqd,bkd->bqk"}> : () -> ()
    %cst_42 = arith.constant dense<0.000000e+00> : vector<2x8x8xf32>
    %156 = tpu.matmul %151, %153, %cst_42 {dimension_numbers = #tpu.dot_dimension_numbers<[2], [2], [1], [1], [0, 0, 0, 1, 1, 1], [0], [0]>} : vector<2x8x64xf32>, vector<2x8x64xf32>, vector<2x8x8xf32> -> vector<2x8x8xf32>
    "tpu.trace_stop"() : () -> ()
    %cst_43 = arith.constant dense<0xFF800000> : vector<2x8xf32>
    %157 = vector.multi_reduction <maximumf>, %156, %cst_43 [2] : vector<2x8x8xf32> to vector<2x8xf32>
    %158 = vector.shape_cast %157 : vector<2x8xf32> to vector<2x8x1xf32>
    %159 = vector.broadcast %158 : vector<2x8x1xf32> to vector<2x8x8xf32>
    %160 = arith.subf %156, %159 : vector<2x8x8xf32>
    %161 = math.exp %160 : vector<2x8x8xf32>
    %cst_44 = arith.constant dense<0.000000e+00> : vector<2x8xf32>
    %162 = vector.multi_reduction <add>, %161, %cst_44 [2] : vector<2x8x8xf32> to vector<2x8xf32>
    %163 = vector.shape_cast %162 : vector<2x8xf32> to vector<2x8x1xf32>
    %164 = tpu.reciprocal %163 {approx = true} : vector<2x8x1xf32> -> vector<2x8x1xf32>
    %165 = vector.broadcast %164 : vector<2x8x1xf32> to vector<2x8x8xf32>
    %166 = arith.mulf %161, %165 : vector<2x8x8xf32>
    "tpu.trace_start"() <{level = 10 : i32, message = "bqk,bkd->bqd"}> : () -> ()
    %cst_45 = arith.constant dense<0.000000e+00> : vector<2x8x64xf32>
    %167 = tpu.matmul %166, %155, %cst_45 {dimension_numbers = #tpu.dot_dimension_numbers<[2], [1], [1], [2], [0, 0, 0, 1, 1, 2], [0], [0]>} : vector<2x8x8xf32>, vector<2x8x64xf32>, vector<2x8x64xf32> -> vector<2x8x64xf32>
    "tpu.trace_stop"() : () -> ()
    %168 = vector.shape_cast %167 : vector<2x8x64xf32> to vector<16x64xf32>
    %c0_46 = arith.constant 0 : index
    %c448 = arith.constant 448 : index
    %169 = vector.load %arg7[%c0_46, %c448] : memref<16x768xf32, #tpu.memory_space<vmem>>, vector<16x64xf32>
    tpu.vector_store %arg7[%c0_46, %c448], %168 {strides = array<i32>} : memref<16x768xf32, #tpu.memory_space<vmem>>, vector<16x64xf32>,
    %170 = vector.extract_strided_slice %7 {offsets = [0, 512], sizes = [16, 64], strides = [1, 1]} : vector<16x768xf32> to vector<16x64xf32>
    %171 = vector.shape_cast %170 : vector<16x64xf32> to vector<2x8x64xf32>
    %172 = vector.extract_strided_slice %8 {offsets = [0, 512], sizes = [16, 64], strides = [1, 1]} : vector<16x768xf32> to vector<16x64xf32>
    %173 = vector.shape_cast %172 : vector<16x64xf32> to vector<2x8x64xf32>
    %174 = vector.extract_strided_slice %9 {offsets = [0, 512], sizes = [16, 64], strides = [1, 1]} : vector<16x768xf32> to vector<16x64xf32>
    %175 = vector.shape_cast %174 : vector<16x64xf32> to vector<2x8x64xf32>
    "tpu.trace_start"() <{level = 10 : i32, message = "bqd,bkd->bqk"}> : () -> ()
    %cst_47 = arith.constant dense<0.000000e+00> : vector<2x8x8xf32>
    %176 = tpu.matmul %171, %173, %cst_47 {dimension_numbers = #tpu.dot_dimension_numbers<[2], [2], [1], [1], [0, 0, 0, 1, 1, 1], [0], [0]>} : vector<2x8x64xf32>, vector<2x8x64xf32>, vector<2x8x8xf32> -> vector<2x8x8xf32>
    "tpu.trace_stop"() : () -> ()
    %cst_48 = arith.constant dense<0xFF800000> : vector<2x8xf32>
    %177 = vector.multi_reduction <maximumf>, %176, %cst_48 [2] : vector<2x8x8xf32> to vector<2x8xf32>
    %178 = vector.shape_cast %177 : vector<2x8xf32> to vector<2x8x1xf32>
    %179 = vector.broadcast %178 : vector<2x8x1xf32> to vector<2x8x8xf32>
    %180 = arith.subf %176, %179 : vector<2x8x8xf32>
    %181 = math.exp %180 : vector<2x8x8xf32>
    %cst_49 = arith.constant dense<0.000000e+00> : vector<2x8xf32>
    %182 = vector.multi_reduction <add>, %181, %cst_49 [2] : vector<2x8x8xf32> to vector<2x8xf32>
    %183 = vector.shape_cast %182 : vector<2x8xf32> to vector<2x8x1xf32>
    %184 = tpu.reciprocal %183 {approx = true} : vector<2x8x1xf32> -> vector<2x8x1xf32>
    %185 = vector.broadcast %184 : vector<2x8x1xf32> to vector<2x8x8xf32>
    %186 = arith.mulf %181, %185 : vector<2x8x8xf32>
    "tpu.trace_start"() <{level = 10 : i32, message = "bqk,bkd->bqd"}> : () -> ()
    %cst_50 = arith.constant dense<0.000000e+00> : vector<2x8x64xf32>
    %187 = tpu.matmul %186, %175, %cst_50 {dimension_numbers = #tpu.dot_dimension_numbers<[2], [1], [1], [2], [0, 0, 0, 1, 1, 2], [0], [0]>} : vector<2x8x8xf32>, vector<2x8x64xf32>, vector<2x8x64xf32> -> vector<2x8x64xf32>
    "tpu.trace_stop"() : () -> ()
    %188 = vector.shape_cast %187 : vector<2x8x64xf32> to vector<16x64xf32>
    %c0_51 = arith.constant 0 : index
    %c512 = arith.constant 512 : index
    %189 = vector.load %arg7[%c0_51, %c512] : memref<16x768xf32, #tpu.memory_space<vmem>>, vector<16x64xf32>
    tpu.vector_store %arg7[%c0_51, %c512], %188 {strides = array<i32>} : memref<16x768xf32, #tpu.memory_space<vmem>>, vector<16x64xf32>,
    %190 = vector.extract_strided_slice %7 {offsets = [0, 576], sizes = [16, 64], strides = [1, 1]} : vector<16x768xf32> to vector<16x64xf32>
    %191 = vector.shape_cast %190 : vector<16x64xf32> to vector<2x8x64xf32>
    %192 = vector.extract_strided_slice %8 {offsets = [0, 576], sizes = [16, 64], strides = [1, 1]} : vector<16x768xf32> to vector<16x64xf32>
    %193 = vector.shape_cast %192 : vector<16x64xf32> to vector<2x8x64xf32>
    %194 = vector.extract_strided_slice %9 {offsets = [0, 576], sizes = [16, 64], strides = [1, 1]} : vector<16x768xf32> to vector<16x64xf32>
    %195 = vector.shape_cast %194 : vector<16x64xf32> to vector<2x8x64xf32>
    "tpu.trace_start"() <{level = 10 : i32, message = "bqd,bkd->bqk"}> : () -> ()
    %cst_52 = arith.constant dense<0.000000e+00> : vector<2x8x8xf32>
    %196 = tpu.matmul %191, %193, %cst_52 {dimension_numbers = #tpu.dot_dimension_numbers<[2], [2], [1], [1], [0, 0, 0, 1, 1, 1], [0], [0]>} : vector<2x8x64xf32>, vector<2x8x64xf32>, vector<2x8x8xf32> -> vector<2x8x8xf32>
    "tpu.trace_stop"() : () -> ()
    %cst_53 = arith.constant dense<0xFF800000> : vector<2x8xf32>
    %197 = vector.multi_reduction <maximumf>, %196, %cst_53 [2] : vector<2x8x8xf32> to vector<2x8xf32>
    %198 = vector.shape_cast %197 : vector<2x8xf32> to vector<2x8x1xf32>
    %199 = vector.broadcast %198 : vector<2x8x1xf32> to vector<2x8x8xf32>
    %200 = arith.subf %196, %199 : vector<2x8x8xf32>
    %201 = math.exp %200 : vector<2x8x8xf32>
    %cst_54 = arith.constant dense<0.000000e+00> : vector<2x8xf32>
    %202 = vector.multi_reduction <add>, %201, %cst_54 [2] : vector<2x8x8xf32> to vector<2x8xf32>
    %203 = vector.shape_cast %202 : vector<2x8xf32> to vector<2x8x1xf32>
    %204 = tpu.reciprocal %203 {approx = true} : vector<2x8x1xf32> -> vector<2x8x1xf32>
    %205 = vector.broadcast %204 : vector<2x8x1xf32> to vector<2x8x8xf32>
    %206 = arith.mulf %201, %205 : vector<2x8x8xf32>
    "tpu.trace_start"() <{level = 10 : i32, message = "bqk,bkd->bqd"}> : () -> ()
    %cst_55 = arith.constant dense<0.000000e+00> : vector<2x8x64xf32>
    %207 = tpu.matmul %206, %195, %cst_55 {dimension_numbers = #tpu.dot_dimension_numbers<[2], [1], [1], [2], [0, 0, 0, 1, 1, 2], [0], [0]>} : vector<2x8x8xf32>, vector<2x8x64xf32>, vector<2x8x64xf32> -> vector<2x8x64xf32>
    "tpu.trace_stop"() : () -> ()
    %208 = vector.shape_cast %207 : vector<2x8x64xf32> to vector<16x64xf32>
    %c0_56 = arith.constant 0 : index
    %c576 = arith.constant 576 : index
    %209 = vector.load %arg7[%c0_56, %c576] : memref<16x768xf32, #tpu.memory_space<vmem>>, vector<16x64xf32>
    tpu.vector_store %arg7[%c0_56, %c576], %208 {strides = array<i32>} : memref<16x768xf32, #tpu.memory_space<vmem>>, vector<16x64xf32>,
    %210 = vector.extract_strided_slice %7 {offsets = [0, 640], sizes = [16, 64], strides = [1, 1]} : vector<16x768xf32> to vector<16x64xf32>
    %211 = vector.shape_cast %210 : vector<16x64xf32> to vector<2x8x64xf32>
    %212 = vector.extract_strided_slice %8 {offsets = [0, 640], sizes = [16, 64], strides = [1, 1]} : vector<16x768xf32> to vector<16x64xf32>
    %213 = vector.shape_cast %212 : vector<16x64xf32> to vector<2x8x64xf32>
    %214 = vector.extract_strided_slice %9 {offsets = [0, 640], sizes = [16, 64], strides = [1, 1]} : vector<16x768xf32> to vector<16x64xf32>
    %215 = vector.shape_cast %214 : vector<16x64xf32> to vector<2x8x64xf32>
    "tpu.trace_start"() <{level = 10 : i32, message = "bqd,bkd->bqk"}> : () -> ()
    %cst_57 = arith.constant dense<0.000000e+00> : vector<2x8x8xf32>
    %216 = tpu.matmul %211, %213, %cst_57 {dimension_numbers = #tpu.dot_dimension_numbers<[2], [2], [1], [1], [0, 0, 0, 1, 1, 1], [0], [0]>} : vector<2x8x64xf32>, vector<2x8x64xf32>, vector<2x8x8xf32> -> vector<2x8x8xf32>
    "tpu.trace_stop"() : () -> ()
    %cst_58 = arith.constant dense<0xFF800000> : vector<2x8xf32>
    %217 = vector.multi_reduction <maximumf>, %216, %cst_58 [2] : vector<2x8x8xf32> to vector<2x8xf32>
    %218 = vector.shape_cast %217 : vector<2x8xf32> to vector<2x8x1xf32>
    %219 = vector.broadcast %218 : vector<2x8x1xf32> to vector<2x8x8xf32>
    %220 = arith.subf %216, %219 : vector<2x8x8xf32>
    %221 = math.exp %220 : vector<2x8x8xf32>
    %cst_59 = arith.constant dense<0.000000e+00> : vector<2x8xf32>
    %222 = vector.multi_reduction <add>, %221, %cst_59 [2] : vector<2x8x8xf32> to vector<2x8xf32>
    %223 = vector.shape_cast %222 : vector<2x8xf32> to vector<2x8x1xf32>
    %224 = tpu.reciprocal %223 {approx = true} : vector<2x8x1xf32> -> vector<2x8x1xf32>
    %225 = vector.broadcast %224 : vector<2x8x1xf32> to vector<2x8x8xf32>
    %226 = arith.mulf %221, %225 : vector<2x8x8xf32>
    "tpu.trace_start"() <{level = 10 : i32, message = "bqk,bkd->bqd"}> : () -> ()
    %cst_60 = arith.constant dense<0.000000e+00> : vector<2x8x64xf32>
    %227 = tpu.matmul %226, %215, %cst_60 {dimension_numbers = #tpu.dot_dimension_numbers<[2], [1], [1], [2], [0, 0, 0, 1, 1, 2], [0], [0]>} : vector<2x8x8xf32>, vector<2x8x64xf32>, vector<2x8x64xf32> -> vector<2x8x64xf32>
    "tpu.trace_stop"() : () -> ()
    %228 = vector.shape_cast %227 : vector<2x8x64xf32> to vector<16x64xf32>
    %c0_61 = arith.constant 0 : index
    %c640 = arith.constant 640 : index
    %229 = vector.load %arg7[%c0_61, %c640] : memref<16x768xf32, #tpu.memory_space<vmem>>, vector<16x64xf32>
    tpu.vector_store %arg7[%c0_61, %c640], %228 {strides = array<i32>} : memref<16x768xf32, #tpu.memory_space<vmem>>, vector<16x64xf32>,
    %230 = vector.extract_strided_slice %7 {offsets = [0, 704], sizes = [16, 64], strides = [1, 1]} : vector<16x768xf32> to vector<16x64xf32>
    %231 = vector.shape_cast %230 : vector<16x64xf32> to vector<2x8x64xf32>
    %232 = vector.extract_strided_slice %8 {offsets = [0, 704], sizes = [16, 64], strides = [1, 1]} : vector<16x768xf32> to vector<16x64xf32>
    %233 = vector.shape_cast %232 : vector<16x64xf32> to vector<2x8x64xf32>
    %234 = vector.extract_strided_slice %9 {offsets = [0, 704], sizes = [16, 64], strides = [1, 1]} : vector<16x768xf32> to vector<16x64xf32>
    %235 = vector.shape_cast %234 : vector<16x64xf32> to vector<2x8x64xf32>
    "tpu.trace_start"() <{level = 10 : i32, message = "bqd,bkd->bqk"}> : () -> ()
    %cst_62 = arith.constant dense<0.000000e+00> : vector<2x8x8xf32>
    %236 = tpu.matmul %231, %233, %cst_62 {dimension_numbers = #tpu.dot_dimension_numbers<[2], [2], [1], [1], [0, 0, 0, 1, 1, 1], [0], [0]>} : vector<2x8x64xf32>, vector<2x8x64xf32>, vector<2x8x8xf32> -> vector<2x8x8xf32>
    "tpu.trace_stop"() : () -> ()
    %cst_63 = arith.constant dense<0xFF800000> : vector<2x8xf32>
    %237 = vector.multi_reduction <maximumf>, %236, %cst_63 [2] : vector<2x8x8xf32> to vector<2x8xf32>
    %238 = vector.shape_cast %237 : vector<2x8xf32> to vector<2x8x1xf32>
    %239 = vector.broadcast %238 : vector<2x8x1xf32> to vector<2x8x8xf32>
    %240 = arith.subf %236, %239 : vector<2x8x8xf32>
    %241 = math.exp %240 : vector<2x8x8xf32>
    %cst_64 = arith.constant dense<0.000000e+00> : vector<2x8xf32>
    %242 = vector.multi_reduction <add>, %241, %cst_64 [2] : vector<2x8x8xf32> to vector<2x8xf32>
    %243 = vector.shape_cast %242 : vector<2x8xf32> to vector<2x8x1xf32>
    %244 = tpu.reciprocal %243 {approx = true} : vector<2x8x1xf32> -> vector<2x8x1xf32>
    %245 = vector.broadcast %244 : vector<2x8x1xf32> to vector<2x8x8xf32>
    %246 = arith.mulf %241, %245 : vector<2x8x8xf32>
    "tpu.trace_start"() <{level = 10 : i32, message = "bqk,bkd->bqd"}> : () -> ()
    %cst_65 = arith.constant dense<0.000000e+00> : vector<2x8x64xf32>
    %247 = tpu.matmul %246, %235, %cst_65 {dimension_numbers = #tpu.dot_dimension_numbers<[2], [1], [1], [2], [0, 0, 0, 1, 1, 2], [0], [0]>} : vector<2x8x8xf32>, vector<2x8x64xf32>, vector<2x8x64xf32> -> vector<2x8x64xf32>
    "tpu.trace_stop"() : () -> ()
    %248 = vector.shape_cast %247 : vector<2x8x64xf32> to vector<16x64xf32>
    %c0_66 = arith.constant 0 : index
    %c704 = arith.constant 704 : index
    %249 = vector.load %arg7[%c0_66, %c704] : memref<16x768xf32, #tpu.memory_space<vmem>>, vector<16x64xf32>
    tpu.vector_store %arg7[%c0_66, %c704], %248 {strides = array<i32>} : memref<16x768xf32, #tpu.memory_space<vmem>>, vector<16x64xf32>,
    %c0_67 = arith.constant 0 : index
    %c0_68 = arith.constant 0 : index
    %250 = vector.load %arg7[%c0_67, %c0_68] : memref<16x768xf32, #tpu.memory_space<vmem>>, vector<16x768xf32>
    %c0_69 = arith.constant 0 : index
    %c0_70 = arith.constant 0 : index
    %251 = vector.load %arg4[%c0_69, %c0_70] : memref<768x768xf32, #tpu.memory_space<vmem>>, vector<768x768xf32>
    %cst_71 = arith.constant dense<0.000000e+00> : vector<16x768xf32>
    %252 = tpu.matmul %250, %251, %cst_71 {dimension_numbers = #tpu.dot_dimension_numbers<[1], [0], [0], [1], [0, 0, 1, 1], [], []>} : vector<16x768xf32>, vector<768x768xf32>, vector<16x768xf32> -> vector<16x768xf32>
    %c0_72 = arith.constant 0 : index
    %c0_73 = arith.constant 0 : index
    %253 = vector.load %arg5[%c0_72, %c0_73] : memref<1x768xf32, #tpu.memory_space<vmem>>, vector<1x768xf32>
    %254 = vector.broadcast %253 : vector<1x768xf32> to vector<16x768xf32>
    %255 = arith.addf %252, %254 : vector<16x768xf32>
    %256 = vector.shape_cast %255 : vector<16x768xf32> to vector<2x8x768xf32>
    %c0_74 = arith.constant 0 : index
    %c0_75 = arith.constant 0 : index
    %c0_76 = arith.constant 0 : index
    %257 = vector.load %arg6[%c0_74, %c0_75, %c0_76] : memref<2x8x768xf32, #tpu.memory_space<vmem>>, vector<2x8x768xf32>
    tpu.vector_store %arg6[%c0_74, %c0_75, %c0_76], %256 {strides = array<i32>} : memref<2x8x768xf32, #tpu.memory_space<vmem>>, vector<2x8x768xf32>,
    return
  }
  func.func @transform_0(%arg0: i32) -> (i32, i32, i32) {
    %c0_i32 = arith.constant 0 : i32
    %c0_i32_0 = arith.constant 0 : i32
    %c0_i32_1 = arith.constant 0 : i32
    return %arg0, %c0_i32, %c0_i32_0 : i32, i32, i32
  }
  func.func @transform_1(%arg0: i32) -> (i32, i32) {
    %c0_i32 = arith.constant 0 : i32
    %c0_i32_0 = arith.constant 0 : i32
    %c0_i32_1 = arith.constant 0 : i32
    return %c0_i32, %c0_i32_0 : i32, i32
  }
  func.func @transform_2(%arg0: i32) -> (i32, i32) {
    %c0_i32 = arith.constant 0 : i32
    %c0_i32_0 = arith.constant 0 : i32
    %c0_i32_1 = arith.constant 0 : i32
    return %c0_i32, %c0_i32_0 : i32, i32
  }
  func.func @transform_3(%arg0: i32) -> (i32, i32) {
    %c0_i32 = arith.constant 0 : i32
    %c0_i32_0 = arith.constant 0 : i32
    %c0_i32_1 = arith.constant 0 : i32
    return %c0_i32, %c0_i32_0 : i32, i32
  }
  func.func @transform_4(%arg0: i32) -> (i32, i32) {
    %c0_i32 = arith.constant 0 : i32
    %c0_i32_0 = arith.constant 0 : i32
    %c0_i32_1 = arith.constant 0 : i32
    return %c0_i32, %c0_i32_0 : i32, i32
  }
  func.func @transform_5(%arg0: i32) -> (i32, i32, i32) {
    %c0_i32 = arith.constant 0 : i32
    %c0_i32_0 = arith.constant 0 : i32
    %c0_i32_1 = arith.constant 0 : i32
    return %arg0, %c0_i32, %c0_i32_0 : i32, i32, i32
  }
}

</mosaic_0001>

<bundles_post_ra>
// kernel: clip_attention_pallas.1
= control target key start
LH: loop header
LB: loop body
LE: loop exit
PB: predicated region body
PF: predicated region fallthrough
CT: control target
= control target key end

     0   :  { %10 = vsyncpa [#allocation4], 0  ;;  %s9354_s0 = inlined_call_operand.hbm [shape: f32[2,8,768], index: 0, kind: input, shape index: {}]   ;;  %s9355_s1 = inlined_call_operand.hbm [shape: f32[768,2304], index: 1, kind: input, shape index: {}]   ;;  %s9356_s2 = inlined_call_operand.hbm [shape: f32[1,2304], index: 2, kind: input, shape index: {}]   ;;  %s9357_s3 = inlined_call_operand.hbm [shape: f32[768,768], index: 3, kind: input, shape index: {}]   ;;  %s9358_s4 = inlined_call_operand.hbm [shape: f32[1,768], index: 4, kind: input, shape index: {}]   ;;  %s9359_s5 = inlined_call_operand.hbm [shape: f32[2,8,768], index: 5, kind: output, shape index: {}]  }
   0x1   :  { %11 = vsyncpa [#allocation7], 0 }
   0x2   :  { %12 = vsyncpa [#allocation10], 0  ;;  %s31_s20 = sshll.u32 %s9355_s1, 4  ;;  %s32_s20 = int_to_ptr.hbm [resolvable:$true] %s31_s20 }
   0x3   :  { %13 = vsyncpa [#allocation5], 0  ;;  %s7843_s21 = smov [#allocation6]   ;;  %s7844_s23 = smov 2304  }
   0x4   :  { %s33_s22 = sshll.u32 %s7843_s21, 4  ;;  %s7845_s24 = smov 144   ;;  %s34_s22 = int_to_ptr.vmem [resolvable:$true] %s33_s22 }
   0x5   :  { %39 = dma.hbm_to_vmem [thread:$0]  %s32_s20, 221184, %s34_s22, [#allocation7], %s7844_s23, %s7844_s23, %s7845_s24  }
   0x6   :  { %s55_s27 = sshll.u32 %s9357_s3, 4  ;;  %s7846_s28 = smov [#allocation9]   ;;  %s56_s27 = int_to_ptr.hbm [resolvable:$true] %s55_s27 }
   0x7   :  { %s57_s29 = sshll.u32 %s7846_s28, 4  ;;  %s18_s7 = sshll.u32 %s9354_s0, 4  ;;  %s58_s29 = int_to_ptr.vmem [resolvable:$true] %s57_s29  ;;  %s19_s7 = int_to_ptr.hbm [resolvable:$true] %s18_s7 }
   0x8   :  { %s7847_s1 = smov 768   ;;  %s7848_s8 = smov 48  }
   0x9   :  { %63 = dma.hbm_to_vmem [thread:$0]  %s56_s27, 73728, %s58_s29, [#allocation10], %s7847_s1, %s7847_s1, %s7848_s8  }
   0xa   :  { %s45_s11 = sshll.u32 %s9356_s2, 4  ;;  %s7849_s3 = smov [#allocation3]   ;;  %s46_s11 = int_to_ptr.hbm [resolvable:$true] %s45_s11 }
   0xb   :  { %s20_s12 = sshll.u32 %s7849_s3, 4  ;;  %s7850_s0 = smov [#allocation8]   ;;  %s21_s12 = int_to_ptr.vmem [resolvable:$true] %s20_s12 }
   0xc   :  { %26 = dma.hbm_to_vmem [thread:$0]  %s19_s7, 1536, %s21_s12, [#allocation4], %s7847_s1, %s7847_s1, %s7848_s8  }
   0xd   :  { %s47_s13 = sshll.u32 %s7850_s0, 4  ;;  %s69_s16 = sshll.u32 %s9358_s4, 4  ;;  %s48_s13 = int_to_ptr.vmem [resolvable:$true] %s47_s13  ;;  %s70_s16 = int_to_ptr.hbm [resolvable:$true] %s69_s16 }
   0xe   :  { %50 = dma.hbm_to_vmem [thread:$0]  %s46_s11, 288, %s48_s13, [#allocation7]  }
   0xf   :  { %s7851_s17 = smov [#allocation11]  }
  0x10   :  { %s71_s18 = sshll.u32 %s7851_s17, 4  ;;  %s72_s18 = int_to_ptr.vmem [resolvable:$true] %s71_s18 }
  0x11   :  { %74 = dma.hbm_to_vmem [thread:$0]  %s70_s16, 96, %s72_s18, [#allocation10]  }
  0x12   :  { %7835 = dma.done.wait [#allocation4], 1536  }
  0x13   :  { %7836 = vsyncadd [#allocation4], 4294965760 }
  0x14   :  { %7837 = dma.done.wait [#allocation7], 221472  }
  0x15   :  { %7838 = vsyncadd [#allocation7], 4294745824 }
  0x16   :  { %7839 = dma.done.wait [#allocation10], 73824  }
  0x17   :  { %7840 = vsyncadd [#allocation10], 4294893472  ;;  %v377_v0 = vld [vmem:[#allocation6 + $0x870] sm:$0xff]  ;;  %v359_v4 = vld [vmem:[#allocation6 + $0x7e0] sm:$0xff]  ;;  %s7852_s2 = smov 64   ;;  %vm4361_vm0 = vcmask 523264  }
  0x18   :  { %v665_v1 = vld [vmem:[#allocation6 + $0x1170] sm:$0xff]  ;;  %1877 = vmatpush.msra.mxu0 %v377_v0  ;;  %v647_v5 = vld [vmem:[#allocation6 + $0x10e0] sm:$0xff]  ;;  %vm4414_vm1 = vcmask 64512   ;;  %vm4625_vm2 = vcmask 1048064   ;;  %s7853_s4 = smov [#allocation12]   ;;  %s7396_s22 = sshll.u32 %s9359_s5, 4  ;;  %s7397_s22 = int_to_ptr.hbm [resolvable:$true] %s7396_s22 }
  0x19   :  { %v953_v2 = vld [vmem:[#allocation6 + $0x1a70] sm:$0xff]  ;;  %1900 = vmatpush.msra.mxu1 %v665_v1  ;;  %v935_v6 = vld [vmem:[#allocation6 + $0x19e0] sm:$0xff]  ;;  %s7394_s19 = sshll.u32 %s7853_s4, 4  ;;  %s7395_s19 = int_to_ptr.vmem [resolvable:$true] %s7394_s19 }
  0x1a   :  { %v1241_v3 = vld [vmem:[#allocation6 + $0x2370] sm:$0xff]  ;;  %1923 = vmatpush.msra.mxu2 %v953_v2  ;;  %v1223_v7 = vld [vmem:[#allocation6 + $0x22e0] sm:$0xff]  ;;  %1878 = vmatpush.msra.mxu0 %v359_v4  ;;  %v378_v2 = vld [vmem:[#allocation6 + $0x878] sm:$0xff] }
  0x1b   :  { %1946 = vmatpush.msra.mxu3 %v1241_v3  ;;  %v341_v8 = vld [vmem:[#allocation6 + $0x750] sm:$0xff]  ;;  %1901 = vmatpush.msra.mxu1 %v647_v5  ;;  %v323_v12 = vld [vmem:[#allocation6 + $0x6c0] sm:$0xff]  ;;  %v666_v3 = vld [vmem:[#allocation6 + $0x1178] sm:$0xff] }
  0x1c   :  { %v629_v9 = vld [vmem:[#allocation6 + $0x1050] sm:$0xff]  ;;  %1924 = vmatpush.msra.mxu2 %v935_v6  ;;  %v611_v13 = vld [vmem:[#allocation6 + $0xfc0] sm:$0xff]  ;;  %1879 = vmatpush.msra.mxu0 %v341_v8  ;;  %v360_v6 = vld [vmem:[#allocation6 + $0x7e8] sm:$0xff] }
  0x1d   :  { %v917_v10 = vld [vmem:[#allocation6 + $0x1950] sm:$0xff]  ;;  %1947 = vmatpush.msra.mxu3 %v1223_v7  ;;  %1902 = vmatpush.msra.mxu1 %v629_v9  ;;  %v899_v14 = vld [vmem:[#allocation6 + $0x18c0] sm:$0xff]  ;;  %v648_v7 = vld [vmem:[#allocation6 + $0x10e8] sm:$0xff] }
  0x1e   :  { %v1205_v11 = vld [vmem:[#allocation6 + $0x2250] sm:$0xff]  ;;  %v1187_v15 = vld [vmem:[#allocation6 + $0x21c0] sm:$0xff]  ;;  %1925 = vmatpush.msra.mxu2 %v917_v10  ;;  %1880 = vmatpush.msra.mxu0 %v323_v12  ;;  %v342_v10 = vld [vmem:[#allocation6 + $0x758] sm:$0xff] }
  0x1f   :  { %1948 = vmatpush.msra.mxu3 %v1205_v11  ;;  %v305_v16 = vld [vmem:[#allocation6 + $0x630] sm:$0xff]  ;;  %1903 = vmatpush.msra.mxu1 %v611_v13  ;;  %v287_v20 = vld [vmem:[#allocation6 + $0x5a0] sm:$0xff]  ;;  %v630_v11 = vld [vmem:[#allocation6 + $0x1058] sm:$0xff] }
  0x20   :  { %v593_v17 = vld [vmem:[#allocation6 + $0xf30] sm:$0xff]  ;;  %1926 = vmatpush.msra.mxu2 %v899_v14  ;;  %v575_v21 = vld [vmem:[#allocation6 + $0xea0] sm:$0xff]  ;;  %1881 = vmatpush.msra.mxu0 %v305_v16  ;;  %v324_v14 = vld [vmem:[#allocation6 + $0x6c8] sm:$0xff] }
  0x21   :  { %v881_v18 = vld [vmem:[#allocation6 + $0x1830] sm:$0xff]  ;;  %1949 = vmatpush.msra.mxu3 %v1187_v15  ;;  %1904 = vmatpush.msra.mxu1 %v593_v17  ;;  %v863_v22 = vld [vmem:[#allocation6 + $0x17a0] sm:$0xff]  ;;  %v612_v15 = vld [vmem:[#allocation6 + $0xfc8] sm:$0xff] }
  0x22   :  { %v1169_v19 = vld [vmem:[#allocation6 + $0x2130] sm:$0xff]  ;;  %v1151_v23 = vld [vmem:[#allocation6 + $0x20a0] sm:$0xff]  ;;  %1927 = vmatpush.msra.mxu2 %v881_v18  ;;  %1882 = vmatpush.msra.mxu0 %v287_v20  ;;  %v306_v18 = vld [vmem:[#allocation6 + $0x638] sm:$0xff] }
  0x23   :  { %1950 = vmatpush.msra.mxu3 %v1169_v19  ;;  %v269_v24 = vld [vmem:[#allocation6 + $0x510] sm:$0xff]  ;;  %1905 = vmatpush.msra.mxu1 %v575_v21  ;;  %v251_v28 = vld [vmem:[#allocation6 + $0x480] sm:$0xff]  ;;  %v594_v19 = vld [vmem:[#allocation6 + $0xf38] sm:$0xff] }
  0x24   :  { %v557_v25 = vld [vmem:[#allocation6 + $0xe10] sm:$0xff]  ;;  %1928 = vmatpush.msra.mxu2 %v863_v22  ;;  %v539_v29 = vld [vmem:[#allocation6 + $0xd80] sm:$0xff]  ;;  %1883 = vmatpush.msra.mxu0 %v269_v24  ;;  %v288_v22 = vld [vmem:[#allocation6 + $0x5a8] sm:$0xff] }
  0x25   :  { %v845_v26 = vld [vmem:[#allocation6 + $0x1710] sm:$0xff]  ;;  %1951 = vmatpush.msra.mxu3 %v1151_v23  ;;  %1906 = vmatpush.msra.mxu1 %v557_v25  ;;  %v827_v30 = vld [vmem:[#allocation6 + $0x1680] sm:$0xff]  ;;  %v576_v23 = vld [vmem:[#allocation6 + $0xea8] sm:$0xff] }
  0x26   :  { %v1133_v27 = vld [vmem:[#allocation6 + $0x2010] sm:$0xff]  ;;  %v1115_v31 = vld [vmem:[#allocation6 + $0x1f80] sm:$0xff]  ;;  %1929 = vmatpush.msra.mxu2 %v845_v26  ;;  %1884 = vmatpush.msra.mxu0 %v251_v28  ;;  %v270_v26 = vld [vmem:[#allocation6 + $0x518] sm:$0xff] }
  0x27   :  { %1952 = vmatpush.msra.mxu3 %v1133_v27  ;;  %v233_v32 = vld [vmem:[#allocation6 + $0x3f0] sm:$0xff]  ;;  %1907 = vmatpush.msra.mxu1 %v539_v29  ;;  %v215_v36 = vld [vmem:[#allocation6 + $0x360] sm:$0xff]  ;;  %v558_v27 = vld [vmem:[#allocation6 + $0xe18] sm:$0xff] }
  0x28   :  { %v521_v33 = vld [vmem:[#allocation6 + $0xcf0] sm:$0xff]  ;;  %1930 = vmatpush.msra.mxu2 %v827_v30  ;;  %v503_v37 = vld [vmem:[#allocation6 + $0xc60] sm:$0xff]  ;;  %1885 = vmatpush.msra.mxu0 %v233_v32  ;;  %v252_v30 = vld [vmem:[#allocation6 + $0x488] sm:$0xff] }
  0x29   :  { %v809_v34 = vld [vmem:[#allocation6 + $0x15f0] sm:$0xff]  ;;  %1953 = vmatpush.msra.mxu3 %v1115_v31  ;;  %1908 = vmatpush.msra.mxu1 %v521_v33  ;;  %v791_v38 = vld [vmem:[#allocation6 + $0x1560] sm:$0xff]  ;;  %v540_v31 = vld [vmem:[#allocation6 + $0xd88] sm:$0xff] }
  0x2a   :  { %v1097_v35 = vld [vmem:[#allocation6 + $0x1ef0] sm:$0xff]  ;;  %v1079_v39 = vld [vmem:[#allocation6 + $0x1e60] sm:$0xff]  ;;  %1931 = vmatpush.msra.mxu2 %v809_v34  ;;  %1886 = vmatpush.msra.mxu0 %v215_v36  ;;  %v234_v34 = vld [vmem:[#allocation6 + $0x3f8] sm:$0xff] }
  0x2b   :  { %1954 = vmatpush.msra.mxu3 %v1097_v35  ;;  %v197_v40 = vld [vmem:[#allocation6 + $0x2d0] sm:$0xff]  ;;  %1909 = vmatpush.msra.mxu1 %v503_v37  ;;  %v179_v44 = vld [vmem:[#allocation6 + $0x240] sm:$0xff]  ;;  %v522_v35 = vld [vmem:[#allocation6 + $0xcf8] sm:$0xff] }
  0x2c   :  { %v485_v41 = vld [vmem:[#allocation6 + $0xbd0] sm:$0xff]  ;;  %1932 = vmatpush.msra.mxu2 %v791_v38  ;;  %v467_v45 = vld [vmem:[#allocation6 + $0xb40] sm:$0xff]  ;;  %1887 = vmatpush.msra.mxu0 %v197_v40  ;;  %v216_v38 = vld [vmem:[#allocation6 + $0x368] sm:$0xff] }
  0x2d   :  { %v773_v42 = vld [vmem:[#allocation6 + $0x14d0] sm:$0xff]  ;;  %1955 = vmatpush.msra.mxu3 %v1079_v39  ;;  %1910 = vmatpush.msra.mxu1 %v485_v41  ;;  %v755_v46 = vld [vmem:[#allocation6 + $0x1440] sm:$0xff]  ;;  %v504_v39 = vld [vmem:[#allocation6 + $0xc68] sm:$0xff] }
  0x2e   :  { %v1061_v43 = vld [vmem:[#allocation6 + $0x1dd0] sm:$0xff]  ;;  %v1043_v47 = vld [vmem:[#allocation6 + $0x1d40] sm:$0xff]  ;;  %1933 = vmatpush.msra.mxu2 %v773_v42  ;;  %1888 = vmatpush.msra.mxu0 %v179_v44  ;;  %v198_v42 = vld [vmem:[#allocation6 + $0x2d8] sm:$0xff] }
  0x2f   :  { %1956 = vmatpush.msra.mxu3 %v1061_v43  ;;  %v161_v48 = vld [vmem:[#allocation6 + $0x1b0] sm:$0xff]  ;;  %1911 = vmatpush.msra.mxu1 %v467_v45  ;;  %v143_v52 = vld [vmem:[#allocation6 + $0x120] sm:$0xff]  ;;  %v486_v43 = vld [vmem:[#allocation6 + $0xbd8] sm:$0xff] }
  0x30   :  { %v449_v49 = vld [vmem:[#allocation6 + $0xab0] sm:$0xff]  ;;  %1934 = vmatpush.msra.mxu2 %v755_v46  ;;  %v431_v53 = vld [vmem:[#allocation6 + $0xa20] sm:$0xff]  ;;  %1889 = vmatpush.msra.mxu0 %v161_v48  ;;  %v468_v48 = vld [vmem:[#allocation6 + $0xb48] sm:$0xff] }
  0x31   :  { %v737_v50 = vld [vmem:[#allocation6 + $0x13b0] sm:$0xff]  ;;  %1957 = vmatpush.msra.mxu3 %v1043_v47  ;;  %1912 = vmatpush.msra.mxu1 %v449_v49  ;;  %v719_v54 = vld [vmem:[#allocation6 + $0x1320] sm:$0xff]  ;;  %v180_v47 = vld [vmem:[#allocation6 + $0x248] sm:$0xff] }
  0x32   :  { %v1025_v51 = vld [vmem:[#allocation6 + $0x1cb0] sm:$0xff]  ;;  %v1007_v55 = vld [vmem:[#allocation6 + $0x1c20] sm:$0xff]  ;;  %1935 = vmatpush.msra.mxu2 %v737_v50  ;;  %1890 = vmatpush.msra.mxu0 %v143_v52  ;;  %v7907_v49 = vld [vmem:[#allocation3 + $0x8] sm:$0xff] }
  0x33   :  { %1958 = vmatpush.msra.mxu3 %v1025_v51  ;;  %v125_v56 = vld [vmem:[#allocation6 + $0x90] sm:$0xff]  ;;  %1913 = vmatpush.msra.mxu1 %v431_v53  ;;  %v107_v60 = vld [vmem:[#allocation6] sm:$0xff]  ;;  %v162_v52 = vld [vmem:[#allocation6 + $0x1b8] sm:$0xff] }
  0x34   :  { %v413_v57 = vld [vmem:[#allocation6 + $0x990] sm:$0xff]  ;;  %1936 = vmatpush.msra.mxu2 %v719_v54  ;;  %v395_v61 = vld [vmem:[#allocation6 + $0x900] sm:$0xff]  ;;  %1891 = vmatpush.msra.mxu0 %v125_v56  ;;  %v450_v53 = vld [vmem:[#allocation6 + $0xab8] sm:$0xff] }
  0x35   :  { %v701_v58 = vld [vmem:[#allocation6 + $0x1290] sm:$0xff]  ;;  %1959 = vmatpush.msra.mxu3 %v1007_v55  ;;  %1914 = vmatpush.msra.mxu1 %v413_v57  ;;  %v683_v62 = vld [vmem:[#allocation6 + $0x1200] sm:$0xff]  ;;  %v144_v56 = vld [vmem:[#allocation6 + $0x128] sm:$0xff] }
  0x36   :  { %v989_v59 = vld [vmem:[#allocation6 + $0x1b90] sm:$0xff]  ;;  %v971_v63 = vld [vmem:[#allocation6 + $0x1b00] sm:$0xff]  ;;  %1937 = vmatpush.msra.mxu2 %v701_v58  ;;  %1892 = vmatpush.msra.mxu0 %v107_v60  ;;  %v432_v57 = vld [vmem:[#allocation6 + $0xa28] sm:$0xff] }
  0x37   :  { %1960 = vmatpush.msra.mxu3 %v989_v59  ;;  %v1529_v0 = vld [vmem:[#allocation6 + $0x2c70] sm:$0xff]  ;;  %1915 = vmatpush.msra.mxu1 %v395_v61  ;;  %v1511_v4 = vld [vmem:[#allocation6 + $0x2be0] sm:$0xff]  ;;  %v126_v61 = vld [vmem:[#allocation6 + $0x98] sm:$0xff] }
  0x38   :  { %v1817_v1 = vld [vmem:[#allocation6 + $0x3570] sm:$0xff]  ;;  %1938 = vmatpush.msra.mxu2 %v683_v62  ;;  %v1799_v5 = vld [vmem:[#allocation6 + $0x34e0] sm:$0xff]  ;;  %1969 = vmatpush.msrb.mxu0 %v1529_v0  ;;  %v414_v62 = vld [vmem:[#allocation6 + $0x998] sm:$0xff] }
  0x39   :  { %1961 = vmatpush.msra.mxu3 %v971_v63  ;;  %1992 = vmatpush.msrb.mxu1 %v1817_v1  ;;  %v1493_v8 = vld [vmem:[#allocation6 + $0x2b50] sm:$0xff]  ;;  %v1475_v12 = vld [vmem:[#allocation6 + $0x2ac0] sm:$0xff]  ;;  %v7916_v0 = vld [vmem:[#allocation3 + $0x18] sm:$0xff] }
  0x3a   :  { %2015 = vmatpush.msrb.mxu2 %v378_v2  ;;  %v1781_v9 = vld [vmem:[#allocation6 + $0x3450] sm:$0xff]  ;;  %1970 = vmatpush.msrb.mxu0 %v1511_v4  ;;  %v1763_v13 = vld [vmem:[#allocation6 + $0x33c0] sm:$0xff]  ;;  %v396_v4 = vld [vmem:[#allocation6 + $0x908] sm:$0xff] }
  0x3b   :  { %2038 = vmatpush.msrb.mxu3 %v666_v3  ;;  %1993 = vmatpush.msrb.mxu1 %v1799_v5  ;;  %v1457_v16 = vld [vmem:[#allocation6 + $0x2a30] sm:$0xff]  ;;  %v1439_v20 = vld [vmem:[#allocation6 + $0x29a0] sm:$0xff]  ;;  %v108_v3 = vld [vmem:[#allocation6 + $0x8] sm:$0xff] }
  0x3c   :  { %2016 = vmatpush.msrb.mxu2 %v360_v6  ;;  %1971 = vmatpush.msrb.mxu0 %v1493_v8  ;;  %v1745_v17 = vld [vmem:[#allocation6 + $0x3330] sm:$0xff]  ;;  %v1727_v21 = vld [vmem:[#allocation6 + $0x32a0] sm:$0xff]  ;;  %v7919_v5 = vld [vmem:[#allocation3 + $0x38] sm:$0xff] }
  0x3d   :  { %2039 = vmatpush.msrb.mxu3 %v648_v7  ;;  %1994 = vmatpush.msrb.mxu1 %v1781_v9  ;;  %v1421_v24 = vld [vmem:[#allocation6 + $0x2910] sm:$0xff]  ;;  %v1403_v28 = vld [vmem:[#allocation6 + $0x2880] sm:$0xff]  ;;  %v954_v6 = vld [vmem:[#allocation6 + $0x1a78] sm:$0xff] }
  0x3e   :  { %2017 = vmatpush.msrb.mxu2 %v342_v10  ;;  %1972 = vmatpush.msrb.mxu0 %v1475_v12  ;;  %v1709_v25 = vld [vmem:[#allocation6 + $0x3210] sm:$0xff]  ;;  %v1691_v29 = vld [vmem:[#allocation6 + $0x3180] sm:$0xff]  ;;  %v1242_v7 = vld [vmem:[#allocation6 + $0x2378] sm:$0xff] }
  0x3f   :  { %2040 = vmatpush.msrb.mxu3 %v630_v11  ;;  %1995 = vmatpush.msrb.mxu1 %v1763_v13  ;;  %v1385_v32 = vld [vmem:[#allocation6 + $0x27f0] sm:$0xff]  ;;  %v1367_v36 = vld [vmem:[#allocation6 + $0x2760] sm:$0xff]  ;;  %v1530_v8 = vld [vmem:[#allocation6 + $0x2c78] sm:$0xff] }
  0x40   :  { %2018 = vmatpush.msrb.mxu2 %v324_v14  ;;  %1973 = vmatpush.msrb.mxu0 %v1457_v16  ;;  %v1673_v33 = vld [vmem:[#allocation6 + $0x30f0] sm:$0xff]  ;;  %v1655_v37 = vld [vmem:[#allocation6 + $0x3060] sm:$0xff]  ;;  %v1818_v9 = vld [vmem:[#allocation6 + $0x3578] sm:$0xff] }
  0x41   :  { %2041 = vmatpush.msrb.mxu3 %v612_v15  ;;  %1996 = vmatpush.msrb.mxu1 %v1745_v17  ;;  %v1349_v40 = vld [vmem:[#allocation6 + $0x26d0] sm:$0xff]  ;;  %v7905_v44 = vld [vmem:[#allocation3] sm:$0xff]  ;;  %v936_v10 = vld [vmem:[#allocation6 + $0x19e8] sm:$0xff] }
  0x42   :  { %2019 = vmatpush.msrb.mxu2 %v306_v18  ;;  %1974 = vmatpush.msrb.mxu0 %v1439_v20  ;;  %v1637_v41 = vld [vmem:[#allocation6 + $0x2fd0] sm:$0xff]  ;;  %v1619_v45 = vld [vmem:[#allocation6 + $0x2f40] sm:$0xff]  ;;  %v1224_v11 = vld [vmem:[#allocation6 + $0x22e8] sm:$0xff] }
  0x43   :  { %2042 = vmatpush.msrb.mxu3 %v594_v19  ;;  %1997 = vmatpush.msrb.mxu1 %v1727_v21  ;;  %v1331_v46 = vld [vmem:[#allocation6 + $0x2640] sm:$0xff]  ;;  %v1313_v50 = vld [vmem:[#allocation6 + $0x25b0] sm:$0xff]  ;;  %v1512_v12 = vld [vmem:[#allocation6 + $0x2be8] sm:$0xff] }
  0x44   :  { %2020 = vmatpush.msrb.mxu2 %v288_v22  ;;  %1975 = vmatpush.msrb.mxu0 %v1421_v24  ;;  %v1601_v51 = vld [vmem:[#allocation6 + $0x2eb0] sm:$0xff]  ;;  %v1295_v54 = vld [vmem:[#allocation6 + $0x2520] sm:$0xff]  ;;  %v1800_v13 = vld [vmem:[#allocation6 + $0x34e8] sm:$0xff] }
  0x45   :  { %2043 = vmatpush.msrb.mxu3 %v576_v23  ;;  %1998 = vmatpush.msrb.mxu1 %v1709_v25  ;;  %v1583_v55 = vld [vmem:[#allocation6 + $0x2e20] sm:$0xff]  ;;  %v7911_v58 = vld [vmem:[#allocation3 + $0x10] sm:$0xff]  ;;  %v918_v14 = vld [vmem:[#allocation6 + $0x1958] sm:$0xff] }
  0x46   :  { %2021 = vmatpush.msrb.mxu2 %v270_v26  ;;  %1976 = vmatpush.msrb.mxu0 %v1403_v28  ;;  %v1277_v59 = vld [vmem:[#allocation6 + $0x2490] sm:$0xff]  ;;  %v1259_v1 = vld [vmem:[#allocation6 + $0x2400] sm:$0xff]  ;;  %v1206_v15 = vld [vmem:[#allocation6 + $0x2258] sm:$0xff] }
  0x47   :  { %2044 = vmatpush.msrb.mxu3 %v558_v27  ;;  %1999 = vmatpush.msrb.mxu1 %v1691_v29  ;;  %v1565_v60 = vld [vmem:[#allocation6 + $0x2d90] sm:$0xff]  ;;  %v1547_v2 = vld [vmem:[#allocation6 + $0x2d00] sm:$0xff]  ;;  %v1494_v16 = vld [vmem:[#allocation6 + $0x2b58] sm:$0xff] }
  0x48   :  { %2022 = vmatpush.msrb.mxu2 %v252_v30  ;;  %1977 = vmatpush.msrb.mxu0 %v1385_v32  ;;  %v7913_v63 = vld [vmem:[#allocation3 + $0x30] sm:$0xff]  ;;  %v1782_v17 = vld [vmem:[#allocation6 + $0x3458] sm:$0xff]  ;;  %v7923_v18 = vld [vmem:[#allocation3 + $0x20] sm:$0xff] }
  0x49   :  { %2045 = vmatpush.msrb.mxu3 %v540_v31  ;;  %2000 = vmatpush.msrb.mxu1 %v1673_v33  ;;  %v1188_v19 = vld [vmem:[#allocation6 + $0x21c8] sm:$0xff]  ;;  %v882_v24 = vld [vmem:[#allocation6 + $0x1838] sm:$0xff] }
  0x4a   :  { %2023 = vmatpush.msrb.mxu2 %v234_v34  ;;  %1978 = vmatpush.msrb.mxu0 %v1367_v36  ;;  %v900_v20 = vld [vmem:[#allocation6 + $0x18c8] sm:$0xff]  ;;  %v1170_v25 = vld [vmem:[#allocation6 + $0x2138] sm:$0xff] }
  0x4b   :  { %2046 = vmatpush.msrb.mxu3 %v522_v35  ;;  %2001 = vmatpush.msrb.mxu1 %v1655_v37  ;;  %v1476_v21 = vld [vmem:[#allocation6 + $0x2ac8] sm:$0xff]  ;;  %v1458_v26 = vld [vmem:[#allocation6 + $0x2a38] sm:$0xff] }
  0x4c   :  { %2024 = vmatpush.msrb.mxu2 %v216_v38  ;;  %1979 = vmatpush.msrb.mxu0 %v1349_v40  ;;  %v1764_v22 = vld [vmem:[#allocation6 + $0x33c8] sm:$0xff]  ;;  %v1746_v27 = vld [vmem:[#allocation6 + $0x3338] sm:$0xff] }
  0x4d   :  { %2047 = vmatpush.msrb.mxu3 %v504_v39  ;;  %2002 = vmatpush.msrb.mxu1 %v1637_v41  ;;  %v7925_v23 = vld [vmem:[#allocation3 + $0x28] sm:$0xff]  ;;  %v846_v32 = vld [vmem:[#allocation6 + $0x1718] sm:$0xff] }
  0x4e   :  { %2025 = vmatpush.msrb.mxu2 %v198_v42  ;;  %1893 = vmatmul.f32.vlgmr.msra.gmra.mxu0 %v7905_v44  ;;  %v864_v28 = vld [vmem:[#allocation6 + $0x17a8] sm:$0xff]  ;;  %v1134_v33 = vld [vmem:[#allocation6 + $0x2018] sm:$0xff] }
  0x4f   :  { %2048 = vmatpush.msrb.mxu3 %v486_v43  ;;  %2003 = vmatpush.msrb.mxu1 %v1619_v45  ;;  %v1152_v29 = vld [vmem:[#allocation6 + $0x20a8] sm:$0xff]  ;;  %v1422_v34 = vld [vmem:[#allocation6 + $0x2918] sm:$0xff] }
  0x50   :  { %1980 = vmatpush.msrb.mxu0 %v1331_v46  ;;  %2026 = vmatpush.msrb.mxu2 %v180_v47  ;;  %v1440_v30 = vld [vmem:[#allocation6 + $0x29a8] sm:$0xff]  ;;  %v1710_v35 = vld [vmem:[#allocation6 + $0x3218] sm:$0xff] }
  0x51   :  { %2049 = vmatpush.msrb.mxu3 %v468_v48  ;;  %1916 = vmatmul.f32.vlgmr.msra.gmra.mxu1 %v7907_v49  ;;  %v1728_v31 = vld [vmem:[#allocation6 + $0x32a8] sm:$0xff]  ;;  %v810_v40 = vld [vmem:[#allocation6 + $0x15f8] sm:$0xff] }
  0x52   :  { %1981 = vmatpush.msrb.mxu0 %v1313_v50  ;;  %2004 = vmatpush.msrb.mxu1 %v1601_v51  ;;  %v828_v36 = vld [vmem:[#allocation6 + $0x1688] sm:$0xff]  ;;  %v1098_v41 = vld [vmem:[#allocation6 + $0x1ef8] sm:$0xff]  ;;  %v7929_v50 = vld [vmem:[#allocation3 + $0x40] sm:$0xff] }
  0x53   :  { %2027 = vmatpush.msrb.mxu2 %v162_v52  ;;  %2050 = vmatpush.msrb.mxu3 %v450_v53  ;;  %v1116_v37 = vld [vmem:[#allocation6 + $0x1f88] sm:$0xff]  ;;  %v1386_v42 = vld [vmem:[#allocation6 + $0x27f8] sm:$0xff] }
  0x54   :  { %1982 = vmatpush.msrb.mxu0 %v1295_v54  ;;  %2005 = vmatpush.msrb.mxu1 %v1583_v55  ;;  %v1404_v38 = vld [vmem:[#allocation6 + $0x2888] sm:$0xff]  ;;  %v1674_v43 = vld [vmem:[#allocation6 + $0x30f8] sm:$0xff] }
  0x55   :  { %2028 = vmatpush.msrb.mxu2 %v144_v56  ;;  %2051 = vmatpush.msrb.mxu3 %v432_v57  ;;  %v1692_v39 = vld [vmem:[#allocation6 + $0x3188] sm:$0xff]  ;;  %v774_v51 = vld [vmem:[#allocation6 + $0x14d8] sm:$0xff] }
  0x56   :  { %1939 = vmatmul.f32.vlgmr.msra.gmra.mxu2 %v7911_v58  ;;  %1983 = vmatpush.msrb.mxu0 %v1277_v59  ;;  %v792_v45 = vld [vmem:[#allocation6 + $0x1568] sm:$0xff]  ;;  %v1062_v52 = vld [vmem:[#allocation6 + $0x1dd8] sm:$0xff] }
  0x57   :  { %2006 = vmatpush.msrb.mxu1 %v1565_v60  ;;  %2029 = vmatpush.msrb.mxu2 %v126_v61  ;;  %v1080_v46 = vld [vmem:[#allocation6 + $0x1e68] sm:$0xff]  ;;  %v1350_v53 = vld [vmem:[#allocation6 + $0x26d8] sm:$0xff] }
  0x58   :  { %2052 = vmatpush.msrb.mxu3 %v414_v62  ;;  %1896 = vmatmul.f32.gmra.mxu0 %v7913_v63  ;;  %v1368_v47 = vld [vmem:[#allocation6 + $0x2768] sm:$0xff]  ;;  %v1638_v54 = vld [vmem:[#allocation6 + $0x2fd8] sm:$0xff] }
  0x59   :  { %1962 = vmatmul.f32.vlgmr.msra.gmra.mxu3 %v7916_v0  ;;  %1984 = vmatpush.msrb.mxu0 %v1259_v1  ;;  %v1656_v48 = vld [vmem:[#allocation6 + $0x3068] sm:$0xff]  ;;  %v738_v61 = vld [vmem:[#allocation6 + $0x13b8] sm:$0xff] }
  0x5a   :  { %2007 = vmatpush.msrb.mxu1 %v1547_v2  ;;  %2030 = vmatpush.msrb.mxu2 %v108_v3  ;;  %v756_v55 = vld [vmem:[#allocation6 + $0x1448] sm:$0xff]  ;;  %v1026_v62 = vld [vmem:[#allocation6 + $0x1cb8] sm:$0xff] }
  0x5b   :  { %2053 = vmatpush.msrb.mxu3 %v396_v4  ;;  %1919 = vmatmul.f32.gmra.mxu1 %v7919_v5  ;;  %v7932_v56 = vld [vmem:[#allocation3 + $0x48] sm:$0xff]  ;;  %v1314_v1 = vld [vmem:[#allocation6 + $0x25b8] sm:$0xff] }
  0x5c   :  { %2061 = vmatpush.msra.mxu0 %v954_v6  ;;  %2084 = vmatpush.msra.mxu1 %v1242_v7  ;;  %v1044_v57 = vld [vmem:[#allocation6 + $0x1d48] sm:$0xff]  ;;  %v1602_v2 = vld [vmem:[#allocation6 + $0x2eb8] sm:$0xff] }
  0x5d   :  { %2107 = vmatpush.msra.mxu2 %v1530_v8  ;;  %2130 = vmatpush.msra.mxu3 %v1818_v9  ;;  %v1332_v59 = vld [vmem:[#allocation6 + $0x2648] sm:$0xff]  ;;  %v702_v8 = vld [vmem:[#allocation6 + $0x1298] sm:$0xff] }
  0x5e   :  { %2062 = vmatpush.msra.mxu0 %v936_v10  ;;  %2085 = vmatpush.msra.mxu1 %v1224_v11  ;;  %v1620_v60 = vld [vmem:[#allocation6 + $0x2f48] sm:$0xff]  ;;  %v990_v9 = vld [vmem:[#allocation6 + $0x1b98] sm:$0xff] }
  0x5f   :  { %2108 = vmatpush.msra.mxu2 %v1512_v12  ;;  %2131 = vmatpush.msra.mxu3 %v1800_v13  ;;  %v720_v3 = vld [vmem:[#allocation6 + $0x1328] sm:$0xff]  ;;  %v1278_v10 = vld [vmem:[#allocation6 + $0x2498] sm:$0xff]  ;;  %v7935_v12 = vld [vmem:[#allocation3 + $0x50] sm:$0xff] }
  0x60   :  { %2063 = vmatpush.msra.mxu0 %v918_v14  ;;  %2086 = vmatpush.msra.mxu1 %v1206_v15  ;;  %v1008_v4 = vld [vmem:[#allocation6 + $0x1c28] sm:$0xff]  ;;  %v1566_v11 = vld [vmem:[#allocation6 + $0x2d98] sm:$0xff] }
  0x61   :  { %2109 = vmatpush.msra.mxu2 %v1494_v16  ;;  %2132 = vmatpush.msra.mxu3 %v1782_v17  ;;  %v1296_v6 = vld [vmem:[#allocation6 + $0x2528] sm:$0xff]  ;;  %v7937_v17 = vld [vmem:[#allocation3 + $0x58] sm:$0xff] }
  0x62   :  { %1985 = vmatmul.f32.vlgmr.msrb.gmra.mxu0 %v7923_v18  ;;  %2087 = vmatpush.msra.mxu1 %v1188_v19  ;;  %v1584_v7 = vld [vmem:[#allocation6 + $0x2e28] sm:$0xff]  ;;  %v379_v19 = vld [vmem:[#allocation6 + $0x880] sm:$0xff] }
  0x63   :  { %2064 = vmatpush.msra.mxu0 %v900_v20  ;;  %2110 = vmatpush.msra.mxu2 %v1476_v21  ;;  %v972_v13 = vld [vmem:[#allocation6 + $0x1b08] sm:$0xff]  ;;  %v667_v20 = vld [vmem:[#allocation6 + $0x1180] sm:$0xff] }
  0x64   :  { %2133 = vmatpush.msra.mxu3 %v1764_v22  ;;  %2008 = vmatmul.f32.vlgmr.msrb.gmra.mxu1 %v7925_v23  ;;  %v684_v14 = vld [vmem:[#allocation6 + $0x1208] sm:$0xff]  ;;  %v955_v21 = vld [vmem:[#allocation6 + $0x1a80] sm:$0xff] }
  0x65   :  { %2065 = vmatpush.msra.mxu0 %v882_v24  ;;  %2088 = vmatpush.msra.mxu1 %v1170_v25  ;;  %v1260_v15 = vld [vmem:[#allocation6 + $0x2408] sm:$0xff]  ;;  %v1243_v22 = vld [vmem:[#allocation6 + $0x2380] sm:$0xff]  ;;  %v361_v24 = vld [vmem:[#allocation6 + $0x7f0] sm:$0xff] }
  0x66   :  { %2111 = vmatpush.msra.mxu2 %v1458_v26  ;;  %2134 = vmatpush.msra.mxu3 %v1746_v27  ;;  %v1548_v16 = vld [vmem:[#allocation6 + $0x2d08] sm:$0xff]  ;;  %v649_v25 = vld [vmem:[#allocation6 + $0x10f0] sm:$0xff] }
  0x67   :  { %2066 = vmatpush.msra.mxu0 %v864_v28  ;;  %2089 = vmatpush.msra.mxu1 %v1152_v29  ;;  %v937_v26 = vld [vmem:[#allocation6 + $0x19f0] sm:$0xff]  ;;  %v343_v28 = vld [vmem:[#allocation6 + $0x760] sm:$0xff] }
  0x68   :  { %2112 = vmatpush.msra.mxu2 %v1440_v30  ;;  %2135 = vmatpush.msra.mxu3 %v1728_v31  ;;  %v1225_v27 = vld [vmem:[#allocation6 + $0x22f0] sm:$0xff]  ;;  %v631_v29 = vld [vmem:[#allocation6 + $0x1060] sm:$0xff] }
  0x69   :  { %2067 = vmatpush.msra.mxu0 %v846_v32  ;;  %2090 = vmatpush.msra.mxu1 %v1134_v33  ;;  %v919_v30 = vld [vmem:[#allocation6 + $0x1960] sm:$0xff]  ;;  %v325_v32 = vld [vmem:[#allocation6 + $0x6d0] sm:$0xff] }
  0x6a   :  { %2113 = vmatpush.msra.mxu2 %v1422_v34  ;;  %2136 = vmatpush.msra.mxu3 %v1710_v35  ;;  %v1207_v31 = vld [vmem:[#allocation6 + $0x2260] sm:$0xff]  ;;  %v613_v33 = vld [vmem:[#allocation6 + $0xfd0] sm:$0xff] }
  0x6b   :  { %2068 = vmatpush.msra.mxu0 %v828_v36  ;;  %2091 = vmatpush.msra.mxu1 %v1116_v37  ;;  %v901_v34 = vld [vmem:[#allocation6 + $0x18d0] sm:$0xff]  ;;  %v307_v36 = vld [vmem:[#allocation6 + $0x640] sm:$0xff] }
  0x6c   :  { %2114 = vmatpush.msra.mxu2 %v1404_v38  ;;  %2137 = vmatpush.msra.mxu3 %v1692_v39  ;;  %v1189_v35 = vld [vmem:[#allocation6 + $0x21d0] sm:$0xff]  ;;  %v595_v37 = vld [vmem:[#allocation6 + $0xf40] sm:$0xff] }
  0x6d   :  { %2069 = vmatpush.msra.mxu0 %v810_v40  ;;  %2092 = vmatpush.msra.mxu1 %v1098_v41  ;;  %v883_v38 = vld [vmem:[#allocation6 + $0x1840] sm:$0xff]  ;;  %v289_v40 = vld [vmem:[#allocation6 + $0x5b0] sm:$0xff] }
  0x6e   :  { %2115 = vmatpush.msra.mxu2 %v1386_v42  ;;  %2138 = vmatpush.msra.mxu3 %v1674_v43  ;;  %v1171_v39 = vld [vmem:[#allocation6 + $0x2140] sm:$0xff]  ;;  %v577_v41 = vld [vmem:[#allocation6 + $0xeb0] sm:$0xff] }
  0x6f   :  { %2070 = vmatpush.msra.mxu0 %v792_v45  ;;  %2093 = vmatpush.msra.mxu1 %v1080_v46  ;;  %v865_v42 = vld [vmem:[#allocation6 + $0x17b0] sm:$0xff]  ;;  %v271_v45 = vld [vmem:[#allocation6 + $0x520] sm:$0xff] }
  0x70   :  { %2116 = vmatpush.msra.mxu2 %v1368_v47  ;;  %2139 = vmatpush.msra.mxu3 %v1656_v48  ;;  %v1153_v43 = vld [vmem:[#allocation6 + $0x20b0] sm:$0xff]  ;;  %v559_v46 = vld [vmem:[#allocation6 + $0xe20] sm:$0xff] }
  0x71   :  { %1942 = vmatmul.f32.gmra.mxu2 %v7929_v50  ;;  %2071 = vmatpush.msra.mxu0 %v774_v51  ;;  %v847_v47 = vld [vmem:[#allocation6 + $0x1720] sm:$0xff]  ;;  %v253_v51 = vld [vmem:[#allocation6 + $0x490] sm:$0xff] }
  0x72   :  { %2094 = vmatpush.msra.mxu1 %v1062_v52  ;;  %2117 = vmatpush.msra.mxu2 %v1350_v53  ;;  %v1135_v48 = vld [vmem:[#allocation6 + $0x2020] sm:$0xff]  ;;  %v541_v52 = vld [vmem:[#allocation6 + $0xd90] sm:$0xff] }
  0x73   :  { %2140 = vmatpush.msra.mxu3 %v1638_v54  ;;  %2072 = vmatpush.msra.mxu0 %v756_v55  ;;  %v829_v53 = vld [vmem:[#allocation6 + $0x1690] sm:$0xff]  ;;  %v235_v55 = vld [vmem:[#allocation6 + $0x400] sm:$0xff] }
  0x74   :  { %1965 = vmatmul.f32.gmra.mxu3 %v7932_v56  ;;  %2095 = vmatpush.msra.mxu1 %v1044_v57  ;;  %v1117_v54 = vld [vmem:[#allocation6 + $0x1f90] sm:$0xff]  ;;  %v523_v57 = vld [vmem:[#allocation6 + $0xd00] sm:$0xff] }
  0x75   :  { %2118 = vmatpush.msra.mxu2 %v1332_v59  ;;  %2141 = vmatpush.msra.mxu3 %v1620_v60  ;;  %v811_v59 = vld [vmem:[#allocation6 + $0x1600] sm:$0xff] }
  0x76   :  { %2073 = vmatpush.msra.mxu0 %v738_v61  ;;  %2096 = vmatpush.msra.mxu1 %v1026_v62  ;;  %v1099_v60 = vld [vmem:[#allocation6 + $0x1f00] sm:$0xff]  ;;  %v217_v61 = vld [vmem:[#allocation6 + $0x370] sm:$0xff] }
  0x77   :  { %2119 = vmatpush.msra.mxu2 %v1314_v1  ;;  %2142 = vmatpush.msra.mxu3 %v1602_v2  ;;  %v505_v62 = vld [vmem:[#allocation6 + $0xc70] sm:$0xff] }
  0x78   :  { %2074 = vmatpush.msra.mxu0 %v720_v3  ;;  %2097 = vmatpush.msra.mxu1 %v1008_v4  ;;  %v793_v1 = vld [vmem:[#allocation6 + $0x1570] sm:$0xff]  ;;  %v199_v3 = vld [vmem:[#allocation6 + $0x2e0] sm:$0xff] }
  0x79   :  { %2120 = vmatpush.msra.mxu2 %v1296_v6  ;;  %2143 = vmatpush.msra.mxu3 %v1584_v7  ;;  %v1081_v2 = vld [vmem:[#allocation6 + $0x1e70] sm:$0xff]  ;;  %v487_v4 = vld [vmem:[#allocation6 + $0xbe0] sm:$0xff] }
  0x7a   :  { %2075 = vmatpush.msra.mxu0 %v702_v8  ;;  %2098 = vmatpush.msra.mxu1 %v990_v9  ;;  %v775_v6 = vld [vmem:[#allocation6 + $0x14e0] sm:$0xff]  ;;  %v181_v8 = vld [vmem:[#allocation6 + $0x250] sm:$0xff] }
  0x7b   :  { %2121 = vmatpush.msra.mxu2 %v1278_v10  ;;  %2144 = vmatpush.msra.mxu3 %v1566_v11  ;;  %v1063_v7 = vld [vmem:[#allocation6 + $0x1de0] sm:$0xff]  ;;  %v469_v9 = vld [vmem:[#allocation6 + $0xb50] sm:$0xff] }
  0x7c   :  { %1988 = vmatmul.f32.gmra.mxu0 %v7935_v12  ;;  %2099 = vmatpush.msra.mxu1 %v972_v13  ;;  %v757_v10 = vld [vmem:[#allocation6 + $0x1450] sm:$0xff]  ;;  %v163_v13 = vld [vmem:[#allocation6 + $0x1c0] sm:$0xff] }
  0x7d   :  { %2076 = vmatpush.msra.mxu0 %v684_v14  ;;  %2122 = vmatpush.msra.mxu2 %v1260_v15  ;;  %v1045_v11 = vld [vmem:[#allocation6 + $0x1d50] sm:$0xff]  ;;  %v451_v14 = vld [vmem:[#allocation6 + $0xac0] sm:$0xff] }
  0x7e   :  { %2145 = vmatpush.msra.mxu3 %v1548_v16  ;;  %2011 = vmatmul.f32.gmra.mxu1 %v7937_v17  ;;  %v739_v15 = vld [vmem:[#allocation6 + $0x13c0] sm:$0xff] }
  0x7f   :  { %2031 = vmatmul.f32.vlgmr.msrb.gmra.mxu2 %v7905_v44  ;;  %2054 = vmatmul.f32.vlgmr.msrb.gmra.mxu3 %v7907_v49  ;;  %v1027_v16 = vld [vmem:[#allocation6 + $0x1cc0] sm:$0xff] }
  0x80   :  { %2153 = vmatpush.msrb.mxu0 %v379_v19  ;;  %2176 = vmatpush.msrb.mxu1 %v667_v20  ;;  %v145_v19 = vld [vmem:[#allocation6 + $0x130] sm:$0xff] }
  0x81   :  { %2199 = vmatpush.msrb.mxu2 %v955_v21  ;;  %2222 = vmatpush.msrb.mxu3 %v1243_v22  ;;  %v433_v20 = vld [vmem:[#allocation6 + $0xa30] sm:$0xff] }
  0x82   :  { %2154 = vmatpush.msrb.mxu0 %v361_v24  ;;  %2177 = vmatpush.msrb.mxu1 %v649_v25  ;;  %v721_v21 = vld [vmem:[#allocation6 + $0x1330] sm:$0xff]  ;;  %v127_v24 = vld [vmem:[#allocation6 + $0xa0] sm:$0xff] }
  0x83   :  { %2200 = vmatpush.msrb.mxu2 %v937_v26  ;;  %2223 = vmatpush.msrb.mxu3 %v1225_v27  ;;  %v1009_v22 = vld [vmem:[#allocation6 + $0x1c30] sm:$0xff]  ;;  %v415_v25 = vld [vmem:[#allocation6 + $0x9a0] sm:$0xff] }
  0x84   :  { %2155 = vmatpush.msrb.mxu0 %v343_v28  ;;  %2178 = vmatpush.msrb.mxu1 %v631_v29  ;;  %v703_v26 = vld [vmem:[#allocation6 + $0x12a0] sm:$0xff]  ;;  %v109_v28 = vld [vmem:[#allocation6 + $0x10] sm:$0xff] }
  0x85   :  { %2201 = vmatpush.msrb.mxu2 %v919_v30  ;;  %2224 = vmatpush.msrb.mxu3 %v1207_v31  ;;  %v991_v27 = vld [vmem:[#allocation6 + $0x1ba0] sm:$0xff]  ;;  %v397_v29 = vld [vmem:[#allocation6 + $0x910] sm:$0xff] }
  0x86   :  { %2156 = vmatpush.msrb.mxu0 %v325_v32  ;;  %2179 = vmatpush.msrb.mxu1 %v613_v33  ;;  %v685_v30 = vld [vmem:[#allocation6 + $0x1210] sm:$0xff]  ;;  %v1531_v32 = vld [vmem:[#allocation6 + $0x2c80] sm:$0xff] }
  0x87   :  { %2202 = vmatpush.msrb.mxu2 %v901_v34  ;;  %2225 = vmatpush.msrb.mxu3 %v1189_v35  ;;  %v973_v31 = vld [vmem:[#allocation6 + $0x1b10] sm:$0xff]  ;;  %v1819_v33 = vld [vmem:[#allocation6 + $0x3580] sm:$0xff]  ;;  %v380_v34 = vld [vmem:[#allocation6 + $0x888] sm:$0xff] }
  0x88   :  { %2157 = vmatpush.msrb.mxu0 %v307_v36  ;;  %2180 = vmatpush.msrb.mxu1 %v595_v37  ;;  %v668_v35 = vld [vmem:[#allocation6 + $0x1188] sm:$0xff]  ;;  %v1513_v36 = vld [vmem:[#allocation6 + $0x2bf0] sm:$0xff] }
  0x89   :  { %2203 = vmatpush.msrb.mxu2 %v883_v38  ;;  %2226 = vmatpush.msrb.mxu3 %v1171_v39  ;;  %v1801_v37 = vld [vmem:[#allocation6 + $0x34f0] sm:$0xff]  ;;  %v362_v38 = vld [vmem:[#allocation6 + $0x7f8] sm:$0xff] }
  0x8a   :  { %2158 = vmatpush.msrb.mxu0 %v289_v40  ;;  %2181 = vmatpush.msrb.mxu1 %v577_v41  ;;  %v650_v39 = vld [vmem:[#allocation6 + $0x10f8] sm:$0xff]  ;;  %v1495_v40 = vld [vmem:[#allocation6 + $0x2b60] sm:$0xff] }
  0x8b   :  { %2204 = vmatpush.msrb.mxu2 %v865_v42  ;;  %2227 = vmatpush.msrb.mxu3 %v1153_v43  ;;  %v1783_v41 = vld [vmem:[#allocation6 + $0x3460] sm:$0xff]  ;;  %v344_v42 = vld [vmem:[#allocation6 + $0x768] sm:$0xff] }
  0x8c   :  { %2159 = vmatpush.msrb.mxu0 %v271_v45  ;;  %2182 = vmatpush.msrb.mxu1 %v559_v46  ;;  %v632_v43 = vld [vmem:[#allocation6 + $0x1068] sm:$0xff]  ;;  %v1477_v45 = vld [vmem:[#allocation6 + $0x2ad0] sm:$0xff] }
  0x8d   :  { %2205 = vmatpush.msrb.mxu2 %v847_v47  ;;  %2228 = vmatpush.msrb.mxu3 %v1135_v48  ;;  %v1765_v46 = vld [vmem:[#allocation6 + $0x33d0] sm:$0xff]  ;;  %v326_v47 = vld [vmem:[#allocation6 + $0x6d8] sm:$0xff] }
  0x8e   :  { %2160 = vmatpush.msrb.mxu0 %v253_v51  ;;  %2183 = vmatpush.msrb.mxu1 %v541_v52  ;;  %v614_v48 = vld [vmem:[#allocation6 + $0xfd8] sm:$0xff]  ;;  %v1459_v51 = vld [vmem:[#allocation6 + $0x2a40] sm:$0xff] }
  0x8f   :  { %2206 = vmatpush.msrb.mxu2 %v829_v53  ;;  %2229 = vmatpush.msrb.mxu3 %v1117_v54  ;;  %v1747_v52 = vld [vmem:[#allocation6 + $0x3340] sm:$0xff]  ;;  %v308_v53 = vld [vmem:[#allocation6 + $0x648] sm:$0xff] }
  0x90   :  { %2161 = vmatpush.msrb.mxu0 %v235_v55  ;;  %2184 = vmatpush.msrb.mxu1 %v523_v57  ;;  %v596_v54 = vld [vmem:[#allocation6 + $0xf48] sm:$0xff]  ;;  %v1441_v55 = vld [vmem:[#allocation6 + $0x29b0] sm:$0xff] }
  0x91   :  { %2207 = vmatpush.msrb.mxu2 %v811_v59  ;;  %2230 = vmatpush.msrb.mxu3 %v1099_v60  ;;  %v1729_v57 = vld [vmem:[#allocation6 + $0x32b0] sm:$0xff]  ;;  %v290_v59 = vld [vmem:[#allocation6 + $0x5b8] sm:$0xff] }
  0x92   :  { %2162 = vmatpush.msrb.mxu0 %v217_v61  ;;  %2185 = vmatpush.msrb.mxu1 %v505_v62  ;;  %v578_v60 = vld [vmem:[#allocation6 + $0xeb8] sm:$0xff]  ;;  %v1423_v61 = vld [vmem:[#allocation6 + $0x2920] sm:$0xff] }
  0x93   :  { %2208 = vmatpush.msrb.mxu2 %v793_v1  ;;  %2231 = vmatpush.msrb.mxu3 %v1081_v2  ;;  %v1711_v62 = vld [vmem:[#allocation6 + $0x3220] sm:$0xff]  ;;  %v272_v1 = vld [vmem:[#allocation6 + $0x528] sm:$0xff] }
  0x94   :  { %2034 = vmatmul.f32.gmra.mxu2 %v7913_v63  ;;  %2163 = vmatpush.msrb.mxu0 %v199_v3  ;;  %v560_v2 = vld [vmem:[#allocation6 + $0xe28] sm:$0xff]  ;;  %v1693_v3 = vld [vmem:[#allocation6 + $0x3190] sm:$0xff] }
  0x95   :  { %2186 = vmatpush.msrb.mxu1 %v487_v4  ;;  %2209 = vmatpush.msrb.mxu2 %v775_v6  ;;  %v1405_v4 = vld [vmem:[#allocation6 + $0x2890] sm:$0xff]  ;;  %v254_v6 = vld [vmem:[#allocation6 + $0x498] sm:$0xff] }
  0x96   :  { %2232 = vmatpush.msrb.mxu3 %v1063_v7  ;;  %2164 = vmatpush.msrb.mxu0 %v181_v8  ;;  %v542_v7 = vld [vmem:[#allocation6 + $0xd98] sm:$0xff]  ;;  %v1387_v8 = vld [vmem:[#allocation6 + $0x2800] sm:$0xff] }
  0x97   :  { %2057 = vmatmul.f32.gmra.mxu3 %v7919_v5  ;;  %2187 = vmatpush.msrb.mxu1 %v469_v9  ;;  %v1675_v9 = vld [vmem:[#allocation6 + $0x3100] sm:$0xff] }
  0x98   :  { %2210 = vmatpush.msrb.mxu2 %v757_v10  ;;  %2233 = vmatpush.msrb.mxu3 %v1045_v11  ;;  %v236_v10 = vld [vmem:[#allocation6 + $0x408] sm:$0xff] }
  0x99   :  { %2165 = vmatpush.msrb.mxu0 %v163_v13  ;;  %2188 = vmatpush.msrb.mxu1 %v451_v14  ;;  %v524_v11 = vld [vmem:[#allocation6 + $0xd08] sm:$0xff]  ;;  %v1369_v13 = vld [vmem:[#allocation6 + $0x2770] sm:$0xff] }
  0x9a   :  { %2211 = vmatpush.msrb.mxu2 %v739_v15  ;;  %2234 = vmatpush.msrb.mxu3 %v1027_v16  ;;  %v1657_v14 = vld [vmem:[#allocation6 + $0x3070] sm:$0xff]  ;;  %v218_v15 = vld [vmem:[#allocation6 + $0x378] sm:$0xff] }
  0x9b   :  { %2166 = vmatpush.msrb.mxu0 %v145_v19  ;;  %2189 = vmatpush.msrb.mxu1 %v433_v20  ;;  %v506_v16 = vld [vmem:[#allocation6 + $0xc78] sm:$0xff]  ;;  %v1351_v19 = vld [vmem:[#allocation6 + $0x26e0] sm:$0xff] }
  0x9c   :  { %2212 = vmatpush.msrb.mxu2 %v721_v21  ;;  %2235 = vmatpush.msrb.mxu3 %v1009_v22  ;;  %v1639_v20 = vld [vmem:[#allocation6 + $0x2fe0] sm:$0xff]  ;;  %v200_v21 = vld [vmem:[#allocation6 + $0x2e8] sm:$0xff] }
  0x9d   :  { %2123 = vmatmul.f32.vlgmr.msra.gmra.mxu2 %v7923_v18  ;;  %2167 = vmatpush.msrb.mxu0 %v127_v24  ;;  %v488_v22 = vld [vmem:[#allocation6 + $0xbe8] sm:$0xff]  ;;  %v1333_v24 = vld [vmem:[#allocation6 + $0x2650] sm:$0xff] }
  0x9e   :  { %2190 = vmatpush.msrb.mxu1 %v415_v25  ;;  %2213 = vmatpush.msrb.mxu2 %v703_v26  ;;  %v1621_v25 = vld [vmem:[#allocation6 + $0x2f50] sm:$0xff]  ;;  %v182_v26 = vld [vmem:[#allocation6 + $0x258] sm:$0xff] }
  0x9f   :  { %2236 = vmatpush.msrb.mxu3 %v991_v27  ;;  %2077 = vmatmul.f32.vlgmr.msra.gmra.mxu0 %v7911_v58  ;;  %v470_v27 = vld [vmem:[#allocation6 + $0xb58] sm:$0xff] }
  0xa0   :  { %2146 = vmatmul.f32.vlgmr.msra.gmra.mxu3 %v7925_v23  ;;  %2168 = vmatpush.msrb.mxu0 %v109_v28  ;;  %v1315_v28 = vld [vmem:[#allocation6 + $0x25c0] sm:$0xff] }
  0xa1   :  { %2191 = vmatpush.msrb.mxu1 %v397_v29  ;;  %2214 = vmatpush.msrb.mxu2 %v685_v30  ;;  %v1603_v29 = vld [vmem:[#allocation6 + $0x2ec0] sm:$0xff]  ;;  %v164_v30 = vld [vmem:[#allocation6 + $0x1c8] sm:$0xff] }
  0xa2   :  { %2237 = vmatpush.msrb.mxu3 %v973_v31  ;;  %2100 = vmatmul.f32.vlgmr.msra.gmra.mxu1 %v7916_v0  ;;  %v452_v31 = vld [vmem:[#allocation6 + $0xac8] sm:$0xff] }
  0xa3   :  { %2245 = vmatpush.msra.mxu0 %v1531_v32  ;;  %2268 = vmatpush.msra.mxu1 %v1819_v33  ;;  %v1297_v32 = vld [vmem:[#allocation6 + $0x2530] sm:$0xff] }
  0xa4   :  { %2291 = vmatpush.msra.mxu2 %v380_v34  ;;  %2314 = vmatpush.msra.mxu3 %v668_v35  ;;  %v1585_v33 = vld [vmem:[#allocation6 + $0x2e30] sm:$0xff]  ;;  %v146_v34 = vld [vmem:[#allocation6 + $0x138] sm:$0xff] }
  0xa5   :  { %2246 = vmatpush.msra.mxu0 %v1513_v36  ;;  %2269 = vmatpush.msra.mxu1 %v1801_v37  ;;  %v434_v35 = vld [vmem:[#allocation6 + $0xa38] sm:$0xff]  ;;  %v1567_v36 = vld [vmem:[#allocation6 + $0x2da0] sm:$0xff]  ;;  %v128_v37 = vld [vmem:[#allocation6 + $0xa8] sm:$0xff] }
  0xa6   :  { %2292 = vmatpush.msra.mxu2 %v362_v38  ;;  %2315 = vmatpush.msra.mxu3 %v650_v39  ;;  %v416_v38 = vld [vmem:[#allocation6 + $0x9a8] sm:$0xff]  ;;  %v1549_v39 = vld [vmem:[#allocation6 + $0x2d10] sm:$0xff] }
  0xa7   :  { %2247 = vmatpush.msra.mxu0 %v1495_v40  ;;  %2270 = vmatpush.msra.mxu1 %v1783_v41  ;;  %v110_v40 = vld [vmem:[#allocation6 + $0x18] sm:$0xff] }
  0xa8   :  { %2293 = vmatpush.msra.mxu2 %v344_v42  ;;  %2316 = vmatpush.msra.mxu3 %v632_v43  ;;  %v398_v41 = vld [vmem:[#allocation6 + $0x918] sm:$0xff]  ;;  %v956_v42 = vld [vmem:[#allocation6 + $0x1a88] sm:$0xff] }
  0xa9   :  { %2248 = vmatpush.msra.mxu0 %v1477_v45  ;;  %2271 = vmatpush.msra.mxu1 %v1765_v46  ;;  %v1244_v43 = vld [vmem:[#allocation6 + $0x2388] sm:$0xff] }
  0xaa   :  { %2294 = vmatpush.msra.mxu2 %v326_v47  ;;  %2317 = vmatpush.msra.mxu3 %v614_v48  ;;  %v1532_v45 = vld [vmem:[#allocation6 + $0x2c88] sm:$0xff]  ;;  %v1226_v47 = vld [vmem:[#allocation6 + $0x22f8] sm:$0xff] }
  0xab   :  { %2249 = vmatpush.msra.mxu0 %v1459_v51  ;;  %2272 = vmatpush.msra.mxu1 %v1747_v52  ;;  %v1820_v46 = vld [vmem:[#allocation6 + $0x3588] sm:$0xff]  ;;  %v1514_v48 = vld [vmem:[#allocation6 + $0x2bf8] sm:$0xff] }
  0xac   :  { %2295 = vmatpush.msra.mxu2 %v308_v53  ;;  %2318 = vmatpush.msra.mxu3 %v596_v54  ;;  %v1802_v51 = vld [vmem:[#allocation6 + $0x34f8] sm:$0xff]  ;;  %v1496_v52 = vld [vmem:[#allocation6 + $0x2b68] sm:$0xff] }
  0xad   :  { %2250 = vmatpush.msra.mxu0 %v1441_v55  ;;  %2273 = vmatpush.msra.mxu1 %v1729_v57  ;;  %v1784_v53 = vld [vmem:[#allocation6 + $0x3468] sm:$0xff]  ;;  %v1190_v54 = vld [vmem:[#allocation6 + $0x21d8] sm:$0xff] }
  0xae   :  { %2296 = vmatpush.msra.mxu2 %v290_v59  ;;  %2319 = vmatpush.msra.mxu3 %v578_v60  ;;  %v1478_v55 = vld [vmem:[#allocation6 + $0x2ad8] sm:$0xff]  ;;  %v884_v59 = vld [vmem:[#allocation6 + $0x1848] sm:$0xff] }
  0xaf   :  { %2251 = vmatpush.msra.mxu0 %v1423_v61  ;;  %2274 = vmatpush.msra.mxu1 %v1711_v62  ;;  %v1766_v57 = vld [vmem:[#allocation6 + $0x33d8] sm:$0xff]  ;;  %v1172_v60 = vld [vmem:[#allocation6 + $0x2148] sm:$0xff] }
  0xb0   :  { %2297 = vmatpush.msra.mxu2 %v272_v1  ;;  %2320 = vmatpush.msra.mxu3 %v560_v2  ;;  %v1460_v61 = vld [vmem:[#allocation6 + $0x2a48] sm:$0xff]  ;;  %v866_v1 = vld [vmem:[#allocation6 + $0x17b8] sm:$0xff] }
  0xb1   :  { %2080 = vmatmul.f32.gmra.mxu0 %v7929_v50  ;;  %2275 = vmatpush.msra.mxu1 %v1693_v3  ;;  %v1748_v62 = vld [vmem:[#allocation6 + $0x3348] sm:$0xff]  ;;  %v1154_v2 = vld [vmem:[#allocation6 + $0x20b8] sm:$0xff] }
  0xb2   :  { %2252 = vmatpush.msra.mxu0 %v1405_v4  ;;  %2298 = vmatpush.msra.mxu2 %v254_v6  ;;  %v1442_v3 = vld [vmem:[#allocation6 + $0x29b8] sm:$0xff]  ;;  %v848_v6 = vld [vmem:[#allocation6 + $0x1728] sm:$0xff] }
  0xb3   :  { %2321 = vmatpush.msra.mxu3 %v542_v7  ;;  %2103 = vmatmul.f32.gmra.mxu1 %v7932_v56  ;;  %v1730_v4 = vld [vmem:[#allocation6 + $0x32b8] sm:$0xff]  ;;  %v1424_v7 = vld [vmem:[#allocation6 + $0x2928] sm:$0xff] }
  0xb4   :  { %2253 = vmatpush.msra.mxu0 %v1387_v8  ;;  %2276 = vmatpush.msra.mxu1 %v1675_v9  ;;  %v1712_v8 = vld [vmem:[#allocation6 + $0x3228] sm:$0xff]  ;;  %v830_v9 = vld [vmem:[#allocation6 + $0x1698] sm:$0xff] }
  0xb5   :  { %2299 = vmatpush.msra.mxu2 %v236_v10  ;;  %2322 = vmatpush.msra.mxu3 %v524_v11  ;;  %v1118_v10 = vld [vmem:[#allocation6 + $0x1f98] sm:$0xff] }
  0xb6   :  { %2254 = vmatpush.msra.mxu0 %v1369_v13  ;;  %2277 = vmatpush.msra.mxu1 %v1657_v14  ;;  %v1694_v11 = vld [vmem:[#allocation6 + $0x3198] sm:$0xff]  ;;  %v812_v13 = vld [vmem:[#allocation6 + $0x1608] sm:$0xff] }
  0xb7   :  { %2300 = vmatpush.msra.mxu2 %v218_v15  ;;  %2323 = vmatpush.msra.mxu3 %v506_v16  ;;  %v1100_v14 = vld [vmem:[#allocation6 + $0x1f08] sm:$0xff] }
  0xb8   :  { %2126 = vmatmul.f32.gmra.mxu2 %v7935_v12  ;;  %2255 = vmatpush.msra.mxu0 %v1351_v19  ;;  %v1388_v15 = vld [vmem:[#allocation6 + $0x2808] sm:$0xff]  ;;  %v794_v19 = vld [vmem:[#allocation6 + $0x1578] sm:$0xff] }
  0xb9   :  { %2278 = vmatpush.msra.mxu1 %v1639_v20  ;;  %2301 = vmatpush.msra.mxu2 %v200_v21  ;;  %v1676_v16 = vld [vmem:[#allocation6 + $0x3108] sm:$0xff]  ;;  %v1082_v20 = vld [vmem:[#allocation6 + $0x1e78] sm:$0xff] }
  0xba   :  { %2324 = vmatpush.msra.mxu3 %v488_v22  ;;  %2169 = vmatmul.f32.vlgmr.msrb.gmra.mxu0 %v7905_v44  ;;  %v1279_v44 = vld [vmem:[#allocation6 + $0x24a0] sm:$0xff]  ;;  %v1370_v21 = vld [vmem:[#allocation6 + $0x2778] sm:$0xff] }
  0xbb   :  { %2149 = vmatmul.f32.gmra.mxu3 %v7937_v17  ;;  %2256 = vmatpush.msra.mxu0 %v1333_v24  ;;  %v1658_v22 = vld [vmem:[#allocation6 + $0x3078] sm:$0xff]  ;;  %v776_v24 = vld [vmem:[#allocation6 + $0x14e8] sm:$0xff] }
  0xbc   :  { %2279 = vmatpush.msra.mxu1 %v1621_v25  ;;  %2302 = vmatpush.msra.mxu2 %v182_v26  ;;  %v1064_v25 = vld [vmem:[#allocation6 + $0x1de8] sm:$0xff] }
  0xbd   :  { %2325 = vmatpush.msra.mxu3 %v470_v27  ;;  %2192 = vmatmul.f32.vlgmr.msrb.gmra.mxu1 %v7907_v49  ;;  %v1261_v49 = vld [vmem:[#allocation6 + $0x2410] sm:$0xff]  ;;  %v1352_v26 = vld [vmem:[#allocation6 + $0x26e8] sm:$0xff] }
  0xbe   :  { %2257 = vmatpush.msra.mxu0 %v1315_v28  ;;  %2280 = vmatpush.msra.mxu1 %v1603_v29  ;;  %v1640_v27 = vld [vmem:[#allocation6 + $0x2fe8] sm:$0xff]  ;;  %v758_v28 = vld [vmem:[#allocation6 + $0x1458] sm:$0xff] }
  0xbf   :  { %2303 = vmatpush.msra.mxu2 %v164_v30  ;;  %2326 = vmatpush.msra.mxu3 %v452_v31  ;;  %v1046_v29 = vld [vmem:[#allocation6 + $0x1d58] sm:$0xff] }
  0xc0   :  { %2258 = vmatpush.msra.mxu0 %v1297_v32  ;;  %2281 = vmatpush.msra.mxu1 %v1585_v33  ;;  %v1334_v30 = vld [vmem:[#allocation6 + $0x2658] sm:$0xff]  ;;  %v740_v32 = vld [vmem:[#allocation6 + $0x13c8] sm:$0xff] }
  0xc1   :  { %2304 = vmatpush.msra.mxu2 %v146_v34  ;;  %2327 = vmatpush.msra.mxu3 %v434_v35  ;;  %v1622_v31 = vld [vmem:[#allocation6 + $0x2f58] sm:$0xff]  ;;  %v1028_v33 = vld [vmem:[#allocation6 + $0x1cc8] sm:$0xff] }
  0xc2   :  { %2215 = vmatmul.f32.vlgmr.msrb.gmra.mxu2 %v7911_v58  ;;  %2259 = vmatpush.msra.mxu0 %v1279_v44  ;;  %v938_v58 = vld [vmem:[#allocation6 + $0x19f8] sm:$0xff]  ;;  %v1316_v34 = vld [vmem:[#allocation6 + $0x25c8] sm:$0xff] }
  0xc3   :  { %2282 = vmatpush.msra.mxu1 %v1567_v36  ;;  %2305 = vmatpush.msra.mxu2 %v128_v37  ;;  %v1604_v35 = vld [vmem:[#allocation6 + $0x2ec8] sm:$0xff]  ;;  %v722_v44 = vld [vmem:[#allocation6 + $0x1338] sm:$0xff] }
  0xc4   :  { %2328 = vmatpush.msra.mxu3 %v416_v38  ;;  %2172 = vmatmul.f32.gmra.mxu0 %v7913_v63  ;;  %v920_v63 = vld [vmem:[#allocation6 + $0x1968] sm:$0xff]  ;;  %v1010_v36 = vld [vmem:[#allocation6 + $0x1c38] sm:$0xff] }
  0xc5   :  { %2238 = vmatmul.f32.vlgmr.msrb.gmra.mxu3 %v7916_v0  ;;  %2260 = vmatpush.msra.mxu0 %v1261_v49  ;;  %v1208_v0 = vld [vmem:[#allocation6 + $0x2268] sm:$0xff]  ;;  %v1586_v37 = vld [vmem:[#allocation6 + $0x2e38] sm:$0xff] }
  0xc6   :  { %2283 = vmatpush.msra.mxu1 %v1549_v39  ;;  %2306 = vmatpush.msra.mxu2 %v110_v40  ;;  %v704_v38 = vld [vmem:[#allocation6 + $0x12a8] sm:$0xff] }
  0xc7   :  { %2329 = vmatpush.msra.mxu3 %v398_v41  ;;  %2195 = vmatmul.f32.gmra.mxu1 %v7919_v5  ;;  %v902_v5 = vld [vmem:[#allocation6 + $0x18d8] sm:$0xff]  ;;  %v992_v49 = vld [vmem:[#allocation6 + $0x1ba8] sm:$0xff] }
  0xc8   :  { %2337 = vmatpush.msrb.mxu0 %v956_v42  ;;  %2360 = vmatpush.msrb.mxu1 %v1244_v43  ;;  %v1280_v39 = vld [vmem:[#allocation6 + $0x24a8] sm:$0xff]  ;;  %v686_v41 = vld [vmem:[#allocation6 + $0x1218] sm:$0xff] }
  0xc9   :  { %2383 = vmatpush.msrb.mxu2 %v1532_v45  ;;  %2406 = vmatpush.msrb.mxu3 %v1820_v46  ;;  %v1568_v40 = vld [vmem:[#allocation6 + $0x2da8] sm:$0xff]  ;;  %v1262_v42 = vld [vmem:[#allocation6 + $0x2418] sm:$0xff]  ;;  %v381_v45 = vld [vmem:[#allocation6 + $0x890] sm:$0xff] }
  0xca   :  { %2338 = vmatpush.msrb.mxu0 %v938_v58  ;;  %2361 = vmatpush.msrb.mxu1 %v1226_v47  ;;  %v1550_v43 = vld [vmem:[#allocation6 + $0x2d18] sm:$0xff]  ;;  %v669_v46 = vld [vmem:[#allocation6 + $0x1190] sm:$0xff] }
  0xcb   :  { %2384 = vmatpush.msrb.mxu2 %v1514_v48  ;;  %2407 = vmatpush.msrb.mxu3 %v1802_v51  ;;  %v957_v58 = vld [vmem:[#allocation6 + $0x1a90] sm:$0xff]  ;;  %v7965_v48 = vld [vmem:[#allocation3] sm:$0xff]  ;;  %v7968_v51 = vld [vmem:[#allocation3 + $0x8] sm:$0xff] }
  0xcc   :  { %2339 = vmatpush.msrb.mxu0 %v920_v63  ;;  %2362 = vmatpush.msrb.mxu1 %v1208_v0  ;;  %v1245_v47 = vld [vmem:[#allocation6 + $0x2390] sm:$0xff]  ;;  %v363_v63 = vld [vmem:[#allocation6 + $0x800] sm:$0xff] }
  0xcd   :  { %2385 = vmatpush.msrb.mxu2 %v1496_v52  ;;  %2408 = vmatpush.msrb.mxu3 %v1784_v53  ;;  %v939_v0 = vld [vmem:[#allocation6 + $0x1a00] sm:$0xff]  ;;  %v345_v53 = vld [vmem:[#allocation6 + $0x770] sm:$0xff] }
  0xce   :  { %2261 = vmatmul.f32.vlgmr.msra.gmra.mxu0 %v7923_v18  ;;  %2363 = vmatpush.msrb.mxu1 %v1190_v54  ;;  %v1136_v18 = vld [vmem:[#allocation6 + $0x2028] sm:$0xff]  ;;  %v1227_v52 = vld [vmem:[#allocation6 + $0x2300] sm:$0xff]  ;;  %v7971_v54 = vpop.f32.mrf.mxu0 }
  0xcf   :  { %2340 = vmatpush.msrb.mxu0 %v902_v5  ;;  %2386 = vmatpush.msrb.mxu2 %v1478_v55  ;;  %v921_v5 = vld [vmem:[#allocation6 + $0x1970] sm:$0xff] }
  0xd0   :  { %2409 = vmatpush.msrb.mxu3 %v1766_v57  ;;  %2284 = vmatmul.f32.vlgmr.msra.gmra.mxu1 %v7925_v23  ;;  %v1406_v23 = vld [vmem:[#allocation6 + $0x2898] sm:$0xff]  ;;  %v1209_v55 = vld [vmem:[#allocation6 + $0x2270] sm:$0xff]  ;;  %v327_v57 = vld [vmem:[#allocation6 + $0x6e0] sm:$0xff] }
  0xd1   :  { %2341 = vmatpush.msrb.mxu0 %v884_v59  ;;  %2364 = vmatpush.msrb.mxu1 %v1172_v60  ;;  %v615_v59 = vld [vmem:[#allocation6 + $0xfe0] sm:$0xff] }
  0xd2   :  { %2387 = vmatpush.msrb.mxu2 %v1460_v61  ;;  %2410 = vmatpush.msrb.mxu3 %v1748_v62  ;;  %v903_v60 = vld [vmem:[#allocation6 + $0x18e0] sm:$0xff]  ;;  %v309_v62 = vld [vmem:[#allocation6 + $0x650] sm:$0xff] }
  0xd3   :  { %2342 = vmatpush.msrb.mxu0 %v866_v1  ;;  %2365 = vmatpush.msrb.mxu1 %v1154_v2  ;;  %v1191_v61 = vld [vmem:[#allocation6 + $0x21e0] sm:$0xff]  ;;  %v597_v1 = vld [vmem:[#allocation6 + $0xf50] sm:$0xff]  ;;  %v7973_v2 = vpop.f32.mrf.mxu1 }
  0xd4   :  { %2388 = vmatpush.msrb.mxu2 %v1442_v3  ;;  %2411 = vmatpush.msrb.mxu3 %v1730_v4  ;;  %v885_v3 = vld [vmem:[#allocation6 + $0x1850] sm:$0xff] }
  0xd5   :  { %2343 = vmatpush.msrb.mxu0 %v848_v6  ;;  %2366 = vmatpush.msrb.mxu1 %v1136_v18  ;;  %v1173_v4 = vld [vmem:[#allocation6 + $0x2150] sm:$0xff]  ;;  %v291_v6 = vld [vmem:[#allocation6 + $0x5c0] sm:$0xff] }
  0xd6   :  { %2389 = vmatpush.msrb.mxu2 %v1424_v7  ;;  %2412 = vmatpush.msrb.mxu3 %v1712_v8  ;;  %v579_v18 = vld [vmem:[#allocation6 + $0xec0] sm:$0xff] }
  0xd7   :  { %2344 = vmatpush.msrb.mxu0 %v830_v9  ;;  %2367 = vmatpush.msrb.mxu1 %v1118_v10  ;;  %v867_v7 = vld [vmem:[#allocation6 + $0x17c0] sm:$0xff]  ;;  %v273_v9 = vld [vmem:[#allocation6 + $0x530] sm:$0xff] }
  0xd8   :  { %2390 = vmatpush.msrb.mxu2 %v1406_v23  ;;  %2413 = vmatpush.msrb.mxu3 %v1694_v11  ;;  %v1155_v8 = vld [vmem:[#allocation6 + $0x20c0] sm:$0xff]  ;;  %v561_v10 = vld [vmem:[#allocation6 + $0xe30] sm:$0xff] }
  0xd9   :  { %2345 = vmatpush.msrb.mxu0 %v812_v13  ;;  %2368 = vmatpush.msrb.mxu1 %v1100_v14  ;;  %v849_v23 = vld [vmem:[#allocation6 + $0x1730] sm:$0xff]  ;;  %v255_v13 = vld [vmem:[#allocation6 + $0x4a0] sm:$0xff] }
  0xda   :  { %2391 = vmatpush.msrb.mxu2 %v1388_v15  ;;  %2414 = vmatpush.msrb.mxu3 %v1676_v16  ;;  %v1137_v11 = vld [vmem:[#allocation6 + $0x2030] sm:$0xff]  ;;  %v543_v14 = vld [vmem:[#allocation6 + $0xda0] sm:$0xff]  ;;  %v1897_v16 = vpop.f32.mrf.mxu0 }
  0xdb   :  { %2346 = vmatpush.msrb.mxu0 %v794_v19  ;;  %2369 = vmatpush.msrb.mxu1 %v1082_v20  ;;  %v7975_v15 = vld [vmem:[#allocation8] sm:$0xff] }
  0xdc   :  { %2392 = vmatpush.msrb.mxu2 %v1370_v21  ;;  %2415 = vmatpush.msrb.mxu3 %v1658_v22  ;;  %v831_v19 = vld [vmem:[#allocation6 + $0x16a0] sm:$0xff]  ;;  %v237_v21 = vld [vmem:[#allocation6 + $0x410] sm:$0xff] }
  0xdd   :  { %2218 = vmatmul.f32.gmra.mxu2 %v7929_v50  ;;  %2347 = vmatpush.msrb.mxu0 %v776_v24  ;;  %v1298_v50 = vld [vmem:[#allocation6 + $0x2538] sm:$0xff]  ;;  %v1119_v20 = vld [vmem:[#allocation6 + $0x1fa0] sm:$0xff]  ;;  %v525_v22 = vld [vmem:[#allocation6 + $0xd10] sm:$0xff]  ;;  %v7977_v24 = vpop.f32.mrf.mxu2 }
  0xde   :  { %2370 = vmatpush.msrb.mxu1 %v1064_v25  ;;  %2393 = vmatpush.msrb.mxu2 %v1352_v26  ;;  %v813_v25 = vld [vmem:[#allocation6 + $0x1610] sm:$0xff] }
  0xdf   :  { %2416 = vmatpush.msrb.mxu3 %v1640_v27  ;;  %2348 = vmatpush.msrb.mxu0 %v758_v28  ;;  %v1101_v26 = vld [vmem:[#allocation6 + $0x1f10] sm:$0xff]  ;;  %v9360_v27 = vperm.slane %v7975_v15, 0  ;;  %v219_v28 = vld [vmem:[#allocation6 + $0x380] sm:$0xff] }
  0xe0   :  { %2241 = vmatmul.f32.gmra.mxu3 %v7932_v56  ;;  %2371 = vmatpush.msrb.mxu1 %v1046_v29  ;;  %v974_v56 = vld [vmem:[#allocation6 + $0x1b18] sm:$0xff]  ;;  %v507_v29 = vld [vmem:[#allocation6 + $0xc80] sm:$0xff] }
  0xe1   :  { %2394 = vmatpush.msrb.mxu2 %v1334_v30  ;;  %2417 = vmatpush.msrb.mxu3 %v1622_v31  ;;  %v1920_v30 = vpop.f32.mrf.mxu1  ;;  %v795_v31 = vld [vmem:[#allocation6 + $0x1580] sm:$0xff] }
  0xe2   :  { %2349 = vmatpush.msrb.mxu0 %v740_v32  ;;  %2372 = vmatpush.msrb.mxu1 %v1028_v33  ;;  %v1083_v32 = vld [vmem:[#allocation6 + $0x1e80] sm:$0xff]  ;;  %v1898_v33 = vadd.f32 %v1897_v16, %v9360_v27 }
  0xe3   :  { %2395 = vmatpush.msrb.mxu2 %v1316_v34  ;;  %2418 = vmatpush.msrb.mxu3 %v1604_v35  ;;  %v201_v34 = vld [vmem:[#allocation6 + $0x2f0] sm:$0xff]  ;;  %v7982_v35 = vpop.f32.mrf.mxu3 }
  0xe4   :  { %2350 = vmatpush.msrb.mxu0 %v722_v44  ;;  %2373 = vmatpush.msrb.mxu1 %v1010_v36  ;;  %v489_v44 = vld [vmem:[#allocation6 + $0xbf0] sm:$0xff] }
  0xe5   :  { %2396 = vmatpush.msrb.mxu2 %v1298_v50  ;;  %2419 = vmatpush.msrb.mxu3 %v1586_v37  ;;  %v777_v36 = vld [vmem:[#allocation6 + $0x14f0] sm:$0xff]  ;;  %v183_v37 = vld [vmem:[#allocation6 + $0x260] sm:$0xff] }
  0xe6   :  { %2351 = vmatpush.msrb.mxu0 %v704_v38  ;;  %2374 = vmatpush.msrb.mxu1 %v992_v49  ;;  %v1065_v50 = vld [vmem:[#allocation6 + $0x1df0] sm:$0xff]  ;;  %v471_v49 = vld [vmem:[#allocation6 + $0xb60] sm:$0xff] }
  0xe7   :  { %2397 = vmatpush.msrb.mxu2 %v1280_v39  ;;  %2420 = vmatpush.msrb.mxu3 %v1568_v40  ;;  %v7984_v38 = vld [vmem:[#allocation3 + $0x30] sm:$0xff]  ;;  %v1921_v39 = vadd.f32 %v1920_v30, %v1898_v33  ;;  %v759_v40 = vld [vmem:[#allocation6 + $0x1460] sm:$0xff]  ;;  %v328_v33 = vld [vmem:[#allocation6 + $0x6e8] sm:$0xff] }
  0xe8   :  { %2264 = vmatmul.f32.gmra.mxu0 %v7935_v12  ;;  %2375 = vmatpush.msrb.mxu1 %v974_v56  ;;  %v651_v12 = vld [vmem:[#allocation6 + $0x1100] sm:$0xff] }
  0xe9   :  { %2352 = vmatpush.msrb.mxu0 %v686_v41  ;;  %2398 = vmatpush.msrb.mxu2 %v1262_v42  ;;  %v1047_v56 = vld [vmem:[#allocation6 + $0x1d60] sm:$0xff]  ;;  %v7987_v41 = vpop.f32.mrf.mxu0  ;;  %v165_v42 = vld [vmem:[#allocation6 + $0x1d0] sm:$0xff] }
  0xea   :  { %2421 = vmatpush.msrb.mxu3 %v1550_v43  ;;  %2287 = vmatmul.f32.gmra.mxu1 %v7937_v17  ;;  %v633_v17 = vld [vmem:[#allocation6 + $0x1070] sm:$0xff] }
  0xeb   :  { %2307 = vmatmul.f32.vlgmr.msra.gmra.mxu2 %v7965_v48  ;;  %2330 = vmatmul.f32.vlgmr.msra.gmra.mxu3 %v7968_v51  ;;  %v453_v43 = vld [vmem:[#allocation6 + $0xad0] sm:$0xff] }
  0xec   :  { %2429 = vmatpush.msra.mxu0 %v381_v45  ;;  %2452 = vmatpush.msra.mxu1 %v669_v46  ;;  %v7989_v46 = vld [vmem:[#allocation3 + $0x38] sm:$0xff] }
  0xed   :  { %2475 = vmatpush.msra.mxu2 %v957_v58  ;;  %2498 = vmatpush.msra.mxu3 %v1245_v47  ;;  %v741_v58 = vld [vmem:[#allocation6 + $0x13d0] sm:$0xff] }
  0xee   :  { %2430 = vmatpush.msra.mxu0 %v363_v63  ;;  %2453 = vmatpush.msra.mxu1 %v651_v12  ;;  %v1029_v47 = vld [vmem:[#allocation6 + $0x1cd0] sm:$0xff]  ;;  %v147_v63 = vld [vmem:[#allocation6 + $0x140] sm:$0xff] }
  0xef   :  { %2476 = vmatpush.msra.mxu2 %v939_v0  ;;  %2499 = vmatpush.msra.mxu3 %v1227_v52  ;;  %v435_v12 = vld [vmem:[#allocation6 + $0xa40] sm:$0xff] }
  0xf0   :  { %2431 = vmatpush.msra.mxu0 %v345_v53  ;;  %2454 = vmatpush.msra.mxu1 %v633_v17  ;;  %v723_v52 = vld [vmem:[#allocation6 + $0x1340] sm:$0xff]  ;;  %v7992_v17 = vpop.f32.mrf.mxu1 }
  0xf1   :  { %2477 = vmatpush.msra.mxu2 %v921_v5  ;;  %2500 = vmatpush.msra.mxu3 %v1209_v55  ;;  %v1011_v53 = vld [vmem:[#allocation6 + $0x1c40] sm:$0xff]  ;;  %v129_v55 = vld [vmem:[#allocation6 + $0xb0] sm:$0xff] }
  0xf2   :  { %2432 = vmatpush.msra.mxu0 %v327_v57  ;;  %2455 = vmatpush.msra.mxu1 %v615_v59  ;;  %v417_v57 = vld [vmem:[#allocation6 + $0x9b0] sm:$0xff] }
  0xf3   :  { %2478 = vmatpush.msra.mxu2 %v903_v60  ;;  %2501 = vmatpush.msra.mxu3 %v1191_v61  ;;  %v705_v59 = vld [vmem:[#allocation6 + $0x12b0] sm:$0xff]  ;;  %v7994_v61 = vld [vmem:[#allocation3 + $0x20] sm:$0xff] }
  0xf4   :  { %2433 = vmatpush.msra.mxu0 %v309_v62  ;;  %2456 = vmatpush.msra.mxu1 %v597_v1  ;;  %v1943_v45 = vpop.f32.mrf.mxu2  ;;  %v993_v60 = vld [vmem:[#allocation6 + $0x1bb0] sm:$0xff]  ;;  %v111_v1 = vld [vmem:[#allocation6 + $0x20] sm:$0xff] }
  0xf5   :  { %2479 = vmatpush.msra.mxu2 %v885_v3  ;;  %2502 = vmatpush.msra.mxu3 %v1173_v4  ;;  %v1944_v0 = vadd.f32 %v1943_v45, %v1921_v39  ;;  %v399_v4 = vld [vmem:[#allocation6 + $0x920] sm:$0xff]  ;;  %v274_v45 = vld [vmem:[#allocation6 + $0x538] sm:$0xff] }
  0xf6   :  { %2434 = vmatpush.msra.mxu0 %v291_v6  ;;  %2457 = vmatpush.msra.mxu1 %v579_v18  ;;  %v687_v6 = vld [vmem:[#allocation6 + $0x1220] sm:$0xff]  ;;  %v7997_v18 = vld [vmem:[#allocation3 + $0x10] sm:$0xff] }
  0xf7   :  { %2480 = vmatpush.msra.mxu2 %v867_v7  ;;  %2503 = vmatpush.msra.mxu3 %v1155_v8  ;;  %v1966_v5 = vpop.f32.mrf.mxu3  ;;  %v975_v7 = vld [vmem:[#allocation6 + $0x1b20] sm:$0xff]  ;;  %v8000_v8 = vld [vmem:[#allocation3 + $0x28] sm:$0xff] }
  0xf8   :  { %2435 = vmatpush.msra.mxu0 %v273_v9  ;;  %2458 = vmatpush.msra.mxu1 %v561_v10  ;;  %v1967_v62 = vadd.f32 %v1966_v5, %v1944_v0  ;;  %v1533_v9 = vld [vmem:[#allocation6 + $0x2c90] sm:$0xff]  ;;  %v1731_v39 = vld [vmem:[#allocation6 + $0x32c0] sm:$0xff]  ;;  %v544_v0 = vld [vmem:[#allocation6 + $0xda8] sm:$0xff] }
  0xf9   :  { %2481 = vmatpush.msra.mxu2 %v849_v23  ;;  %2504 = vmatpush.msra.mxu3 %v1137_v11  ;;  %v1989_v3 = vpop.f32.mrf.mxu0  ;;  %v1821_v10 = vld [vmem:[#allocation6 + $0x3590] sm:$0xff]  ;;  %v382_v11 = vld [vmem:[#allocation6 + $0x898] sm:$0xff] }
  0xfa   :  { %2436 = vmatpush.msra.mxu0 %v255_v13  ;;  %2459 = vmatpush.msra.mxu1 %v543_v14  ;;  %v1990_v23 = vadd.f32 %v1989_v3, %v1967_v62  ;;  %v670_v13 = vld [vmem:[#allocation6 + $0x1198] sm:$0xff]  ;;  %v1677_v5 = vld [vmem:[#allocation6 + $0x3110] sm:$0xff]  ;;  %v1659_v62 = vld [vmem:[#allocation6 + $0x3080] sm:$0xff] }
  0xfb   :  { %2482 = vmatpush.msra.mxu2 %v831_v19  ;;  %2505 = vmatpush.msra.mxu3 %v1119_v20  ;;  %v8003_v14 = vld [vmem:[#allocation3 + $0x18] sm:$0xff]  ;;  %v2012_v16 = vpop.f32.mrf.mxu1  ;;  %v1515_v19 = vld [vmem:[#allocation6 + $0x2c00] sm:$0xff]  ;;  %v508_v3 = vld [vmem:[#allocation6 + $0xc88] sm:$0xff] }
  0xfc   :  { %2437 = vmatpush.msra.mxu0 %v237_v21  ;;  %2460 = vmatpush.msra.mxu1 %v525_v22  ;;  %v1803_v20 = vld [vmem:[#allocation6 + $0x3500] sm:$0xff]  ;;  %v364_v21 = vld [vmem:[#allocation6 + $0x808] sm:$0xff]  ;;  %v8006_v30 = vadd.f32 %v2012_v16, %v1990_v23 }
  0xfd   :  { %2483 = vmatpush.msra.mxu2 %v813_v25  ;;  %2506 = vmatpush.msra.mxu3 %v1101_v26  ;;  %v652_v22 = vld [vmem:[#allocation6 + $0x1108] sm:$0xff]  ;;  %v1497_v25 = vld [vmem:[#allocation6 + $0x2b70] sm:$0xff]  ;;  %v1335_v23 = vld [vmem:[#allocation6 + $0x2660] sm:$0xff] }
  0xfe   :  { %2438 = vmatpush.msra.mxu0 %v219_v28  ;;  %2461 = vmatpush.msra.mxu1 %v507_v29  ;;  %v1785_v26 = vld [vmem:[#allocation6 + $0x3470] sm:$0xff]  ;;  %v346_v28 = vld [vmem:[#allocation6 + $0x778] sm:$0xff]  ;;  %9366 = vst [vmem:[#allocation17_spill] sm:$0xff] %v8006_v30  ;;  %v472_v16 = vld [vmem:[#allocation6 + $0xb68] sm:$0xff] }
  0xff   :  { %2484 = vmatpush.msra.mxu2 %v795_v31  ;;  %2507 = vmatpush.msra.mxu3 %v1083_v32  ;;  %v634_v29 = vld [vmem:[#allocation6 + $0x1078] sm:$0xff]  ;;  %v1479_v31 = vld [vmem:[#allocation6 + $0x2ae0] sm:$0xff] }
 0x100   :  { %2310 = vmatmul.f32.gmra.mxu2 %v7984_v38  ;;  %2439 = vmatpush.msra.mxu0 %v201_v34  ;;  %v1767_v32 = vld [vmem:[#allocation6 + $0x33e0] sm:$0xff]  ;;  %v616_v34 = vld [vmem:[#allocation6 + $0xfe8] sm:$0xff] }
 0x101   :  { %2462 = vmatpush.msra.mxu1 %v489_v44  ;;  %2485 = vmatpush.msra.mxu2 %v777_v36  ;;  %v1461_v44 = vld [vmem:[#allocation6 + $0x2a50] sm:$0xff] }
 0x102   :  { %2508 = vmatpush.msra.mxu3 %v1065_v50  ;;  %2440 = vmatpush.msra.mxu0 %v183_v37  ;;  %v1749_v36 = vld [vmem:[#allocation6 + $0x3350] sm:$0xff]  ;;  %v310_v50 = vld [vmem:[#allocation6 + $0x658] sm:$0xff] }
 0x103   :  { %2333 = vmatmul.f32.gmra.mxu3 %v7989_v46  ;;  %2463 = vmatpush.msra.mxu1 %v471_v49  ;;  %v598_v37 = vld [vmem:[#allocation6 + $0xf58] sm:$0xff]  ;;  %v1443_v49 = vld [vmem:[#allocation6 + $0x29c0] sm:$0xff] }
 0x104   :  { %2486 = vmatpush.msra.mxu2 %v759_v40  ;;  %2509 = vmatpush.msra.mxu3 %v1047_v56  ;;  %v292_v40 = vld [vmem:[#allocation6 + $0x5c8] sm:$0xff] }
 0x105   :  { %2441 = vmatpush.msra.mxu0 %v165_v42  ;;  %2464 = vmatpush.msra.mxu1 %v453_v43  ;;  %v580_v56 = vld [vmem:[#allocation6 + $0xec8] sm:$0xff]  ;;  %v1425_v42 = vld [vmem:[#allocation6 + $0x2930] sm:$0xff] }
 0x106   :  { %2487 = vmatpush.msra.mxu2 %v741_v58  ;;  %2510 = vmatpush.msra.mxu3 %v1029_v47  ;;  %v1713_v43 = vld [vmem:[#allocation6 + $0x3230] sm:$0xff]  ;;  %v562_v58 = vld [vmem:[#allocation6 + $0xe38] sm:$0xff]  ;;  %v1407_v47 = vld [vmem:[#allocation6 + $0x28a0] sm:$0xff] }
 0x107   :  { %2442 = vmatpush.msra.mxu0 %v147_v63  ;;  %2465 = vmatpush.msra.mxu1 %v435_v12  ;;  %v1695_v63 = vld [vmem:[#allocation6 + $0x31a0] sm:$0xff]  ;;  %v256_v12 = vld [vmem:[#allocation6 + $0x4a8] sm:$0xff] }
 0x108   :  { %2488 = vmatpush.msra.mxu2 %v723_v52  ;;  %2511 = vmatpush.msra.mxu3 %v1011_v53  ;;  %v8010_v52 = vld [vmem:[#allocation3 + $0x40] sm:$0xff]  ;;  %v1389_v53 = vld [vmem:[#allocation6 + $0x2810] sm:$0xff] }
 0x109   :  { %2399 = vmatmul.f32.vlgmr.msrb.gmra.mxu2 %v7994_v61  ;;  %2443 = vmatpush.msra.mxu0 %v129_v55  ;;  %v238_v55 = vld [vmem:[#allocation6 + $0x418] sm:$0xff] }
 0x10a   :  { %2466 = vmatpush.msra.mxu1 %v417_v57  ;;  %2489 = vmatpush.msra.mxu2 %v705_v59  ;;  %v526_v57 = vld [vmem:[#allocation6 + $0xd18] sm:$0xff]  ;;  %v1371_v59 = vld [vmem:[#allocation6 + $0x2780] sm:$0xff] }
 0x10b   :  { %2512 = vmatpush.msra.mxu3 %v993_v60  ;;  %2353 = vmatmul.f32.vlgmr.msrb.gmra.mxu0 %v7997_v18  ;;  %v8013_v60 = vld [vmem:[#allocation3 + $0x48] sm:$0xff] }
 0x10c   :  { %2422 = vmatmul.f32.vlgmr.msrb.gmra.mxu3 %v8000_v8  ;;  %2444 = vmatpush.msra.mxu0 %v111_v1  ;;  %v220_v1 = vld [vmem:[#allocation6 + $0x388] sm:$0xff] }
 0x10d   :  { %2467 = vmatpush.msra.mxu1 %v399_v4  ;;  %2490 = vmatpush.msra.mxu2 %v687_v6  ;;  %v1353_v4 = vld [vmem:[#allocation6 + $0x26f0] sm:$0xff] }
 0x10e   :  { %2513 = vmatpush.msra.mxu3 %v975_v7  ;;  %2376 = vmatmul.f32.vlgmr.msrb.gmra.mxu1 %v8003_v14  ;;  %v1641_v6 = vld [vmem:[#allocation6 + $0x2ff0] sm:$0xff]  ;;  %v202_v7 = vld [vmem:[#allocation6 + $0x2f8] sm:$0xff] }
 0x10f   :  { %2521 = vmatpush.msrb.mxu0 %v1533_v9  ;;  %2544 = vmatpush.msrb.mxu1 %v1821_v10  ;;  %v490_v9 = vld [vmem:[#allocation6 + $0xbf8] sm:$0xff]  ;;  %v8016_v10 = vld [vmem:[#allocation3 + $0x50] sm:$0xff] }
 0x110   :  { %2567 = vmatpush.msrb.mxu2 %v382_v11  ;;  %2590 = vmatpush.msrb.mxu3 %v670_v13  ;;  %v1623_v11 = vld [vmem:[#allocation6 + $0x2f60] sm:$0xff]  ;;  %v184_v13 = vld [vmem:[#allocation6 + $0x268] sm:$0xff] }
 0x111   :  { %2522 = vmatpush.msrb.mxu0 %v1515_v19  ;;  %2545 = vmatpush.msrb.mxu1 %v1803_v20  ;;  %v8019_v19 = vld [vmem:[#allocation3 + $0x58] sm:$0xff]  ;;  %v1317_v20 = vld [vmem:[#allocation6 + $0x25d0] sm:$0xff] }
 0x112   :  { %2568 = vmatpush.msrb.mxu2 %v364_v21  ;;  %2591 = vmatpush.msrb.mxu3 %v652_v22  ;;  %v1605_v21 = vld [vmem:[#allocation6 + $0x2ed0] sm:$0xff]  ;;  %v166_v22 = vld [vmem:[#allocation6 + $0x1d8] sm:$0xff] }
 0x113   :  { %2523 = vmatpush.msrb.mxu0 %v1497_v25  ;;  %2546 = vmatpush.msrb.mxu1 %v1785_v26  ;;  %v454_v25 = vld [vmem:[#allocation6 + $0xad8] sm:$0xff]  ;;  %v1299_v26 = vld [vmem:[#allocation6 + $0x2540] sm:$0xff] }
 0x114   :  { %2569 = vmatpush.msrb.mxu2 %v346_v28  ;;  %2592 = vmatpush.msrb.mxu3 %v634_v29  ;;  %v1587_v28 = vld [vmem:[#allocation6 + $0x2e40] sm:$0xff]  ;;  %v148_v29 = vld [vmem:[#allocation6 + $0x148] sm:$0xff] }
 0x115   :  { %4513 = vrot.lane.b32.xlu1 %v8006_v30, %s7852_s2  ;;  %2524 = vmatpush.msrb.mxu0 %v1479_v31  ;;  %v436_v31 = vld [vmem:[#allocation6 + $0xa48] sm:$0xff] }
 0x116   :  { %2547 = vmatpush.msrb.mxu1 %v1767_v32  ;;  %2570 = vmatpush.msrb.mxu2 %v328_v33  ;;  %v1281_v32 = vld [vmem:[#allocation6 + $0x24b0] sm:$0xff] }
 0x117   :  { %2593 = vmatpush.msrb.mxu3 %v616_v34  ;;  %2525 = vmatpush.msrb.mxu0 %v1461_v44  ;;  %v1569_v33 = vld [vmem:[#allocation6 + $0x2db0] sm:$0xff]  ;;  %v130_v34 = vld [vmem:[#allocation6 + $0xb8] sm:$0xff] }
 0x118   :  { %2548 = vmatpush.msrb.mxu1 %v1749_v36  ;;  %2571 = vmatpush.msrb.mxu2 %v310_v50  ;;  %v418_v44 = vld [vmem:[#allocation6 + $0x9b8] sm:$0xff]  ;;  %v1263_v36 = vld [vmem:[#allocation6 + $0x2420] sm:$0xff] }
 0x119   :  { %2594 = vmatpush.msrb.mxu3 %v598_v37  ;;  %2526 = vmatpush.msrb.mxu0 %v1443_v49  ;;  %v1551_v50 = vld [vmem:[#allocation6 + $0x2d20] sm:$0xff]  ;;  %v112_v37 = vld [vmem:[#allocation6 + $0x28] sm:$0xff] }
 0x11a   :  { %2549 = vmatpush.msrb.mxu1 %v1731_v39  ;;  %2572 = vmatpush.msrb.mxu2 %v292_v40  ;;  %v400_v49 = vld [vmem:[#allocation6 + $0x928] sm:$0xff]  ;;  %v958_v39 = vld [vmem:[#allocation6 + $0x1a98] sm:$0xff] }
 0x11b   :  { %2595 = vmatpush.msrb.mxu3 %v580_v56  ;;  %2527 = vmatpush.msrb.mxu0 %v1425_v42  ;;  %v1246_v40 = vld [vmem:[#allocation6 + $0x2398] sm:$0xff] }
 0x11c   :  { %2550 = vmatpush.msrb.mxu1 %v1713_v43  ;;  %2573 = vmatpush.msrb.mxu2 %v274_v45  ;;  %v1534_v56 = vld [vmem:[#allocation6 + $0x2c98] sm:$0xff]  ;;  %v940_v43 = vld [vmem:[#allocation6 + $0x1a08] sm:$0xff] }
 0x11d   :  { %2596 = vmatpush.msrb.mxu3 %v562_v58  ;;  %2356 = vmatmul.f32.gmra.mxu0 %v8010_v52  ;;  %v1822_v42 = vld [vmem:[#allocation6 + $0x3598] sm:$0xff]  ;;  %v1228_v45 = vld [vmem:[#allocation6 + $0x2308] sm:$0xff] }
 0x11e   :  { %2528 = vmatpush.msrb.mxu0 %v1407_v47  ;;  %2551 = vmatpush.msrb.mxu1 %v1695_v63  ;;  %v1516_v58 = vld [vmem:[#allocation6 + $0x2c08] sm:$0xff]  ;;  %v922_v63 = vld [vmem:[#allocation6 + $0x1978] sm:$0xff] }
 0x11f   :  { %2574 = vmatpush.msrb.mxu2 %v256_v12  ;;  %2597 = vmatpush.msrb.mxu3 %v544_v0  ;;  %v1804_v47 = vld [vmem:[#allocation6 + $0x3508] sm:$0xff]  ;;  %v1210_v12 = vld [vmem:[#allocation6 + $0x2278] sm:$0xff] }
 0x120   :  { %2379 = vmatmul.f32.gmra.mxu1 %v8013_v60  ;;  %2529 = vmatpush.msrb.mxu0 %v1389_v53  ;;  %v1498_v0 = vld [vmem:[#allocation6 + $0x2b78] sm:$0xff] }
 0x121   :  { %2552 = vmatpush.msrb.mxu1 %v1677_v5  ;;  %2575 = vmatpush.msrb.mxu2 %v238_v55  ;;  %v1786_v53 = vld [vmem:[#allocation6 + $0x3478] sm:$0xff]  ;;  %v904_v5 = vld [vmem:[#allocation6 + $0x18e8] sm:$0xff] }
 0x122   :  { %2598 = vmatpush.msrb.mxu3 %v526_v57  ;;  %2530 = vmatpush.msrb.mxu0 %v1371_v59  ;;  %v1192_v55 = vld [vmem:[#allocation6 + $0x21e8] sm:$0xff] }
 0x123   :  { %2553 = vmatpush.msrb.mxu1 %v1659_v62  ;;  %2576 = vmatpush.msrb.mxu2 %v220_v1  ;;  %v1480_v57 = vld [vmem:[#allocation6 + $0x2ae8] sm:$0xff]  ;;  %v886_v62 = vld [vmem:[#allocation6 + $0x1858] sm:$0xff] }
 0x124   :  { %2599 = vmatpush.msrb.mxu3 %v508_v3  ;;  %2402 = vmatmul.f32.gmra.mxu2 %v8016_v10  ;;  %v1768_v59 = vld [vmem:[#allocation6 + $0x33e8] sm:$0xff]  ;;  %v1174_v1 = vld [vmem:[#allocation6 + $0x2158] sm:$0xff] }
 0x125   :  { %2531 = vmatpush.msrb.mxu0 %v1353_v4  ;;  %2554 = vmatpush.msrb.mxu1 %v1641_v6  ;;  %v1462_v3 = vld [vmem:[#allocation6 + $0x2a58] sm:$0xff]  ;;  %v868_v6 = vld [vmem:[#allocation6 + $0x17c8] sm:$0xff] }
 0x126   :  { %2577 = vmatpush.msrb.mxu2 %v202_v7  ;;  %2600 = vmatpush.msrb.mxu3 %v490_v9  ;;  %v1750_v4 = vld [vmem:[#allocation6 + $0x3358] sm:$0xff]  ;;  %v1156_v7 = vld [vmem:[#allocation6 + $0x20c8] sm:$0xff] }
 0x127   :  { %2425 = vmatmul.f32.gmra.mxu3 %v8019_v19  ;;  %2445 = vmatmul.f32.vlgmr.msra.gmra.mxu0 %v7965_v48  ;;  %v1444_v9 = vld [vmem:[#allocation6 + $0x29c8] sm:$0xff] }
 0x128   :  { %2532 = vmatpush.msrb.mxu0 %v1335_v23  ;;  %2555 = vmatpush.msrb.mxu1 %v1623_v11  ;;  %v1732_v23 = vld [vmem:[#allocation6 + $0x32c8] sm:$0xff]  ;;  %v850_v11 = vld [vmem:[#allocation6 + $0x1738] sm:$0xff] }
 0x129   :  { %2578 = vmatpush.msrb.mxu2 %v184_v13  ;;  %2601 = vmatpush.msrb.mxu3 %v472_v16  ;;  %v1138_v13 = vld [vmem:[#allocation6 + $0x2038] sm:$0xff] }
 0x12a   :  { %2468 = vmatmul.f32.vlgmr.msra.gmra.mxu1 %v7968_v51  ;;  %2533 = vmatpush.msrb.mxu0 %v1317_v20  ;;  %v1426_v16 = vld [vmem:[#allocation6 + $0x2938] sm:$0xff] }
 0x12b   :  { %2556 = vmatpush.msrb.mxu1 %v1605_v21  ;;  %2579 = vmatpush.msrb.mxu2 %v166_v22  ;;  %v1714_v20 = vld [vmem:[#allocation6 + $0x3238] sm:$0xff]  ;;  %v832_v21 = vld [vmem:[#allocation6 + $0x16a8] sm:$0xff] }
 0x12c   :  { %2602 = vmatpush.msrb.mxu3 %v454_v25  ;;  %2534 = vmatpush.msrb.mxu0 %v1299_v26  ;;  %v1120_v22 = vld [vmem:[#allocation6 + $0x1fa8] sm:$0xff] }
 0x12d   :  { %2557 = vmatpush.msrb.mxu1 %v1587_v28  ;;  %2580 = vmatpush.msrb.mxu2 %v148_v29  ;;  %v1408_v25 = vld [vmem:[#allocation6 + $0x28a8] sm:$0xff]  ;;  %v814_v28 = vld [vmem:[#allocation6 + $0x1618] sm:$0xff] }
 0x12e   :  { %2603 = vmatpush.msrb.mxu3 %v436_v31  ;;  %2491 = vmatmul.f32.vlgmr.msra.gmra.mxu2 %v7997_v18  ;;  %v1696_v26 = vld [vmem:[#allocation6 + $0x31a8] sm:$0xff]  ;;  %v1102_v29 = vld [vmem:[#allocation6 + $0x1f18] sm:$0xff] }
 0x12f   :  { %2535 = vmatpush.msrb.mxu0 %v1281_v32  ;;  %2558 = vmatpush.msrb.mxu1 %v1569_v33  ;;  %v1390_v31 = vld [vmem:[#allocation6 + $0x2818] sm:$0xff]  ;;  %v796_v33 = vld [vmem:[#allocation6 + $0x1588] sm:$0xff] }
 0x130   :  { %2581 = vmatpush.msrb.mxu2 %v130_v34  ;;  %2604 = vmatpush.msrb.mxu3 %v418_v44  ;;  %v1678_v32 = vld [vmem:[#allocation6 + $0x3118] sm:$0xff]  ;;  %v1084_v34 = vld [vmem:[#allocation6 + $0x1e88] sm:$0xff] }
 0x131   :  { %2448 = vmatmul.f32.gmra.mxu0 %v7984_v38  ;;  %2514 = vmatmul.f32.vlgmr.msra.gmra.mxu3 %v8003_v14  ;;  %v1372_v44 = vld [vmem:[#allocation6 + $0x2788] sm:$0xff] }
 0x132   :  { %2536 = vmatpush.msrb.mxu0 %v1263_v36  ;;  %2559 = vmatpush.msrb.mxu1 %v1551_v50  ;;  %v1660_v36 = vld [vmem:[#allocation6 + $0x3088] sm:$0xff]  ;;  %v778_v50 = vld [vmem:[#allocation6 + $0x14f8] sm:$0xff] }
 0x133   :  { %2582 = vmatpush.msrb.mxu2 %v112_v37  ;;  %2605 = vmatpush.msrb.mxu3 %v400_v49  ;;  %v1066_v37 = vld [vmem:[#allocation6 + $0x1df8] sm:$0xff] }
 0x134   :  { %2471 = vmatmul.f32.gmra.mxu1 %v7989_v46  ;;  %2613 = vmatpush.msra.mxu0 %v958_v39  ;;  %v1354_v49 = vld [vmem:[#allocation6 + $0x26f8] sm:$0xff] }
 0x135   :  { %2636 = vmatpush.msra.mxu1 %v1246_v40  ;;  %2659 = vmatpush.msra.mxu2 %v1534_v56  ;;  %v1642_v39 = vld [vmem:[#allocation6 + $0x2ff8] sm:$0xff]  ;;  %v760_v40 = vld [vmem:[#allocation6 + $0x1468] sm:$0xff] }
 0x136   :  { %2682 = vmatpush.msra.mxu3 %v1822_v42  ;;  %2614 = vmatpush.msra.mxu0 %v940_v43  ;;  %v1048_v56 = vld [vmem:[#allocation6 + $0x1d68] sm:$0xff] }
 0x137   :  { %2637 = vmatpush.msra.mxu1 %v1228_v45  ;;  %2660 = vmatpush.msra.mxu2 %v1516_v58  ;;  %v1336_v42 = vld [vmem:[#allocation6 + $0x2668] sm:$0xff]  ;;  %v742_v45 = vld [vmem:[#allocation6 + $0x13d8] sm:$0xff] }
 0x138   :  { %2683 = vmatpush.msra.mxu3 %v1804_v47  ;;  %2615 = vmatpush.msra.mxu0 %v922_v63  ;;  %v1624_v43 = vld [vmem:[#allocation6 + $0x2f68] sm:$0xff]  ;;  %v1030_v58 = vld [vmem:[#allocation6 + $0x1cd8] sm:$0xff] }
 0x139   :  { %2638 = vmatpush.msra.mxu1 %v1210_v12  ;;  %2661 = vmatpush.msra.mxu2 %v1498_v0  ;;  %v1318_v47 = vld [vmem:[#allocation6 + $0x25d8] sm:$0xff]  ;;  %v724_v12 = vld [vmem:[#allocation6 + $0x1348] sm:$0xff] }
 0x13a   :  { %2684 = vmatpush.msra.mxu3 %v1786_v53  ;;  %2537 = vmatmul.f32.vlgmr.msrb.gmra.mxu0 %v7994_v61  ;;  %v1606_v63 = vld [vmem:[#allocation6 + $0x2ed8] sm:$0xff]  ;;  %v1012_v0 = vld [vmem:[#allocation6 + $0x1c48] sm:$0xff] }
 0x13b   :  { %2616 = vmatpush.msra.mxu0 %v904_v5  ;;  %2639 = vmatpush.msra.mxu1 %v1192_v55  ;;  %v1300_v53 = vld [vmem:[#allocation6 + $0x2548] sm:$0xff]  ;;  %v706_v55 = vld [vmem:[#allocation6 + $0x12b8] sm:$0xff] }
 0x13c   :  { %2662 = vmatpush.msra.mxu2 %v1480_v57  ;;  %2685 = vmatpush.msra.mxu3 %v1768_v59  ;;  %v1588_v5 = vld [vmem:[#allocation6 + $0x2e48] sm:$0xff]  ;;  %v994_v57 = vld [vmem:[#allocation6 + $0x1bb8] sm:$0xff] }
 0x13d   :  { %2560 = vmatmul.f32.vlgmr.msrb.gmra.mxu1 %v8000_v8  ;;  %2617 = vmatpush.msra.mxu0 %v886_v62  ;;  %v1282_v59 = vld [vmem:[#allocation6 + $0x24b8] sm:$0xff] }
 0x13e   :  { %2640 = vmatpush.msra.mxu1 %v1174_v1  ;;  %2663 = vmatpush.msra.mxu2 %v1462_v3  ;;  %v1570_v62 = vld [vmem:[#allocation6 + $0x2db8] sm:$0xff]  ;;  %v688_v1 = vld [vmem:[#allocation6 + $0x1228] sm:$0xff] }
 0x13f   :  { %2686 = vmatpush.msra.mxu3 %v1750_v4  ;;  %2618 = vmatpush.msra.mxu0 %v868_v6  ;;  %v976_v3 = vld [vmem:[#allocation6 + $0x1b28] sm:$0xff] }
 0x140   :  { %2641 = vmatpush.msra.mxu1 %v1156_v7  ;;  %2664 = vmatpush.msra.mxu2 %v1444_v9  ;;  %v1264_v4 = vld [vmem:[#allocation6 + $0x2428] sm:$0xff]  ;;  %v383_v7 = vld [vmem:[#allocation6 + $0x8a0] sm:$0xff] }
 0x141   :  { %2687 = vmatpush.msra.mxu3 %v1732_v23  ;;  %2619 = vmatpush.msra.mxu0 %v850_v11  ;;  %v1552_v6 = vld [vmem:[#allocation6 + $0x2d28] sm:$0xff]  ;;  %v671_v9 = vld [vmem:[#allocation6 + $0x11a0] sm:$0xff] }
 0x142   :  { %2642 = vmatpush.msra.mxu1 %v1138_v13  ;;  %2665 = vmatpush.msra.mxu2 %v1426_v16  ;;  %v959_v23 = vld [vmem:[#allocation6 + $0x1aa0] sm:$0xff]  ;;  %v365_v13 = vld [vmem:[#allocation6 + $0x810] sm:$0xff] }
 0x143   :  { %2688 = vmatpush.msra.mxu3 %v1714_v20  ;;  %2620 = vmatpush.msra.mxu0 %v832_v21  ;;  %v1247_v11 = vld [vmem:[#allocation6 + $0x23a0] sm:$0xff]  ;;  %v653_v16 = vld [vmem:[#allocation6 + $0x1110] sm:$0xff] }
 0x144   :  { %2643 = vmatpush.msra.mxu1 %v1120_v22  ;;  %2666 = vmatpush.msra.mxu2 %v1408_v25  ;;  %v941_v20 = vld [vmem:[#allocation6 + $0x1a10] sm:$0xff]  ;;  %v347_v22 = vld [vmem:[#allocation6 + $0x780] sm:$0xff] }
 0x145   :  { %2689 = vmatpush.msra.mxu3 %v1696_v26  ;;  %2621 = vmatpush.msra.mxu0 %v814_v28  ;;  %v1229_v21 = vld [vmem:[#allocation6 + $0x2310] sm:$0xff]  ;;  %v635_v25 = vld [vmem:[#allocation6 + $0x1080] sm:$0xff] }
 0x146   :  { %2644 = vmatpush.msra.mxu1 %v1102_v29  ;;  %2667 = vmatpush.msra.mxu2 %v1390_v31  ;;  %v923_v26 = vld [vmem:[#allocation6 + $0x1980] sm:$0xff]  ;;  %v329_v29 = vld [vmem:[#allocation6 + $0x6f0] sm:$0xff] }
 0x147   :  { %2690 = vmatpush.msra.mxu3 %v1678_v32  ;;  %2622 = vmatpush.msra.mxu0 %v796_v33  ;;  %v1211_v28 = vld [vmem:[#allocation6 + $0x2280] sm:$0xff]  ;;  %v905_v31 = vld [vmem:[#allocation6 + $0x18f0] sm:$0xff] }
 0x148   :  { %2645 = vmatpush.msra.mxu1 %v1084_v34  ;;  %2668 = vmatpush.msra.mxu2 %v1372_v44  ;;  %v311_v32 = vld [vmem:[#allocation6 + $0x660] sm:$0xff] }
 0x149   :  { %2691 = vmatpush.msra.mxu3 %v1660_v36  ;;  %2494 = vmatmul.f32.gmra.mxu2 %v8010_v52  ;;  %v599_v33 = vld [vmem:[#allocation6 + $0xf60] sm:$0xff]  ;;  %v293_v36 = vld [vmem:[#allocation6 + $0x5d0] sm:$0xff] }
 0x14a   :  { %2623 = vmatpush.msra.mxu0 %v778_v50  ;;  %2646 = vmatpush.msra.mxu1 %v1066_v37  ;;  %v887_v34 = vld [vmem:[#allocation6 + $0x1860] sm:$0xff]  ;;  %v581_v50 = vld [vmem:[#allocation6 + $0xed0] sm:$0xff] }
 0x14b   :  { %2669 = vmatpush.msra.mxu2 %v1354_v49  ;;  %2692 = vmatpush.msra.mxu3 %v1642_v39  ;;  %v1175_v44 = vld [vmem:[#allocation6 + $0x2160] sm:$0xff]  ;;  %v869_v37 = vld [vmem:[#allocation6 + $0x17d0] sm:$0xff] }
 0x14c   :  { %2517 = vmatmul.f32.gmra.mxu3 %v8013_v60  ;;  %2624 = vmatpush.msra.mxu0 %v760_v40  ;;  %v1157_v49 = vld [vmem:[#allocation6 + $0x20d0] sm:$0xff]  ;;  %v275_v39 = vld [vmem:[#allocation6 + $0x540] sm:$0xff] }
 0x14d   :  { %2647 = vmatpush.msra.mxu1 %v1048_v56  ;;  %2670 = vmatpush.msra.mxu2 %v1336_v42  ;;  %v563_v40 = vld [vmem:[#allocation6 + $0xe40] sm:$0xff] }
 0x14e   :  { %2693 = vmatpush.msra.mxu3 %v1624_v43  ;;  %2625 = vmatpush.msra.mxu0 %v742_v45  ;;  %v851_v56 = vld [vmem:[#allocation6 + $0x1740] sm:$0xff]  ;;  %v257_v43 = vld [vmem:[#allocation6 + $0x4b0] sm:$0xff] }
 0x14f   :  { %2648 = vmatpush.msra.mxu1 %v1030_v58  ;;  %2671 = vmatpush.msra.mxu2 %v1318_v47  ;;  %v1139_v42 = vld [vmem:[#allocation6 + $0x2040] sm:$0xff]  ;;  %v545_v45 = vld [vmem:[#allocation6 + $0xdb0] sm:$0xff] }
 0x150   :  { %2694 = vmatpush.msra.mxu3 %v1606_v63  ;;  %2626 = vmatpush.msra.mxu0 %v724_v12  ;;  %v833_v58 = vld [vmem:[#allocation6 + $0x16b0] sm:$0xff]  ;;  %v239_v63 = vld [vmem:[#allocation6 + $0x420] sm:$0xff] }
 0x151   :  { %2649 = vmatpush.msra.mxu1 %v1012_v0  ;;  %2672 = vmatpush.msra.mxu2 %v1300_v53  ;;  %v1121_v47 = vld [vmem:[#allocation6 + $0x1fb0] sm:$0xff]  ;;  %v527_v12 = vld [vmem:[#allocation6 + $0xd20] sm:$0xff] }
 0x152   :  { %2695 = vmatpush.msra.mxu3 %v1588_v5  ;;  %2627 = vmatpush.msra.mxu0 %v706_v55  ;;  %v815_v0 = vld [vmem:[#allocation6 + $0x1620] sm:$0xff]  ;;  %v221_v5 = vld [vmem:[#allocation6 + $0x390] sm:$0xff] }
 0x153   :  { %2650 = vmatpush.msra.mxu1 %v994_v57  ;;  %2673 = vmatpush.msra.mxu2 %v1282_v59  ;;  %v1103_v53 = vld [vmem:[#allocation6 + $0x1f20] sm:$0xff]  ;;  %v509_v55 = vld [vmem:[#allocation6 + $0xc90] sm:$0xff] }
 0x154   :  { %2696 = vmatpush.msra.mxu3 %v1570_v62  ;;  %2540 = vmatmul.f32.gmra.mxu0 %v8016_v10  ;;  %v797_v57 = vld [vmem:[#allocation6 + $0x1590] sm:$0xff]  ;;  %v203_v62 = vld [vmem:[#allocation6 + $0x300] sm:$0xff] }
 0x155   :  { %2628 = vmatpush.msra.mxu0 %v688_v1  ;;  %2651 = vmatpush.msra.mxu1 %v976_v3  ;;  %v1085_v59 = vld [vmem:[#allocation6 + $0x1e90] sm:$0xff]  ;;  %v491_v1 = vld [vmem:[#allocation6 + $0xc00] sm:$0xff] }
 0x156   :  { %2674 = vmatpush.msra.mxu2 %v1264_v4  ;;  %2697 = vmatpush.msra.mxu3 %v1552_v6  ;;  %v779_v3 = vld [vmem:[#allocation6 + $0x1500] sm:$0xff]  ;;  %v185_v6 = vld [vmem:[#allocation6 + $0x270] sm:$0xff] }
 0x157   :  { %2563 = vmatmul.f32.gmra.mxu1 %v8019_v19  ;;  %2583 = vmatmul.f32.vlgmr.msrb.gmra.mxu2 %v7965_v48  ;;  %v617_v48 = vld [vmem:[#allocation6 + $0xff0] sm:$0xff]  ;;  %v1067_v4 = vld [vmem:[#allocation6 + $0x1e00] sm:$0xff] }
 0x158   :  { %2606 = vmatmul.f32.vlgmr.msrb.gmra.mxu3 %v7968_v51  ;;  %2705 = vmatpush.msrb.mxu0 %v383_v7  ;;  %v1193_v51 = vld [vmem:[#allocation6 + $0x21f0] sm:$0xff] }
 0x159   :  { %2728 = vmatpush.msrb.mxu1 %v671_v9  ;;  %2751 = vmatpush.msrb.mxu2 %v959_v23  ;;  %v473_v7 = vld [vmem:[#allocation6 + $0xb70] sm:$0xff] }
 0x15a   :  { %2774 = vmatpush.msrb.mxu3 %v1247_v11  ;;  %2706 = vmatpush.msrb.mxu0 %v365_v13  ;;  %v761_v9 = vld [vmem:[#allocation6 + $0x1470] sm:$0xff]  ;;  %v167_v11 = vld [vmem:[#allocation6 + $0x1e0] sm:$0xff] }
 0x15b   :  { %2729 = vmatpush.msrb.mxu1 %v653_v16  ;;  %2752 = vmatpush.msrb.mxu2 %v941_v20  ;;  %v1049_v23 = vld [vmem:[#allocation6 + $0x1d70] sm:$0xff]  ;;  %v455_v13 = vld [vmem:[#allocation6 + $0xae0] sm:$0xff] }
 0x15c   :  { %2775 = vmatpush.msrb.mxu3 %v1229_v21  ;;  %2707 = vmatpush.msrb.mxu0 %v347_v22  ;;  %v743_v16 = vld [vmem:[#allocation6 + $0x13e0] sm:$0xff]  ;;  %v149_v21 = vld [vmem:[#allocation6 + $0x150] sm:$0xff] }
 0x15d   :  { %2730 = vmatpush.msrb.mxu1 %v635_v25  ;;  %2753 = vmatpush.msrb.mxu2 %v923_v26  ;;  %v1031_v20 = vld [vmem:[#allocation6 + $0x1ce0] sm:$0xff]  ;;  %v725_v22 = vld [vmem:[#allocation6 + $0x1350] sm:$0xff] }
 0x15e   :  { %2776 = vmatpush.msrb.mxu3 %v1211_v28  ;;  %2708 = vmatpush.msrb.mxu0 %v329_v29  ;;  %v1013_v25 = vld [vmem:[#allocation6 + $0x1c50] sm:$0xff]  ;;  %v131_v26 = vld [vmem:[#allocation6 + $0xc0] sm:$0xff] }
 0x15f   :  { %2731 = vmatpush.msrb.mxu1 %v617_v48  ;;  %2754 = vmatpush.msrb.mxu2 %v905_v31  ;;  %v419_v28 = vld [vmem:[#allocation6 + $0x9c0] sm:$0xff]  ;;  %v113_v48 = vld [vmem:[#allocation6 + $0x30] sm:$0xff] }
 0x160   :  { %2777 = vmatpush.msrb.mxu3 %v1193_v51  ;;  %2709 = vmatpush.msrb.mxu0 %v311_v32  ;;  %v995_v29 = vld [vmem:[#allocation6 + $0x1bc0] sm:$0xff]  ;;  %v401_v31 = vld [vmem:[#allocation6 + $0x930] sm:$0xff] }
 0x161   :  { %2732 = vmatpush.msrb.mxu1 %v599_v33  ;;  %2755 = vmatpush.msrb.mxu2 %v887_v34  ;;  %v689_v51 = vld [vmem:[#allocation6 + $0x1230] sm:$0xff]  ;;  %v1535_v33 = vld [vmem:[#allocation6 + $0x2ca0] sm:$0xff] }
 0x162   :  { %2778 = vmatpush.msrb.mxu3 %v1175_v44  ;;  %2710 = vmatpush.msrb.mxu0 %v293_v36  ;;  %v977_v32 = vld [vmem:[#allocation6 + $0x1b30] sm:$0xff]  ;;  %v1823_v34 = vld [vmem:[#allocation6 + $0x35a0] sm:$0xff]  ;;  %v384_v44 = vld [vmem:[#allocation6 + $0x8a8] sm:$0xff] }
 0x163   :  { %2733 = vmatpush.msrb.mxu1 %v581_v50  ;;  %2756 = vmatpush.msrb.mxu2 %v869_v37  ;;  %v1517_v36 = vld [vmem:[#allocation6 + $0x2c10] sm:$0xff]  ;;  %v366_v37 = vld [vmem:[#allocation6 + $0x818] sm:$0xff] }
 0x164   :  { %2779 = vmatpush.msrb.mxu3 %v1157_v49  ;;  %2711 = vmatpush.msrb.mxu0 %v275_v39  ;;  %v1805_v50 = vld [vmem:[#allocation6 + $0x3510] sm:$0xff]  ;;  %v654_v49 = vld [vmem:[#allocation6 + $0x1118] sm:$0xff]  ;;  %v348_v39 = vld [vmem:[#allocation6 + $0x788] sm:$0xff] }
 0x165   :  { %2734 = vmatpush.msrb.mxu1 %v563_v40  ;;  %2757 = vmatpush.msrb.mxu2 %v851_v56  ;;  %v636_v40 = vld [vmem:[#allocation6 + $0x1088] sm:$0xff]  ;;  %v1481_v56 = vld [vmem:[#allocation6 + $0x2af0] sm:$0xff] }
 0x166   :  { %2780 = vmatpush.msrb.mxu3 %v1139_v42  ;;  %2712 = vmatpush.msrb.mxu0 %v257_v43  ;;  %v1769_v42 = vld [vmem:[#allocation6 + $0x33f0] sm:$0xff]  ;;  %v330_v43 = vld [vmem:[#allocation6 + $0x6f8] sm:$0xff] }
 0x167   :  { %2735 = vmatpush.msrb.mxu1 %v545_v45  ;;  %2758 = vmatpush.msrb.mxu2 %v833_v58  ;;  %v1463_v45 = vld [vmem:[#allocation6 + $0x2a60] sm:$0xff] }
 0x168   :  { %2781 = vmatpush.msrb.mxu3 %v1121_v47  ;;  %2713 = vmatpush.msrb.mxu0 %v239_v63  ;;  %v1751_v58 = vld [vmem:[#allocation6 + $0x3360] sm:$0xff]  ;;  %v312_v47 = vld [vmem:[#allocation6 + $0x668] sm:$0xff] }
 0x169   :  { %2736 = vmatpush.msrb.mxu1 %v527_v12  ;;  %2759 = vmatpush.msrb.mxu2 %v815_v0  ;;  %v600_v63 = vld [vmem:[#allocation6 + $0xf68] sm:$0xff]  ;;  %v1445_v12 = vld [vmem:[#allocation6 + $0x29d0] sm:$0xff] }
 0x16a   :  { %2782 = vmatpush.msrb.mxu3 %v1103_v53  ;;  %2714 = vmatpush.msrb.mxu0 %v221_v5  ;;  %v1733_v0 = vld [vmem:[#allocation6 + $0x32d0] sm:$0xff]  ;;  %v294_v53 = vld [vmem:[#allocation6 + $0x5d8] sm:$0xff] }
 0x16b   :  { %2737 = vmatpush.msrb.mxu1 %v509_v55  ;;  %2760 = vmatpush.msrb.mxu2 %v797_v57  ;;  %v582_v5 = vld [vmem:[#allocation6 + $0xed8] sm:$0xff]  ;;  %v1427_v55 = vld [vmem:[#allocation6 + $0x2940] sm:$0xff] }
 0x16c   :  { %2783 = vmatpush.msrb.mxu3 %v1085_v59  ;;  %2586 = vmatmul.f32.gmra.mxu2 %v7984_v38  ;;  %v437_v38 = vld [vmem:[#allocation6 + $0xa50] sm:$0xff]  ;;  %v1715_v57 = vld [vmem:[#allocation6 + $0x3240] sm:$0xff]  ;;  %v276_v59 = vld [vmem:[#allocation6 + $0x548] sm:$0xff] }
 0x16d   :  { %2715 = vmatpush.msrb.mxu0 %v203_v62  ;;  %2738 = vmatpush.msrb.mxu1 %v491_v1  ;;  %v564_v62 = vld [vmem:[#allocation6 + $0xe48] sm:$0xff]  ;;  %v1409_v1 = vld [vmem:[#allocation6 + $0x28b0] sm:$0xff] }
 0x16e   :  { %2761 = vmatpush.msrb.mxu2 %v779_v3  ;;  %2784 = vmatpush.msrb.mxu3 %v1067_v4  ;;  %v1697_v3 = vld [vmem:[#allocation6 + $0x31b0] sm:$0xff]  ;;  %v258_v4 = vld [vmem:[#allocation6 + $0x4b8] sm:$0xff] }
 0x16f   :  { %2609 = vmatmul.f32.gmra.mxu3 %v7989_v46  ;;  %2716 = vmatpush.msrb.mxu0 %v185_v6  ;;  %v707_v46 = vld [vmem:[#allocation6 + $0x12c0] sm:$0xff]  ;;  %v546_v6 = vld [vmem:[#allocation6 + $0xdb8] sm:$0xff] }
 0x170   :  { %2739 = vmatpush.msrb.mxu1 %v473_v7  ;;  %2762 = vmatpush.msrb.mxu2 %v761_v9  ;;  %v1391_v7 = vld [vmem:[#allocation6 + $0x2820] sm:$0xff] }
 0x171   :  { %2785 = vmatpush.msrb.mxu3 %v1049_v23  ;;  %2717 = vmatpush.msrb.mxu0 %v167_v11  ;;  %v1679_v9 = vld [vmem:[#allocation6 + $0x3120] sm:$0xff]  ;;  %v240_v23 = vld [vmem:[#allocation6 + $0x428] sm:$0xff] }
 0x172   :  { %2740 = vmatpush.msrb.mxu1 %v455_v13  ;;  %2763 = vmatpush.msrb.mxu2 %v743_v16  ;;  %v528_v11 = vld [vmem:[#allocation6 + $0xd28] sm:$0xff]  ;;  %v8046_v13 = vld [vmem:[#allocation3] sm:$0xff]  ;;  %v1373_v16 = vld [vmem:[#allocation6 + $0x2790] sm:$0xff] }
 0x173   :  { %2786 = vmatpush.msrb.mxu3 %v1031_v20  ;;  %2718 = vmatpush.msrb.mxu0 %v149_v21  ;;  %v1661_v20 = vld [vmem:[#allocation6 + $0x3090] sm:$0xff]  ;;  %v222_v21 = vld [vmem:[#allocation6 + $0x398] sm:$0xff] }
 0x174   :  { %2741 = vmatpush.msrb.mxu1 %v437_v38  ;;  %2764 = vmatpush.msrb.mxu2 %v725_v22  ;;  %v510_v38 = vld [vmem:[#allocation6 + $0xc98] sm:$0xff]  ;;  %v1355_v22 = vld [vmem:[#allocation6 + $0x2700] sm:$0xff] }
 0x175   :  { %2787 = vmatpush.msrb.mxu3 %v1013_v25  ;;  %2675 = vmatmul.f32.vlgmr.msra.gmra.mxu2 %v7994_v61  ;;  %v672_v61 = vld [vmem:[#allocation6 + $0x11a8] sm:$0xff] }
 0x176   :  { %2719 = vmatpush.msrb.mxu0 %v131_v26  ;;  %2742 = vmatpush.msrb.mxu1 %v419_v28  ;;  %v8049_v25 = vld [vmem:[#allocation3 + $0x8] sm:$0xff]  ;;  %v1643_v26 = vld [vmem:[#allocation6 + $0x3000] sm:$0xff] }
 0x177   :  { %2765 = vmatpush.msrb.mxu2 %v707_v46  ;;  %2788 = vmatpush.msrb.mxu3 %v995_v29  ;;  %v204_v28 = vld [vmem:[#allocation6 + $0x308] sm:$0xff]  ;;  %v1337_v29 = vld [vmem:[#allocation6 + $0x2670] sm:$0xff] }
 0x178   :  { %2629 = vmatmul.f32.vlgmr.msra.gmra.mxu0 %v7997_v18  ;;  %2698 = vmatmul.f32.vlgmr.msra.gmra.mxu3 %v8000_v8  ;;  %v1499_v18 = vld [vmem:[#allocation6 + $0x2b80] sm:$0xff]  ;;  %v492_v46 = vld [vmem:[#allocation6 + $0xc08] sm:$0xff] }
 0x179   :  { %2720 = vmatpush.msrb.mxu0 %v113_v48  ;;  %2743 = vmatpush.msrb.mxu1 %v401_v31  ;;  %v1787_v8 = vld [vmem:[#allocation6 + $0x3480] sm:$0xff]  ;;  %v1625_v48 = vld [vmem:[#allocation6 + $0x2f70] sm:$0xff]  ;;  %v186_v31 = vld [vmem:[#allocation6 + $0x278] sm:$0xff] }
 0x17a   :  { %2766 = vmatpush.msrb.mxu2 %v689_v51  ;;  %2789 = vmatpush.msrb.mxu3 %v977_v32  ;;  %v474_v51 = vld [vmem:[#allocation6 + $0xb78] sm:$0xff]  ;;  %v8052_v32 = vld [vmem:[#allocation3 + $0x10] sm:$0xff] }
 0x17b   :  { %2652 = vmatmul.f32.vlgmr.msra.gmra.mxu1 %v8003_v14  ;;  %2797 = vmatpush.msra.mxu0 %v1535_v33  ;;  %v618_v14 = vld [vmem:[#allocation6 + $0xff8] sm:$0xff]  ;;  %v1319_v33 = vld [vmem:[#allocation6 + $0x25e0] sm:$0xff] }
 0x17c   :  { %2820 = vmatpush.msra.mxu1 %v1823_v34  ;;  %2843 = vmatpush.msra.mxu2 %v384_v44  ;;  %v1607_v34 = vld [vmem:[#allocation6 + $0x2ee0] sm:$0xff]  ;;  %v8055_v44 = vpop.f32.mrf.mxu2 }
 0x17d   :  { %2866 = vmatpush.msra.mxu3 %v672_v61  ;;  %2798 = vmatpush.msra.mxu0 %v1517_v36  ;;  %v168_v61 = vld [vmem:[#allocation6 + $0x1e8] sm:$0xff] }
 0x17e   :  { %2821 = vmatpush.msra.mxu1 %v1805_v50  ;;  %2844 = vmatpush.msra.mxu2 %v366_v37  ;;  %v456_v36 = vld [vmem:[#allocation6 + $0xae8] sm:$0xff]  ;;  %v8057_v50 = vld [vmem:[#allocation3 + $0x30] sm:$0xff]  ;;  %v8060_v37 = vld [vmem:[#allocation3 + $0x18] sm:$0xff] }
 0x17f   :  { %2867 = vmatpush.msra.mxu3 %v654_v49  ;;  %2799 = vmatpush.msra.mxu0 %v1499_v18  ;;  %v1301_v49 = vld [vmem:[#allocation6 + $0x2550] sm:$0xff] }
 0x180   :  { %2822 = vmatpush.msra.mxu1 %v1787_v8  ;;  %2845 = vmatpush.msra.mxu2 %v348_v39  ;;  %v1589_v18 = vld [vmem:[#allocation6 + $0x2e50] sm:$0xff]  ;;  %v150_v8 = vld [vmem:[#allocation6 + $0x158] sm:$0xff] }
 0x181   :  { %2868 = vmatpush.msra.mxu3 %v636_v40  ;;  %2800 = vmatpush.msra.mxu0 %v1481_v56  ;;  %v438_v39 = vld [vmem:[#allocation6 + $0xa58] sm:$0xff]  ;;  %v1283_v40 = vld [vmem:[#allocation6 + $0x24c0] sm:$0xff]  ;;  %v8063_v56 = vpop.f32.mrf.mxu3 }
 0x182   :  { %2823 = vmatpush.msra.mxu1 %v1769_v42  ;;  %2846 = vmatpush.msra.mxu2 %v330_v43  ;;  %v8065_v42 = vld [vmem:[#allocation3 + $0x38] sm:$0xff]  ;;  %v1571_v43 = vld [vmem:[#allocation6 + $0x2dc0] sm:$0xff] }
 0x183   :  { %2869 = vmatpush.msra.mxu3 %v618_v14  ;;  %2632 = vmatmul.f32.gmra.mxu0 %v8010_v52  ;;  %v132_v14 = vld [vmem:[#allocation6 + $0xc8] sm:$0xff] }
 0x184   :  { %2801 = vmatpush.msra.mxu0 %v1463_v45  ;;  %2824 = vmatpush.msra.mxu1 %v1751_v58  ;;  %v420_v45 = vld [vmem:[#allocation6 + $0x9c8] sm:$0xff]  ;;  %v8068_v58 = vpop.f32.mrf.mxu0 }
 0x185   :  { %2847 = vmatpush.msra.mxu2 %v312_v47  ;;  %2870 = vmatpush.msra.mxu3 %v600_v63  ;;  %v1265_v47 = vld [vmem:[#allocation6 + $0x2430] sm:$0xff] }
 0x186   :  { %2655 = vmatmul.f32.gmra.mxu1 %v8013_v60  ;;  %2802 = vmatpush.msra.mxu0 %v1445_v12  ;;  %v1553_v63 = vld [vmem:[#allocation6 + $0x2d30] sm:$0xff]  ;;  %v114_v12 = vld [vmem:[#allocation6 + $0x38] sm:$0xff] }
 0x187   :  { %2825 = vmatpush.msra.mxu1 %v1733_v0  ;;  %2848 = vmatpush.msra.mxu2 %v294_v53  ;;  %v402_v0 = vld [vmem:[#allocation6 + $0x938] sm:$0xff]  ;;  %v960_v53 = vld [vmem:[#allocation6 + $0x1aa8] sm:$0xff] }
 0x188   :  { %2871 = vmatpush.msra.mxu3 %v582_v5  ;;  %2803 = vmatpush.msra.mxu0 %v1427_v55  ;;  %v1248_v5 = vld [vmem:[#allocation6 + $0x23a8] sm:$0xff]  ;;  %v8071_v55 = vpop.f32.mrf.mxu2 }
 0x189   :  { %2826 = vmatpush.msra.mxu1 %v1715_v57  ;;  %2849 = vmatpush.msra.mxu2 %v276_v59  ;;  %v8073_v57 = vpop.f32.mrf.mxu1  ;;  %v1536_v59 = vld [vmem:[#allocation6 + $0x2ca8] sm:$0xff] }
 0x18a   :  { %2872 = vmatpush.msra.mxu3 %v564_v62  ;;  %2678 = vmatmul.f32.gmra.mxu2 %v8016_v10  ;;  %v1824_v62 = vld [vmem:[#allocation6 + $0x35a8] sm:$0xff] }
 0x18b   :  { %2804 = vmatpush.msra.mxu0 %v1409_v1  ;;  %2827 = vmatpush.msra.mxu1 %v1697_v3  ;;  %v8076_v1 = vld [vmem:[#allocation3 + $0x20] sm:$0xff]  ;;  %v942_v3 = vld [vmem:[#allocation6 + $0x1a18] sm:$0xff] }
 0x18c   :  { %2850 = vmatpush.msra.mxu2 %v258_v4  ;;  %2873 = vmatpush.msra.mxu3 %v546_v6  ;;  %v1518_v4 = vld [vmem:[#allocation6 + $0x2c18] sm:$0xff] }
 0x18d   :  { %2701 = vmatmul.f32.gmra.mxu3 %v8019_v19  ;;  %2721 = vmatmul.f32.vlgmr.msrb.gmra.mxu0 %v8046_v13  ;;  %v1806_v6 = vld [vmem:[#allocation6 + $0x3518] sm:$0xff] }
 0x18e   :  { %2805 = vmatpush.msra.mxu0 %v1391_v7  ;;  %2828 = vmatpush.msra.mxu1 %v1679_v9  ;;  %v924_v7 = vld [vmem:[#allocation6 + $0x1988] sm:$0xff]  ;;  %v8079_v9 = vpop.f32.mrf.mxu3 }
 0x18f   :  { %2851 = vmatpush.msra.mxu2 %v240_v23  ;;  %2874 = vmatpush.msra.mxu3 %v528_v11  ;;  %v8081_v23 = vpop.f32.mrf.mxu0  ;;  %v8083_v11 = vld [vmem:[#allocation3 + $0x28] sm:$0xff] }
 0x190   :  { %2744 = vmatmul.f32.vlgmr.msrb.gmra.mxu1 %v8049_v25  ;;  %2806 = vmatpush.msra.mxu0 %v1373_v16  ;;  %v1500_v16 = vld [vmem:[#allocation6 + $0x2b88] sm:$0xff] }
 0x191   :  { %2829 = vmatpush.msra.mxu1 %v1661_v20  ;;  %2852 = vmatpush.msra.mxu2 %v222_v21  ;;  %v1788_v20 = vld [vmem:[#allocation6 + $0x3488] sm:$0xff]  ;;  %v906_v21 = vld [vmem:[#allocation6 + $0x18f8] sm:$0xff] }
 0x192   :  { %2875 = vmatpush.msra.mxu3 %v510_v38  ;;  %2807 = vmatpush.msra.mxu0 %v1355_v22  ;;  %v1194_v38 = vld [vmem:[#allocation6 + $0x21f8] sm:$0xff] }
 0x193   :  { %2830 = vmatpush.msra.mxu1 %v1643_v26  ;;  %2853 = vmatpush.msra.mxu2 %v204_v28  ;;  %v1482_v22 = vld [vmem:[#allocation6 + $0x2af8] sm:$0xff]  ;;  %v8086_v28 = vpop.f32.mrf.mxu1 }
 0x194   :  { %2876 = vmatpush.msra.mxu3 %v492_v46  ;;  %2767 = vmatmul.f32.vlgmr.msrb.gmra.mxu2 %v8052_v32  ;;  %v1770_v26 = vld [vmem:[#allocation6 + $0x33f8] sm:$0xff]  ;;  %v888_v46 = vld [vmem:[#allocation6 + $0x1868] sm:$0xff] }
 0x195   :  { %2808 = vmatpush.msra.mxu0 %v1337_v29  ;;  %2831 = vmatpush.msra.mxu1 %v1625_v48  ;;  %v1176_v29 = vld [vmem:[#allocation6 + $0x2168] sm:$0xff] }
 0x196   :  { %2854 = vmatpush.msra.mxu2 %v186_v31  ;;  %2877 = vmatpush.msra.mxu3 %v474_v51  ;;  %v1464_v48 = vld [vmem:[#allocation6 + $0x2a68] sm:$0xff]  ;;  %v8088_v51 = vpop.f32.mrf.mxu2 }
 0x197   :  { %2724 = vmatmul.f32.gmra.mxu0 %v8057_v50  ;;  %2790 = vmatmul.f32.vlgmr.msrb.gmra.mxu3 %v8060_v37  ;;  %v1752_v31 = vld [vmem:[#allocation6 + $0x3368] sm:$0xff] }
 0x198   :  { %2809 = vmatpush.msra.mxu0 %v1319_v33  ;;  %2832 = vmatpush.msra.mxu1 %v1607_v34  ;;  %v870_v33 = vld [vmem:[#allocation6 + $0x17d8] sm:$0xff] }
 0x199   :  { %2855 = vmatpush.msra.mxu2 %v168_v61  ;;  %2878 = vmatpush.msra.mxu3 %v456_v36  ;;  %v1158_v34 = vld [vmem:[#allocation6 + $0x20d8] sm:$0xff] }
 0x19a   :  { %2747 = vmatmul.f32.gmra.mxu1 %v8065_v42  ;;  %2810 = vmatpush.msra.mxu0 %v1301_v49  ;;  %v1446_v61 = vld [vmem:[#allocation6 + $0x29d8] sm:$0xff]  ;;  %v852_v49 = vld [vmem:[#allocation6 + $0x1748] sm:$0xff] }
 0x19b   :  { %2833 = vmatpush.msra.mxu1 %v1589_v18  ;;  %2856 = vmatpush.msra.mxu2 %v150_v8  ;;  %v1734_v36 = vld [vmem:[#allocation6 + $0x32d8] sm:$0xff]  ;;  %v1140_v18 = vld [vmem:[#allocation6 + $0x2048] sm:$0xff] }
 0x19c   :  { %2879 = vmatpush.msra.mxu3 %v438_v39  ;;  %2811 = vmatpush.msra.mxu0 %v1283_v40  ;;  %v1428_v8 = vld [vmem:[#allocation6 + $0x2948] sm:$0xff]  ;;  %v8092_v39 = vpop.f32.mrf.mxu3  ;;  %v8094_v40 = vpop.f32.mrf.mxu0 }
 0x19d   :  { %2834 = vmatpush.msra.mxu1 %v1571_v43  ;;  %2857 = vmatpush.msra.mxu2 %v132_v14  ;;  %v834_v43 = vld [vmem:[#allocation6 + $0x16b8] sm:$0xff] }
 0x19e   :  { %2880 = vmatpush.msra.mxu3 %v420_v45  ;;  %2770 = vmatmul.f32.gmra.mxu2 %v8010_v52  ;;  %v1230_v52 = vld [vmem:[#allocation6 + $0x2318] sm:$0xff] }
 0x19f   :  { %2812 = vmatpush.msra.mxu0 %v1265_v47  ;;  %2835 = vmatpush.msra.mxu1 %v1553_v63  ;;  %v1122_v14 = vld [vmem:[#allocation6 + $0x1fb8] sm:$0xff]  ;;  %v1104_v63 = vld [vmem:[#allocation6 + $0x1f28] sm:$0xff] }
 0x1a0   :  { %2858 = vmatpush.msra.mxu2 %v114_v12  ;;  %2881 = vmatpush.msra.mxu3 %v402_v0  ;;  %v1410_v45 = vld [vmem:[#allocation6 + $0x28b8] sm:$0xff]  ;;  %v8096_v12 = vpop.f32.mrf.mxu1  ;;  %v8098_v0 = vpop.f32.mrf.mxu2 }
 0x1a1   :  { %2793 = vmatmul.f32.gmra.mxu3 %v8013_v60  ;;  %2813 = vmatmul.f32.vlgmr.msra.gmra.mxu0 %v8076_v1  ;;  %v1212_v60 = vld [vmem:[#allocation6 + $0x2288] sm:$0xff]  ;;  %v1698_v47 = vld [vmem:[#allocation6 + $0x31b8] sm:$0xff] }
 0x1a2   :  { %2889 = vmatpush.msrb.mxu0 %v960_v53  ;;  %2912 = vmatpush.msrb.mxu1 %v1248_v5  ;;  %v1392_v53 = vld [vmem:[#allocation6 + $0x2828] sm:$0xff] }
 0x1a3   :  { %2935 = vmatpush.msrb.mxu2 %v1536_v59  ;;  %2958 = vmatpush.msrb.mxu3 %v1824_v62  ;;  %v1680_v5 = vld [vmem:[#allocation6 + $0x3128] sm:$0xff]  ;;  %v798_v59 = vld [vmem:[#allocation6 + $0x1598] sm:$0xff] }
 0x1a4   :  { %2836 = vmatmul.f32.vlgmr.msra.gmra.mxu1 %v8083_v11  ;;  %2890 = vmatpush.msrb.mxu0 %v942_v3  ;;  %v1086_v62 = vld [vmem:[#allocation6 + $0x1e98] sm:$0xff] }
 0x1a5   :  { %2913 = vmatpush.msrb.mxu1 %v1230_v52  ;;  %2936 = vmatpush.msrb.mxu2 %v1518_v4  ;;  %v1374_v3 = vld [vmem:[#allocation6 + $0x2798] sm:$0xff]  ;;  %v780_v4 = vld [vmem:[#allocation6 + $0x1508] sm:$0xff] }
 0x1a6   :  { %2959 = vmatpush.msrb.mxu3 %v1806_v6  ;;  %2891 = vmatpush.msrb.mxu0 %v924_v7  ;;  %v1662_v52 = vld [vmem:[#allocation6 + $0x3098] sm:$0xff]  ;;  %v8101_v6 = vpop.f32.mrf.mxu3  ;;  %v1068_v7 = vld [vmem:[#allocation6 + $0x1e08] sm:$0xff] }
 0x1a7   :  { %2914 = vmatpush.msrb.mxu1 %v1212_v60  ;;  %2937 = vmatpush.msrb.mxu2 %v1500_v16  ;;  %v1356_v60 = vld [vmem:[#allocation6 + $0x2708] sm:$0xff] }
 0x1a8   :  { %2960 = vmatpush.msrb.mxu3 %v1788_v20  ;;  %2892 = vmatpush.msrb.mxu0 %v906_v21  ;;  %v1644_v16 = vld [vmem:[#allocation6 + $0x3008] sm:$0xff]  ;;  %v762_v20 = vld [vmem:[#allocation6 + $0x1478] sm:$0xff]  ;;  %v8104_v21 = vpop.f32.mrf.mxu0 }
 0x1a9   :  { %2915 = vmatpush.msrb.mxu1 %v1194_v38  ;;  %2938 = vmatpush.msrb.mxu2 %v1482_v22  ;;  %v1050_v38 = vld [vmem:[#allocation6 + $0x1d78] sm:$0xff] }
 0x1aa   :  { %2961 = vmatpush.msrb.mxu3 %v1770_v26  ;;  %2816 = vmatmul.f32.gmra.mxu0 %v8016_v10  ;;  %v1716_v10 = vld [vmem:[#allocation6 + $0x3248] sm:$0xff]  ;;  %v1338_v22 = vld [vmem:[#allocation6 + $0x2678] sm:$0xff] }
 0x1ab   :  { %2893 = vmatpush.msrb.mxu0 %v888_v46  ;;  %2916 = vmatpush.msrb.mxu1 %v1176_v29  ;;  %v1626_v26 = vld [vmem:[#allocation6 + $0x2f78] sm:$0xff]  ;;  %v744_v46 = vld [vmem:[#allocation6 + $0x13e8] sm:$0xff] }
 0x1ac   :  { %2939 = vmatpush.msrb.mxu2 %v1464_v48  ;;  %2962 = vmatpush.msrb.mxu3 %v1752_v31  ;;  %v1032_v29 = vld [vmem:[#allocation6 + $0x1ce8] sm:$0xff] }
 0x1ad   :  { %2839 = vmatmul.f32.gmra.mxu1 %v8019_v19  ;;  %2894 = vmatpush.msrb.mxu0 %v870_v33  ;;  %v816_v19 = vld [vmem:[#allocation6 + $0x1628] sm:$0xff]  ;;  %v8106_v33 = vpop.f32.mrf.mxu1 }
 0x1ae   :  { %2917 = vmatpush.msrb.mxu1 %v1158_v34  ;;  %2940 = vmatpush.msrb.mxu2 %v1446_v61  ;;  %v1320_v48 = vld [vmem:[#allocation6 + $0x25e8] sm:$0xff]  ;;  %v8108_v34 = vpop.f32.mrf.mxu2  ;;  %v726_v61 = vld [vmem:[#allocation6 + $0x1358] sm:$0xff] }
 0x1af   :  { %2963 = vmatpush.msrb.mxu3 %v1734_v36  ;;  %2895 = vmatpush.msrb.mxu0 %v852_v49  ;;  %v1608_v31 = vld [vmem:[#allocation6 + $0x2ee8] sm:$0xff]  ;;  %v1014_v36 = vld [vmem:[#allocation6 + $0x1c58] sm:$0xff] }
 0x1b0   :  { %2918 = vmatpush.msrb.mxu1 %v1140_v18  ;;  %2941 = vmatpush.msrb.mxu2 %v1428_v8  ;;  %v1302_v49 = vld [vmem:[#allocation6 + $0x2558] sm:$0xff]  ;;  %v708_v8 = vld [vmem:[#allocation6 + $0x12c8] sm:$0xff] }
 0x1b1   :  { %2964 = vmatpush.msrb.mxu3 %v1716_v10  ;;  %2896 = vmatpush.msrb.mxu0 %v834_v43  ;;  %v1590_v18 = vld [vmem:[#allocation6 + $0x2e58] sm:$0xff]  ;;  %v996_v10 = vld [vmem:[#allocation6 + $0x1bc8] sm:$0xff] }
 0x1b2   :  { %2919 = vmatpush.msrb.mxu1 %v1122_v14  ;;  %2942 = vmatpush.msrb.mxu2 %v1410_v45  ;;  %v1284_v43 = vld [vmem:[#allocation6 + $0x24c8] sm:$0xff]  ;;  %v8112_v14 = vpop.f32.mrf.mxu3 }
 0x1b3   :  { %2965 = vmatpush.msrb.mxu3 %v1698_v47  ;;  %2859 = vmatmul.f32.vlgmr.msra.gmra.mxu2 %v8046_v13  ;;  %v1572_v45 = vld [vmem:[#allocation6 + $0x2dc8] sm:$0xff]  ;;  %v690_v47 = vld [vmem:[#allocation6 + $0x1238] sm:$0xff] }
 0x1b4   :  { %2897 = vmatpush.msrb.mxu0 %v816_v19  ;;  %2920 = vmatpush.msrb.mxu1 %v1104_v63  ;;  %v978_v19 = vld [vmem:[#allocation6 + $0x1b38] sm:$0xff] }
 0x1b5   :  { %2943 = vmatpush.msrb.mxu2 %v1392_v53  ;;  %2966 = vmatpush.msrb.mxu3 %v1680_v5  ;;  %v1266_v63 = vld [vmem:[#allocation6 + $0x2438] sm:$0xff]  ;;  %v8114_v53 = vpop.f32.mrf.mxu0 }
 0x1b6   :  { %2882 = vmatmul.f32.vlgmr.msra.gmra.mxu3 %v8049_v25  ;;  %2898 = vmatpush.msrb.mxu0 %v798_v59  ;;  %v1554_v5 = vld [vmem:[#allocation6 + $0x2d38] sm:$0xff]  ;;  %v385_v59 = vld [vmem:[#allocation6 + $0x8b0] sm:$0xff] }
 0x1b7   :  { %2921 = vmatpush.msrb.mxu1 %v1086_v62  ;;  %2944 = vmatpush.msrb.mxu2 %v1374_v3  ;;  %v673_v62 = vld [vmem:[#allocation6 + $0x11b0] sm:$0xff]  ;;  %v8116_v3 = vpop.f32.mrf.mxu2 }
 0x1b8   :  { %2967 = vmatpush.msrb.mxu3 %v1662_v52  ;;  %2899 = vmatpush.msrb.mxu0 %v780_v4  ;;  %v961_v52 = vld [vmem:[#allocation6 + $0x1ab0] sm:$0xff] }
 0x1b9   :  { %2922 = vmatpush.msrb.mxu1 %v1068_v7  ;;  %2945 = vmatpush.msrb.mxu2 %v1356_v60  ;;  %v1249_v4 = vld [vmem:[#allocation6 + $0x23b0] sm:$0xff]  ;;  %v8119_v7 = vpop.f32.mrf.mxu1  ;;  %v367_v60 = vld [vmem:[#allocation6 + $0x820] sm:$0xff] }
 0x1ba   :  { %2968 = vmatpush.msrb.mxu3 %v1644_v16  ;;  %2900 = vmatpush.msrb.mxu0 %v762_v20  ;;  %v655_v16 = vld [vmem:[#allocation6 + $0x1120] sm:$0xff] }
 0x1bb   :  { %2923 = vmatpush.msrb.mxu1 %v1050_v38  ;;  %2946 = vmatpush.msrb.mxu2 %v1338_v22  ;;  %v943_v20 = vld [vmem:[#allocation6 + $0x1a20] sm:$0xff]  ;;  %v8121_v22 = vpop.f32.mrf.mxu3 }
 0x1bc   :  { %2969 = vmatpush.msrb.mxu3 %v1626_v26  ;;  %2862 = vmatmul.f32.gmra.mxu2 %v8057_v50  ;;  %v1231_v38 = vld [vmem:[#allocation6 + $0x2320] sm:$0xff]  ;;  %v349_v26 = vld [vmem:[#allocation6 + $0x790] sm:$0xff] }
 0x1bd   :  { %2901 = vmatpush.msrb.mxu0 %v744_v46  ;;  %2924 = vmatpush.msrb.mxu1 %v1032_v29  ;;  %v637_v46 = vld [vmem:[#allocation6 + $0x1090] sm:$0xff] }
 0x1be   :  { %2947 = vmatpush.msrb.mxu2 %v1320_v48  ;;  %2970 = vmatpush.msrb.mxu3 %v1608_v31  ;;  %v925_v29 = vld [vmem:[#allocation6 + $0x1990] sm:$0xff]  ;;  %v8125_v48 = vpop.f32.mrf.mxu0 }
 0x1bf   :  { %2885 = vmatmul.f32.gmra.mxu3 %v8065_v42  ;;  %2902 = vmatpush.msrb.mxu0 %v726_v61  ;;  %v1213_v31 = vld [vmem:[#allocation6 + $0x2290] sm:$0xff]  ;;  %v331_v61 = vld [vmem:[#allocation6 + $0x700] sm:$0xff] }
 0x1c0   :  { %2925 = vmatpush.msrb.mxu1 %v1014_v36  ;;  %2948 = vmatpush.msrb.mxu2 %v1302_v49  ;;  %v619_v36 = vld [vmem:[#allocation6 + $0x1000] sm:$0xff] }
 0x1c1   :  { %2971 = vmatpush.msrb.mxu3 %v1590_v18  ;;  %2903 = vmatpush.msrb.mxu0 %v708_v8  ;;  %v907_v49 = vld [vmem:[#allocation6 + $0x1900] sm:$0xff]  ;;  %v8128_v18 = vpop.f32.mrf.mxu2 }
 0x1c2   :  { %2926 = vmatpush.msrb.mxu1 %v996_v10  ;;  %2949 = vmatpush.msrb.mxu2 %v1284_v43  ;;  %v1195_v8 = vld [vmem:[#allocation6 + $0x2200] sm:$0xff]  ;;  %v313_v10 = vld [vmem:[#allocation6 + $0x670] sm:$0xff] }
 0x1c3   :  { %2972 = vmatpush.msrb.mxu3 %v1572_v45  ;;  %2904 = vmatpush.msrb.mxu0 %v690_v47  ;;  %v601_v43 = vld [vmem:[#allocation6 + $0xf70] sm:$0xff]  ;;  %v8130_v45 = vpop.f32.mrf.mxu1 }
 0x1c4   :  { %2927 = vmatpush.msrb.mxu1 %v978_v19  ;;  %2950 = vmatpush.msrb.mxu2 %v1266_v63  ;;  %9367 = vst [vmem:[#allocation18_spill] sm:$0xff] %v8130_v45  ;;  %v889_v47 = vld [vmem:[#allocation6 + $0x1870] sm:$0xff]  ;;  %v8248_v45 = vld [vmem:[#allocation3 + $0x20] sm:$0xff] }
 0x1c5   :  { %2973 = vmatpush.msrb.mxu3 %v1554_v5  ;;  %2951 = vmatmul.f32.vlgmr.msrb.gmra.mxu2 %v8076_v1  ;;  %v1177_v19 = vld [vmem:[#allocation6 + $0x2170] sm:$0xff]  ;;  %v8135_v5 = vpop.f32.mrf.mxu3 }
 0x1c6   :  { %2981 = vmatpush.msra.mxu0 %v385_v59  ;;  %3004 = vmatpush.msra.mxu1 %v673_v62  ;;  %v8132_v63 = vld [vmem:[#allocation3 + $0x50] sm:$0xff]  ;;  %v295_v59 = vld [vmem:[#allocation6 + $0x5e0] sm:$0xff] }
 0x1c7   :  { %3027 = vmatpush.msra.mxu2 %v961_v52  ;;  %3050 = vmatpush.msra.mxu3 %v1249_v4  ;;  %v583_v62 = vld [vmem:[#allocation6 + $0xee0] sm:$0xff] }
 0x1c8   :  { %2905 = vmatmul.f32.vlgmr.msrb.gmra.mxu0 %v8052_v32  ;;  %2974 = vmatmul.f32.vlgmr.msrb.gmra.mxu3 %v8083_v11  ;;  %v871_v52 = vld [vmem:[#allocation6 + $0x17e0] sm:$0xff] }
 0x1c9   :  { %2982 = vmatpush.msra.mxu0 %v367_v60  ;;  %3005 = vmatpush.msra.mxu1 %v655_v16  ;;  %v1159_v4 = vld [vmem:[#allocation6 + $0x20e0] sm:$0xff]  ;;  %v8137_v60 = vpop.f32.mrf.mxu0 }
 0x1ca   :  { %3028 = vmatpush.msra.mxu2 %v943_v20  ;;  %3051 = vmatpush.msra.mxu3 %v1231_v38  ;;  %v8139_v16 = vld [vmem:[#allocation3 + $0x40] sm:$0xff]  ;;  %v8142_v20 = vld [vmem:[#allocation3 + $0x58] sm:$0xff]  ;;  %v277_v38 = vld [vmem:[#allocation6 + $0x550] sm:$0xff] }
 0x1cb   :  { %2928 = vmatmul.f32.vlgmr.msrb.gmra.mxu1 %v8060_v37  ;;  %2983 = vmatpush.msra.mxu0 %v349_v26  ;;  %v565_v26 = vld [vmem:[#allocation6 + $0xe50] sm:$0xff] }
 0x1cc   :  { %3006 = vmatpush.msra.mxu1 %v637_v46  ;;  %3029 = vmatpush.msra.mxu2 %v925_v29  ;;  %v853_v46 = vld [vmem:[#allocation6 + $0x1750] sm:$0xff] }
 0x1cd   :  { %3052 = vmatpush.msra.mxu3 %v1213_v31  ;;  %2984 = vmatpush.msra.mxu0 %v331_v61  ;;  %v1141_v29 = vld [vmem:[#allocation6 + $0x2050] sm:$0xff]  ;;  %v259_v31 = vld [vmem:[#allocation6 + $0x4c0] sm:$0xff]  ;;  %v8145_v61 = vld [vmem:[#allocation3 + $0x48] sm:$0xff]  ;;  %v8152_v27 = vpop.f32.mrf.mxu3 }
 0x1ce   :  { %3007 = vmatpush.msra.mxu1 %v619_v36  ;;  %3030 = vmatpush.msra.mxu2 %v907_v49  ;;  %v547_v36 = vld [vmem:[#allocation6 + $0xdc0] sm:$0xff]  ;;  %9370 = vst [vmem:[#allocation21_spill] sm:$0xff] %v8152_v27 }
 0x1cf   :  { %3053 = vmatpush.msra.mxu3 %v1195_v8  ;;  %2954 = vmatmul.f32.gmra.mxu2 %v8132_v63  ;;  %v835_v49 = vld [vmem:[#allocation6 + $0x16c0] sm:$0xff]  ;;  %v8148_v8 = vpop.f32.mrf.mxu2 }
 0x1d0   :  { %2985 = vmatpush.msra.mxu0 %v313_v10  ;;  %3008 = vmatpush.msra.mxu1 %v601_v43  ;;  %9368 = vst [vmem:[#allocation19_spill] sm:$0xff] %v8148_v8  ;;  %v8150_v10 = vpop.f32.mrf.mxu1  ;;  %v1123_v43 = vld [vmem:[#allocation6 + $0x1fc0] sm:$0xff] }
 0x1d1   :  { %3031 = vmatpush.msra.mxu2 %v889_v47  ;;  %3054 = vmatpush.msra.mxu3 %v1177_v19  ;;  %9369 = vst [vmem:[#allocation20_spill] sm:$0xff] %v8150_v10  ;;  %v241_v47 = vld [vmem:[#allocation6 + $0x430] sm:$0xff]  ;;  %v8154_v30 = vpop.f32.mrf.mxu0 }
 0x1d2   :  { %2908 = vmatmul.f32.gmra.mxu0 %v8139_v16  ;;  %2977 = vmatmul.f32.gmra.mxu3 %v8142_v20  ;;  %v529_v19 = vld [vmem:[#allocation6 + $0xd30] sm:$0xff]  ;;  %9371 = vst [vmem:[#allocation22_spill] sm:$0xff] %v8154_v30 }
 0x1d3   :  { %2986 = vmatpush.msra.mxu0 %v295_v59  ;;  %3009 = vmatpush.msra.mxu1 %v583_v62  ;;  %v817_v59 = vld [vmem:[#allocation6 + $0x1630] sm:$0xff] }
 0x1d4   :  { %3032 = vmatpush.msra.mxu2 %v871_v52  ;;  %3055 = vmatpush.msra.mxu3 %v1159_v4  ;;  %v1105_v62 = vld [vmem:[#allocation6 + $0x1f30] sm:$0xff]  ;;  %v223_v52 = vld [vmem:[#allocation6 + $0x3a0] sm:$0xff] }
 0x1d5   :  { %2931 = vmatmul.f32.gmra.mxu1 %v8145_v61  ;;  %2987 = vmatpush.msra.mxu0 %v277_v38  ;;  %v511_v4 = vld [vmem:[#allocation6 + $0xca0] sm:$0xff] }
 0x1d6   :  { %3010 = vmatpush.msra.mxu1 %v565_v26  ;;  %3033 = vmatpush.msra.mxu2 %v853_v46  ;;  %v799_v38 = vld [vmem:[#allocation6 + $0x15a0] sm:$0xff]  ;;  %v205_v46 = vld [vmem:[#allocation6 + $0x310] sm:$0xff] }
 0x1d7   :  { %3056 = vmatpush.msra.mxu3 %v1141_v29  ;;  %2988 = vmatpush.msra.mxu0 %v259_v31  ;;  %v1087_v26 = vld [vmem:[#allocation6 + $0x1ea0] sm:$0xff]  ;;  %v493_v29 = vld [vmem:[#allocation6 + $0xc10] sm:$0xff]  ;;  %v8158_v30 = vpop.f32.mrf.mxu2 }
 0x1d8   :  { %3011 = vmatpush.msra.mxu1 %v547_v36  ;;  %3034 = vmatpush.msra.mxu2 %v835_v49  ;;  %v781_v31 = vld [vmem:[#allocation6 + $0x1510] sm:$0xff]  ;;  %v187_v49 = vld [vmem:[#allocation6 + $0x280] sm:$0xff]  ;;  %v8156_v8 = vpop.f32.mrf.mxu1  ;;  %9373 = vst [vmem:[#allocation24_spill] sm:$0xff] %v8158_v30 }
 0x1d9   :  { %3057 = vmatpush.msra.mxu3 %v1123_v43  ;;  %2989 = vmatpush.msra.mxu0 %v241_v47  ;;  %v1069_v36 = vld [vmem:[#allocation6 + $0x1e10] sm:$0xff]  ;;  %v475_v43 = vld [vmem:[#allocation6 + $0xb80] sm:$0xff]  ;;  %9372 = vst [vmem:[#allocation23_spill] sm:$0xff] %v8156_v8  ;;  %v8160_v8 = vpop.f32.mrf.mxu3  ;;  %v8162_v27 = vpop.f32.mrf.mxu0 }
 0x1da   :  { %3012 = vmatpush.msra.mxu1 %v529_v19  ;;  %3035 = vmatpush.msra.mxu2 %v817_v59  ;;  %v763_v47 = vld [vmem:[#allocation6 + $0x1480] sm:$0xff]  ;;  %v169_v59 = vld [vmem:[#allocation6 + $0x1f0] sm:$0xff]  ;;  %9374 = vst [vmem:[#allocation25_spill] sm:$0xff] %v8160_v8 }
 0x1db   :  { %3058 = vmatpush.msra.mxu3 %v1105_v62  ;;  %2990 = vmatpush.msra.mxu0 %v223_v52  ;;  %v1051_v19 = vld [vmem:[#allocation6 + $0x1d80] sm:$0xff]  ;;  %v457_v62 = vld [vmem:[#allocation6 + $0xaf0] sm:$0xff]  ;;  %9375 = vst [vmem:[#allocation26_spill] sm:$0xff] %v8162_v27 }
 0x1dc   :  { %3013 = vmatpush.msra.mxu1 %v511_v4  ;;  %3036 = vmatpush.msra.mxu2 %v799_v38  ;;  %v745_v52 = vld [vmem:[#allocation6 + $0x13f0] sm:$0xff]  ;;  %v151_v38 = vld [vmem:[#allocation6 + $0x160] sm:$0xff] }
 0x1dd   :  { %3059 = vmatpush.msra.mxu3 %v1087_v26  ;;  %2991 = vmatpush.msra.mxu0 %v205_v46  ;;  %v1033_v4 = vld [vmem:[#allocation6 + $0x1cf0] sm:$0xff]  ;;  %v439_v26 = vld [vmem:[#allocation6 + $0xa60] sm:$0xff] }
 0x1de   :  { %3014 = vmatpush.msra.mxu1 %v493_v29  ;;  %3037 = vmatpush.msra.mxu2 %v781_v31  ;;  %v727_v46 = vld [vmem:[#allocation6 + $0x1360] sm:$0xff]  ;;  %v133_v31 = vld [vmem:[#allocation6 + $0xd0] sm:$0xff] }
 0x1df   :  { %3060 = vmatpush.msra.mxu3 %v1069_v36  ;;  %2992 = vmatpush.msra.mxu0 %v187_v49  ;;  %v1015_v29 = vld [vmem:[#allocation6 + $0x1c60] sm:$0xff]  ;;  %v421_v36 = vld [vmem:[#allocation6 + $0x9d0] sm:$0xff]  ;;  %v8166_v8 = vpop.f32.mrf.mxu2 }
 0x1e0   :  { %3015 = vmatpush.msra.mxu1 %v475_v43  ;;  %3038 = vmatpush.msra.mxu2 %v763_v47  ;;  %v709_v49 = vld [vmem:[#allocation6 + $0x12d0] sm:$0xff]  ;;  %v115_v47 = vld [vmem:[#allocation6 + $0x40] sm:$0xff]  ;;  %v8164_v30 = vpop.f32.mrf.mxu1  ;;  %9377 = vst [vmem:[#allocation28_spill] sm:$0xff] %v8166_v8 }
 0x1e1   :  { %3061 = vmatpush.msra.mxu3 %v1051_v19  ;;  %2993 = vmatpush.msra.mxu0 %v169_v59  ;;  %v997_v43 = vld [vmem:[#allocation6 + $0x1bd0] sm:$0xff]  ;;  %v403_v19 = vld [vmem:[#allocation6 + $0x940] sm:$0xff]  ;;  %9376 = vst [vmem:[#allocation27_spill] sm:$0xff] %v8164_v30  ;;  %v8168_v27 = vpop.f32.mrf.mxu3  ;;  %v8170_v8 = vpop.f32.mrf.mxu0 }
 0x1e2   :  { %3016 = vmatpush.msra.mxu1 %v457_v62  ;;  %3039 = vmatpush.msra.mxu2 %v745_v52  ;;  %v691_v59 = vld [vmem:[#allocation6 + $0x1240] sm:$0xff]  ;;  %v1537_v52 = vld [vmem:[#allocation6 + $0x2cb0] sm:$0xff]  ;;  %9378 = vst [vmem:[#allocation29_spill] sm:$0xff] %v8168_v27 }
 0x1e3   :  { %3062 = vmatpush.msra.mxu3 %v1033_v4  ;;  %2994 = vmatpush.msra.mxu0 %v151_v38  ;;  %v979_v62 = vld [vmem:[#allocation6 + $0x1b40] sm:$0xff]  ;;  %v1825_v4 = vld [vmem:[#allocation6 + $0x35b0] sm:$0xff]  ;;  %v386_v38 = vld [vmem:[#allocation6 + $0x8b8] sm:$0xff]  ;;  %9379 = vst [vmem:[#allocation30_spill] sm:$0xff] %v8170_v8 }
 0x1e4   :  { %3017 = vmatpush.msra.mxu1 %v439_v26  ;;  %3040 = vmatpush.msra.mxu2 %v727_v46  ;;  %v674_v26 = vld [vmem:[#allocation6 + $0x11b8] sm:$0xff]  ;;  %v1519_v46 = vld [vmem:[#allocation6 + $0x2c20] sm:$0xff] }
 0x1e5   :  { %3063 = vmatpush.msra.mxu3 %v1015_v29  ;;  %2995 = vmatpush.msra.mxu0 %v133_v31  ;;  %v1807_v29 = vld [vmem:[#allocation6 + $0x3520] sm:$0xff]  ;;  %v368_v31 = vld [vmem:[#allocation6 + $0x828] sm:$0xff] }
 0x1e6   :  { %3018 = vmatpush.msra.mxu1 %v421_v36  ;;  %3041 = vmatpush.msra.mxu2 %v709_v49  ;;  %v656_v36 = vld [vmem:[#allocation6 + $0x1128] sm:$0xff]  ;;  %v1501_v49 = vld [vmem:[#allocation6 + $0x2b90] sm:$0xff] }
 0x1e7   :  { %3064 = vmatpush.msra.mxu3 %v997_v43  ;;  %2996 = vmatpush.msra.mxu0 %v115_v47  ;;  %v1789_v43 = vld [vmem:[#allocation6 + $0x3490] sm:$0xff]  ;;  %v350_v47 = vld [vmem:[#allocation6 + $0x798] sm:$0xff]  ;;  %v8174_v30 = vpop.f32.mrf.mxu2 }
 0x1e8   :  { %3019 = vmatpush.msra.mxu1 %v403_v19  ;;  %3042 = vmatpush.msra.mxu2 %v691_v59  ;;  %v638_v19 = vld [vmem:[#allocation6 + $0x1098] sm:$0xff]  ;;  %v1483_v59 = vld [vmem:[#allocation6 + $0x2b00] sm:$0xff]  ;;  %v8172_v27 = vpop.f32.mrf.mxu1  ;;  %9381 = vst [vmem:[#allocation32_spill] sm:$0xff] %v8174_v30  ;;  %v1556_v30 = vld [vmem:[#allocation6 + $0x2d48] sm:$0xff] }
 0x1e9   :  { %3065 = vmatpush.msra.mxu3 %v979_v62  ;;  %3073 = vmatpush.msrb.mxu0 %v1537_v52  ;;  %v1771_v62 = vld [vmem:[#allocation6 + $0x3400] sm:$0xff]  ;;  %v332_v52 = vld [vmem:[#allocation6 + $0x708] sm:$0xff]  ;;  %9380 = vst [vmem:[#allocation31_spill] sm:$0xff] %v8172_v27  ;;  %v8176_v8 = vpop.f32.mrf.mxu3 }
 0x1ea   :  { %3096 = vmatpush.msrb.mxu1 %v1825_v4  ;;  %3119 = vmatpush.msrb.mxu2 %v386_v38  ;;  %v620_v4 = vld [vmem:[#allocation6 + $0x1008] sm:$0xff]  ;;  %v1465_v38 = vld [vmem:[#allocation6 + $0x2a70] sm:$0xff]  ;;  %9382 = vst [vmem:[#allocation33_spill] sm:$0xff] %v8176_v8 }
 0x1eb   :  { %3142 = vmatpush.msrb.mxu3 %v674_v26  ;;  %3074 = vmatpush.msrb.mxu0 %v1519_v46  ;;  %v1753_v26 = vld [vmem:[#allocation6 + $0x3370] sm:$0xff]  ;;  %v314_v46 = vld [vmem:[#allocation6 + $0x678] sm:$0xff] }
 0x1ec   :  { %3097 = vmatpush.msrb.mxu1 %v1807_v29  ;;  %3120 = vmatpush.msrb.mxu2 %v368_v31  ;;  %v602_v29 = vld [vmem:[#allocation6 + $0xf78] sm:$0xff]  ;;  %v1447_v31 = vld [vmem:[#allocation6 + $0x29e0] sm:$0xff] }
 0x1ed   :  { %3143 = vmatpush.msrb.mxu3 %v656_v36  ;;  %3075 = vmatpush.msrb.mxu0 %v1501_v49  ;;  %v1735_v36 = vld [vmem:[#allocation6 + $0x32e0] sm:$0xff]  ;;  %v296_v49 = vld [vmem:[#allocation6 + $0x5e8] sm:$0xff] }
 0x1ee   :  { %3098 = vmatpush.msrb.mxu1 %v1789_v43  ;;  %3121 = vmatpush.msrb.mxu2 %v350_v47  ;;  %v584_v43 = vld [vmem:[#allocation6 + $0xee8] sm:$0xff]  ;;  %v1429_v47 = vld [vmem:[#allocation6 + $0x2950] sm:$0xff] }
 0x1ef   :  { %3144 = vmatpush.msrb.mxu3 %v638_v19  ;;  %3076 = vmatpush.msrb.mxu0 %v1483_v59  ;;  %v1717_v19 = vld [vmem:[#allocation6 + $0x3250] sm:$0xff]  ;;  %v278_v59 = vld [vmem:[#allocation6 + $0x558] sm:$0xff] }
 0x1f0   :  { %3099 = vmatpush.msrb.mxu1 %v1771_v62  ;;  %3122 = vmatpush.msrb.mxu2 %v332_v52  ;;  %v566_v62 = vld [vmem:[#allocation6 + $0xe58] sm:$0xff]  ;;  %v1411_v52 = vld [vmem:[#allocation6 + $0x28c0] sm:$0xff]  ;;  %v8183_v27 = vpop.f32.mrf.mxu1 }
 0x1f1   :  { %3145 = vmatpush.msrb.mxu3 %v620_v4  ;;  %3077 = vmatpush.msrb.mxu0 %v1465_v38  ;;  %v1699_v4 = vld [vmem:[#allocation6 + $0x31c0] sm:$0xff]  ;;  %v260_v38 = vld [vmem:[#allocation6 + $0x4c8] sm:$0xff]  ;;  %9385 = vst [vmem:[#allocation36_spill] sm:$0xff] %v8183_v27  ;;  %v1034_v27 = vld [vmem:[#allocation6 + $0x1cf8] sm:$0xff] }
 0x1f2   :  { %3100 = vmatpush.msrb.mxu1 %v1753_v26  ;;  %3123 = vmatpush.msrb.mxu2 %v314_v46  ;;  %v548_v26 = vld [vmem:[#allocation6 + $0xdc8] sm:$0xff]  ;;  %v1393_v46 = vld [vmem:[#allocation6 + $0x2830] sm:$0xff] }
 0x1f3   :  { %3146 = vmatpush.msrb.mxu3 %v602_v29  ;;  %3078 = vmatpush.msrb.mxu0 %v1447_v31  ;;  %v1681_v29 = vld [vmem:[#allocation6 + $0x3130] sm:$0xff]  ;;  %v8178_v31 = vpop.f32.mrf.mxu0 }
 0x1f4   :  { %3101 = vmatpush.msrb.mxu1 %v1735_v36  ;;  %3124 = vmatpush.msrb.mxu2 %v296_v49  ;;  %9383 = vst [vmem:[#allocation34_spill] sm:$0xff] %v8178_v31  ;;  %v242_v36 = vld [vmem:[#allocation6 + $0x438] sm:$0xff] }
 0x1f5   :  { %3147 = vmatpush.msrb.mxu3 %v584_v43  ;;  %3079 = vmatpush.msrb.mxu0 %v1429_v47  ;;  %v530_v49 = vld [vmem:[#allocation6 + $0xd38] sm:$0xff]  ;;  %v1375_v43 = vld [vmem:[#allocation6 + $0x27a0] sm:$0xff]  ;;  %v8181_v47 = vpop.f32.mrf.mxu2 }
 0x1f6   :  { %3102 = vmatpush.msrb.mxu1 %v1717_v19  ;;  %3125 = vmatpush.msrb.mxu2 %v278_v59  ;;  %9384 = vst [vmem:[#allocation35_spill] sm:$0xff] %v8181_v47  ;;  %v1663_v19 = vld [vmem:[#allocation6 + $0x30a0] sm:$0xff]  ;;  %v224_v59 = vld [vmem:[#allocation6 + $0x3a8] sm:$0xff] }
 0x1f7   :  { %3148 = vmatpush.msrb.mxu3 %v566_v62  ;;  %3080 = vmatpush.msrb.mxu0 %v1411_v52  ;;  %v512_v62 = vld [vmem:[#allocation6 + $0xca8] sm:$0xff]  ;;  %v1357_v52 = vld [vmem:[#allocation6 + $0x2710] sm:$0xff] }
 0x1f8   :  { %3103 = vmatpush.msrb.mxu1 %v1699_v4  ;;  %3126 = vmatpush.msrb.mxu2 %v260_v38  ;;  %v1645_v4 = vld [vmem:[#allocation6 + $0x3010] sm:$0xff]  ;;  %v206_v38 = vld [vmem:[#allocation6 + $0x318] sm:$0xff] }
 0x1f9   :  { %3149 = vmatpush.msrb.mxu3 %v548_v26  ;;  %2997 = vmatmul.f32.vlgmr.msra.gmra.mxu0 %v8046_v13  ;;  %v494_v13 = vld [vmem:[#allocation6 + $0xc18] sm:$0xff]  ;;  %v8186_v26 = vpop.f32.mrf.mxu3 }
 0x1fa   :  { %3081 = vmatpush.msrb.mxu0 %v1393_v46  ;;  %3104 = vmatpush.msrb.mxu1 %v1681_v29  ;;  %9386 = vst [vmem:[#allocation37_spill] sm:$0xff] %v8186_v26  ;;  %v1339_v46 = vld [vmem:[#allocation6 + $0x2680] sm:$0xff]  ;;  %v1628_v26 = vld [vmem:[#allocation6 + $0x2f88] sm:$0xff] }
 0x1fb   :  { %3127 = vmatpush.msrb.mxu2 %v242_v36  ;;  %3150 = vmatpush.msrb.mxu3 %v530_v49  ;;  %v1627_v29 = vld [vmem:[#allocation6 + $0x2f80] sm:$0xff]  ;;  %v188_v36 = vld [vmem:[#allocation6 + $0x288] sm:$0xff]  ;;  %v8188_v47 = vpop.f32.mrf.mxu0 }
 0x1fc   :  { %3020 = vmatmul.f32.vlgmr.msra.gmra.mxu1 %v8049_v25  ;;  %3082 = vmatpush.msrb.mxu0 %v1375_v43  ;;  %v476_v49 = vld [vmem:[#allocation6 + $0xb88] sm:$0xff]  ;;  %9387 = vst [vmem:[#allocation38_spill] sm:$0xff] %v8188_v47  ;;  %v1321_v25 = vld [vmem:[#allocation6 + $0x25f0] sm:$0xff] }
 0x1fd   :  { %3105 = vmatpush.msrb.mxu1 %v1663_v19  ;;  %3128 = vmatpush.msrb.mxu2 %v224_v59  ;;  %v1609_v43 = vld [vmem:[#allocation6 + $0x2ef0] sm:$0xff]  ;;  %v8191_v19 = vpop.f32.mrf.mxu2  ;;  %v170_v59 = vld [vmem:[#allocation6 + $0x1f8] sm:$0xff] }
 0x1fe   :  { %3151 = vmatpush.msrb.mxu3 %v512_v62  ;;  %3083 = vmatpush.msrb.mxu0 %v1357_v52  ;;  %9388 = vst [vmem:[#allocation39_spill] sm:$0xff] %v8191_v19  ;;  %v458_v62 = vld [vmem:[#allocation6 + $0xaf8] sm:$0xff]  ;;  %v1303_v52 = vld [vmem:[#allocation6 + $0x2560] sm:$0xff] }
 0x1ff   :  { %3106 = vmatpush.msrb.mxu1 %v1645_v4  ;;  %3129 = vmatpush.msrb.mxu2 %v206_v38  ;;  %v8195_v4 = vpop.f32.mrf.mxu1  ;;  %v152_v38 = vld [vmem:[#allocation6 + $0x168] sm:$0xff]  ;;  %v746_v19 = vld [vmem:[#allocation6 + $0x13f8] sm:$0xff] }
 0x200   :  { %3152 = vmatpush.msrb.mxu3 %v494_v13  ;;  %3043 = vmatmul.f32.vlgmr.msra.gmra.mxu2 %v8052_v32  ;;  %9389 = vst [vmem:[#allocation40_spill] sm:$0xff] %v8195_v4  ;;  %v1591_v32 = vld [vmem:[#allocation6 + $0x2e60] sm:$0xff]  ;;  %v440_v13 = vld [vmem:[#allocation6 + $0xa68] sm:$0xff] }
 0x201   :  { %3084 = vmatpush.msrb.mxu0 %v1339_v46  ;;  %3107 = vmatpush.msrb.mxu1 %v1627_v29  ;;  %v1285_v46 = vld [vmem:[#allocation6 + $0x24d0] sm:$0xff]  ;;  %v8197_v29 = vpop.f32.mrf.mxu3 }
 0x202   :  { %3130 = vmatpush.msrb.mxu2 %v188_v36  ;;  %3153 = vmatpush.msrb.mxu3 %v476_v49  ;;  %9390 = vst [vmem:[#allocation41_spill] sm:$0xff] %v8197_v29  ;;  %v1573_v36 = vld [vmem:[#allocation6 + $0x2dd0] sm:$0xff]  ;;  %v764_v29 = vld [vmem:[#allocation6 + $0x1488] sm:$0xff] }
 0x203   :  { %3000 = vmatmul.f32.gmra.mxu0 %v8057_v50  ;;  %3066 = vmatmul.f32.vlgmr.msra.gmra.mxu3 %v8060_v37  ;;  %v134_v50 = vld [vmem:[#allocation6 + $0xd8] sm:$0xff]  ;;  %v8200_v49 = vpop.f32.mrf.mxu0 }
 0x204   :  { %3085 = vmatpush.msrb.mxu0 %v1321_v25  ;;  %3108 = vmatpush.msrb.mxu1 %v1609_v43  ;;  %v422_v37 = vld [vmem:[#allocation6 + $0x9d8] sm:$0xff]  ;;  %9391 = vst [vmem:[#allocation42_spill] sm:$0xff] %v8200_v49  ;;  %v1267_v25 = vld [vmem:[#allocation6 + $0x2440] sm:$0xff] }
 0x205   :  { %3131 = vmatpush.msrb.mxu2 %v170_v59  ;;  %3154 = vmatpush.msrb.mxu3 %v458_v62  ;;  %v1555_v43 = vld [vmem:[#allocation6 + $0x2d40] sm:$0xff]  ;;  %v116_v59 = vld [vmem:[#allocation6 + $0x48] sm:$0xff]  ;;  %v1358_v49 = vld [vmem:[#allocation6 + $0x2718] sm:$0xff] }
 0x206   :  { %3023 = vmatmul.f32.gmra.mxu1 %v8065_v42  ;;  %3086 = vmatpush.msrb.mxu0 %v1303_v52  ;;  %v404_v62 = vld [vmem:[#allocation6 + $0x948] sm:$0xff]  ;;  %v962_v42 = vld [vmem:[#allocation6 + $0x1ab8] sm:$0xff] }
 0x207   :  { %3109 = vmatpush.msrb.mxu1 %v1591_v32  ;;  %3132 = vmatpush.msrb.mxu2 %v152_v38  ;;  %v1250_v52 = vld [vmem:[#allocation6 + $0x23b8] sm:$0xff]  ;;  %v8203_v32 = vpop.f32.mrf.mxu2 }
 0x208   :  { %3155 = vmatpush.msrb.mxu3 %v440_v13  ;;  %3087 = vmatpush.msrb.mxu0 %v1285_v46  ;;  %9392 = vst [vmem:[#allocation43_spill] sm:$0xff] %v8203_v32  ;;  %v1538_v38 = vld [vmem:[#allocation6 + $0x2cb8] sm:$0xff]  ;;  %v8205_v46 = vpop.f32.mrf.mxu1 }
 0x209   :  { %3110 = vmatpush.msrb.mxu1 %v1573_v36  ;;  %3133 = vmatpush.msrb.mxu2 %v134_v50  ;;  %v1826_v13 = vld [vmem:[#allocation6 + $0x35b8] sm:$0xff]  ;;  %9393 = vst [vmem:[#allocation44_spill] sm:$0xff] %v8205_v46  ;;  %v944_v36 = vld [vmem:[#allocation6 + $0x1a28] sm:$0xff]  ;;  %v8209_v32 = vpop.f32.mrf.mxu3 }
 0x20a   :  { %3156 = vmatpush.msrb.mxu3 %v422_v37  ;;  %3046 = vmatmul.f32.gmra.mxu2 %v8139_v16  ;;  %v1232_v50 = vld [vmem:[#allocation6 + $0x2328] sm:$0xff]  ;;  %9394 = vst [vmem:[#allocation45_spill] sm:$0xff] %v8209_v32  ;;  %v1790_v46 = vld [vmem:[#allocation6 + $0x3498] sm:$0xff] }
 0x20b   :  { %3088 = vmatpush.msrb.mxu0 %v1267_v25  ;;  %3111 = vmatpush.msrb.mxu1 %v1555_v43  ;;  %v1520_v37 = vld [vmem:[#allocation6 + $0x2c28] sm:$0xff]  ;;  %v926_v43 = vld [vmem:[#allocation6 + $0x1998] sm:$0xff]  ;;  %v8212_v4 = vpop.f32.mrf.mxu0 }
 0x20c   :  { %3134 = vmatpush.msrb.mxu2 %v116_v59  ;;  %3157 = vmatpush.msrb.mxu3 %v404_v62  ;;  %v1808_v25 = vld [vmem:[#allocation6 + $0x3528] sm:$0xff]  ;;  %v1214_v59 = vld [vmem:[#allocation6 + $0x2298] sm:$0xff]  ;;  %9395 = vst [vmem:[#allocation46_spill] sm:$0xff] %v8212_v4 }
 0x20d   :  { %3069 = vmatmul.f32.gmra.mxu3 %v8145_v61  ;;  %3089 = vmatmul.f32.vlgmr.msrb.gmra.mxu0 %v8076_v1  ;;  %v1502_v62 = vld [vmem:[#allocation6 + $0x2b98] sm:$0xff]  ;;  %v908_v1 = vld [vmem:[#allocation6 + $0x1908] sm:$0xff] }
 0x20e   :  { %3165 = vmatpush.msra.mxu0 %v962_v42  ;;  %3188 = vmatpush.msra.mxu1 %v1250_v52  ;;  %v1196_v42 = vld [vmem:[#allocation6 + $0x2208] sm:$0xff]  ;;  %v818_v32 = vld [vmem:[#allocation6 + $0x1638] sm:$0xff] }
 0x20f   :  { %3211 = vmatpush.msra.mxu2 %v1538_v38  ;;  %3234 = vmatpush.msra.mxu3 %v1826_v13  ;;  %v1484_v52 = vld [vmem:[#allocation6 + $0x2b08] sm:$0xff]  ;;  %v890_v13 = vld [vmem:[#allocation6 + $0x1878] sm:$0xff] }
 0x210   :  { %3112 = vmatmul.f32.vlgmr.msrb.gmra.mxu1 %v8083_v11  ;;  %3166 = vmatpush.msra.mxu0 %v944_v36  ;;  %v1772_v38 = vld [vmem:[#allocation6 + $0x3408] sm:$0xff]  ;;  %v1178_v11 = vld [vmem:[#allocation6 + $0x2178] sm:$0xff] }
 0x211   :  { %3189 = vmatpush.msra.mxu1 %v1232_v50  ;;  %3212 = vmatpush.msra.mxu2 %v1520_v37  ;;  %v1466_v36 = vld [vmem:[#allocation6 + $0x2a78] sm:$0xff]  ;;  %v8214_v37 = vpop.f32.mrf.mxu2  ;;  %v8220_v4 = vpop.f32.mrf.mxu3 }
 0x212   :  { %3235 = vmatpush.msra.mxu3 %v1808_v25  ;;  %3167 = vmatpush.msra.mxu0 %v926_v43  ;;  %v1754_v50 = vld [vmem:[#allocation6 + $0x3378] sm:$0xff]  ;;  %9396 = vst [vmem:[#allocation47_spill] sm:$0xff] %v8214_v37  ;;  %v8217_v25 = vpop.f32.mrf.mxu1  ;;  %v872_v43 = vld [vmem:[#allocation6 + $0x17e8] sm:$0xff] }
 0x213   :  { %3190 = vmatpush.msra.mxu1 %v1214_v59  ;;  %3213 = vmatpush.msra.mxu2 %v1502_v62  ;;  %9397 = vst [vmem:[#allocation48_spill] sm:$0xff] %v8217_v25  ;;  %v1160_v59 = vld [vmem:[#allocation6 + $0x20e8] sm:$0xff]  ;;  %v1394_v37 = vld [vmem:[#allocation6 + $0x2838] sm:$0xff] }
 0x214   :  { %3236 = vmatpush.msra.mxu3 %v1790_v46  ;;  %3168 = vmatpush.msra.mxu0 %v908_v1  ;;  %v1448_v62 = vld [vmem:[#allocation6 + $0x29e8] sm:$0xff]  ;;  %v854_v1 = vld [vmem:[#allocation6 + $0x1758] sm:$0xff]  ;;  %9398 = vst [vmem:[#allocation49_spill] sm:$0xff] %v8220_v4 }
 0x215   :  { %3191 = vmatpush.msra.mxu1 %v1196_v42  ;;  %3214 = vmatpush.msra.mxu2 %v1484_v52  ;;  %v1736_v46 = vld [vmem:[#allocation6 + $0x32e8] sm:$0xff]  ;;  %v1142_v42 = vld [vmem:[#allocation6 + $0x2058] sm:$0xff] }
 0x216   :  { %3237 = vmatpush.msra.mxu3 %v1772_v38  ;;  %3092 = vmatmul.f32.gmra.mxu0 %v8132_v63  ;;  %v1430_v52 = vld [vmem:[#allocation6 + $0x2958] sm:$0xff]  ;;  %v836_v25 = vld [vmem:[#allocation6 + $0x16c8] sm:$0xff] }
 0x217   :  { %3169 = vmatpush.msra.mxu0 %v890_v13  ;;  %3192 = vmatpush.msra.mxu1 %v1178_v11  ;;  %v1718_v38 = vld [vmem:[#allocation6 + $0x3258] sm:$0xff]  ;;  %v1124_v13 = vld [vmem:[#allocation6 + $0x1fc8] sm:$0xff] }
 0x218   :  { %3215 = vmatpush.msra.mxu2 %v1466_v36  ;;  %3238 = vmatpush.msra.mxu3 %v1754_v50  ;;  %v1412_v11 = vld [vmem:[#allocation6 + $0x28c8] sm:$0xff]  ;;  %v2722_v50 = vpop.f32.mrf.mxu0  ;;  %v1682_v4 = vld [vmem:[#allocation6 + $0x3138] sm:$0xff] }
 0x219   :  { %3115 = vmatmul.f32.gmra.mxu1 %v8142_v20  ;;  %3170 = vmatpush.msra.mxu0 %v872_v43  ;;  %v1700_v36 = vld [vmem:[#allocation6 + $0x31c8] sm:$0xff]  ;;  %v1106_v43 = vld [vmem:[#allocation6 + $0x1f38] sm:$0xff]  ;;  %v8233_v47 = vpop.f32.mrf.mxu3 }
 0x21a   :  { %3193 = vmatpush.msra.mxu1 %v1160_v59  ;;  %3216 = vmatpush.msra.mxu2 %v1448_v62  ;;  %v8222_v59 = vpop.f32.mrf.mxu2  ;;  %v8224_v62 = vld [vmem:[#allocation3] sm:$0xff]  ;;  %9400 = vst [vmem:[#allocation51_spill] sm:$0xff] %v8233_v47 }
 0x21b   :  { %3239 = vmatpush.msra.mxu3 %v1736_v46  ;;  %3171 = vmatpush.msra.mxu0 %v854_v1  ;;  %9399 = vst [vmem:[#allocation50_spill] sm:$0xff] %v8222_v59  ;;  %v8227_v46 = vld [vmem:[#allocation8] sm:$0xff]  ;;  %v8230_v59 = vld [vmem:[#allocation3 + $0x8] sm:$0xff] }
 0x21c   :  { %3194 = vmatpush.msra.mxu1 %v1142_v42  ;;  %3217 = vmatpush.msra.mxu2 %v1430_v52  ;;  %v9362_v1 = vperm.slane %v8227_v46, 6  ;;  %v800_v42 = vld [vmem:[#allocation6 + $0x15a8] sm:$0xff]  ;;  %v9401_v31 = vperm.slane %v8227_v46, 6 }
 0x21d   :  { %3240 = vmatpush.msra.mxu3 %v1718_v38  ;;  %3172 = vmatpush.msra.mxu0 %v836_v25  ;;  %v2745_v25 = vpop.f32.mrf.mxu1  ;;  %v1088_v52 = vld [vmem:[#allocation6 + $0x1ea8] sm:$0xff] }
 0x21e   :  { %3195 = vmatpush.msra.mxu1 %v1124_v13  ;;  %3218 = vmatpush.msra.mxu2 %v1412_v11  ;;  %v1376_v38 = vld [vmem:[#allocation6 + $0x27a8] sm:$0xff]  ;;  %v782_v11 = vld [vmem:[#allocation6 + $0x1518] sm:$0xff] }
 0x21f   :  { %3241 = vmatpush.msra.mxu3 %v1700_v36  ;;  %3135 = vmatmul.f32.vlgmr.msrb.gmra.mxu2 %v8224_v62  ;;  %v1664_v13 = vld [vmem:[#allocation6 + $0x30a8] sm:$0xff]  ;;  %v1070_v36 = vld [vmem:[#allocation6 + $0x1e18] sm:$0xff] }
 0x220   :  { %3173 = vmatpush.msra.mxu0 %v818_v32  ;;  %3196 = vmatpush.msra.mxu1 %v1106_v43  ;;  %v2723_v32 = vadd.f32 %v2722_v50, %v9362_v1  ;;  %v1646_v43 = vld [vmem:[#allocation6 + $0x3018] sm:$0xff] }
 0x221   :  { %3219 = vmatpush.msra.mxu2 %v1394_v37  ;;  %3242 = vmatpush.msra.mxu3 %v1682_v4  ;;  %v1052_v4 = vld [vmem:[#allocation6 + $0x1d88] sm:$0xff]  ;;  %v1322_v50 = vld [vmem:[#allocation6 + $0x25f8] sm:$0xff] }
 0x222   :  { %3158 = vmatmul.f32.vlgmr.msrb.gmra.mxu3 %v8230_v59  ;;  %3174 = vmatpush.msra.mxu0 %v800_v42  ;;  %v1340_v37 = vld [vmem:[#allocation6 + $0x2688] sm:$0xff]  ;;  %v2725_v42 = vpop.f32.mrf.mxu0  ;;  %v2746_v47 = vadd.f32 %v2745_v25, %v2723_v32  ;;  %v710_v25 = vld [vmem:[#allocation6 + $0x12d8] sm:$0xff] }
 0x223   :  { %3197 = vmatpush.msra.mxu1 %v1088_v52  ;;  %3220 = vmatpush.msra.mxu2 %v1376_v38  ;;  %v1610_v52 = vld [vmem:[#allocation6 + $0x2ef8] sm:$0xff]  ;;  %v8237_v38 = vld [vmem:[#allocation3 + $0x30] sm:$0xff]  ;;  %v2726_v8 = vadd.f32 %v2725_v42, %v9401_v31 }
 0x224   :  { %3243 = vmatpush.msra.mxu3 %v1664_v13  ;;  %3175 = vmatpush.msra.mxu0 %v782_v11  ;;  %v728_v13 = vld [vmem:[#allocation6 + $0x1368] sm:$0xff]  ;;  %v2768_v11 = vpop.f32.mrf.mxu2  ;;  %v8240_v32 = vld [vmem:[#allocation3 + $0x38] sm:$0xff]  ;;  %v657_v42 = vld [vmem:[#allocation6 + $0x1130] sm:$0xff] }
 0x225   :  { %3198 = vmatpush.msra.mxu1 %v1070_v36  ;;  %3221 = vmatpush.msra.mxu2 %v1358_v49  ;;  %v1016_v49 = vld [vmem:[#allocation6 + $0x1c68] sm:$0xff]  ;;  %v1574_v1 = vld [vmem:[#allocation6 + $0x2dd8] sm:$0xff] }
 0x226   :  { %3244 = vmatpush.msra.mxu3 %v1646_v43  ;;  %3176 = vmatpush.msra.mxu0 %v764_v29  ;;  %v1304_v36 = vld [vmem:[#allocation6 + $0x2568] sm:$0xff]  ;;  %v2748_v29 = vpop.f32.mrf.mxu1 }
 0x227   :  { %3199 = vmatpush.msra.mxu1 %v1052_v4  ;;  %3222 = vmatpush.msra.mxu2 %v1340_v37  ;;  %v1592_v43 = vld [vmem:[#allocation6 + $0x2e68] sm:$0xff]  ;;  %v998_v4 = vld [vmem:[#allocation6 + $0x1bd8] sm:$0xff]  ;;  %v2749_v31 = vadd.f32 %v2748_v29, %v2726_v8  ;;  %v351_v29 = vld [vmem:[#allocation6 + $0x7a0] sm:$0xff] }
 0x228   :  { %3245 = vmatpush.msra.mxu3 %v1628_v26  ;;  %3138 = vmatmul.f32.gmra.mxu2 %v8237_v38  ;;  %v2769_v26 = vadd.f32 %v2768_v11, %v2746_v47  ;;  %v1286_v37 = vld [vmem:[#allocation6 + $0x24d8] sm:$0xff]  ;;  %v387_v47 = vld [vmem:[#allocation6 + $0x8c0] sm:$0xff] }
 0x229   :  { %3177 = vmatpush.msra.mxu0 %v746_v19  ;;  %3200 = vmatpush.msra.mxu1 %v1034_v27  ;;  %v2791_v19 = vpop.f32.mrf.mxu3  ;;  %v692_v27 = vld [vmem:[#allocation6 + $0x1248] sm:$0xff]  ;;  %v675_v11 = vld [vmem:[#allocation6 + $0x11c0] sm:$0xff] }
 0x22a   :  { %3223 = vmatpush.msra.mxu2 %v1322_v50  ;;  %3246 = vmatpush.msra.mxu3 %v1610_v52  ;;  %v980_v50 = vld [vmem:[#allocation6 + $0x1b48] sm:$0xff]  ;;  %v2814_v10 = vpop.f32.mrf.mxu0 }
 0x22b   :  { %3161 = vmatmul.f32.gmra.mxu3 %v8240_v32  ;;  %3178 = vmatpush.msra.mxu0 %v728_v13  ;;  %v1268_v52 = vld [vmem:[#allocation6 + $0x2448] sm:$0xff]  ;;  %v2792_v13 = vadd.f32 %v2791_v19, %v2769_v26  ;;  %v945_v26 = vld [vmem:[#allocation6 + $0x1a30] sm:$0xff] }
 0x22c   :  { %3201 = vmatpush.msra.mxu1 %v1016_v49  ;;  %3224 = vmatpush.msra.mxu2 %v1304_v36  ;;  %v9402_v49 = vperm.slane %v7975_v15, 0  ;;  %v8252_v19 = vld [vmem:[#allocation3 + $0x10] sm:$0xff] }
 0x22d   :  { %3247 = vmatpush.msra.mxu3 %v1592_v43  ;;  %3179 = vmatpush.msra.mxu0 %v710_v25  ;;  %v963_v43 = vld [vmem:[#allocation6 + $0x1ac0] sm:$0xff]  ;;  %v2815_v15 = vadd.f32 %v2814_v10, %v2792_v13  ;;  %v333_v13 = vld [vmem:[#allocation6 + $0x710] sm:$0xff] }
 0x22e   :  { %3202 = vmatpush.msra.mxu1 %v998_v4  ;;  %3225 = vmatpush.msra.mxu2 %v1286_v37  ;;  %v1895_v36 = vadd.f32 %v7971_v54, %v9402_v49  ;;  %v1251_v25 = vld [vmem:[#allocation6 + $0x23c0] sm:$0xff]  ;;  %v1233_v54 = vld [vmem:[#allocation6 + $0x2330] sm:$0xff]  ;;  %v2771_v4 = vpop.f32.mrf.mxu2  ;;  %v2837_v8 = vpop.f32.mrf.mxu1 }
 0x22f   :  { %3248 = vmatpush.msra.mxu3 %v1574_v1  ;;  %3180 = vmatpush.msra.mxu0 %v692_v27  ;;  %v369_v1 = vld [vmem:[#allocation6 + $0x830] sm:$0xff]  ;;  %v639_v27 = vld [vmem:[#allocation6 + $0x10a0] sm:$0xff] }
 0x230   :  { %3203 = vmatpush.msra.mxu1 %v980_v50  ;;  %3226 = vmatpush.msra.mxu2 %v1268_v52  ;;  %v1918_v37 = vadd.f32 %v7973_v2, %v1895_v36  ;;  %v927_v50 = vld [vmem:[#allocation6 + $0x19a0] sm:$0xff]  ;;  %v2772_v52 = vadd.f32 %v2771_v4, %v2749_v31  ;;  %v1842_v2 = vperm.slane %v8227_v46, 1  ;;  %v909_v49 = vld [vmem:[#allocation6 + $0x1910] sm:$0xff]  ;;  %v8262_v36 = vadd.f32 %v2837_v8, %v2815_v15 }
 0x231   :  { %3249 = vmatpush.msra.mxu3 %v1556_v30  ;;  %3227 = vmatmul.f32.vlgmr.msra.gmra.mxu2 %v8248_v45  ;;  %v8255_v30 = vld [vmem:[#allocation3 + $0x28] sm:$0xff]  ;;  %v1215_v10 = vld [vmem:[#allocation6 + $0x22a0] sm:$0xff] }
 0x232   :  { %3257 = vmatpush.msrb.mxu0 %v387_v47  ;;  %3280 = vmatpush.msrb.mxu1 %v675_v11  ;;  %v8259_v47 = vld [vmem:[#allocation3 + $0x18] sm:$0xff]  ;;  %v621_v11 = vld [vmem:[#allocation6 + $0x1010] sm:$0xff]  ;;  %v2036_v31 = vadd.f32 %v8071_v55, %v1842_v2  ;;  %v891_v4 = vld [vmem:[#allocation6 + $0x1880] sm:$0xff]  ;;  %v2817_v15 = vpop.f32.mrf.mxu0 }
 0x233   :  { %3303 = vmatpush.msrb.mxu2 %v963_v43  ;;  %3326 = vmatpush.msrb.mxu3 %v1251_v25  ;;  %v2794_v43 = vpop.f32.mrf.mxu3  ;;  %v1941_v25 = vadd.f32 %v7977_v24, %v1918_v37  ;;  %v1179_v24 = vld [vmem:[#allocation6 + $0x2180] sm:$0xff]  ;;  %v297_v55 = vld [vmem:[#allocation6 + $0x5f0] sm:$0xff] }
 0x234   :  { %3181 = vmatmul.f32.vlgmr.msra.gmra.mxu0 %v8252_v19  ;;  %3250 = vmatmul.f32.vlgmr.msra.gmra.mxu3 %v8255_v30  ;;  %v2059_v8 = vadd.f32 %v8079_v9, %v2036_v31  ;;  %v855_v9 = vld [vmem:[#allocation6 + $0x1760] sm:$0xff] }
 0x235   :  { %3258 = vmatpush.msrb.mxu0 %v369_v1  ;;  %3281 = vmatpush.msrb.mxu1 %v657_v42  ;;  %v1197_v1 = vld [vmem:[#allocation6 + $0x2210] sm:$0xff]  ;;  %v315_v42 = vld [vmem:[#allocation6 + $0x680] sm:$0xff]  ;;  %v1964_v37 = vadd.f32 %v7982_v35, %v1941_v25 }
 0x236   :  { %3304 = vmatpush.msrb.mxu2 %v945_v26  ;;  %3327 = vmatpush.msrb.mxu3 %v1233_v54  ;;  %v2795_v26 = vadd.f32 %v2794_v43, %v2772_v52  ;;  %v603_v54 = vld [vmem:[#allocation6 + $0xf80] sm:$0xff]  ;;  %v2840_v52 = vpop.f32.mrf.mxu1  ;;  %v261_v43 = vld [vmem:[#allocation6 + $0x4d0] sm:$0xff] }
 0x237   :  { %3204 = vmatmul.f32.vlgmr.msra.gmra.mxu1 %v8259_v47  ;;  %3259 = vmatpush.msrb.mxu0 %v351_v29  ;;  %v585_v29 = vld [vmem:[#allocation6 + $0xef0] sm:$0xff]  ;;  %v279_v35 = vld [vmem:[#allocation6 + $0x560] sm:$0xff] }
 0x238   :  { %3282 = vmatpush.msrb.mxu1 %v639_v27  ;;  %3305 = vmatpush.msrb.mxu2 %v927_v50  ;;  %v873_v27 = vld [vmem:[#allocation6 + $0x17f0] sm:$0xff]  ;;  %v2818_v50 = vadd.f32 %v2817_v15, %v2795_v26  ;;  %v243_v31 = vld [vmem:[#allocation6 + $0x440] sm:$0xff] }
 0x239   :  { %3328 = vmatpush.msrb.mxu3 %v1215_v10  ;;  %3260 = vmatpush.msrb.mxu0 %v333_v13  ;;  %v1161_v10 = vld [vmem:[#allocation6 + $0x20f0] sm:$0xff]  ;;  %v567_v13 = vld [vmem:[#allocation6 + $0xe60] sm:$0xff] }
 0x23a   :  { %3283 = vmatpush.msrb.mxu1 %v621_v11  ;;  %3306 = vmatpush.msrb.mxu2 %v909_v49  ;;  %v1143_v11 = vld [vmem:[#allocation6 + $0x2060] sm:$0xff]  ;;  %v2082_v49 = vadd.f32 %v8081_v23, %v2059_v8  ;;  %v8278_v25 = vadd.f32 %v2840_v52, %v2818_v50  ;;  %v1089_v15 = vld [vmem:[#allocation6 + $0x1eb0] sm:$0xff] }
 0x23b   :  { %3329 = vmatpush.msrb.mxu3 %v1197_v1  ;;  %4487 = vrot.lane.b32.xlu0 %v8262_v36, %s7852_s2  ;;  %v1125_v1 = vld [vmem:[#allocation6 + $0x1fd0] sm:$0xff]  ;;  %v531_v23 = vld [vmem:[#allocation6 + $0xd40] sm:$0xff]  ;;  %v2883_v52 = vpop.f32.mrf.mxu3 }
 0x23c   :  { %3230 = vmatmul.f32.gmra.mxu2 %v8132_v63  ;;  %3261 = vmatpush.msrb.mxu0 %v315_v42  ;;  %v1987_v63 = vadd.f32 %v7987_v41, %v1964_v37  ;;  %v2105_v42 = vadd.f32 %v8086_v28, %v2082_v49  ;;  %v1107_v26 = vld [vmem:[#allocation6 + $0x1f40] sm:$0xff]  ;;  %v189_v50 = vld [vmem:[#allocation6 + $0x290] sm:$0xff] }
 0x23d   :  { %3284 = vmatpush.msrb.mxu1 %v603_v54  ;;  %3307 = vmatpush.msrb.mxu2 %v891_v4  ;;  %v225_v54 = vld [vmem:[#allocation6 + $0x3b0] sm:$0xff]  ;;  %v207_v28 = vld [vmem:[#allocation6 + $0x320] sm:$0xff] }
 0x23e   :  { %3330 = vmatpush.msrb.mxu3 %v1179_v24  ;;  %3184 = vmatmul.f32.gmra.mxu0 %v8139_v16  ;;  %v549_v16 = vld [vmem:[#allocation6 + $0xdd0] sm:$0xff]  ;;  %v8281_v41 = vadd.f32 %v7992_v17, %v1987_v63  ;;  %v2860_v17 = vpop.f32.mrf.mxu2  ;;  %v495_v37 = vld [vmem:[#allocation6 + $0xc20] sm:$0xff] }
 0x23f   :  { %3253 = vmatmul.f32.gmra.mxu3 %v8142_v20  ;;  %3262 = vmatpush.msrb.mxu0 %v297_v55  ;;  %v837_v20 = vld [vmem:[#allocation6 + $0x16d0] sm:$0xff]  ;;  %v2128_v55 = vadd.f32 %v8098_v0, %v2105_v42  ;;  %v783_v8 = vld [vmem:[#allocation6 + $0x1520] sm:$0xff] }
 0x240   :  { %3285 = vmatpush.msrb.mxu1 %v585_v29  ;;  %3308 = vmatpush.msrb.mxu2 %v873_v27  ;;  %v513_v4 = vld [vmem:[#allocation6 + $0xcb0] sm:$0xff]  ;;  %v1071_v29 = vld [vmem:[#allocation6 + $0x1e20] sm:$0xff]  ;;  %v1848_v27 = vperm.slane %v8227_v46, 7 }
 0x241   :  { %3331 = vmatpush.msrb.mxu3 %v1161_v10  ;;  %3207 = vmatmul.f32.gmra.mxu1 %v8145_v61  ;;  %v819_v61 = vld [vmem:[#allocation6 + $0x1640] sm:$0xff]  ;;  %v801_v24 = vld [vmem:[#allocation6 + $0x15b0] sm:$0xff]  ;;  %v8291_v0 = vadd.f32 %v8101_v6, %v2128_v55 }
 0x242   :  { %3263 = vmatpush.msrb.mxu0 %v279_v35  ;;  %3286 = vmatpush.msrb.mxu1 %v567_v13  ;;  %v477_v10 = vld [vmem:[#allocation6 + $0xb90] sm:$0xff]  ;;  %v171_v63 = vld [vmem:[#allocation6 + $0x200] sm:$0xff] }
 0x243   :  { %3309 = vmatpush.msrb.mxu2 %v855_v9  ;;  %3332 = vmatpush.msrb.mxu3 %v1143_v11  ;;  %v765_v35 = vld [vmem:[#allocation6 + $0x1490] sm:$0xff]  ;;  %v2861_v9 = vadd.f32 %v2860_v17, %v1848_v27  ;;  %v459_v11 = vld [vmem:[#allocation6 + $0xb00] sm:$0xff]  ;;  %v2886_v55 = vpop.f32.mrf.mxu3 }
 0x244   :  { %3264 = vmatpush.msrb.mxu0 %v261_v43  ;;  %3287 = vmatpush.msrb.mxu1 %v549_v16  ;;  %v1053_v13 = vld [vmem:[#allocation6 + $0x1d90] sm:$0xff]  ;;  %v747_v49 = vld [vmem:[#allocation6 + $0x1400] sm:$0xff] }
 0x245   :  { %3310 = vmatpush.msrb.mxu2 %v837_v20  ;;  %3333 = vmatpush.msrb.mxu3 %v1125_v1  ;;  %v1035_v43 = vld [vmem:[#allocation6 + $0x1d00] sm:$0xff]  ;;  %v153_v16 = vld [vmem:[#allocation6 + $0x170] sm:$0xff]  ;;  %v2884_v42 = vadd.f32 %v2883_v52, %v2861_v9  ;;  %v2906_v17 = vpop.f32.mrf.mxu0  ;;  %v370_v9 = vld [vmem:[#allocation6 + $0x838] sm:$0xff] }
 0x246   :  { %4515 = vrot.lane.b32.xlu1 %v8278_v25, %s7852_s2  ;;  %4485 = vrot.lane.b32.xlu0 %v8281_v41, %s7852_s2  ;;  %v441_v20 = vld [vmem:[#allocation6 + $0xa70] sm:$0xff]  ;;  %v135_v6 = vld [vmem:[#allocation6 + $0xe0] sm:$0xff] }
 0x247   :  { %3265 = vmatpush.msrb.mxu0 %v243_v31  ;;  %3288 = vmatpush.msrb.mxu1 %v531_v23  ;;  %v729_v1 = vld [vmem:[#allocation6 + $0x1370] sm:$0xff]  ;;  %v2863_v23 = vpop.f32.mrf.mxu2 }
 0x248   :  { %3311 = vmatpush.msrb.mxu2 %v819_v61  ;;  %3334 = vmatpush.msrb.mxu3 %v1107_v26  ;;  %v1017_v31 = vld [vmem:[#allocation6 + $0x1c70] sm:$0xff]  ;;  %v423_v61 = vld [vmem:[#allocation6 + $0x9e0] sm:$0xff] }
 0x249   :  { %3266 = vmatpush.msrb.mxu0 %v225_v54  ;;  %3289 = vmatpush.msrb.mxu1 %v513_v4  ;;  %v711_v26 = vld [vmem:[#allocation6 + $0x12e0] sm:$0xff]  ;;  %v117_v4 = vld [vmem:[#allocation6 + $0x50] sm:$0xff] }
 0x24a   :  { %3312 = vmatpush.msrb.mxu2 %v801_v24  ;;  %3335 = vmatpush.msrb.mxu3 %v1089_v15  ;;  %v999_v54 = vld [vmem:[#allocation6 + $0x1be0] sm:$0xff]  ;;  %v405_v24 = vld [vmem:[#allocation6 + $0x950] sm:$0xff] }
 0x24b   :  { %3267 = vmatpush.msrb.mxu0 %v207_v28  ;;  %3290 = vmatpush.msrb.mxu1 %v495_v37  ;;  %v693_v15 = vld [vmem:[#allocation6 + $0x1250] sm:$0xff]  ;;  %v1539_v37 = vld [vmem:[#allocation6 + $0x2cc0] sm:$0xff] }
 0x24c   :  { %3313 = vmatpush.msrb.mxu2 %v783_v8  ;;  %3336 = vmatpush.msrb.mxu3 %v1071_v29  ;;  %v981_v28 = vld [vmem:[#allocation6 + $0x1b50] sm:$0xff]  ;;  %v1827_v8 = vld [vmem:[#allocation6 + $0x35c0] sm:$0xff]  ;;  %v388_v29 = vld [vmem:[#allocation6 + $0x8c8] sm:$0xff] }
 0x24d   :  { %3268 = vmatpush.msrb.mxu0 %v189_v50  ;;  %3291 = vmatpush.msrb.mxu1 %v477_v10  ;;  %v2907_v50 = vadd.f32 %v2906_v17, %v2884_v42  ;;  %v676_v10 = vld [vmem:[#allocation6 + $0x11c8] sm:$0xff]  ;;  %v1521_v52 = vld [vmem:[#allocation6 + $0x2c30] sm:$0xff]  ;;  %v1755_v17 = vld [vmem:[#allocation6 + $0x3380] sm:$0xff] }
 0x24e   :  { %3314 = vmatpush.msrb.mxu2 %v765_v35  ;;  %3337 = vmatpush.msrb.mxu3 %v1053_v13  ;;  %v2929_v35 = vpop.f32.mrf.mxu1  ;;  %v2864_v13 = vadd.f32 %v2863_v23, %v1848_v27  ;;  %v640_v27 = vld [vmem:[#allocation6 + $0x10a8] sm:$0xff]  ;;  %v1773_v42 = vld [vmem:[#allocation6 + $0x3410] sm:$0xff] }
 0x24f   :  { %4778 = vrot.lane.b32.xlu1 %v8291_v0, %s7852_s2  ;;  %3269 = vmatpush.msrb.mxu0 %v171_v63  ;;  %v1809_v63 = vld [vmem:[#allocation6 + $0x3530] sm:$0xff] }
 0x250   :  { %3292 = vmatpush.msrb.mxu1 %v459_v11  ;;  %3315 = vmatpush.msrb.mxu2 %v747_v49  ;;  %v658_v11 = vld [vmem:[#allocation6 + $0x1138] sm:$0xff]  ;;  %v1503_v49 = vld [vmem:[#allocation6 + $0x2ba0] sm:$0xff]  ;;  %v2887_v23 = vadd.f32 %v2886_v55, %v2864_v13  ;;  %v1737_v55 = vld [vmem:[#allocation6 + $0x32f0] sm:$0xff] }
 0x251   :  { %3338 = vmatpush.msrb.mxu3 %v1035_v43  ;;  %3270 = vmatpush.msrb.mxu0 %v153_v16  ;;  %v2033_v43 = vadd.f32 %v8055_v44, %v1842_v2  ;;  %v1791_v16 = vld [vmem:[#allocation6 + $0x34a0] sm:$0xff]  ;;  %v2909_v44 = vpop.f32.mrf.mxu0 }
 0x252   :  { %3293 = vmatpush.msrb.mxu1 %v441_v20  ;;  %3316 = vmatpush.msrb.mxu2 %v729_v1  ;;  %v352_v20 = vld [vmem:[#allocation6 + $0x7a8] sm:$0xff]  ;;  %v2930_v1 = vadd.f32 %v2929_v35, %v2907_v50  ;;  %v1843_v50 = vperm.slane %v8227_v46, 2  ;;  %v1719_v13 = vld [vmem:[#allocation6 + $0x3260] sm:$0xff] }
 0x253   :  { %3339 = vmatpush.msrb.mxu3 %v1017_v31  ;;  %3271 = vmatpush.msrb.mxu0 %v135_v6  ;;  %v1485_v31 = vld [vmem:[#allocation6 + $0x2b10] sm:$0xff]  ;;  %v2952_v6 = vpop.f32.mrf.mxu2  ;;  %v2056_v2 = vadd.f32 %v8063_v56, %v2033_v43  ;;  %v586_v56 = vld [vmem:[#allocation6 + $0xef8] sm:$0xff] }
 0x254   :  { %3294 = vmatpush.msrb.mxu1 %v423_v61  ;;  %3317 = vmatpush.msrb.mxu2 %v711_v26  ;;  %v334_v61 = vld [vmem:[#allocation6 + $0x718] sm:$0xff]  ;;  %v1413_v43 = vld [vmem:[#allocation6 + $0x28d0] sm:$0xff] }
 0x255   :  { %3340 = vmatpush.msrb.mxu3 %v999_v54  ;;  %3272 = vmatpush.msrb.mxu0 %v117_v4  ;;  %v622_v26 = vld [vmem:[#allocation6 + $0x1018] sm:$0xff]  ;;  %v1467_v54 = vld [vmem:[#allocation6 + $0x2a80] sm:$0xff]  ;;  %v2953_v4 = vadd.f32 %v2952_v6, %v2930_v1  ;;  %v2079_v35 = vadd.f32 %v8068_v58, %v2056_v2 }
 0x256   :  { %3295 = vmatpush.msrb.mxu1 %v405_v24  ;;  %3318 = vmatpush.msrb.mxu2 %v693_v15  ;;  %v316_v24 = vld [vmem:[#allocation6 + $0x688] sm:$0xff]  ;;  %v262_v58 = vld [vmem:[#allocation6 + $0x4d8] sm:$0xff]  ;;  %v1683_v6 = vld [vmem:[#allocation6 + $0x3140] sm:$0xff] }
 0x257   :  { %3341 = vmatpush.msrb.mxu3 %v981_v28  ;;  %3349 = vmatpush.msra.mxu0 %v1539_v37  ;;  %v604_v15 = vld [vmem:[#allocation6 + $0xf88] sm:$0xff]  ;;  %v2975_v28 = vpop.f32.mrf.mxu3  ;;  %v1449_v37 = vld [vmem:[#allocation6 + $0x29f0] sm:$0xff]  ;;  %v550_v1 = vld [vmem:[#allocation6 + $0xdd8] sm:$0xff] }
 0x258   :  { %3372 = vmatpush.msra.mxu1 %v1827_v8  ;;  %3395 = vmatpush.msra.mxu2 %v388_v29  ;;  %v298_v8 = vld [vmem:[#allocation6 + $0x5f8] sm:$0xff]  ;;  %v2910_v29 = vadd.f32 %v2909_v44, %v2887_v23  ;;  %v1395_v23 = vld [vmem:[#allocation6 + $0x2840] sm:$0xff]  ;;  %v1665_v44 = vld [vmem:[#allocation6 + $0x30b0] sm:$0xff] }
 0x259   :  { %3418 = vmatpush.msra.mxu3 %v676_v10  ;;  %3350 = vmatpush.msra.mxu0 %v1521_v52  ;;  %v1431_v10 = vld [vmem:[#allocation6 + $0x2960] sm:$0xff]  ;;  %v2932_v52 = vpop.f32.mrf.mxu1 }
 0x25a   :  { %3373 = vmatpush.msra.mxu1 %v1809_v63  ;;  %3396 = vmatpush.msra.mxu2 %v370_v9  ;;  %v280_v63 = vld [vmem:[#allocation6 + $0x568] sm:$0xff]  ;;  %v8301_v9 = vadd.f32 %v2975_v28, %v2953_v4  ;;  %v226_v4 = vld [vmem:[#allocation6 + $0x3b8] sm:$0xff] }
 0x25b   :  { %3419 = vmatpush.msra.mxu3 %v658_v11  ;;  %3351 = vmatpush.msra.mxu0 %v1503_v49  ;;  %v568_v11 = vld [vmem:[#allocation6 + $0xe68] sm:$0xff]  ;;  %v2933_v49 = vadd.f32 %v2932_v52, %v2910_v29  ;;  %v1629_v29 = vld [vmem:[#allocation6 + $0x2f90] sm:$0xff]  ;;  %v1611_v52 = vld [vmem:[#allocation6 + $0x2f00] sm:$0xff] }
 0x25c   :  { %3374 = vmatpush.msra.mxu1 %v1791_v16  ;;  %3397 = vmatpush.msra.mxu2 %v352_v20  ;;  %v1701_v16 = vld [vmem:[#allocation6 + $0x31d0] sm:$0xff]  ;;  %v2171_v20 = vadd.f32 %v8094_v40, %v1843_v50  ;;  %v532_v40 = vld [vmem:[#allocation6 + $0xd48] sm:$0xff] }
 0x25d   :  { %3420 = vmatpush.msra.mxu3 %v640_v27  ;;  %3352 = vmatpush.msra.mxu0 %v1485_v31  ;;  %v2955_v27 = vpop.f32.mrf.mxu2  ;;  %v2102_v31 = vadd.f32 %v8073_v57, %v2079_v35  ;;  %v1377_v57 = vld [vmem:[#allocation6 + $0x27b0] sm:$0xff]  ;;  %v172_v35 = vld [vmem:[#allocation6 + $0x208] sm:$0xff] }
 0x25e   :  { %3375 = vmatpush.msra.mxu1 %v1773_v42  ;;  %3398 = vmatpush.msra.mxu2 %v334_v61  ;;  %v244_v42 = vld [vmem:[#allocation6 + $0x448] sm:$0xff]  ;;  %v2956_v61 = vadd.f32 %v2955_v27, %v2933_v49 }
 0x25f   :  { %3421 = vmatpush.msra.mxu3 %v622_v26  ;;  %3353 = vmatpush.msra.mxu0 %v1467_v54  ;;  %v2194_v26 = vadd.f32 %v8096_v12, %v2171_v20  ;;  %v2978_v54 = vpop.f32.mrf.mxu3  ;;  %v2125_v2 = vadd.f32 %v8088_v51, %v2102_v31  ;;  %v208_v12 = vld [vmem:[#allocation6 + $0x328] sm:$0xff]  ;;  %v1575_v20 = vld [vmem:[#allocation6 + $0x2de0] sm:$0xff]  ;;  %v1557_v31 = vld [vmem:[#allocation6 + $0x2d50] sm:$0xff] }
 0x260   :  { %3376 = vmatpush.msra.mxu1 %v1755_v17  ;;  %3399 = vmatpush.msra.mxu2 %v316_v24  ;;  %v514_v17 = vld [vmem:[#allocation6 + $0xcb8] sm:$0xff]  ;;  %v1359_v24 = vld [vmem:[#allocation6 + $0x2720] sm:$0xff]  ;;  %v8313_v28 = vadd.f32 %v2978_v54, %v2956_v61  ;;  %v964_v61 = vld [vmem:[#allocation6 + $0x1ac8] sm:$0xff] }
 0x261   :  { %3422 = vmatpush.msra.mxu3 %v604_v15  ;;  %3354 = vmatpush.msra.mxu0 %v1449_v37  ;;  %v1647_v15 = vld [vmem:[#allocation6 + $0x3020] sm:$0xff]  ;;  %v496_v37 = vld [vmem:[#allocation6 + $0xc28] sm:$0xff]  ;;  %v8317_v51 = vadd.f32 %v8092_v39, %v2125_v2  ;;  %v1522_v2 = vld [vmem:[#allocation6 + $0x2c38] sm:$0xff] }
 0x262   :  { %3377 = vmatpush.msra.mxu1 %v1737_v55  ;;  %3400 = vmatpush.msra.mxu2 %v298_v8  ;;  %v2217_v55 = vadd.f32 %v8108_v34, %v2194_v26  ;;  %v1341_v8 = vld [vmem:[#allocation6 + $0x2690] sm:$0xff]  ;;  %v1323_v39 = vld [vmem:[#allocation6 + $0x2600] sm:$0xff]  ;;  %v1828_v26 = vld [vmem:[#allocation6 + $0x35c8] sm:$0xff] }
 0x263   :  { %3423 = vmatpush.msra.mxu3 %v586_v56  ;;  %3355 = vmatpush.msra.mxu0 %v1431_v10  ;;  %v190_v56 = vld [vmem:[#allocation6 + $0x298] sm:$0xff]  ;;  %v8337_v54 = vld [vmem:[#allocation3 + $0x48] sm:$0xff] }
 0x264   :  { %3378 = vmatpush.msra.mxu1 %v1719_v13  ;;  %3401 = vmatpush.msra.mxu2 %v280_v63  ;;  %v478_v10 = vld [vmem:[#allocation6 + $0xb98] sm:$0xff]  ;;  %v2240_v34 = vadd.f32 %v8112_v14, %v2217_v55  ;;  %v460_v13 = vld [vmem:[#allocation6 + $0xb08] sm:$0xff]  ;;  %v1305_v63 = vld [vmem:[#allocation6 + $0x2570] sm:$0xff] }
 0x265   :  { %3424 = vmatpush.msra.mxu3 %v568_v11  ;;  %4752 = vrot.lane.b32.xlu2 %v8301_v9, %s7852_s2  ;;  %v1593_v11 = vld [vmem:[#allocation6 + $0x2e70] sm:$0xff]  ;;  %v154_v14 = vld [vmem:[#allocation6 + $0x178] sm:$0xff] }
 0x266   :  { %3356 = vmatpush.msra.mxu0 %v1413_v43  ;;  %3379 = vmatpush.msra.mxu1 %v1701_v16  ;;  %v2263_v49 = vadd.f32 %v8114_v53, %v2240_v34  ;;  %v442_v43 = vld [vmem:[#allocation6 + $0xa78] sm:$0xff]  ;;  %v1287_v16 = vld [vmem:[#allocation6 + $0x24e0] sm:$0xff]  ;;  %v1269_v53 = vld [vmem:[#allocation6 + $0x2450] sm:$0xff] }
 0x267   :  { %3402 = vmatpush.msra.mxu2 %v262_v58  ;;  %3425 = vmatpush.msra.mxu3 %v550_v1  ;;  %v136_v58 = vld [vmem:[#allocation6 + $0xe8] sm:$0xff]  ;;  %v1198_v55 = vld [vmem:[#allocation6 + $0x2218] sm:$0xff] }
 0x268   :  { %3273 = vmatmul.f32.vlgmr.msrb.gmra.mxu0 %v8224_v62  ;;  %3380 = vmatpush.msra.mxu1 %v1683_v6  ;;  %v424_v1 = vld [vmem:[#allocation6 + $0x9e8] sm:$0xff]  ;;  %v8330_v27 = vadd.f32 %v8119_v7, %v2263_v49  ;;  %v118_v6 = vld [vmem:[#allocation6 + $0x58] sm:$0xff] }
 0x269   :  { %3357 = vmatpush.msra.mxu0 %v1395_v23  ;;  %3403 = vmatpush.msra.mxu2 %v244_v42  ;;  %v406_v23 = vld [vmem:[#allocation6 + $0x958] sm:$0xff]  ;;  %v8334_v42 = vld [vmem:[#allocation3 + $0x40] sm:$0xff]  ;;  %v1252_v7 = vld [vmem:[#allocation6 + $0x23c8] sm:$0xff] }
 0x26a   :  { %3426 = vmatpush.msra.mxu3 %v532_v40  ;;  %3296 = vmatmul.f32.vlgmr.msrb.gmra.mxu1 %v8230_v59  ;;  %v1540_v40 = vld [vmem:[#allocation6 + $0x2cc8] sm:$0xff] }
 0x26b   :  { %3358 = vmatpush.msra.mxu0 %v1377_v57  ;;  %3381 = vmatpush.msra.mxu1 %v1665_v44  ;;  %v946_v57 = vld [vmem:[#allocation6 + $0x1a38] sm:$0xff]  ;;  %v1468_v34 = vld [vmem:[#allocation6 + $0x2a88] sm:$0xff] }
 0x26c   :  { %3404 = vmatpush.msra.mxu2 %v226_v4  ;;  %3427 = vmatpush.msra.mxu3 %v514_v17  ;;  %v1234_v44 = vld [vmem:[#allocation6 + $0x2338] sm:$0xff]  ;;  %v928_v17 = vld [vmem:[#allocation6 + $0x19a8] sm:$0xff] }
 0x26d   :  { %3359 = vmatpush.msra.mxu0 %v1359_v24  ;;  %3382 = vmatpush.msra.mxu1 %v1647_v15  ;;  %v1810_v4 = vld [vmem:[#allocation6 + $0x3538] sm:$0xff]  ;;  %v1216_v24 = vld [vmem:[#allocation6 + $0x22a8] sm:$0xff] }
 0x26e   :  { %3405 = vmatpush.msra.mxu2 %v208_v12  ;;  %3428 = vmatpush.msra.mxu3 %v496_v37  ;;  %v1504_v15 = vld [vmem:[#allocation6 + $0x2ba8] sm:$0xff]  ;;  %v910_v37 = vld [vmem:[#allocation6 + $0x1918] sm:$0xff] }
 0x26f   :  { %4750 = vrot.lane.b32.xlu2 %v8317_v51, %s7852_s2  ;;  %4780 = vrot.lane.b32.xlu0 %v8313_v28, %s7852_s2  ;;  %v1792_v12 = vld [vmem:[#allocation6 + $0x34a8] sm:$0xff] }
 0x270   :  { %3319 = vmatmul.f32.vlgmr.msrb.gmra.mxu2 %v8252_v19  ;;  %3360 = vmatpush.msra.mxu0 %v1341_v8  ;;  %v1486_v8 = vld [vmem:[#allocation6 + $0x2b18] sm:$0xff]  ;;  %v856_v49 = vld [vmem:[#allocation6 + $0x1768] sm:$0xff] }
 0x271   :  { %3383 = vmatpush.msra.mxu1 %v1629_v29  ;;  %3406 = vmatpush.msra.mxu2 %v190_v56  ;;  %v1774_v29 = vld [vmem:[#allocation6 + $0x3418] sm:$0xff]  ;;  %v892_v56 = vld [vmem:[#allocation6 + $0x1888] sm:$0xff] }
 0x272   :  { %3429 = vmatpush.msra.mxu3 %v478_v10  ;;  %3276 = vmatmul.f32.gmra.mxu0 %v8237_v38  ;;  %v1180_v10 = vld [vmem:[#allocation6 + $0x2188] sm:$0xff] }
 0x273   :  { %3342 = vmatmul.f32.vlgmr.msrb.gmra.mxu3 %v8259_v47  ;;  %3361 = vmatpush.msra.mxu0 %v1323_v39  ;;  %v1756_v39 = vld [vmem:[#allocation6 + $0x3388] sm:$0xff] }
 0x274   :  { %3384 = vmatpush.msra.mxu1 %v1611_v52  ;;  %3407 = vmatpush.msra.mxu2 %v172_v35  ;;  %v8342_v52 = vld [vmem:[#allocation3 + $0x50] sm:$0xff]  ;;  %v874_v35 = vld [vmem:[#allocation6 + $0x17f8] sm:$0xff] }
 0x275   :  { %3430 = vmatpush.msra.mxu3 %v460_v13  ;;  %3299 = vmatmul.f32.gmra.mxu1 %v8240_v32  ;;  %v1162_v13 = vld [vmem:[#allocation6 + $0x20f8] sm:$0xff] }
 0x276   :  { %3362 = vmatpush.msra.mxu0 %v1305_v63  ;;  %3385 = vmatpush.msra.mxu1 %v1593_v11  ;;  %v1450_v63 = vld [vmem:[#allocation6 + $0x29f8] sm:$0xff] }
 0x277   :  { %3408 = vmatpush.msra.mxu2 %v154_v14  ;;  %3431 = vmatpush.msra.mxu3 %v442_v43  ;;  %v1738_v11 = vld [vmem:[#allocation6 + $0x32f8] sm:$0xff]  ;;  %v1144_v43 = vld [vmem:[#allocation6 + $0x2068] sm:$0xff] }
 0x278   :  { %3363 = vmatpush.msra.mxu0 %v1287_v16  ;;  %3386 = vmatpush.msra.mxu1 %v1575_v20  ;;  %v8345_v14 = vld [vmem:[#allocation3 + $0x58] sm:$0xff]  ;;  %v1432_v16 = vld [vmem:[#allocation6 + $0x2968] sm:$0xff] }
 0x279   :  { %3409 = vmatpush.msra.mxu2 %v136_v58  ;;  %3432 = vmatpush.msra.mxu3 %v424_v1  ;;  %v1720_v20 = vld [vmem:[#allocation6 + $0x3268] sm:$0xff]  ;;  %v838_v58 = vld [vmem:[#allocation6 + $0x16d8] sm:$0xff] }
 0x27a   :  { %5014 = vrot.lane.b32.xlu0 %v8330_v27, %s7852_s2  ;;  %3322 = vmatmul.f32.gmra.mxu2 %v8334_v42  ;;  %v1126_v1 = vld [vmem:[#allocation6 + $0x1fd8] sm:$0xff] }
 0x27b   :  { %3364 = vmatpush.msra.mxu0 %v1269_v53  ;;  %3387 = vmatpush.msra.mxu1 %v1557_v31  ;;  %v1414_v53 = vld [vmem:[#allocation6 + $0x28d8] sm:$0xff]  ;;  %v2998_v31 = vpop.f32.mrf.mxu0 }
 0x27c   :  { %3410 = vmatpush.msra.mxu2 %v118_v6  ;;  %3433 = vmatpush.msra.mxu3 %v406_v23  ;;  %v1702_v6 = vld [vmem:[#allocation6 + $0x31d8] sm:$0xff]  ;;  %v8348_v23 = vld [vmem:[#allocation8 + $0x8] sm:$0xff] }
 0x27d   :  { %3345 = vmatmul.f32.gmra.mxu3 %v8337_v54  ;;  %3365 = vmatmul.f32.vlgmr.msra.gmra.mxu0 %v8248_v45 }
 0x27e   :  { %3441 = vmatpush.msrb.mxu0 %v964_v61  ;;  %3464 = vmatpush.msrb.mxu1 %v1252_v7  ;;  %v820_v61 = vld [vmem:[#allocation6 + $0x1648] sm:$0xff] }
 0x27f   :  { %3487 = vmatpush.msrb.mxu2 %v1540_v40  ;;  %3510 = vmatpush.msrb.mxu3 %v1828_v26  ;;  %v1108_v7 = vld [vmem:[#allocation6 + $0x1f48] sm:$0xff] }
 0x280   :  { %3388 = vmatmul.f32.vlgmr.msra.gmra.mxu1 %v8255_v30  ;;  %3442 = vmatpush.msrb.mxu0 %v946_v57  ;;  %v1396_v40 = vld [vmem:[#allocation6 + $0x2848] sm:$0xff]  ;;  %v1849_v57 = vperm.slane %v8348_v23, 0 }
 0x281   :  { %3465 = vmatpush.msrb.mxu1 %v1234_v44  ;;  %3488 = vmatpush.msrb.mxu2 %v1522_v2  ;;  %v1684_v26 = vld [vmem:[#allocation6 + $0x3148] sm:$0xff]  ;;  %v3021_v44 = vpop.f32.mrf.mxu1  ;;  %v802_v2 = vld [vmem:[#allocation6 + $0x15b8] sm:$0xff] }
 0x282   :  { %3511 = vmatpush.msrb.mxu3 %v1810_v4  ;;  %3443 = vmatpush.msrb.mxu0 %v928_v17  ;;  %v1090_v4 = vld [vmem:[#allocation6 + $0x1eb8] sm:$0xff] }
 0x283   :  { %3466 = vmatpush.msrb.mxu1 %v1216_v24  ;;  %3489 = vmatpush.msrb.mxu2 %v1504_v15  ;;  %v1378_v17 = vld [vmem:[#allocation6 + $0x27b8] sm:$0xff]  ;;  %v784_v15 = vld [vmem:[#allocation6 + $0x1528] sm:$0xff] }
 0x284   :  { %3512 = vmatpush.msrb.mxu3 %v1792_v12  ;;  %3444 = vmatpush.msrb.mxu0 %v910_v37  ;;  %v1666_v24 = vld [vmem:[#allocation6 + $0x30b8] sm:$0xff]  ;;  %v1072_v12 = vld [vmem:[#allocation6 + $0x1e28] sm:$0xff] }
 0x285   :  { %3467 = vmatpush.msrb.mxu1 %v1198_v55  ;;  %3490 = vmatpush.msrb.mxu2 %v1486_v8  ;;  %v1360_v37 = vld [vmem:[#allocation6 + $0x2728] sm:$0xff]  ;;  %v2999_v55 = vadd.f32 %v2998_v31, %v1849_v57  ;;  %v766_v8 = vld [vmem:[#allocation6 + $0x1498] sm:$0xff] }
 0x286   :  { %3513 = vmatpush.msrb.mxu3 %v1774_v29  ;;  %3368 = vmatmul.f32.gmra.mxu0 %v8342_v52  ;;  %v1054_v29 = vld [vmem:[#allocation6 + $0x1d98] sm:$0xff]  ;;  %v1000_v31 = vld [vmem:[#allocation6 + $0x1be8] sm:$0xff] }
 0x287   :  { %3445 = vmatpush.msrb.mxu0 %v892_v56  ;;  %3468 = vmatpush.msrb.mxu1 %v1180_v10  ;;  %v1342_v56 = vld [vmem:[#allocation6 + $0x2698] sm:$0xff] }
 0x288   :  { %3491 = vmatpush.msrb.mxu2 %v1468_v34  ;;  %3514 = vmatpush.msrb.mxu3 %v1756_v39  ;;  %v1630_v10 = vld [vmem:[#allocation6 + $0x2f98] sm:$0xff]  ;;  %v3001_v34 = vpop.f32.mrf.mxu0  ;;  %v748_v39 = vld [vmem:[#allocation6 + $0x1408] sm:$0xff] }
 0x289   :  { %3391 = vmatmul.f32.gmra.mxu1 %v8345_v14  ;;  %3446 = vmatpush.msrb.mxu0 %v874_v35  ;;  %v3022_v35 = vadd.f32 %v3021_v44, %v2999_v55  ;;  %v1270_v44 = vld [vmem:[#allocation6 + $0x2458] sm:$0xff]  ;;  %v659_v55 = vld [vmem:[#allocation6 + $0x1140] sm:$0xff] }
 0x28a   :  { %3469 = vmatpush.msrb.mxu1 %v1162_v13  ;;  %3492 = vmatpush.msrb.mxu2 %v1450_v63  ;;  %v1324_v13 = vld [vmem:[#allocation6 + $0x2608] sm:$0xff] }
 0x28b   :  { %3515 = vmatpush.msrb.mxu3 %v1738_v11  ;;  %3447 = vmatpush.msrb.mxu0 %v856_v49  ;;  %v1612_v63 = vld [vmem:[#allocation6 + $0x2f08] sm:$0xff]  ;;  %v3044_v11 = vpop.f32.mrf.mxu2  ;;  %v730_v49 = vld [vmem:[#allocation6 + $0x1378] sm:$0xff] }
 0x28c   :  { %3470 = vmatpush.msrb.mxu1 %v1144_v43  ;;  %3493 = vmatpush.msrb.mxu2 %v1432_v16  ;;  %v3024_v43 = vpop.f32.mrf.mxu1  ;;  %v1018_v16 = vld [vmem:[#allocation6 + $0x1c78] sm:$0xff] }
 0x28d   :  { %3516 = vmatpush.msrb.mxu3 %v1720_v20  ;;  %3448 = vmatpush.msrb.mxu0 %v838_v58  ;;  %v1306_v20 = vld [vmem:[#allocation6 + $0x2578] sm:$0xff] }
 0x28e   :  { %3471 = vmatpush.msrb.mxu1 %v1126_v1  ;;  %3494 = vmatpush.msrb.mxu2 %v1414_v53  ;;  %v1594_v58 = vld [vmem:[#allocation6 + $0x2e78] sm:$0xff]  ;;  %v712_v1 = vld [vmem:[#allocation6 + $0x12e8] sm:$0xff]  ;;  %v3045_v53 = vadd.f32 %v3044_v11, %v3022_v35  ;;  %v335_v11 = vld [vmem:[#allocation6 + $0x720] sm:$0xff] }
 0x28f   :  { %3517 = vmatpush.msrb.mxu3 %v1702_v6  ;;  %3411 = vmatmul.f32.vlgmr.msra.gmra.mxu2 %v8224_v62  ;;  %v1648_v62 = vld [vmem:[#allocation6 + $0x3028] sm:$0xff] }
 0x290   :  { %3449 = vmatpush.msrb.mxu0 %v820_v61  ;;  %3472 = vmatpush.msrb.mxu1 %v1108_v7  ;;  %v1288_v6 = vld [vmem:[#allocation6 + $0x24e8] sm:$0xff]  ;;  %v3067_v61 = vpop.f32.mrf.mxu3  ;;  %v3002_v7 = vadd.f32 %v3001_v34, %v1849_v57  ;;  %v677_v57 = vld [vmem:[#allocation6 + $0x11d0] sm:$0xff] }
 0x291   :  { %3495 = vmatpush.msrb.mxu2 %v1396_v40  ;;  %3518 = vmatpush.msrb.mxu3 %v1684_v26  ;;  %v694_v40 = vld [vmem:[#allocation6 + $0x1258] sm:$0xff] }
 0x292   :  { %3434 = vmatmul.f32.vlgmr.msra.gmra.mxu3 %v8230_v59  ;;  %3450 = vmatpush.msrb.mxu0 %v802_v2  ;;  %v1036_v59 = vld [vmem:[#allocation6 + $0x1d08] sm:$0xff]  ;;  %v982_v26 = vld [vmem:[#allocation6 + $0x1b58] sm:$0xff]  ;;  %v2174_v2 = vadd.f32 %v8104_v21, %v1843_v50  ;;  %v371_v50 = vld [vmem:[#allocation6 + $0x840] sm:$0xff] }
 0x293   :  { %3473 = vmatpush.msrb.mxu1 %v1090_v4  ;;  %3496 = vmatpush.msrb.mxu2 %v1378_v17  ;;  %v3068_v4 = vadd.f32 %v3067_v61, %v3045_v53  ;;  %v389_v17 = vld [vmem:[#allocation6 + $0x8d0] sm:$0xff]  ;;  %v3047_v46 = vpop.f32.mrf.mxu2  ;;  %v587_v61 = vld [vmem:[#allocation6 + $0xf00] sm:$0xff] }
 0x294   :  { %3519 = vmatpush.msrb.mxu3 %v1666_v24  ;;  %3451 = vmatpush.msrb.mxu0 %v784_v15  ;;  %v3090_v24 = vpop.f32.mrf.mxu0  ;;  %v3025_v15 = vadd.f32 %v3024_v43, %v3002_v7  ;;  %v2197_v21 = vadd.f32 %v8106_v33, %v2174_v2  ;;  %v3113_v34 = vpop.f32.mrf.mxu1  ;;  %v911_v43 = vld [vmem:[#allocation6 + $0x1920] sm:$0xff] }
 0x295   :  { %3474 = vmatpush.msrb.mxu1 %v1072_v12  ;;  %3497 = vmatpush.msrb.mxu2 %v1360_v37  ;;  %v965_v12 = vld [vmem:[#allocation6 + $0x1ad0] sm:$0xff] }
 0x296   :  { %3520 = vmatpush.msrb.mxu3 %v1648_v62  ;;  %3452 = vmatpush.msrb.mxu0 %v766_v8  ;;  %v1253_v37 = vld [vmem:[#allocation6 + $0x23d0] sm:$0xff]  ;;  %v8360_v62 = vld [vmem:[#allocation8] sm:$0xff]  ;;  %v3048_v33 = vadd.f32 %v3047_v46, %v3025_v15 }
 0x297   :  { %3475 = vmatpush.msrb.mxu1 %v1054_v29  ;;  %3498 = vmatpush.msrb.mxu2 %v1342_v56  ;;  %v1844_v8 = vperm.slane %v8360_v62, 3  ;;  %v3091_v29 = vadd.f32 %v3090_v24, %v3068_v4  ;;  %v947_v56 = vld [vmem:[#allocation6 + $0x1a40] sm:$0xff]  ;;  %v245_v46 = vld [vmem:[#allocation6 + $0x450] sm:$0xff] }
 0x298   :  { %3521 = vmatpush.msrb.mxu3 %v1630_v10  ;;  %3414 = vmatmul.f32.gmra.mxu2 %v8237_v38  ;;  %v1576_v38 = vld [vmem:[#allocation6 + $0x2de8] sm:$0xff]  ;;  %v1235_v10 = vld [vmem:[#allocation6 + $0x2340] sm:$0xff]  ;;  %v3070_v35 = vpop.f32.mrf.mxu3 }
 0x299   :  { %3453 = vmatpush.msrb.mxu0 %v748_v39  ;;  %3476 = vmatpush.msrb.mxu1 %v1036_v59  ;;  %v641_v39 = vld [vmem:[#allocation6 + $0x10b0] sm:$0xff]  ;;  %v839_v15 = vld [vmem:[#allocation6 + $0x16e0] sm:$0xff] }
 0x29a   :  { %3499 = vmatpush.msrb.mxu2 %v1324_v13  ;;  %3522 = vmatpush.msrb.mxu3 %v1612_v63  ;;  %v929_v59 = vld [vmem:[#allocation6 + $0x19b0] sm:$0xff]  ;;  %v2220_v13 = vadd.f32 %v8116_v3, %v2197_v21 }
 0x29b   :  { %3437 = vmatmul.f32.gmra.mxu3 %v8240_v32  ;;  %3454 = vmatpush.msrb.mxu0 %v730_v49  ;;  %v1558_v32 = vld [vmem:[#allocation6 + $0x2d58] sm:$0xff]  ;;  %v1217_v63 = vld [vmem:[#allocation6 + $0x22b0] sm:$0xff]  ;;  %v2309_v49 = vadd.f32 %v8128_v18, %v1844_v8 }
 0x29c   :  { %3477 = vmatpush.msrb.mxu1 %v1018_v16  ;;  %3500 = vmatpush.msrb.mxu2 %v1306_v20  ;;  %v1199_v16 = vld [vmem:[#allocation6 + $0x2220] sm:$0xff]  ;;  %v3071_v20 = vadd.f32 %v3070_v35, %v3048_v33  ;;  %v317_v3 = vld [vmem:[#allocation6 + $0x690] sm:$0xff]  ;;  %v2243_v53 = vadd.f32 %v8121_v22, %v2220_v13  ;;  %v3116_v22 = vpop.f32.mrf.mxu1 }
 0x29d   :  { %3523 = vmatpush.msrb.mxu3 %v1594_v58  ;;  %3455 = vmatpush.msrb.mxu0 %v712_v1  ;;  %v605_v58 = vld [vmem:[#allocation6 + $0xf90] sm:$0xff]  ;;  %v3093_v1 = vpop.f32.mrf.mxu0 }
 0x29e   :  { %3478 = vmatpush.msrb.mxu1 %v1000_v31  ;;  %3501 = vmatpush.msrb.mxu2 %v1288_v6  ;;  %v893_v18 = vld [vmem:[#allocation6 + $0x1890] sm:$0xff]  ;;  %v299_v6 = vld [vmem:[#allocation6 + $0x600] sm:$0xff]  ;;  %v3094_v7 = vadd.f32 %v3093_v1, %v3071_v20  ;;  %v2266_v2 = vadd.f32 %v8125_v48, %v2243_v53  ;;  %v9406_v1 = vld [vmem:[#allocation25_spill] sm:$0xff] }
 0x29f   :  { %3524 = vmatpush.msrb.mxu3 %v1576_v38  ;;  %3456 = vmatpush.msrb.mxu0 %v694_v40  ;;  %v1181_v31 = vld [vmem:[#allocation6 + $0x2190] sm:$0xff]  ;;  %v875_v38 = vld [vmem:[#allocation6 + $0x1800] sm:$0xff] }
 0x2a0   :  { %3479 = vmatpush.msrb.mxu1 %v982_v26  ;;  %3502 = vmatpush.msrb.mxu2 %v1270_v44  ;;  %v1163_v40 = vld [vmem:[#allocation6 + $0x2100] sm:$0xff]  ;;  %v281_v26 = vld [vmem:[#allocation6 + $0x570] sm:$0xff]  ;;  %v8378_v24 = vadd.f32 %v3116_v22, %v3094_v7 }
 0x2a1   :  { %3525 = vmatpush.msrb.mxu3 %v1558_v32  ;;  %3503 = vmatmul.f32.vlgmr.msrb.gmra.mxu2 %v8248_v45  ;;  %v353_v45 = vld [vmem:[#allocation6 + $0x7b0] sm:$0xff]  ;;  %v1055_v20 = vld [vmem:[#allocation6 + $0x1da0] sm:$0xff] }
 0x2a2   :  { %3533 = vmatpush.msra.mxu0 %v389_v17  ;;  %3556 = vmatpush.msra.mxu1 %v677_v57  ;;  %v569_v44 = vld [vmem:[#allocation6 + $0xe70] sm:$0xff]  ;;  %v263_v17 = vld [vmem:[#allocation6 + $0x4e0] sm:$0xff]  ;;  %v3136_v33 = vpop.f32.mrf.mxu2 }
 0x2a3   :  { %3579 = vmatpush.msra.mxu2 %v965_v12  ;;  %3602 = vmatpush.msra.mxu3 %v1253_v37  ;;  %v1145_v32 = vld [vmem:[#allocation6 + $0x2070] sm:$0xff]  ;;  %v551_v57 = vld [vmem:[#allocation6 + $0xde0] sm:$0xff] }
 0x2a4   :  { %3457 = vmatmul.f32.vlgmr.msrb.gmra.mxu0 %v8252_v19  ;;  %3526 = vmatmul.f32.vlgmr.msrb.gmra.mxu3 %v8255_v30  ;;  %v8369_v19 = vadd.f32 %v3113_v34, %v3091_v29  ;;  %v623_v30 = vld [vmem:[#allocation6 + $0x1020] sm:$0xff]  ;;  %v533_v21 = vld [vmem:[#allocation6 + $0xd50] sm:$0xff] }
 0x2a5   :  { %3534 = vmatpush.msra.mxu0 %v371_v50  ;;  %3557 = vmatpush.msra.mxu1 %v659_v55  ;;  %v1127_v12 = vld [vmem:[#allocation6 + $0x1fe0] sm:$0xff]  ;;  %v821_v55 = vld [vmem:[#allocation6 + $0x1650] sm:$0xff] }
 0x2a6   :  { %3580 = vmatpush.msra.mxu2 %v947_v56  ;;  %3603 = vmatpush.msra.mxu3 %v1235_v10  ;;  %v9403_v37 = vld [vmem:[#allocation18_spill] sm:$0xff]  ;;  %v1109_v29 = vld [vmem:[#allocation6 + $0x1f50] sm:$0xff] }
 0x2a7   :  { %3480 = vmatmul.f32.vlgmr.msrb.gmra.mxu1 %v8259_v47  ;;  %3535 = vmatpush.msra.mxu0 %v353_v45  ;;  %v2332_v47 = vadd.f32 %v8135_v5, %v2309_v49  ;;  %v857_v5 = vld [vmem:[#allocation6 + $0x1770] sm:$0xff]  ;;  %v8381_v48 = vadd.f32 %v9403_v37, %v2266_v2  ;;  %v227_v56 = vld [vmem:[#allocation6 + $0x3c0] sm:$0xff]  ;;  %v1850_v49 = vperm.slane %v8348_v23, 1 }
 0x2a8   :  { %3558 = vmatpush.msra.mxu1 %v641_v39  ;;  %3581 = vmatpush.msra.mxu2 %v929_v59  ;;  %v515_v10 = vld [vmem:[#allocation6 + $0xcc0] sm:$0xff]  ;;  %v209_v39 = vld [vmem:[#allocation6 + $0x330] sm:$0xff] }
 0x2a9   :  { %3604 = vmatpush.msra.mxu3 %v1217_v63  ;;  %3536 = vmatpush.msra.mxu0 %v335_v11  ;;  %v2355_v4 = vadd.f32 %v8137_v60, %v2332_v47  ;;  %v9404_v60 = vld [vmem:[#allocation20_spill] sm:$0xff]  ;;  %v803_v34 = vld [vmem:[#allocation6 + $0x15c0] sm:$0xff]  ;;  %v3137_v47 = vadd.f32 %v3136_v33, %v1850_v49 }
 0x2aa   :  { %3559 = vmatpush.msra.mxu1 %v623_v30  ;;  %3582 = vmatpush.msra.mxu2 %v911_v43  ;;  %v1091_v45 = vld [vmem:[#allocation6 + $0x1ec0] sm:$0xff]  ;;  %v497_v59 = vld [vmem:[#allocation6 + $0xc30] sm:$0xff] }
 0x2ab   :  { %3605 = vmatpush.msra.mxu3 %v1199_v16  ;;  %5016 = vrot.lane.b32.xlu2 %v8369_v19, %s7852_s2  ;;  %v2378_v50 = vadd.f32 %v9404_v60, %v2355_v4  ;;  %v9405_v35 = vld [vmem:[#allocation24_spill] sm:$0xff]  ;;  %v191_v30 = vld [vmem:[#allocation6 + $0x2a0] sm:$0xff]  ;;  %v3139_v2 = vpop.f32.mrf.mxu2 }
 0x2ac   :  { %3537 = vmatpush.msra.mxu0 %v317_v3  ;;  %3560 = vmatpush.msra.mxu1 %v605_v58  ;;  %v785_v63 = vld [vmem:[#allocation6 + $0x1530] sm:$0xff]  ;;  %v479_v43 = vld [vmem:[#allocation6 + $0xba0] sm:$0xff]  ;;  %v3159_v3 = vpop.f32.mrf.mxu3 }
 0x2ad   :  { %3583 = vmatpush.msra.mxu2 %v893_v18  ;;  %3606 = vmatpush.msra.mxu3 %v1181_v31  ;;  %v2401_v13 = vadd.f32 %v9405_v35, %v2378_v50  ;;  %v1073_v11 = vld [vmem:[#allocation6 + $0x1e30] sm:$0xff]  ;;  %v767_v16 = vld [vmem:[#allocation6 + $0x14a0] sm:$0xff]  ;;  %v678_v50 = vld [vmem:[#allocation6 + $0x11d8] sm:$0xff] }
 0x2ae   :  { %3538 = vmatpush.msra.mxu0 %v299_v6  ;;  %3561 = vmatpush.msra.mxu1 %v587_v61  ;;  %v173_v58 = vld [vmem:[#allocation6 + $0x210] sm:$0xff]  ;;  %v155_v61 = vld [vmem:[#allocation6 + $0x180] sm:$0xff]  ;;  %v354_v35 = vld [vmem:[#allocation6 + $0x7b8] sm:$0xff] }
 0x2af   :  { %3584 = vmatpush.msra.mxu2 %v875_v38  ;;  %3607 = vmatpush.msra.mxu3 %v1163_v40  ;;  %v8391_v53 = vadd.f32 %v9406_v1, %v2401_v13  ;;  %v461_v18 = vld [vmem:[#allocation6 + $0xb10] sm:$0xff]  ;;  %v443_v7 = vld [vmem:[#allocation6 + $0xa80] sm:$0xff]  ;;  %v642_v13 = vld [vmem:[#allocation6 + $0x10b8] sm:$0xff] }
 0x2b0   :  { %3539 = vmatpush.msra.mxu0 %v281_v26  ;;  %3562 = vmatpush.msra.mxu1 %v569_v44  ;;  %v749_v31 = vld [vmem:[#allocation6 + $0x1410] sm:$0xff]  ;;  %v731_v38 = vld [vmem:[#allocation6 + $0x1380] sm:$0xff] }
 0x2b1   :  { %3585 = vmatpush.msra.mxu2 %v857_v5  ;;  %3608 = vmatpush.msra.mxu3 %v1145_v32  ;;  %v1037_v6 = vld [vmem:[#allocation6 + $0x1d10] sm:$0xff]  ;;  %v1019_v40 = vld [vmem:[#allocation6 + $0x1c80] sm:$0xff]  ;;  %v3160_v5 = vadd.f32 %v3159_v3, %v3137_v47  ;;  %v318_v47 = vld [vmem:[#allocation6 + $0x698] sm:$0xff] }
 0x2b2   :  { %3540 = vmatpush.msra.mxu0 %v263_v17  ;;  %3563 = vmatpush.msra.mxu1 %v551_v57  ;;  %v137_v22 = vld [vmem:[#allocation6 + $0xf0] sm:$0xff]  ;;  %v119_v4 = vld [vmem:[#allocation6 + $0x60] sm:$0xff] }
 0x2b3   :  { %3586 = vmatpush.msra.mxu2 %v839_v15  ;;  %3609 = vmatpush.msra.mxu3 %v1127_v12  ;;  %v425_v26 = vld [vmem:[#allocation6 + $0x9f0] sm:$0xff]  ;;  %v407_v17 = vld [vmem:[#allocation6 + $0x960] sm:$0xff]  ;;  %v3182_v15 = vpop.f32.mrf.mxu0 }
 0x2b4   :  { %5042 = vrot.lane.b32.xlu2 %v8381_v48, %s7852_s2  ;;  %5044 = vrot.lane.b32.xlu1 %v8378_v24, %s7852_s2  ;;  %v713_v44 = vld [vmem:[#allocation6 + $0x12f0] sm:$0xff]  ;;  %v695_v57 = vld [vmem:[#allocation6 + $0x1260] sm:$0xff]  ;;  %v3162_v60 = vpop.f32.mrf.mxu3  ;;  %v3228_v3 = vpop.f32.mrf.mxu2 }
 0x2b5   :  { %3541 = vmatpush.msra.mxu0 %v245_v46  ;;  %3564 = vmatpush.msra.mxu1 %v533_v21  ;;  %v1001_v32 = vld [vmem:[#allocation6 + $0x1bf0] sm:$0xff]  ;;  %v983_v12 = vld [vmem:[#allocation6 + $0x1b60] sm:$0xff]  ;;  %v390_v21 = vld [vmem:[#allocation6 + $0x8d8] sm:$0xff] }
 0x2b6   :  { %3587 = vmatpush.msra.mxu2 %v821_v55  ;;  %3610 = vmatpush.msra.mxu3 %v1109_v29  ;;  %v1541_v37 = vld [vmem:[#allocation6 + $0x2cd0] sm:$0xff]  ;;  %v1523_v55 = vld [vmem:[#allocation6 + $0x2c40] sm:$0xff]  ;;  %v3183_v29 = vadd.f32 %v3182_v15, %v3160_v5 }
 0x2b7   :  { %3542 = vmatpush.msra.mxu0 %v227_v56  ;;  %3565 = vmatpush.msra.mxu1 %v515_v10  ;;  %v1829_v46 = vld [vmem:[#allocation6 + $0x35d0] sm:$0xff]  ;;  %v1811_v56 = vld [vmem:[#allocation6 + $0x3540] sm:$0xff]  ;;  %v372_v10 = vld [vmem:[#allocation6 + $0x848] sm:$0xff] }
 0x2b8   :  { %3588 = vmatpush.msra.mxu2 %v803_v34  ;;  %3611 = vmatpush.msra.mxu3 %v1091_v45  ;;  %v3205_v34 = vpop.f32.mrf.mxu1  ;;  %v660_v45 = vld [vmem:[#allocation6 + $0x1148] sm:$0xff]  ;;  %v1505_v33 = vld [vmem:[#allocation6 + $0x2bb0] sm:$0xff] }
 0x2b9   :  { %3543 = vmatpush.msra.mxu0 %v209_v39  ;;  %3566 = vmatpush.msra.mxu1 %v497_v59  ;;  %v3140_v39 = vadd.f32 %v3139_v2, %v1850_v49  ;;  %v1793_v59 = vld [vmem:[#allocation6 + $0x34b0] sm:$0xff]  ;;  %v624_v49 = vld [vmem:[#allocation6 + $0x1028] sm:$0xff] }
 0x2ba   :  { %3589 = vmatpush.msra.mxu2 %v785_v63  ;;  %3612 = vmatpush.msra.mxu3 %v1073_v11  ;;  %v3206_v63 = vadd.f32 %v3205_v34, %v3183_v29  ;;  %v1487_v11 = vld [vmem:[#allocation6 + $0x2b20] sm:$0xff]  ;;  %v1469_v1 = vld [vmem:[#allocation6 + $0x2a90] sm:$0xff] }
 0x2bb   :  { %3544 = vmatpush.msra.mxu0 %v191_v30  ;;  %3567 = vmatpush.msra.mxu1 %v479_v43  ;;  %v9407_v30 = vld [vmem:[#allocation19_spill] sm:$0xff]  ;;  %v1433_v5 = vld [vmem:[#allocation6 + $0x2970] sm:$0xff]  ;;  %v9410_v29 = vld [vmem:[#allocation26_spill] sm:$0xff] }
 0x2bc   :  { %3590 = vmatpush.msra.mxu2 %v767_v16  ;;  %3613 = vmatpush.msra.mxu3 %v1055_v20  ;;  %v2312_v43 = vadd.f32 %v9407_v30, %v1844_v8  ;;  %v1775_v16 = vld [vmem:[#allocation6 + $0x3420] sm:$0xff]  ;;  %v336_v20 = vld [vmem:[#allocation6 + $0x728] sm:$0xff]  ;;  %v9408_v8 = vld [vmem:[#allocation21_spill] sm:$0xff] }
 0x2bd   :  { %5278 = vrot.lane.b32.xlu1 %v8391_v53, %s7852_s2  ;;  %3545 = vmatpush.msra.mxu0 %v173_v58  ;;  %v3163_v58 = vadd.f32 %v3162_v60, %v3140_v39  ;;  %v1397_v39 = vld [vmem:[#allocation6 + $0x2850] sm:$0xff]  ;;  %v9412_v30 = vld [vmem:[#allocation27_spill] sm:$0xff] }
 0x2be   :  { %3568 = vmatpush.msra.mxu1 %v461_v18  ;;  %3591 = vmatpush.msra.mxu2 %v749_v31  ;;  %v1757_v18 = vld [vmem:[#allocation6 + $0x3390] sm:$0xff]  ;;  %v3229_v31 = vadd.f32 %v3228_v3, %v3206_v63  ;;  %v8416_v63 = vld [vmem:[#allocation3] sm:$0xff] }
 0x2bf   :  { %3614 = vmatpush.msra.mxu3 %v1037_v6  ;;  %3546 = vmatpush.msra.mxu0 %v155_v61  ;;  %v606_v6 = vld [vmem:[#allocation6 + $0xf98] sm:$0xff]  ;;  %v3185_v61 = vpop.f32.mrf.mxu0  ;;  %v3231_v34 = vpop.f32.mrf.mxu2  ;;  %v1667_v3 = vld [vmem:[#allocation6 + $0x30c0] sm:$0xff] }
 0x2c0   :  { %3569 = vmatpush.msra.mxu1 %v443_v7  ;;  %3592 = vmatpush.msra.mxu2 %v731_v38  ;;  %v2335_v7 = vadd.f32 %v9408_v8, %v2312_v43  ;;  %v3251_v38 = vpop.f32.mrf.mxu3  ;;  %v3186_v2 = vadd.f32 %v3185_v61, %v3163_v58  ;;  %v3208_v15 = vpop.f32.mrf.mxu1  ;;  %v210_v8 = vld [vmem:[#allocation6 + $0x338] sm:$0xff] }
 0x2c1   :  { %3615 = vmatpush.msra.mxu3 %v1019_v40  ;;  %3547 = vmatpush.msra.mxu0 %v137_v22  ;;  %v1451_v40 = vld [vmem:[#allocation6 + $0x2a00] sm:$0xff] }
 0x2c2   :  { %3570 = vmatpush.msra.mxu1 %v425_v26  ;;  %3593 = vmatpush.msra.mxu2 %v713_v44  ;;  %v1739_v22 = vld [vmem:[#allocation6 + $0x3300] sm:$0xff]  ;;  %v300_v26 = vld [vmem:[#allocation6 + $0x608] sm:$0xff]  ;;  %v3209_v60 = vadd.f32 %v3208_v15, %v3186_v2 }
 0x2c3   :  { %3616 = vmatpush.msra.mxu3 %v1001_v32  ;;  %3548 = vmatpush.msra.mxu0 %v119_v4  ;;  %v588_v44 = vld [vmem:[#allocation6 + $0xf08] sm:$0xff]  ;;  %v1845_v32 = vperm.slane %v8360_v62, 4  ;;  %v8405_v4 = vadd.f32 %v3251_v38, %v3229_v31  ;;  %v9414_v38 = vld [vmem:[#allocation32_spill] sm:$0xff]  ;;  %v1631_v2 = vld [vmem:[#allocation6 + $0x2fa0] sm:$0xff] }
 0x2c4   :  { %3571 = vmatpush.msra.mxu1 %v407_v17  ;;  %3594 = vmatpush.msra.mxu2 %v695_v57  ;;  %v1721_v17 = vld [vmem:[#allocation6 + $0x3270] sm:$0xff]  ;;  %v282_v57 = vld [vmem:[#allocation6 + $0x578] sm:$0xff]  ;;  %v8422_v31 = vld [vmem:[#allocation3 + $0x8] sm:$0xff] }
 0x2c5   :  { %3617 = vmatpush.msra.mxu3 %v983_v12  ;;  %3625 = vmatpush.msrb.mxu0 %v1541_v37  ;;  %v9409_v12 = vld [vmem:[#allocation22_spill] sm:$0xff] }
 0x2c6   :  { %3648 = vmatpush.msrb.mxu1 %v1829_v46  ;;  %3671 = vmatpush.msrb.mxu2 %v390_v21  ;;  %v2358_v37 = vadd.f32 %v9409_v12, %v2335_v7  ;;  %v570_v46 = vld [vmem:[#allocation6 + $0xe78] sm:$0xff]  ;;  %v1415_v21 = vld [vmem:[#allocation6 + $0x28e0] sm:$0xff]  ;;  %v8436_v12 = vld [vmem:[#allocation3 + $0x10] sm:$0xff] }
 0x2c7   :  { %3694 = vmatpush.msrb.mxu3 %v678_v50  ;;  %3626 = vmatpush.msrb.mxu0 %v1523_v55  ;;  %v1703_v50 = vld [vmem:[#allocation6 + $0x31e0] sm:$0xff]  ;;  %v264_v55 = vld [vmem:[#allocation6 + $0x4e8] sm:$0xff]  ;;  %v498_v7 = vld [vmem:[#allocation6 + $0xc38] sm:$0xff] }
 0x2c8   :  { %3649 = vmatpush.msrb.mxu1 %v1811_v56  ;;  %3672 = vmatpush.msrb.mxu2 %v372_v10  ;;  %v2447_v56 = vadd.f32 %v9410_v29, %v1845_v32  ;;  %v552_v10 = vld [vmem:[#allocation6 + $0xde8] sm:$0xff]  ;;  %v1307_v29 = vld [vmem:[#allocation6 + $0x2580] sm:$0xff] }
 0x2c9   :  { %3695 = vmatpush.msrb.mxu3 %v660_v45  ;;  %3627 = vmatpush.msrb.mxu0 %v1505_v33  ;;  %v9411_v45 = vld [vmem:[#allocation23_spill] sm:$0xff] }
 0x2ca   :  { %3650 = vmatpush.msrb.mxu1 %v1793_v59  ;;  %3673 = vmatpush.msrb.mxu2 %v354_v35  ;;  %v2381_v33 = vadd.f32 %v9411_v45, %v2358_v37  ;;  %v1685_v59 = vld [vmem:[#allocation6 + $0x3150] sm:$0xff]  ;;  %v246_v35 = vld [vmem:[#allocation6 + $0x458] sm:$0xff]  ;;  %v2470_v43 = vadd.f32 %v9412_v30, %v2447_v56  ;;  %v1595_v56 = vld [vmem:[#allocation6 + $0x2e80] sm:$0xff] }
 0x2cb   :  { %3696 = vmatpush.msrb.mxu3 %v642_v13  ;;  %3628 = vmatpush.msrb.mxu0 %v1487_v11  ;;  %v3232_v13 = vadd.f32 %v3231_v34, %v3209_v60  ;;  %v534_v11 = vld [vmem:[#allocation6 + $0xd58] sm:$0xff]  ;;  %v1325_v37 = vld [vmem:[#allocation6 + $0x2610] sm:$0xff]  ;;  %v156_v45 = vld [vmem:[#allocation6 + $0x188] sm:$0xff] }
 0x2cc   :  { %3651 = vmatpush.msrb.mxu1 %v1775_v16  ;;  %3674 = vmatpush.msrb.mxu2 %v336_v20  ;;  %v3254_v16 = vpop.f32.mrf.mxu3  ;;  %v1379_v20 = vld [vmem:[#allocation6 + $0x27c0] sm:$0xff]  ;;  %v8439_v60 = vld [vmem:[#allocation3 + $0x30] sm:$0xff] }
 0x2cd   :  { %3697 = vmatpush.msrb.mxu3 %v624_v49  ;;  %3460 = vmatmul.f32.gmra.mxu0 %v8334_v42  ;;  %v9413_v49 = vld [vmem:[#allocation28_spill] sm:$0xff]  ;;  %v8425_v61 = vadd.f32 %v3254_v16, %v3232_v13  ;;  %v138_v13 = vld [vmem:[#allocation6 + $0xf8] sm:$0xff]  ;;  %v1271_v16 = vld [vmem:[#allocation6 + $0x2460] sm:$0xff] }
 0x2ce   :  { %3629 = vmatpush.msrb.mxu0 %v1469_v1  ;;  %3652 = vmatpush.msrb.mxu1 %v1757_v18  ;;  %v2404_v58 = vadd.f32 %v9413_v49, %v2381_v33  ;;  %v228_v1 = vld [vmem:[#allocation6 + $0x3c8] sm:$0xff]  ;;  %v9418_v30 = vld [vmem:[#allocation36_spill] sm:$0xff] }
 0x2cf   :  { %3675 = vmatpush.msrb.mxu2 %v318_v47  ;;  %3698 = vmatpush.msrb.mxu3 %v606_v6  ;;  %v516_v18 = vld [vmem:[#allocation6 + $0xcc8] sm:$0xff]  ;;  %v1361_v47 = vld [vmem:[#allocation6 + $0x2730] sm:$0xff] }
 0x2d0   :  { %3483 = vmatmul.f32.gmra.mxu1 %v8337_v54  ;;  %3630 = vmatpush.msrb.mxu0 %v1451_v40  ;;  %v1649_v6 = vld [vmem:[#allocation6 + $0x3030] sm:$0xff]  ;;  %v2493_v40 = vadd.f32 %v9414_v38, %v2470_v43  ;;  %v444_v33 = vld [vmem:[#allocation6 + $0xa88] sm:$0xff] }
 0x2d1   :  { %3653 = vmatpush.msrb.mxu1 %v1739_v22  ;;  %3676 = vmatpush.msrb.mxu2 %v300_v26  ;;  %v9415_v22 = vld [vmem:[#allocation29_spill] sm:$0xff]  ;;  %v408_v49 = vld [vmem:[#allocation6 + $0x968] sm:$0xff] }
 0x2d2   :  { %3699 = vmatpush.msrb.mxu3 %v588_v44  ;;  %3631 = vmatpush.msrb.mxu0 %v1433_v5  ;;  %v8429_v26 = vadd.f32 %v9415_v22, %v2404_v58  ;;  %v1343_v44 = vld [vmem:[#allocation6 + $0x26a0] sm:$0xff]  ;;  %v192_v5 = vld [vmem:[#allocation6 + $0x2a8] sm:$0xff]  ;;  %v966_v58 = vld [vmem:[#allocation6 + $0x1ad8] sm:$0xff] }
 0x2d3   :  { %3654 = vmatpush.msrb.mxu1 %v1721_v17  ;;  %3677 = vmatpush.msrb.mxu2 %v282_v57  ;;  %v480_v17 = vld [vmem:[#allocation6 + $0xba8] sm:$0xff]  ;;  %v9416_v57 = vld [vmem:[#allocation33_spill] sm:$0xff] }
 0x2d4   :  { %3700 = vmatpush.msrb.mxu3 %v570_v46  ;;  %5280 = vrot.lane.b32.xlu0 %v8405_v4, %s7852_s2  ;;  %v2516_v15 = vadd.f32 %v9416_v57, %v2493_v40  ;;  %v1613_v46 = vld [vmem:[#allocation6 + $0x2f10] sm:$0xff]  ;;  %v1524_v38 = vld [vmem:[#allocation6 + $0x2c48] sm:$0xff]  ;;  %v930_v40 = vld [vmem:[#allocation6 + $0x19b8] sm:$0xff] }
 0x2d5   :  { %3506 = vmatmul.f32.gmra.mxu2 %v8342_v52  ;;  %3632 = vmatpush.msrb.mxu0 %v1415_v21  ;;  %v174_v21 = vld [vmem:[#allocation6 + $0x218] sm:$0xff]  ;;  %v8459_v22 = vld [vmem:[#allocation3 + $0x28] sm:$0xff] }
 0x2d6   :  { %3655 = vmatpush.msrb.mxu1 %v1703_v50  ;;  %3678 = vmatpush.msrb.mxu2 %v264_v55  ;;  %v462_v50 = vld [vmem:[#allocation6 + $0xb18] sm:$0xff]  ;;  %v1488_v57 = vld [vmem:[#allocation6 + $0x2b28] sm:$0xff] }
 0x2d7   :  { %3701 = vmatpush.msrb.mxu3 %v552_v10  ;;  %3549 = vmatmul.f32.vlgmr.msra.gmra.mxu0 %v8416_v63  ;;  %v8442_v55 = vld [vmem:[#allocation3 + $0x18] sm:$0xff]  ;;  %v9417_v10 = vld [vmem:[#allocation34_spill] sm:$0xff] }
 0x2d8   :  { %3529 = vmatmul.f32.gmra.mxu3 %v8345_v14  ;;  %3633 = vmatpush.msrb.mxu0 %v1397_v39  ;;  %v2539_v34 = vadd.f32 %v9417_v10, %v2516_v15  ;;  %v8446_v39 = vld [vmem:[#allocation3 + $0x38] sm:$0xff]  ;;  %v1776_v15 = vld [vmem:[#allocation6 + $0x3428] sm:$0xff] }
 0x2d9   :  { %3656 = vmatpush.msrb.mxu1 %v1685_v59  ;;  %3679 = vmatpush.msrb.mxu2 %v246_v35  ;;  %v1289_v59 = vld [vmem:[#allocation6 + $0x24f0] sm:$0xff]  ;;  %v1452_v10 = vld [vmem:[#allocation6 + $0x2a08] sm:$0xff] }
 0x2da   :  { %3702 = vmatpush.msrb.mxu3 %v534_v11  ;;  %3572 = vmatmul.f32.vlgmr.msra.gmra.mxu1 %v8422_v31  ;;  %v1577_v35 = vld [vmem:[#allocation6 + $0x2df0] sm:$0xff]  ;;  %v426_v11 = vld [vmem:[#allocation6 + $0x9f8] sm:$0xff]  ;;  %v8450_v43 = vadd.f32 %v9418_v30, %v2539_v34  ;;  %v1740_v34 = vld [vmem:[#allocation6 + $0x3308] sm:$0xff] }
 0x2db   :  { %3634 = vmatpush.msrb.mxu0 %v1379_v20  ;;  %3657 = vmatpush.msrb.mxu1 %v1667_v3  ;;  %v1559_v20 = vld [vmem:[#allocation6 + $0x2d60] sm:$0xff]  ;;  %v120_v3 = vld [vmem:[#allocation6 + $0x68] sm:$0xff] }
 0x2dc   :  { %3680 = vmatpush.msrb.mxu2 %v228_v1  ;;  %3703 = vmatpush.msrb.mxu3 %v516_v18  ;;  %v1254_v1 = vld [vmem:[#allocation6 + $0x23d8] sm:$0xff]  ;;  %v1416_v30 = vld [vmem:[#allocation6 + $0x28e8] sm:$0xff] }
 0x2dd   :  { %3635 = vmatpush.msrb.mxu0 %v1361_v47  ;;  %3658 = vmatpush.msrb.mxu1 %v1649_v6  ;;  %v1542_v18 = vld [vmem:[#allocation6 + $0x2cd8] sm:$0xff]  ;;  %v8456_v6 = vld [vmem:[#allocation3 + $0x20] sm:$0xff] }
 0x2de   :  { %3681 = vmatpush.msrb.mxu2 %v210_v8  ;;  %3704 = vmatpush.msrb.mxu3 %v498_v7  ;;  %v1830_v47 = vld [vmem:[#allocation6 + $0x35d8] sm:$0xff]  ;;  %v948_v8 = vld [vmem:[#allocation6 + $0x1a48] sm:$0xff] }
 0x2df   :  { %5308 = vrot.lane.b32.xlu2 %v8425_v61, %s7852_s2  ;;  %5306 = vrot.lane.b32.xlu0 %v8429_v26, %s7852_s2  ;;  %v1236_v7 = vld [vmem:[#allocation6 + $0x2348] sm:$0xff] }
 0x2e0   :  { %3595 = vmatmul.f32.vlgmr.msra.gmra.mxu2 %v8436_v12  ;;  %3636 = vmatpush.msrb.mxu0 %v1343_v44  ;;  %v1218_v44 = vld [vmem:[#allocation6 + $0x22b8] sm:$0xff] }
 0x2e1   :  { %3659 = vmatpush.msrb.mxu1 %v1631_v2  ;;  %3682 = vmatpush.msrb.mxu2 %v192_v5  ;;  %v1794_v2 = vld [vmem:[#allocation6 + $0x34b8] sm:$0xff]  ;;  %v912_v5 = vld [vmem:[#allocation6 + $0x1928] sm:$0xff] }
 0x2e2   :  { %3705 = vmatpush.msrb.mxu3 %v480_v17  ;;  %3552 = vmatmul.f32.gmra.mxu0 %v8439_v60  ;;  %v1200_v17 = vld [vmem:[#allocation6 + $0x2228] sm:$0xff] }
 0x2e3   :  { %3618 = vmatmul.f32.vlgmr.msra.gmra.mxu3 %v8442_v55  ;;  %3637 = vmatpush.msrb.mxu0 %v1325_v37  ;;  %v894_v37 = vld [vmem:[#allocation6 + $0x1898] sm:$0xff] }
 0x2e4   :  { %3660 = vmatpush.msrb.mxu1 %v1613_v46  ;;  %3683 = vmatpush.msrb.mxu2 %v174_v21  ;;  %v1182_v46 = vld [vmem:[#allocation6 + $0x2198] sm:$0xff] }
 0x2e5   :  { %3706 = vmatpush.msrb.mxu3 %v462_v50  ;;  %3575 = vmatmul.f32.gmra.mxu1 %v8446_v39  ;;  %v1470_v21 = vld [vmem:[#allocation6 + $0x2a98] sm:$0xff] }
 0x2e6   :  { %3638 = vmatpush.msrb.mxu0 %v1307_v29  ;;  %3661 = vmatpush.msrb.mxu1 %v1595_v56  ;;  %v1758_v50 = vld [vmem:[#allocation6 + $0x3398] sm:$0xff]  ;;  %v876_v29 = vld [vmem:[#allocation6 + $0x1808] sm:$0xff] }
 0x2e7   :  { %3684 = vmatpush.msrb.mxu2 %v156_v45  ;;  %3707 = vmatpush.msrb.mxu3 %v444_v33  ;;  %v1164_v56 = vld [vmem:[#allocation6 + $0x2108] sm:$0xff]  ;;  %v858_v45 = vld [vmem:[#allocation6 + $0x1778] sm:$0xff] }
 0x2e8   :  { %3639 = vmatpush.msrb.mxu0 %v1289_v59  ;;  %3662 = vmatpush.msrb.mxu1 %v1577_v35  ;;  %v1146_v33 = vld [vmem:[#allocation6 + $0x2078] sm:$0xff]  ;;  %v3274_v35 = vpop.f32.mrf.mxu0 }
 0x2e9   :  { %3685 = vmatpush.msrb.mxu2 %v138_v13  ;;  %3708 = vmatpush.msrb.mxu3 %v426_v11  ;;  %v1434_v59 = vld [vmem:[#allocation6 + $0x2978] sm:$0xff]  ;;  %v840_v11 = vld [vmem:[#allocation6 + $0x16e8] sm:$0xff] }
 0x2ea   :  { %5542 = vrot.lane.b32.xlu2 %v8450_v43, %s7852_s2  ;;  %3598 = vmatmul.f32.gmra.mxu2 %v8334_v42  ;;  %v1812_v42 = vld [vmem:[#allocation6 + $0x3548] sm:$0xff]  ;;  %v1722_v13 = vld [vmem:[#allocation6 + $0x3278] sm:$0xff] }
 0x2eb   :  { %3640 = vmatpush.msrb.mxu0 %v1271_v16  ;;  %3663 = vmatpush.msrb.mxu1 %v1559_v20  ;;  %v1704_v16 = vld [vmem:[#allocation6 + $0x31e8] sm:$0xff]  ;;  %v1851_v20 = vperm.slane %v8348_v23, 2  ;;  %v1074_v23 = vld [vmem:[#allocation6 + $0x1e38] sm:$0xff] }
 0x2ec   :  { %3686 = vmatpush.msrb.mxu2 %v120_v3  ;;  %3709 = vmatpush.msrb.mxu3 %v408_v49  ;;  %v822_v3 = vld [vmem:[#allocation6 + $0x1658] sm:$0xff] }
 0x2ed   :  { %3621 = vmatmul.f32.gmra.mxu3 %v8337_v54  ;;  %3641 = vmatmul.f32.vlgmr.msrb.gmra.mxu0 %v8456_v6  ;;  %v1506_v54 = vld [vmem:[#allocation6 + $0x2bb8] sm:$0xff] }
 0x2ee   :  { %3717 = vmatpush.msra.mxu0 %v966_v58  ;;  %3740 = vmatpush.msra.mxu1 %v1254_v1  ;;  %v1398_v49 = vld [vmem:[#allocation6 + $0x2858] sm:$0xff]  ;;  %v3297_v58 = vpop.f32.mrf.mxu1 }
 0x2ef   :  { %3763 = vmatpush.msra.mxu2 %v1542_v18  ;;  %3786 = vmatpush.msra.mxu3 %v1830_v47  ;;  %v1686_v1 = vld [vmem:[#allocation6 + $0x3158] sm:$0xff]  ;;  %v804_v18 = vld [vmem:[#allocation6 + $0x15c8] sm:$0xff] }
 0x2f0   :  { %3664 = vmatmul.f32.vlgmr.msrb.gmra.mxu1 %v8459_v22  ;;  %3718 = vmatpush.msra.mxu0 %v948_v8  ;;  %v1092_v47 = vld [vmem:[#allocation6 + $0x1ec8] sm:$0xff] }
 0x2f1   :  { %3741 = vmatpush.msra.mxu1 %v1236_v7  ;;  %3764 = vmatpush.msra.mxu2 %v1524_v38  ;;  %v1380_v8 = vld [vmem:[#allocation6 + $0x27c8] sm:$0xff]  ;;  %v3275_v7 = vadd.f32 %v3274_v35, %v1851_v20  ;;  %v714_v35 = vld [vmem:[#allocation6 + $0x12f8] sm:$0xff] }
 0x2f2   :  { %3787 = vmatpush.msra.mxu3 %v1812_v42  ;;  %3719 = vmatpush.msra.mxu0 %v930_v40  ;;  %v1668_v38 = vld [vmem:[#allocation6 + $0x30c8] sm:$0xff]  ;;  %v786_v42 = vld [vmem:[#allocation6 + $0x1538] sm:$0xff] }
 0x2f3   :  { %3742 = vmatpush.msra.mxu1 %v1218_v44  ;;  %3765 = vmatpush.msra.mxu2 %v1506_v54  ;;  %v1362_v40 = vld [vmem:[#allocation6 + $0x2738] sm:$0xff]  ;;  %v768_v54 = vld [vmem:[#allocation6 + $0x14a8] sm:$0xff] }
 0x2f4   :  { %3788 = vmatpush.msra.mxu3 %v1794_v2  ;;  %3720 = vmatpush.msra.mxu0 %v912_v5  ;;  %v1650_v44 = vld [vmem:[#allocation6 + $0x3038] sm:$0xff]  ;;  %v1056_v2 = vld [vmem:[#allocation6 + $0x1da8] sm:$0xff] }
 0x2f5   :  { %3743 = vmatpush.msra.mxu1 %v1200_v17  ;;  %3766 = vmatpush.msra.mxu2 %v1488_v57  ;;  %v1344_v5 = vld [vmem:[#allocation6 + $0x26a8] sm:$0xff]  ;;  %v3277_v17 = vpop.f32.mrf.mxu0  ;;  %v3298_v57 = vadd.f32 %v3297_v58, %v3275_v7  ;;  %v9419_v58 = vld [vmem:[#allocation30_spill] sm:$0xff] }
 0x2f6   :  { %3789 = vmatpush.msra.mxu3 %v1776_v15  ;;  %3644 = vmatmul.f32.gmra.mxu0 %v8342_v52  ;;  %v1128_v52 = vld [vmem:[#allocation6 + $0x1fe8] sm:$0xff] }
 0x2f7   :  { %3721 = vmatpush.msra.mxu0 %v894_v37  ;;  %3744 = vmatpush.msra.mxu1 %v1182_v46  ;;  %v1632_v15 = vld [vmem:[#allocation6 + $0x2fa8] sm:$0xff]  ;;  %v750_v37 = vld [vmem:[#allocation6 + $0x1418] sm:$0xff] }
 0x2f8   :  { %3767 = vmatpush.msra.mxu2 %v1470_v21  ;;  %3790 = vmatpush.msra.mxu3 %v1758_v50  ;;  %v1038_v46 = vld [vmem:[#allocation6 + $0x1d18] sm:$0xff]  ;;  %v3320_v50 = vpop.f32.mrf.mxu2 }
 0x2f9   :  { %3667 = vmatmul.f32.gmra.mxu1 %v8345_v14  ;;  %3722 = vmatpush.msra.mxu0 %v876_v29  ;;  %v1110_v14 = vld [vmem:[#allocation6 + $0x1f58] sm:$0xff] }
 0x2fa   :  { %3745 = vmatpush.msra.mxu1 %v1164_v56  ;;  %3768 = vmatpush.msra.mxu2 %v1452_v10  ;;  %v1326_v21 = vld [vmem:[#allocation6 + $0x2618] sm:$0xff]  ;;  %v732_v56 = vld [vmem:[#allocation6 + $0x1388] sm:$0xff]  ;;  %v3300_v10 = vpop.f32.mrf.mxu1 }
 0x2fb   :  { %3791 = vmatpush.msra.mxu3 %v1740_v34  ;;  %3723 = vmatpush.msra.mxu0 %v858_v45  ;;  %v1614_v29 = vld [vmem:[#allocation6 + $0x2f18] sm:$0xff]  ;;  %v1020_v34 = vld [vmem:[#allocation6 + $0x1c88] sm:$0xff] }
 0x2fc   :  { %3746 = vmatpush.msra.mxu1 %v1146_v33  ;;  %3769 = vmatpush.msra.mxu2 %v1434_v59  ;;  %v1308_v45 = vld [vmem:[#allocation6 + $0x2588] sm:$0xff]  ;;  %v3321_v59 = vadd.f32 %v3320_v50, %v3298_v57  ;;  %v1237_v57 = vld [vmem:[#allocation6 + $0x2350] sm:$0xff]  ;;  %v931_v50 = vld [vmem:[#allocation6 + $0x19c0] sm:$0xff] }
 0x2fd   :  { %3792 = vmatpush.msra.mxu3 %v1722_v13  ;;  %3724 = vmatpush.msra.mxu0 %v840_v11  ;;  %v1596_v33 = vld [vmem:[#allocation6 + $0x2e88] sm:$0xff]  ;;  %v1002_v13 = vld [vmem:[#allocation6 + $0x1bf8] sm:$0xff] }
 0x2fe   :  { %3747 = vmatpush.msra.mxu1 %v1128_v52  ;;  %3770 = vmatpush.msra.mxu2 %v1416_v30  ;;  %v1290_v11 = vld [vmem:[#allocation6 + $0x24f8] sm:$0xff]  ;;  %v3343_v52 = vpop.f32.mrf.mxu3  ;;  %v3278_v30 = vadd.f32 %v3277_v17, %v1851_v20  ;;  %v3366_v20 = vpop.f32.mrf.mxu0  ;;  %v949_v17 = vld [vmem:[#allocation6 + $0x1a50] sm:$0xff] }
 0x2ff   :  { %3793 = vmatpush.msra.mxu3 %v1704_v16  ;;  %3725 = vmatpush.msra.mxu0 %v822_v3  ;;  %v1578_v16 = vld [vmem:[#allocation6 + $0x2df8] sm:$0xff]  ;;  %v696_v3 = vld [vmem:[#allocation6 + $0x1268] sm:$0xff] }
 0x300   :  { %3748 = vmatpush.msra.mxu1 %v1110_v14  ;;  %3771 = vmatpush.msra.mxu2 %v1398_v49  ;;  %v984_v14 = vld [vmem:[#allocation6 + $0x1b68] sm:$0xff]  ;;  %v3301_v7 = vadd.f32 %v3300_v10, %v3278_v30  ;;  %v337_v10 = vld [vmem:[#allocation6 + $0x730] sm:$0xff] }
 0x301   :  { %3794 = vmatpush.msra.mxu3 %v1686_v1  ;;  %3726 = vmatpush.msra.mxu0 %v804_v18  ;;  %v1272_v49 = vld [vmem:[#allocation6 + $0x2468] sm:$0xff]  ;;  %v2450_v1 = vadd.f32 %v9419_v58, %v1845_v32  ;;  %v3344_v18 = vadd.f32 %v3343_v52, %v3321_v59  ;;  %v1183_v58 = vld [vmem:[#allocation6 + $0x21a0] sm:$0xff] }
 0x302   :  { %3749 = vmatpush.msra.mxu1 %v1092_v47  ;;  %3772 = vmatpush.msra.mxu2 %v1380_v8  ;;  %v1560_v47 = vld [vmem:[#allocation6 + $0x2d68] sm:$0xff]  ;;  %v391_v8 = vld [vmem:[#allocation6 + $0x8e0] sm:$0xff] }
 0x303   :  { %3795 = vmatpush.msra.mxu3 %v1668_v38  ;;  %3727 = vmatpush.msra.mxu0 %v786_v42  ;;  %v679_v38 = vld [vmem:[#allocation6 + $0x11e0] sm:$0xff]  ;;  %v9420_v32 = vld [vmem:[#allocation31_spill] sm:$0xff] }
 0x304   :  { %3750 = vmatpush.msra.mxu1 %v1074_v23  ;;  %3773 = vmatpush.msra.mxu2 %v1362_v40  ;;  %v967_v42 = vld [vmem:[#allocation6 + $0x1ae0] sm:$0xff]  ;;  %v373_v40 = vld [vmem:[#allocation6 + $0x850] sm:$0xff]  ;;  %v9422_v52 = vld [vmem:[#allocation39_spill] sm:$0xff] }
 0x305   :  { %3796 = vmatpush.msra.mxu3 %v1650_v44  ;;  %3728 = vmatpush.msra.mxu0 %v768_v54  ;;  %v1255_v23 = vld [vmem:[#allocation6 + $0x23e0] sm:$0xff]  ;;  %v3323_v44 = vpop.f32.mrf.mxu2  ;;  %v2473_v54 = vadd.f32 %v9420_v32, %v2450_v1 }
 0x306   :  { %3751 = vmatpush.msra.mxu1 %v1056_v2  ;;  %3774 = vmatpush.msra.mxu2 %v1344_v5  ;;  %v3367_v2 = vadd.f32 %v3366_v20, %v3344_v18  ;;  %v661_v5 = vld [vmem:[#allocation6 + $0x1150] sm:$0xff]  ;;  %v3369_v1 = vpop.f32.mrf.mxu0  ;;  %v9423_v18 = vld [vmem:[#allocation37_spill] sm:$0xff] }
 0x307   :  { %3797 = vmatpush.msra.mxu3 %v1632_v15  ;;  %3729 = vmatpush.msra.mxu0 %v750_v37  ;;  %v3389_v15 = vpop.f32.mrf.mxu1  ;;  %v355_v37 = vld [vmem:[#allocation6 + $0x7c0] sm:$0xff]  ;;  %v589_v20 = vld [vmem:[#allocation6 + $0xf10] sm:$0xff] }
 0x308   :  { %3752 = vmatpush.msra.mxu1 %v1038_v46  ;;  %3775 = vmatpush.msra.mxu2 %v1326_v21  ;;  %v1846_v46 = vperm.slane %v8360_v62, 5  ;;  %v643_v21 = vld [vmem:[#allocation6 + $0x10c0] sm:$0xff]  ;;  %v8473_v59 = vadd.f32 %v3389_v15, %v3367_v2  ;;  %v265_v15 = vld [vmem:[#allocation6 + $0x4f0] sm:$0xff] }
 0x309   :  { %3798 = vmatpush.msra.mxu3 %v1614_v29  ;;  %3730 = vmatpush.msra.mxu0 %v732_v56  ;;  %v3324_v29 = vadd.f32 %v3323_v44, %v3301_v7  ;;  %v1219_v56 = vld [vmem:[#allocation6 + $0x22c0] sm:$0xff]  ;;  %v877_v7 = vld [vmem:[#allocation6 + $0x1810] sm:$0xff] }
 0x30a   :  { %3753 = vmatpush.msra.mxu1 %v1020_v34  ;;  %3776 = vmatpush.msra.mxu2 %v1308_v45  ;;  %v3346_v34 = vpop.f32.mrf.mxu3  ;;  %v9421_v45 = vld [vmem:[#allocation35_spill] sm:$0xff]  ;;  %v2585_v30 = vadd.f32 %v9422_v52, %v1846_v46  ;;  %v283_v44 = vld [vmem:[#allocation6 + $0x580] sm:$0xff]  ;;  %v9428_v52 = vld [vmem:[#allocation44_spill] sm:$0xff] }
 0x30b   :  { %3799 = vmatpush.msra.mxu3 %v1596_v33  ;;  %3731 = vmatpush.msra.mxu0 %v714_v35  ;;  %v2496_v33 = vadd.f32 %v9421_v45, %v2473_v54  ;;  %v625_v35 = vld [vmem:[#allocation6 + $0x1030] sm:$0xff]  ;;  %v571_v54 = vld [vmem:[#allocation6 + $0xe80] sm:$0xff] }
 0x30c   :  { %3754 = vmatpush.msra.mxu1 %v1002_v13  ;;  %3777 = vmatpush.msra.mxu2 %v1290_v11  ;;  %v913_v13 = vld [vmem:[#allocation6 + $0x1930] sm:$0xff]  ;;  %v859_v2 = vld [vmem:[#allocation6 + $0x1780] sm:$0xff] }
 0x30d   :  { %3800 = vmatpush.msra.mxu3 %v1578_v16  ;;  %3732 = vmatpush.msra.mxu0 %v696_v3  ;;  %v1201_v11 = vld [vmem:[#allocation6 + $0x2230] sm:$0xff]  ;;  %v3347_v16 = vadd.f32 %v3346_v34, %v3324_v29  ;;  %v319_v3 = vld [vmem:[#allocation6 + $0x6a0] sm:$0xff] }
 0x30e   :  { %3755 = vmatpush.msra.mxu1 %v984_v14  ;;  %3778 = vmatpush.msra.mxu2 %v1272_v49  ;;  %v607_v14 = vld [vmem:[#allocation6 + $0xfa0] sm:$0xff]  ;;  %v9427_v34 = vld [vmem:[#allocation40_spill] sm:$0xff] }
 0x30f   :  { %3801 = vmatpush.msra.mxu3 %v1560_v47  ;;  %3687 = vmatmul.f32.vlgmr.msrb.gmra.mxu2 %v8416_v63  ;;  %v895_v49 = vld [vmem:[#allocation6 + $0x18a0] sm:$0xff]  ;;  %v2519_v47 = vadd.f32 %v9423_v18, %v2496_v33  ;;  %v3392_v32 = vpop.f32.mrf.mxu1 }
 0x310   :  { %3710 = vmatmul.f32.vlgmr.msrb.gmra.mxu3 %v8422_v31  ;;  %3809 = vmatpush.msrb.mxu0 %v391_v8  ;;  %v301_v8 = vld [vmem:[#allocation6 + $0x610] sm:$0xff]  ;;  %v247_v33 = vld [vmem:[#allocation6 + $0x460] sm:$0xff] }
 0x311   :  { %3832 = vmatpush.msrb.mxu1 %v679_v38  ;;  %3855 = vmatpush.msrb.mxu2 %v967_v42  ;;  %v1165_v38 = vld [vmem:[#allocation6 + $0x2110] sm:$0xff]  ;;  %v9424_v42 = vld [vmem:[#allocation41_spill] sm:$0xff]  ;;  %v787_v18 = vld [vmem:[#allocation6 + $0x1540] sm:$0xff] }
 0x312   :  { %3878 = vmatpush.msrb.mxu3 %v1255_v23  ;;  %3810 = vmatpush.msrb.mxu0 %v373_v40  ;;  %v2608_v23 = vadd.f32 %v9424_v42, %v2585_v30  ;;  %v3370_v40 = vadd.f32 %v3369_v1, %v3347_v16  ;;  %v229_v16 = vld [vmem:[#allocation6 + $0x3d0] sm:$0xff]  ;;  %v499_v1 = vld [vmem:[#allocation6 + $0xc40] sm:$0xff] }
 0x313   :  { %3833 = vmatpush.msrb.mxu1 %v661_v5  ;;  %3856 = vmatpush.msrb.mxu2 %v949_v17  ;;  %v9425_v5 = vld [vmem:[#allocation38_spill] sm:$0xff]  ;;  %v481_v42 = vld [vmem:[#allocation6 + $0xbb0] sm:$0xff] }
 0x314   :  { %3879 = vmatpush.msrb.mxu3 %v1237_v57  ;;  %3811 = vmatpush.msrb.mxu0 %v355_v37  ;;  %v2542_v17 = vadd.f32 %v9425_v5, %v2519_v47  ;;  %v1147_v57 = vld [vmem:[#allocation6 + $0x2080] sm:$0xff]  ;;  %v553_v37 = vld [vmem:[#allocation6 + $0xdf0] sm:$0xff]  ;;  %v8485_v29 = vadd.f32 %v3392_v32, %v3370_v40  ;;  %v9429_v47 = vld [vmem:[#allocation47_spill] sm:$0xff] }
 0x315   :  { %3834 = vmatpush.msrb.mxu1 %v643_v21  ;;  %3857 = vmatpush.msrb.mxu2 %v931_v50  ;;  %v9426_v21 = vld [vmem:[#allocation42_spill] sm:$0xff]  ;;  %v8499_v40 = vld [vmem:[#allocation8 + $0x8] sm:$0xff]  ;;  %v1057_v32 = vld [vmem:[#allocation6 + $0x1db0] sm:$0xff]  ;;  %v3435_v5 = vpop.f32.mrf.mxu3 }
 0x316   :  { %3880 = vmatpush.msrb.mxu3 %v1219_v56  ;;  %3812 = vmatpush.msrb.mxu0 %v337_v10  ;;  %v2631_v50 = vadd.f32 %v9426_v21, %v2608_v23  ;;  %v841_v56 = vld [vmem:[#allocation6 + $0x16f0] sm:$0xff]  ;;  %v8488_v45 = vadd.f32 %v9427_v34, %v2542_v17  ;;  %v175_v17 = vld [vmem:[#allocation6 + $0x220] sm:$0xff] }
 0x317   :  { %3835 = vmatpush.msrb.mxu1 %v625_v35  ;;  %3858 = vmatpush.msrb.mxu2 %v913_v13  ;;  %v1129_v10 = vld [vmem:[#allocation6 + $0x1ff0] sm:$0xff]  ;;  %v535_v35 = vld [vmem:[#allocation6 + $0xd60] sm:$0xff] }
 0x318   :  { %3881 = vmatpush.msrb.mxu3 %v1201_v11  ;;  %5544 = vrot.lane.b32.xlu1 %v8473_v59, %s7852_s2  ;;  %v823_v13 = vld [vmem:[#allocation6 + $0x1660] sm:$0xff]  ;;  %v2654_v30 = vadd.f32 %v9428_v52, %v2631_v50  ;;  %v769_v23 = vld [vmem:[#allocation6 + $0x14b0] sm:$0xff] }
 0x319   :  { %3813 = vmatpush.msrb.mxu0 %v319_v3  ;;  %3836 = vmatpush.msrb.mxu1 %v607_v14  ;;  %v1111_v11 = vld [vmem:[#allocation6 + $0x1f60] sm:$0xff]  ;;  %v517_v3 = vld [vmem:[#allocation6 + $0xcd0] sm:$0xff] }
 0x31a   :  { %3859 = vmatpush.msrb.mxu2 %v895_v49  ;;  %3882 = vmatpush.msrb.mxu3 %v1183_v58  ;;  %v805_v14 = vld [vmem:[#allocation6 + $0x15d0] sm:$0xff]  ;;  %v211_v58 = vld [vmem:[#allocation6 + $0x340] sm:$0xff] }
 0x31b   :  { %3814 = vmatpush.msrb.mxu0 %v301_v8  ;;  %3837 = vmatpush.msrb.mxu1 %v589_v20  ;;  %v1093_v49 = vld [vmem:[#allocation6 + $0x1ed0] sm:$0xff]  ;;  %v2677_v8 = vadd.f32 %v9429_v47, %v2654_v30  ;;  %v1075_v20 = vld [vmem:[#allocation6 + $0x1e40] sm:$0xff]  ;;  %v8519_v47 = vld [vmem:[#allocation3 + $0x58] sm:$0xff] }
 0x31c   :  { %3860 = vmatpush.msrb.mxu2 %v877_v7  ;;  %3883 = vmatpush.msrb.mxu3 %v1165_v38  ;;  %v3412_v7 = vpop.f32.mrf.mxu2  ;;  %v193_v38 = vld [vmem:[#allocation6 + $0x2b0] sm:$0xff]  ;;  %v1471_v62 = vld [vmem:[#allocation6 + $0x2aa0] sm:$0xff] }
 0x31d   :  { %3690 = vmatmul.f32.gmra.mxu2 %v8439_v60  ;;  %3815 = vmatpush.msrb.mxu0 %v283_v44  ;;  %v1852_v44 = vperm.slane %v8499_v40, 3  ;;  %v157_v21 = vld [vmem:[#allocation6 + $0x190] sm:$0xff] }
 0x31e   :  { %3838 = vmatpush.msrb.mxu1 %v571_v54  ;;  %3861 = vmatpush.msrb.mxu2 %v859_v2  ;;  %v9430_v54 = vld [vmem:[#allocation49_spill] sm:$0xff]  ;;  %v1021_v34 = vld [vmem:[#allocation6 + $0x1c90] sm:$0xff] }
 0x31f   :  { %3884 = vmatpush.msrb.mxu3 %v1147_v57  ;;  %3816 = vmatpush.msrb.mxu0 %v265_v15  ;;  %v8503_v2 = vadd.f32 %v9430_v54, %v2677_v8  ;;  %v463_v57 = vld [vmem:[#allocation6 + $0xb20] sm:$0xff]  ;;  %v3413_v50 = vadd.f32 %v3412_v7, %v1852_v44 }
 0x320   :  { %3713 = vmatmul.f32.gmra.mxu3 %v8446_v39  ;;  %3839 = vmatpush.msrb.mxu1 %v553_v37  ;;  %v751_v15 = vld [vmem:[#allocation6 + $0x1420] sm:$0xff] }
 0x321   :  { %3862 = vmatpush.msrb.mxu2 %v841_v56  ;;  %3885 = vmatpush.msrb.mxu3 %v1129_v10  ;;  %v1039_v37 = vld [vmem:[#allocation6 + $0x1d20] sm:$0xff]  ;;  %v445_v56 = vld [vmem:[#allocation6 + $0xa90] sm:$0xff]  ;;  %v3436_v30 = vadd.f32 %v3435_v5, %v3413_v50  ;;  %v8524_v5 = vld [vmem:[#allocation3 + $0x48] sm:$0xff] }
 0x322   :  { %5570 = vrot.lane.b32.xlu1 %v8488_v45, %s7852_s2  ;;  %5572 = vrot.lane.b32.xlu0 %v8485_v29, %s7852_s2  ;;  %v733_v10 = vld [vmem:[#allocation6 + $0x1390] sm:$0xff]  ;;  %v1543_v8 = vld [vmem:[#allocation6 + $0x2ce0] sm:$0xff] }
 0x323   :  { %3817 = vmatpush.msrb.mxu0 %v247_v33  ;;  %3840 = vmatpush.msrb.mxu1 %v535_v35  ;;  %v139_v33 = vld [vmem:[#allocation6 + $0x100] sm:$0xff] }
 0x324   :  { %3863 = vmatpush.msrb.mxu2 %v823_v13  ;;  %3886 = vmatpush.msrb.mxu3 %v1111_v11  ;;  %v427_v35 = vld [vmem:[#allocation6 + $0xa00] sm:$0xff]  ;;  %v8511_v52 = vpop.f32.mrf.mxu2  ;;  %v3481_v54 = vpop.f32.mrf.mxu1 }
 0x325   :  { %3818 = vmatpush.msrb.mxu0 %v229_v16  ;;  %3841 = vmatpush.msrb.mxu1 %v517_v3  ;;  %v715_v13 = vld [vmem:[#allocation6 + $0x1300] sm:$0xff]  ;;  %v8513_v16 = vld [vmem:[#allocation3 + $0x50] sm:$0xff] }
 0x326   :  { %3864 = vmatpush.msrb.mxu2 %v805_v14  ;;  %3887 = vmatpush.msrb.mxu3 %v1093_v49  ;;  %v1003_v11 = vld [vmem:[#allocation6 + $0x1c00] sm:$0xff]  ;;  %v121_v3 = vld [vmem:[#allocation6 + $0x70] sm:$0xff]  ;;  %v3458_v49 = vpop.f32.mrf.mxu0 }
 0x327   :  { %3779 = vmatmul.f32.vlgmr.msra.gmra.mxu2 %v8456_v6  ;;  %3819 = vmatpush.msrb.mxu0 %v211_v58  ;;  %v409_v14 = vld [vmem:[#allocation6 + $0x970] sm:$0xff]  ;;  %v1831_v7 = vld [vmem:[#allocation6 + $0x35e0] sm:$0xff] }
 0x328   :  { %3842 = vmatpush.msrb.mxu1 %v499_v1  ;;  %3865 = vmatpush.msrb.mxu2 %v787_v18  ;;  %v697_v58 = vld [vmem:[#allocation6 + $0x1270] sm:$0xff]  ;;  %v8516_v18 = vld [vmem:[#allocation3 + $0x40] sm:$0xff] }
 0x329   :  { %3888 = vmatpush.msrb.mxu3 %v1075_v20  ;;  %3733 = vmatmul.f32.vlgmr.msra.gmra.mxu0 %v8436_v12  ;;  %v985_v1 = vld [vmem:[#allocation6 + $0x1b70] sm:$0xff]  ;;  %v8522_v20 = vpop.f32.mrf.mxu3 }
 0x32a   :  { %3802 = vmatmul.f32.vlgmr.msra.gmra.mxu3 %v8459_v22  ;;  %3820 = vmatpush.msrb.mxu0 %v193_v38  ;;  %v392_v38 = vld [vmem:[#allocation6 + $0x8e8] sm:$0xff] }
 0x32b   :  { %3843 = vmatpush.msrb.mxu1 %v481_v42  ;;  %3866 = vmatpush.msrb.mxu2 %v769_v23  ;;  %v3459_v42 = vadd.f32 %v3458_v49, %v3436_v30  ;;  %v680_v23 = vld [vmem:[#allocation6 + $0x11e8] sm:$0xff]  ;;  %v338_v30 = vld [vmem:[#allocation6 + $0x738] sm:$0xff] }
 0x32c   :  { %3889 = vmatpush.msrb.mxu3 %v1057_v32  ;;  %5806 = vrot.lane.b32.xlu0 %v8503_v2, %s7852_s2  ;;  %v1525_v32 = vld [vmem:[#allocation6 + $0x2c50] sm:$0xff] }
 0x32d   :  { %3756 = vmatmul.f32.vlgmr.msra.gmra.mxu1 %v8442_v55  ;;  %3821 = vmatpush.msrb.mxu0 %v175_v17  ;;  %v1813_v17 = vld [vmem:[#allocation6 + $0x3550] sm:$0xff] }
 0x32e   :  { %3844 = vmatpush.msrb.mxu1 %v463_v57  ;;  %3867 = vmatpush.msrb.mxu2 %v751_v15  ;;  %v374_v57 = vld [vmem:[#allocation6 + $0x858] sm:$0xff] }
 0x32f   :  { %3890 = vmatpush.msrb.mxu3 %v1039_v37  ;;  %3822 = vmatpush.msrb.mxu0 %v157_v21  ;;  %v662_v15 = vld [vmem:[#allocation6 + $0x1158] sm:$0xff]  ;;  %v1507_v37 = vld [vmem:[#allocation6 + $0x2bc0] sm:$0xff]  ;;  %v9431_v21 = vld [vmem:[#allocation43_spill] sm:$0xff] }
 0x330   :  { %3845 = vmatpush.msrb.mxu1 %v445_v56  ;;  %3868 = vmatpush.msrb.mxu2 %v733_v10  ;;  %v2588_v50 = vadd.f32 %v9431_v21, %v1846_v46  ;;  %v1795_v56 = vld [vmem:[#allocation6 + $0x34c0] sm:$0xff]  ;;  %v356_v10 = vld [vmem:[#allocation6 + $0x7c8] sm:$0xff] }
 0x331   :  { %3891 = vmatpush.msrb.mxu3 %v1021_v34  ;;  %3782 = vmatmul.f32.gmra.mxu2 %v8513_v16  ;;  %v3482_v34 = vadd.f32 %v3481_v54, %v3459_v42  ;;  %v1741_v42 = vld [vmem:[#allocation6 + $0x3310] sm:$0xff]  ;;  %v1435_v54 = vld [vmem:[#allocation6 + $0x2980] sm:$0xff]  ;;  %v284_v21 = vld [vmem:[#allocation6 + $0x588] sm:$0xff] }
 0x332   :  { %3823 = vmatpush.msrb.mxu0 %v139_v33  ;;  %3846 = vmatpush.msrb.mxu1 %v427_v35  ;;  %v644_v33 = vld [vmem:[#allocation6 + $0x10c8] sm:$0xff]  ;;  %v1489_v35 = vld [vmem:[#allocation6 + $0x2b30] sm:$0xff] }
 0x333   :  { %3869 = vmatpush.msrb.mxu2 %v715_v13  ;;  %3892 = vmatpush.msrb.mxu3 %v1003_v11  ;;  %v3504_v13 = vpop.f32.mrf.mxu2  ;;  %v1777_v11 = vld [vmem:[#allocation6 + $0x3430] sm:$0xff] }
 0x334   :  { %3736 = vmatmul.f32.gmra.mxu0 %v8516_v18  ;;  %3805 = vmatmul.f32.gmra.mxu3 %v8519_v47  ;;  %v3505_v49 = vadd.f32 %v3504_v13, %v3482_v34  ;;  %v266_v34 = vld [vmem:[#allocation6 + $0x4f8] sm:$0xff] }
 0x335   :  { %3824 = vmatpush.msrb.mxu0 %v121_v3  ;;  %3847 = vmatpush.msrb.mxu1 %v409_v14  ;;  %v626_v3 = vld [vmem:[#allocation6 + $0x1038] sm:$0xff] }
 0x336   :  { %3870 = vmatpush.msrb.mxu2 %v697_v58  ;;  %3893 = vmatpush.msrb.mxu3 %v985_v1  ;;  %v9432_v14 = vld [vmem:[#allocation45_spill] sm:$0xff]  ;;  %v1759_v58 = vld [vmem:[#allocation6 + $0x33a0] sm:$0xff]  ;;  %v320_v1 = vld [vmem:[#allocation6 + $0x6a8] sm:$0xff] }
 0x337   :  { %3759 = vmatmul.f32.gmra.mxu1 %v8524_v5  ;;  %3901 = vmatpush.msra.mxu0 %v1543_v8  ;;  %v2611_v46 = vadd.f32 %v9432_v14, %v2588_v50  ;;  %v608_v8 = vld [vmem:[#allocation6 + $0xfa8] sm:$0xff]  ;;  %v1381_v14 = vld [vmem:[#allocation6 + $0x27d0] sm:$0xff] }
 0x338   :  { %3924 = vmatpush.msra.mxu1 %v1831_v7  ;;  %3947 = vmatpush.msra.mxu2 %v392_v38  ;;  %v3527_v7 = vpop.f32.mrf.mxu3  ;;  %v1453_v38 = vld [vmem:[#allocation6 + $0x2a10] sm:$0xff]  ;;  %v572_v50 = vld [vmem:[#allocation6 + $0xe88] sm:$0xff] }
 0x339   :  { %3970 = vmatpush.msra.mxu3 %v680_v23  ;;  %3902 = vmatpush.msra.mxu0 %v1525_v32  ;;  %v302_v23 = vld [vmem:[#allocation6 + $0x618] sm:$0xff] }
 0x33a   :  { %3925 = vmatpush.msra.mxu1 %v1813_v17  ;;  %3948 = vmatpush.msra.mxu2 %v374_v57  ;;  %v590_v32 = vld [vmem:[#allocation6 + $0xf18] sm:$0xff]  ;;  %v9433_v17 = vld [vmem:[#allocation46_spill] sm:$0xff] }
 0x33b   :  { %3971 = vmatpush.msra.mxu3 %v662_v15  ;;  %3903 = vmatpush.msra.mxu0 %v1507_v37  ;;  %v2634_v57 = vadd.f32 %v9433_v17, %v2611_v46  ;;  %v8532_v15 = vadd.f32 %v3527_v7, %v3505_v49  ;;  %v1723_v37 = vld [vmem:[#allocation6 + $0x3280] sm:$0xff]  ;;  %v1669_v46 = vld [vmem:[#allocation6 + $0x30d0] sm:$0xff] }
 0x33c   :  { %3926 = vmatpush.msra.mxu1 %v1795_v56  ;;  %3949 = vmatpush.msra.mxu2 %v356_v10  ;;  %v1417_v56 = vld [vmem:[#allocation6 + $0x28f0] sm:$0xff]  ;;  %v9435_v49 = vld [vmem:[#allocation50_spill] sm:$0xff] }
 0x33d   :  { %3972 = vmatpush.msra.mxu3 %v644_v33  ;;  %3904 = vmatpush.msra.mxu0 %v1489_v35  ;;  %v1705_v10 = vld [vmem:[#allocation6 + $0x31f0] sm:$0xff]  ;;  %v554_v33 = vld [vmem:[#allocation6 + $0xdf8] sm:$0xff]  ;;  %v1363_v7 = vld [vmem:[#allocation6 + $0x2740] sm:$0xff] }
 0x33e   :  { %3927 = vmatpush.msra.mxu1 %v1777_v11  ;;  %3950 = vmatpush.msra.mxu2 %v338_v30  ;;  %v9434_v35 = vld [vmem:[#allocation48_spill] sm:$0xff]  ;;  %v1687_v11 = vld [vmem:[#allocation6 + $0x3160] sm:$0xff] }
 0x33f   :  { %3973 = vmatpush.msra.mxu3 %v626_v3  ;;  %3905 = vmatpush.msra.mxu0 %v1471_v62  ;;  %v2657_v13 = vadd.f32 %v9434_v35, %v2634_v57  ;;  %v1399_v30 = vld [vmem:[#allocation6 + $0x2860] sm:$0xff]  ;;  %v248_v3 = vld [vmem:[#allocation6 + $0x468] sm:$0xff]  ;;  %v1633_v17 = vld [vmem:[#allocation6 + $0x2fb0] sm:$0xff] }
 0x340   :  { %3928 = vmatpush.msra.mxu1 %v1759_v58  ;;  %3951 = vmatpush.msra.mxu2 %v320_v1  ;;  %v536_v62 = vld [vmem:[#allocation6 + $0xd68] sm:$0xff]  ;;  %v230_v1 = vld [vmem:[#allocation6 + $0x3d8] sm:$0xff]  ;;  %v1291_v35 = vld [vmem:[#allocation6 + $0x2500] sm:$0xff] }
 0x341   :  { %3974 = vmatpush.msra.mxu3 %v608_v8  ;;  %3906 = vmatpush.msra.mxu0 %v1453_v38  ;;  %v2680_v58 = vadd.f32 %v9435_v49, %v2657_v13  ;;  %v518_v8 = vld [vmem:[#allocation6 + $0xcd8] sm:$0xff]  ;;  %v1651_v38 = vld [vmem:[#allocation6 + $0x3040] sm:$0xff]  ;;  %v1832_v49 = vld [vmem:[#allocation6 + $0x35e8] sm:$0xff] }
 0x342   :  { %3929 = vmatpush.msra.mxu1 %v1741_v42  ;;  %3952 = vmatpush.msra.mxu2 %v302_v23  ;;  %v212_v42 = vld [vmem:[#allocation6 + $0x348] sm:$0xff]  ;;  %v194_v57 = vld [vmem:[#allocation6 + $0x2b8] sm:$0xff]  ;;  %v1579_v13 = vld [vmem:[#allocation6 + $0x2e00] sm:$0xff] }
 0x343   :  { %3975 = vmatpush.msra.mxu3 %v590_v32  ;;  %3907 = vmatpush.msra.mxu0 %v1435_v54  ;;  %v500_v23 = vld [vmem:[#allocation6 + $0xc48] sm:$0xff]  ;;  %v1345_v54 = vld [vmem:[#allocation6 + $0x26b0] sm:$0xff] }
 0x344   :  { %3930 = vmatpush.msra.mxu1 %v1723_v37  ;;  %3953 = vmatpush.msra.mxu2 %v284_v21  ;;  %v482_v37 = vld [vmem:[#allocation6 + $0xbb8] sm:$0xff]  ;;  %v1615_v21 = vld [vmem:[#allocation6 + $0x2f20] sm:$0xff] }
 0x345   :  { %3976 = vmatpush.msra.mxu3 %v572_v50  ;;  %5808 = vrot.lane.b32.xlu2 %v8532_v15, %s7852_s2  ;;  %v176_v50 = vld [vmem:[#allocation6 + $0x228] sm:$0xff] }
 0x346   :  { %3908 = vmatpush.msra.mxu0 %v1417_v56  ;;  %3931 = vmatpush.msra.mxu1 %v1705_v10  ;;  %v464_v56 = vld [vmem:[#allocation6 + $0xb28] sm:$0xff]  ;;  %v1309_v10 = vld [vmem:[#allocation6 + $0x2590] sm:$0xff] }
 0x347   :  { %3954 = vmatpush.msra.mxu2 %v266_v34  ;;  %3977 = vmatpush.msra.mxu3 %v554_v33  ;;  %v1597_v34 = vld [vmem:[#allocation6 + $0x2e90] sm:$0xff]  ;;  %v158_v33 = vld [vmem:[#allocation6 + $0x198] sm:$0xff] }
 0x348   :  { %3825 = vmatmul.f32.vlgmr.msrb.gmra.mxu0 %v8416_v63  ;;  %3932 = vmatpush.msra.mxu1 %v1687_v11  ;;  %v9436_v63 = vld [vmem:[#allocation51_spill] sm:$0xff] }
 0x349   :  { %3909 = vmatpush.msra.mxu0 %v1399_v30  ;;  %3955 = vmatpush.msra.mxu2 %v248_v3  ;;  %v8541_v32 = vadd.f32 %v9436_v63, %v2680_v58  ;;  %v140_v11 = vld [vmem:[#allocation6 + $0x108] sm:$0xff]  ;;  %v122_v3 = vld [vmem:[#allocation6 + $0x78] sm:$0xff] }
 0x34a   :  { %3978 = vmatpush.msra.mxu3 %v536_v62  ;;  %3848 = vmatmul.f32.vlgmr.msrb.gmra.mxu1 %v8422_v31  ;;  %v1327_v31 = vld [vmem:[#allocation6 + $0x2620] sm:$0xff]  ;;  %v428_v30 = vld [vmem:[#allocation6 + $0xa08] sm:$0xff]  ;;  %v410_v62 = vld [vmem:[#allocation6 + $0x978] sm:$0xff] }
 0x34b   :  { %3910 = vmatpush.msra.mxu0 %v1381_v14  ;;  %3933 = vmatpush.msra.mxu1 %v1669_v46  ;;  %v1256_v14 = vld [vmem:[#allocation6 + $0x23e8] sm:$0xff]  ;;  %v950_v58 = vld [vmem:[#allocation6 + $0x1a58] sm:$0xff] }
 0x34c   :  { %3956 = vmatpush.msra.mxu2 %v230_v1  ;;  %3979 = vmatpush.msra.mxu3 %v518_v8  ;;  %v1544_v46 = vld [vmem:[#allocation6 + $0x2ce8] sm:$0xff]  ;;  %v8552_v1 = vpop.f32.mrf.mxu0  ;;  %v1238_v8 = vld [vmem:[#allocation6 + $0x2358] sm:$0xff] }
 0x34d   :  { %3911 = vmatpush.msra.mxu0 %v1363_v7  ;;  %3934 = vmatpush.msra.mxu1 %v1651_v38  ;;  %v1526_v7 = vld [vmem:[#allocation6 + $0x2c58] sm:$0xff]  ;;  %v1508_v63 = vld [vmem:[#allocation6 + $0x2bc8] sm:$0xff] }
 0x34e   :  { %3957 = vmatpush.msra.mxu2 %v212_v42  ;;  %3980 = vmatpush.msra.mxu3 %v500_v23  ;;  %v1814_v38 = vld [vmem:[#allocation6 + $0x3558] sm:$0xff]  ;;  %v932_v42 = vld [vmem:[#allocation6 + $0x19c8] sm:$0xff] }
 0x34f   :  { %5834 = vrot.lane.b32.xlu2 %v8541_v32, %s7852_s2  ;;  %3871 = vmatmul.f32.vlgmr.msrb.gmra.mxu2 %v8436_v12  ;;  %v446_v12 = vld [vmem:[#allocation6 + $0xa98] sm:$0xff]  ;;  %v1220_v23 = vld [vmem:[#allocation6 + $0x22c8] sm:$0xff] }
 0x350   :  { %3912 = vmatpush.msra.mxu0 %v1345_v54  ;;  %3935 = vmatpush.msra.mxu1 %v1633_v17  ;;  %v1796_v54 = vld [vmem:[#allocation6 + $0x34c8] sm:$0xff]  ;;  %v8555_v17 = vpop.f32.mrf.mxu1 }
 0x351   :  { %3958 = vmatpush.msra.mxu2 %v194_v57  ;;  %3981 = vmatpush.msra.mxu3 %v482_v37  ;;  %v1202_v57 = vld [vmem:[#allocation6 + $0x2238] sm:$0xff] }
 0x352   :  { %3828 = vmatmul.f32.gmra.mxu0 %v8439_v60  ;;  %3894 = vmatmul.f32.vlgmr.msrb.gmra.mxu3 %v8442_v55  ;;  %v1273_v60 = vld [vmem:[#allocation6 + $0x2470] sm:$0xff]  ;;  %v1490_v37 = vld [vmem:[#allocation6 + $0x2b38] sm:$0xff] }
 0x353   :  { %3913 = vmatpush.msra.mxu0 %v1327_v31  ;;  %3936 = vmatpush.msra.mxu1 %v1615_v21  ;;  %v1561_v55 = vld [vmem:[#allocation6 + $0x2d70] sm:$0xff]  ;;  %v1778_v31 = vld [vmem:[#allocation6 + $0x3438] sm:$0xff]  ;;  %v896_v21 = vld [vmem:[#allocation6 + $0x18a8] sm:$0xff] }
 0x354   :  { %3959 = vmatpush.msra.mxu2 %v176_v50  ;;  %3982 = vmatpush.msra.mxu3 %v464_v56  ;;  %v1472_v50 = vld [vmem:[#allocation6 + $0x2aa8] sm:$0xff] }
 0x355   :  { %3851 = vmatmul.f32.gmra.mxu1 %v8446_v39  ;;  %3914 = vmatpush.msra.mxu0 %v1309_v10  ;;  %v968_v39 = vld [vmem:[#allocation6 + $0x1ae8] sm:$0xff]  ;;  %v878_v10 = vld [vmem:[#allocation6 + $0x1818] sm:$0xff] }
 0x356   :  { %3937 = vmatpush.msra.mxu1 %v1597_v34  ;;  %3960 = vmatpush.msra.mxu2 %v158_v33  ;;  %v1760_v56 = vld [vmem:[#allocation6 + $0x33a8] sm:$0xff]  ;;  %v1166_v34 = vld [vmem:[#allocation6 + $0x2118] sm:$0xff] }
 0x357   :  { %3983 = vmatpush.msra.mxu3 %v446_v12  ;;  %3915 = vmatpush.msra.mxu0 %v1291_v35  ;;  %v1454_v33 = vld [vmem:[#allocation6 + $0x2a18] sm:$0xff]  ;;  %v8558_v12 = vpop.f32.mrf.mxu0 }
 0x358   :  { %3938 = vmatpush.msra.mxu1 %v1579_v13  ;;  %3961 = vmatpush.msra.mxu2 %v140_v11  ;;  %v1742_v35 = vld [vmem:[#allocation6 + $0x3318] sm:$0xff]  ;;  %v860_v13 = vld [vmem:[#allocation6 + $0x1788] sm:$0xff] }
 0x359   :  { %3984 = vmatpush.msra.mxu3 %v428_v30  ;;  %3874 = vmatmul.f32.gmra.mxu2 %v8516_v18  ;;  %v1148_v11 = vld [vmem:[#allocation6 + $0x2088] sm:$0xff] }
 0x35a   :  { %3916 = vmatpush.msra.mxu0 %v1273_v60  ;;  %3939 = vmatpush.msra.mxu1 %v1561_v55  ;;  %v1436_v30 = vld [vmem:[#allocation6 + $0x2988] sm:$0xff]  ;;  %v8561_v60 = vpop.f32.mrf.mxu2  ;;  %v3416_v55 = vadd.f32 %v8511_v52, %v1852_v44 }
 0x35b   :  { %3962 = vmatpush.msra.mxu2 %v122_v3  ;;  %3985 = vmatpush.msra.mxu3 %v410_v62  ;;  %v1724_v3 = vld [vmem:[#allocation6 + $0x3288] sm:$0xff]  ;;  %v842_v62 = vld [vmem:[#allocation6 + $0x16f8] sm:$0xff] }
 0x35c   :  { %3897 = vmatmul.f32.gmra.mxu3 %v8524_v5  ;;  %3917 = vmatmul.f32.vlgmr.msra.gmra.mxu0 %v8456_v6  ;;  %v914_v6 = vld [vmem:[#allocation6 + $0x1938] sm:$0xff]  ;;  %v3439_v44 = vadd.f32 %v8522_v20, %v3416_v55  ;;  %v1688_v52 = vld [vmem:[#allocation6 + $0x3168] sm:$0xff] }
 0x35d   :  { %3993 = vmatpush.msrb.mxu0 %v968_v39  ;;  %4016 = vmatpush.msrb.mxu1 %v1256_v14  ;;  %v1130_v39 = vld [vmem:[#allocation6 + $0x1ff8] sm:$0xff]  ;;  %v1652_v20 = vld [vmem:[#allocation6 + $0x3048] sm:$0xff] }
 0x35e   :  { %4039 = vmatpush.msrb.mxu2 %v1544_v46  ;;  %4062 = vmatpush.msrb.mxu3 %v1832_v49  ;;  %v1418_v14 = vld [vmem:[#allocation6 + $0x28f8] sm:$0xff]  ;;  %v8566_v46 = vpop.f32.mrf.mxu1  ;;  %v1616_v55 = vld [vmem:[#allocation6 + $0x2f28] sm:$0xff] }
 0x35f   :  { %3940 = vmatmul.f32.vlgmr.msra.gmra.mxu1 %v8459_v22  ;;  %3994 = vmatpush.msrb.mxu0 %v950_v58  ;;  %v1184_v22 = vld [vmem:[#allocation6 + $0x21a8] sm:$0xff]  ;;  %v1706_v49 = vld [vmem:[#allocation6 + $0x31f8] sm:$0xff] }
 0x360   :  { %4017 = vmatpush.msrb.mxu1 %v1238_v8  ;;  %4040 = vmatpush.msrb.mxu2 %v1526_v7  ;;  %v824_v58 = vld [vmem:[#allocation6 + $0x1668] sm:$0xff] }
 0x361   :  { %4063 = vmatpush.msrb.mxu3 %v1814_v38  ;;  %3995 = vmatpush.msrb.mxu0 %v932_v42  ;;  %v1112_v8 = vld [vmem:[#allocation6 + $0x1f68] sm:$0xff]  ;;  %v8568_v38 = vpop.f32.mrf.mxu3  ;;  %v806_v42 = vld [vmem:[#allocation6 + $0x15d8] sm:$0xff] }
 0x362   :  { %4018 = vmatpush.msrb.mxu1 %v1220_v23  ;;  %4041 = vmatpush.msrb.mxu2 %v1508_v63  ;;  %v1400_v7 = vld [vmem:[#allocation6 + $0x2868] sm:$0xff]  ;;  %v1094_v23 = vld [vmem:[#allocation6 + $0x1ed8] sm:$0xff] }
 0x363   :  { %4064 = vmatpush.msrb.mxu3 %v1796_v54  ;;  %3996 = vmatpush.msrb.mxu0 %v914_v6  ;;  %v1382_v63 = vld [vmem:[#allocation6 + $0x27d8] sm:$0xff]  ;;  %v788_v6 = vld [vmem:[#allocation6 + $0x1548] sm:$0xff] }
 0x364   :  { %4019 = vmatpush.msrb.mxu1 %v1202_v57  ;;  %4042 = vmatpush.msrb.mxu2 %v1490_v37  ;;  %v1670_v54 = vld [vmem:[#allocation6 + $0x30d8] sm:$0xff]  ;;  %v1076_v57 = vld [vmem:[#allocation6 + $0x1e48] sm:$0xff] }
 0x365   :  { %4065 = vmatpush.msrb.mxu3 %v1778_v31  ;;  %3920 = vmatmul.f32.gmra.mxu0 %v8513_v16  ;;  %v1364_v37 = vld [vmem:[#allocation6 + $0x2748] sm:$0xff]  ;;  %v3553_v31 = vpop.f32.mrf.mxu0 }
 0x366   :  { %3997 = vmatpush.msrb.mxu0 %v896_v21  ;;  %4020 = vmatpush.msrb.mxu1 %v1184_v22  ;;  %v3462_v21 = vadd.f32 %v8552_v1, %v3439_v44  ;;  %v770_v22 = vld [vmem:[#allocation6 + $0x14b8] sm:$0xff] }
 0x367   :  { %4043 = vmatpush.msrb.mxu2 %v1472_v50  ;;  %4066 = vmatpush.msrb.mxu3 %v1760_v56  ;;  %v1058_v50 = vld [vmem:[#allocation6 + $0x1db8] sm:$0xff] }
 0x368   :  { %3943 = vmatmul.f32.gmra.mxu1 %v8519_v47  ;;  %3998 = vmatpush.msrb.mxu0 %v878_v10  ;;  %v1346_v56 = vld [vmem:[#allocation6 + $0x26b8] sm:$0xff]  ;;  %v8572_v10 = vpop.f32.mrf.mxu2  ;;  %v3485_v1 = vadd.f32 %v8555_v17, %v3462_v21  ;;  %v1004_v17 = vld [vmem:[#allocation6 + $0x1c08] sm:$0xff]  ;;  %v681_v21 = vld [vmem:[#allocation6 + $0x11f0] sm:$0xff] }
 0x369   :  { %4021 = vmatpush.msrb.mxu1 %v1166_v34  ;;  %4044 = vmatpush.msrb.mxu2 %v1454_v33  ;;  %v1634_v34 = vld [vmem:[#allocation6 + $0x2fb8] sm:$0xff]  ;;  %v752_v33 = vld [vmem:[#allocation6 + $0x1428] sm:$0xff] }
 0x36a   :  { %4067 = vmatpush.msrb.mxu3 %v1742_v35  ;;  %3999 = vmatpush.msrb.mxu0 %v860_v13  ;;  %v1040_v35 = vld [vmem:[#allocation6 + $0x1d28] sm:$0xff]  ;;  %v3508_v44 = vadd.f32 %v8561_v60, %v3485_v1 }
 0x36b   :  { %4022 = vmatpush.msrb.mxu1 %v1148_v11  ;;  %4045 = vmatpush.msrb.mxu2 %v1436_v30  ;;  %v1328_v13 = vld [vmem:[#allocation6 + $0x2628] sm:$0xff]  ;;  %v3576_v11 = vpop.f32.mrf.mxu1  ;;  %v1853_v30 = vperm.slane %v8499_v40, 4 }
 0x36c   :  { %4068 = vmatpush.msrb.mxu3 %v1724_v3  ;;  %4000 = vmatpush.msrb.mxu0 %v842_v62  ;;  %v734_v3 = vld [vmem:[#allocation6 + $0x1398] sm:$0xff] }
 0x36d   :  { %4023 = vmatpush.msrb.mxu1 %v1130_v39  ;;  %4046 = vmatpush.msrb.mxu2 %v1418_v14  ;;  %v1022_v62 = vld [vmem:[#allocation6 + $0x1c98] sm:$0xff]  ;;  %v8576_v14 = vpop.f32.mrf.mxu3  ;;  %v3551_v40 = vadd.f32 %v8558_v12, %v1853_v30 }
 0x36e   :  { %4069 = vmatpush.msrb.mxu3 %v1706_v49  ;;  %4001 = vmatpush.msrb.mxu0 %v824_v58  ;;  %v1310_v39 = vld [vmem:[#allocation6 + $0x2598] sm:$0xff]  ;;  %v3554_v49 = vadd.f32 %v3553_v31, %v1853_v30  ;;  %v8584_v31 = vadd.f32 %v8568_v38, %v3508_v44  ;;  %v663_v38 = vld [vmem:[#allocation6 + $0x1160] sm:$0xff]  ;;  %v357_v30 = vld [vmem:[#allocation6 + $0x7d0] sm:$0xff] }
 0x36f   :  { %4024 = vmatpush.msrb.mxu1 %v1112_v8  ;;  %4047 = vmatpush.msrb.mxu2 %v1400_v7  ;;  %v1598_v58 = vld [vmem:[#allocation6 + $0x2e98] sm:$0xff]  ;;  %v716_v8 = vld [vmem:[#allocation6 + $0x1308] sm:$0xff]  ;;  %v3574_v60 = vadd.f32 %v8566_v46, %v3551_v40  ;;  %v375_v46 = vld [vmem:[#allocation6 + $0x860] sm:$0xff] }
 0x370   :  { %4070 = vmatpush.msrb.mxu3 %v1688_v52  ;;  %4002 = vmatpush.msrb.mxu0 %v806_v42  ;;  %v1292_v7 = vld [vmem:[#allocation6 + $0x2508] sm:$0xff]  ;;  %v698_v42 = vld [vmem:[#allocation6 + $0x1278] sm:$0xff]  ;;  %v3599_v12 = vpop.f32.mrf.mxu2  ;;  %v321_v40 = vld [vmem:[#allocation6 + $0x6b0] sm:$0xff] }
 0x371   :  { %4025 = vmatpush.msrb.mxu1 %v1094_v23  ;;  %4048 = vmatpush.msrb.mxu2 %v1382_v63  ;;  %v1580_v52 = vld [vmem:[#allocation6 + $0x2e08] sm:$0xff]  ;;  %v986_v23 = vld [vmem:[#allocation6 + $0x1b78] sm:$0xff]  ;;  %v3597_v1 = vadd.f32 %v8572_v10, %v3574_v60  ;;  %v609_v44 = vld [vmem:[#allocation6 + $0xfb0] sm:$0xff] }
 0x372   :  { %4071 = vmatpush.msrb.mxu3 %v1670_v54  ;;  %4003 = vmatpush.msrb.mxu0 %v788_v6  ;;  %v1274_v63 = vld [vmem:[#allocation6 + $0x2478] sm:$0xff]  ;;  %v8580_v54 = vpop.f32.mrf.mxu0  ;;  %v3577_v6 = vadd.f32 %v3576_v11, %v3554_v49  ;;  %v627_v49 = vld [vmem:[#allocation6 + $0x1040] sm:$0xff]  ;;  %v285_v60 = vld [vmem:[#allocation6 + $0x590] sm:$0xff] }
 0x373   :  { %4026 = vmatpush.msrb.mxu1 %v1076_v57  ;;  %4049 = vmatpush.msrb.mxu2 %v1364_v37  ;;  %v1562_v57 = vld [vmem:[#allocation6 + $0x2d78] sm:$0xff]  ;;  %v393_v37 = vld [vmem:[#allocation6 + $0x8f0] sm:$0xff] }
 0x374   :  { %4072 = vmatpush.msrb.mxu3 %v1652_v20  ;;  %4004 = vmatpush.msrb.mxu0 %v770_v22  ;;  %v969_v20 = vld [vmem:[#allocation6 + $0x1af0] sm:$0xff]  ;;  %v8586_v22 = vld [vmem:[#allocation3] sm:$0xff] }
 0x375   :  { %4027 = vmatpush.msrb.mxu1 %v1058_v50  ;;  %4050 = vmatpush.msrb.mxu2 %v1346_v56  ;;  %v1257_v50 = vld [vmem:[#allocation6 + $0x23f0] sm:$0xff]  ;;  %v8589_v56 = vpop.f32.mrf.mxu1  ;;  %v3622_v11 = vpop.f32.mrf.mxu3 }
 0x376   :  { %4073 = vmatpush.msrb.mxu3 %v1634_v34  ;;  %4005 = vmatpush.msrb.mxu0 %v752_v33  ;;  %v8591_v34 = vld [vmem:[#allocation3 + $0x8] sm:$0xff]  ;;  %v3600_v33 = vadd.f32 %v3599_v12, %v3577_v6  ;;  %v591_v6 = vld [vmem:[#allocation6 + $0xf20] sm:$0xff] }
 0x377   :  { %4028 = vmatpush.msrb.mxu1 %v1040_v35  ;;  %4051 = vmatpush.msrb.mxu2 %v1328_v13  ;;  %v951_v35 = vld [vmem:[#allocation6 + $0x1a60] sm:$0xff] }
 0x378   :  { %4074 = vmatpush.msrb.mxu3 %v1616_v55  ;;  %4006 = vmatpush.msrb.mxu0 %v734_v3  ;;  %v1239_v13 = vld [vmem:[#allocation6 + $0x2360] sm:$0xff]  ;;  %v645_v55 = vld [vmem:[#allocation6 + $0x10d0] sm:$0xff] }
 0x379   :  { %4029 = vmatpush.msrb.mxu1 %v1022_v62  ;;  %4052 = vmatpush.msrb.mxu2 %v1310_v39  ;;  %v933_v3 = vld [vmem:[#allocation6 + $0x19d0] sm:$0xff]  ;;  %v339_v39 = vld [vmem:[#allocation6 + $0x740] sm:$0xff] }
 0x37a   :  { %4075 = vmatpush.msrb.mxu3 %v1598_v58  ;;  %4007 = vmatpush.msrb.mxu0 %v716_v8  ;;  %v1221_v62 = vld [vmem:[#allocation6 + $0x22d0] sm:$0xff]  ;;  %v3623_v58 = vadd.f32 %v3622_v11, %v3600_v33  ;;  %v915_v8 = vld [vmem:[#allocation6 + $0x1940] sm:$0xff]  ;;  %v3645_v10 = vpop.f32.mrf.mxu0 }
 0x37b   :  { %4030 = vmatpush.msrb.mxu1 %v1004_v17  ;;  %4053 = vmatpush.msrb.mxu2 %v1292_v7  ;;  %v1203_v17 = vld [vmem:[#allocation6 + $0x2240] sm:$0xff]  ;;  %v3620_v7 = vadd.f32 %v8576_v14, %v3597_v1  ;;  %v8601_v33 = vld [vmem:[#allocation3 + $0x30] sm:$0xff] }
 0x37c   :  { %4076 = vmatpush.msrb.mxu3 %v1580_v52  ;;  %4008 = vmatpush.msrb.mxu0 %v698_v42  ;;  %v897_v52 = vld [vmem:[#allocation6 + $0x18b0] sm:$0xff]  ;;  %v1131_v11 = vld [vmem:[#allocation6 + $0x2000] sm:$0xff] }
 0x37d   :  { %4031 = vmatpush.msrb.mxu1 %v986_v23  ;;  %4054 = vmatpush.msrb.mxu2 %v1274_v63  ;;  %v1185_v42 = vld [vmem:[#allocation6 + $0x21b0] sm:$0xff]  ;;  %v3646_v23 = vadd.f32 %v3645_v10, %v3623_v58  ;;  %v303_v63 = vld [vmem:[#allocation6 + $0x620] sm:$0xff]  ;;  %v3668_v12 = vpop.f32.mrf.mxu1  ;;  %v3643_v14 = vadd.f32 %v8580_v54, %v3620_v7 }
 0x37e   :  { %4077 = vmatpush.msrb.mxu3 %v1562_v57  ;;  %3963 = vmatmul.f32.vlgmr.msra.gmra.mxu2 %v8586_v22  ;;  %v879_v57 = vld [vmem:[#allocation6 + $0x1820] sm:$0xff]  ;;  %v249_v1 = vld [vmem:[#allocation6 + $0x470] sm:$0xff] }
 0x37f   :  { %3986 = vmatmul.f32.vlgmr.msra.gmra.mxu3 %v8591_v34  ;;  %4085 = vmatpush.msra.mxu0 %v393_v37  ;;  %v1167_v37 = vld [vmem:[#allocation6 + $0x2120] sm:$0xff]  ;;  %v8605_v54 = vadd.f32 %v8589_v56, %v3643_v14  ;;  %v501_v10 = vld [vmem:[#allocation6 + $0xc50] sm:$0xff] }
 0x380   :  { %4108 = vmatpush.msra.mxu1 %v681_v21  ;;  %4131 = vmatpush.msra.mxu2 %v969_v20  ;;  %v573_v21 = vld [vmem:[#allocation6 + $0xe90] sm:$0xff]  ;;  %v231_v56 = vld [vmem:[#allocation6 + $0x3e0] sm:$0xff] }
 0x381   :  { %4154 = vmatpush.msra.mxu3 %v1257_v50  ;;  %5836 = vrot.lane.b32.xlu1 %v8584_v31, %s7852_s2  ;;  %v861_v20 = vld [vmem:[#allocation6 + $0x1790] sm:$0xff]  ;;  %v8599_v50 = vadd.f32 %v3668_v12, %v3646_v23  ;;  %v807_v58 = vld [vmem:[#allocation6 + $0x15e0] sm:$0xff] }
 0x382   :  { %4086 = vmatpush.msra.mxu0 %v375_v46  ;;  %4109 = vmatpush.msra.mxu1 %v663_v38  ;;  %v1149_v46 = vld [vmem:[#allocation6 + $0x2090] sm:$0xff]  ;;  %v267_v38 = vld [vmem:[#allocation6 + $0x500] sm:$0xff] }
 0x383   :  { %4132 = vmatpush.msra.mxu2 %v951_v35  ;;  %4155 = vmatpush.msra.mxu3 %v1239_v13  ;;  %v555_v35 = vld [vmem:[#allocation6 + $0xe00] sm:$0xff]  ;;  %v789_v7 = vld [vmem:[#allocation6 + $0x1550] sm:$0xff] }
 0x384   :  { %4087 = vmatpush.msra.mxu0 %v357_v30  ;;  %4110 = vmatpush.msra.mxu1 %v645_v55  ;;  %v843_v13 = vld [vmem:[#allocation6 + $0x1700] sm:$0xff]  ;;  %v537_v30 = vld [vmem:[#allocation6 + $0xd70] sm:$0xff]  ;;  %v7494_v55 = vpack.i.bf16 %v8599_v50, %v8605_v54 }
 0x385   :  { %4133 = vmatpush.msra.mxu2 %v933_v3  ;;  %4156 = vmatpush.msra.mxu3 %v1221_v62  ;;  %v8609_v3 = vld [vmem:[#allocation3 + $0x38] sm:$0xff]  ;;  %v825_v62 = vld [vmem:[#allocation6 + $0x1670] sm:$0xff]  ;;  %v771_v23 = vld [vmem:[#allocation6 + $0x14c0] sm:$0xff] }
 0x386   :  { %4088 = vmatpush.msra.mxu0 %v339_v39  ;;  %4111 = vmatpush.msra.mxu1 %v627_v49  ;;  %v1113_v39 = vld [vmem:[#allocation6 + $0x1f70] sm:$0xff]  ;;  %v519_v49 = vld [vmem:[#allocation6 + $0xce0] sm:$0xff] }
 0x387   :  { %4134 = vmatpush.msra.mxu2 %v915_v8  ;;  %4157 = vmatpush.msra.mxu3 %v1203_v17  ;;  %v1095_v8 = vld [vmem:[#allocation6 + $0x1ee0] sm:$0xff]  ;;  %v213_v17 = vld [vmem:[#allocation6 + $0x350] sm:$0xff] }
 0x388   :  { %4089 = vmatpush.msra.mxu0 %v321_v40  ;;  %4112 = vmatpush.msra.mxu1 %v609_v44  ;;  %v1077_v40 = vld [vmem:[#allocation6 + $0x1e50] sm:$0xff]  ;;  %v8613_v44 = vld [vmem:[#allocation3 + $0x20] sm:$0xff] }
 0x389   :  { %4135 = vmatpush.msra.mxu2 %v897_v52  ;;  %4158 = vmatpush.msra.mxu3 %v1185_v42  ;;  %v195_v52 = vld [vmem:[#allocation6 + $0x2c0] sm:$0xff]  ;;  %v465_v12 = vld [vmem:[#allocation6 + $0xb30] sm:$0xff] }
 0x38a   :  { %4090 = vmatpush.msra.mxu0 %v303_v63  ;;  %4113 = vmatpush.msra.mxu1 %v591_v6  ;;  %v483_v42 = vld [vmem:[#allocation6 + $0xbc0] sm:$0xff]  ;;  %v8616_v6 = vld [vmem:[#allocation3 + $0x10] sm:$0xff] }
 0x38b   :  { %4136 = vmatpush.msra.mxu2 %v879_v57  ;;  %4159 = vmatpush.msra.mxu3 %v1167_v37  ;;  %v1059_v63 = vld [vmem:[#allocation6 + $0x1dc0] sm:$0xff]  ;;  %v8619_v57 = vld [vmem:[#allocation3 + $0x28] sm:$0xff]  ;;  %v177_v37 = vld [vmem:[#allocation6 + $0x230] sm:$0xff] }
 0x38c   :  { %3966 = vmatmul.f32.gmra.mxu2 %v8601_v33  ;;  %4091 = vmatpush.msra.mxu0 %v285_v60  ;;  %v753_v14 = vld [vmem:[#allocation6 + $0x1430] sm:$0xff] }
 0x38d   :  { %4114 = vmatpush.msra.mxu1 %v573_v21  ;;  %4137 = vmatpush.msra.mxu2 %v861_v20  ;;  %v1041_v60 = vld [vmem:[#allocation6 + $0x1d30] sm:$0xff]  ;;  %v159_v21 = vld [vmem:[#allocation6 + $0x1a0] sm:$0xff]  ;;  %v8622_v20 = vld [vmem:[#allocation3 + $0x18] sm:$0xff] }
 0x38e   :  { %4160 = vmatpush.msra.mxu3 %v1149_v46  ;;  %4092 = vmatpush.msra.mxu0 %v267_v38  ;;  %v447_v46 = vld [vmem:[#allocation6 + $0xaa0] sm:$0xff] }
 0x38f   :  { %3989 = vmatmul.f32.gmra.mxu3 %v8609_v3  ;;  %4115 = vmatpush.msra.mxu1 %v555_v35  ;;  %v735_v38 = vld [vmem:[#allocation6 + $0x13a0] sm:$0xff] }
 0x390   :  { %4138 = vmatpush.msra.mxu2 %v843_v13  ;;  %4161 = vmatpush.msra.mxu3 %v1131_v11  ;;  %v1023_v35 = vld [vmem:[#allocation6 + $0x1ca0] sm:$0xff]  ;;  %v141_v13 = vld [vmem:[#allocation6 + $0x110] sm:$0xff] }
 0x391   :  { %4093 = vmatpush.msra.mxu0 %v249_v1  ;;  %4116 = vmatpush.msra.mxu1 %v537_v30  ;;  %v429_v11 = vld [vmem:[#allocation6 + $0xa10] sm:$0xff] }
 0x392   :  { %4139 = vmatpush.msra.mxu2 %v825_v62  ;;  %4162 = vmatpush.msra.mxu3 %v1113_v39  ;;  %v717_v1 = vld [vmem:[#allocation6 + $0x1310] sm:$0xff]  ;;  %v411_v62 = vld [vmem:[#allocation6 + $0x980] sm:$0xff] }
 0x393   :  { %7495 = vrot.lane.b32.xlu0 %v7494_v55, %s7852_s2  ;;  %4094 = vmatpush.msra.mxu0 %v231_v56  ;;  %v1005_v30 = vld [vmem:[#allocation6 + $0x1c10] sm:$0xff]  ;;  %v123_v55 = vld [vmem:[#allocation6 + $0x80] sm:$0xff] }
 0x394   :  { %4117 = vmatpush.msra.mxu1 %v519_v49  ;;  %4140 = vmatpush.msra.mxu2 %v807_v58  ;;  %v699_v39 = vld [vmem:[#allocation6 + $0x1280] sm:$0xff]  ;;  %v1545_v49 = vld [vmem:[#allocation6 + $0x2cf0] sm:$0xff] }
 0x395   :  { %4163 = vmatpush.msra.mxu3 %v1095_v8  ;;  %4055 = vmatmul.f32.vlgmr.msrb.gmra.mxu2 %v8613_v44  ;;  %v987_v56 = vld [vmem:[#allocation6 + $0x1b80] sm:$0xff]  ;;  %v1833_v58 = vld [vmem:[#allocation6 + $0x35f0] sm:$0xff]  ;;  %v394_v8 = vld [vmem:[#allocation6 + $0x8f8] sm:$0xff] }
 0x396   :  { %4095 = vmatpush.msra.mxu0 %v213_v17  ;;  %4118 = vmatpush.msra.mxu1 %v501_v10  ;;  %v1527_v17 = vld [vmem:[#allocation6 + $0x2c60] sm:$0xff] }
 0x397   :  { %4141 = vmatpush.msra.mxu2 %v789_v7  ;;  %4164 = vmatpush.msra.mxu3 %v1077_v40  ;;  %v1815_v10 = vld [vmem:[#allocation6 + $0x3560] sm:$0xff]  ;;  %v376_v7 = vld [vmem:[#allocation6 + $0x868] sm:$0xff] }
 0x398   :  { %4009 = vmatmul.f32.vlgmr.msrb.gmra.mxu0 %v8616_v6  ;;  %4078 = vmatmul.f32.vlgmr.msrb.gmra.mxu3 %v8619_v57  ;;  %v664_v40 = vld [vmem:[#allocation6 + $0x1168] sm:$0xff] }
 0x399   :  { %4096 = vmatpush.msra.mxu0 %v195_v52  ;;  %4119 = vmatpush.msra.mxu1 %v483_v42  ;;  %v358_v52 = vld [vmem:[#allocation6 + $0x7d8] sm:$0xff] }
 0x39a   :  { %4142 = vmatpush.msra.mxu2 %v771_v23  ;;  %4165 = vmatpush.msra.mxu3 %v1059_v63  ;;  %v646_v42 = vld [vmem:[#allocation6 + $0x10d8] sm:$0xff]  ;;  %v1491_v23 = vld [vmem:[#allocation6 + $0x2b40] sm:$0xff] }
 0x39b   :  { %4032 = vmatmul.f32.vlgmr.msrb.gmra.mxu1 %v8622_v20  ;;  %4097 = vmatpush.msra.mxu0 %v177_v37  ;;  %v1779_v63 = vld [vmem:[#allocation6 + $0x3440] sm:$0xff]  ;;  %v340_v37 = vld [vmem:[#allocation6 + $0x748] sm:$0xff] }
 0x39c   :  { %4120 = vmatpush.msra.mxu1 %v465_v12  ;;  %4143 = vmatpush.msra.mxu2 %v753_v14  ;;  %v1473_v12 = vld [vmem:[#allocation6 + $0x2ab0] sm:$0xff]  ;;  %v8629_v14 = vpop.f32.mrf.mxu2 }
 0x39d   :  { %4166 = vmatpush.msra.mxu3 %v1041_v60  ;;  %4098 = vmatpush.msra.mxu0 %v159_v21  ;;  %v1761_v60 = vld [vmem:[#allocation6 + $0x33b0] sm:$0xff]  ;;  %v322_v21 = vld [vmem:[#allocation6 + $0x6b8] sm:$0xff] }
 0x39e   :  { %4121 = vmatpush.msra.mxu1 %v447_v46  ;;  %4144 = vmatpush.msra.mxu2 %v735_v38  ;;  %v610_v46 = vld [vmem:[#allocation6 + $0xfb8] sm:$0xff]  ;;  %v1455_v38 = vld [vmem:[#allocation6 + $0x2a20] sm:$0xff] }
 0x39f   :  { %4167 = vmatpush.msra.mxu3 %v1023_v35  ;;  %4058 = vmatmul.f32.gmra.mxu2 %v8513_v16  ;;  %v682_v16 = vld [vmem:[#allocation6 + $0x11f8] sm:$0xff]  ;;  %v1743_v35 = vld [vmem:[#allocation6 + $0x3320] sm:$0xff] }
 0x3a0   :  { %4099 = vmatpush.msra.mxu0 %v141_v13  ;;  %4122 = vmatpush.msra.mxu1 %v429_v11  ;;  %v304_v13 = vld [vmem:[#allocation6 + $0x628] sm:$0xff] }
 0x3a1   :  { %4145 = vmatpush.msra.mxu2 %v717_v1  ;;  %4168 = vmatpush.msra.mxu3 %v1005_v30  ;;  %v592_v11 = vld [vmem:[#allocation6 + $0xf28] sm:$0xff]  ;;  %v8631_v1 = vpop.f32.mrf.mxu3  ;;  %v1437_v30 = vld [vmem:[#allocation6 + $0x2990] sm:$0xff] }
 0x3a2   :  { %4012 = vmatmul.f32.gmra.mxu0 %v8516_v18  ;;  %4081 = vmatmul.f32.gmra.mxu3 %v8519_v47  ;;  %v1509_v18 = vld [vmem:[#allocation6 + $0x2bd0] sm:$0xff] }
 0x3a3   :  { %4100 = vmatpush.msra.mxu0 %v123_v55  ;;  %4123 = vmatpush.msra.mxu1 %v411_v62  ;;  %v1797_v47 = vld [vmem:[#allocation6 + $0x34d0] sm:$0xff]  ;;  %v286_v62 = vld [vmem:[#allocation6 + $0x598] sm:$0xff] }
 0x3a4   :  { %4146 = vmatpush.msra.mxu2 %v699_v39  ;;  %4169 = vmatpush.msra.mxu3 %v987_v56  ;;  %v1725_v55 = vld [vmem:[#allocation6 + $0x3290] sm:$0xff]  ;;  %v574_v39 = vld [vmem:[#allocation6 + $0xe98] sm:$0xff]  ;;  %v1419_v56 = vld [vmem:[#allocation6 + $0x2900] sm:$0xff] }
 0x3a5   :  { %4035 = vmatmul.f32.gmra.mxu1 %v8524_v5  ;;  %4177 = vmatpush.msrb.mxu0 %v1545_v49  ;;  %v628_v5 = vld [vmem:[#allocation6 + $0x1048] sm:$0xff]  ;;  %v1707_v49 = vld [vmem:[#allocation6 + $0x3200] sm:$0xff] }
 0x3a6   :  { %4200 = vmatpush.msrb.mxu1 %v1833_v58  ;;  %4223 = vmatpush.msrb.mxu2 %v394_v8  ;;  %v268_v58 = vld [vmem:[#allocation6 + $0x508] sm:$0xff] }
 0x3a7   :  { %4246 = vmatpush.msrb.mxu3 %v682_v16  ;;  %4178 = vmatpush.msrb.mxu0 %v1527_v17  ;;  %v556_v8 = vld [vmem:[#allocation6 + $0xe08] sm:$0xff]  ;;  %v1401_v16 = vld [vmem:[#allocation6 + $0x2870] sm:$0xff] }
 0x3a8   :  { %4201 = vmatpush.msrb.mxu1 %v1815_v10  ;;  %4224 = vmatpush.msrb.mxu2 %v376_v7  ;;  %v1689_v17 = vld [vmem:[#allocation6 + $0x3170] sm:$0xff]  ;;  %v250_v10 = vld [vmem:[#allocation6 + $0x478] sm:$0xff] }
 0x3a9   :  { %4247 = vmatpush.msrb.mxu3 %v664_v40  ;;  %4179 = vmatpush.msrb.mxu0 %v1509_v18  ;;  %v538_v7 = vld [vmem:[#allocation6 + $0xd78] sm:$0xff]  ;;  %v3691_v40 = vpop.f32.mrf.mxu2  ;;  %v1383_v18 = vld [vmem:[#allocation6 + $0x27e0] sm:$0xff] }
 0x3aa   :  { %4202 = vmatpush.msrb.mxu1 %v1797_v47  ;;  %4225 = vmatpush.msrb.mxu2 %v358_v52  ;;  %v1671_v47 = vld [vmem:[#allocation6 + $0x30e0] sm:$0xff]  ;;  %v232_v52 = vld [vmem:[#allocation6 + $0x3e8] sm:$0xff] }
 0x3ab   :  { %4248 = vmatpush.msrb.mxu3 %v646_v42  ;;  %4180 = vmatpush.msrb.mxu0 %v1491_v23  ;;  %v3734_v42 = vpop.f32.mrf.mxu0  ;;  %v8634_v23 = vld [vmem:[#allocation8 + $0x8] sm:$0xff] }
 0x3ac   :  { %4203 = vmatpush.msrb.mxu1 %v1779_v63  ;;  %4226 = vmatpush.msrb.mxu2 %v340_v37  ;;  %v1854_v63 = vperm.slane %v8634_v23, 5  ;;  %v520_v37 = vld [vmem:[#allocation6 + $0xce8] sm:$0xff] }
 0x3ad   :  { %4249 = vmatpush.msrb.mxu3 %v628_v5  ;;  %4181 = vmatpush.msrb.mxu0 %v1473_v12  ;;  %v1365_v5 = vld [vmem:[#allocation6 + $0x2750] sm:$0xff]  ;;  %v3714_v12 = vpop.f32.mrf.mxu3 }
 0x3ae   :  { %4204 = vmatpush.msrb.mxu1 %v1761_v60  ;;  %4227 = vmatpush.msrb.mxu2 %v322_v21  ;;  %v1653_v60 = vld [vmem:[#allocation6 + $0x3050] sm:$0xff]  ;;  %v214_v21 = vld [vmem:[#allocation6 + $0x358] sm:$0xff] }
 0x3af   :  { %4250 = vmatpush.msrb.mxu3 %v610_v46  ;;  %4182 = vmatpush.msrb.mxu0 %v1455_v38  ;;  %v502_v46 = vld [vmem:[#allocation6 + $0xc58] sm:$0xff]  ;;  %v1347_v38 = vld [vmem:[#allocation6 + $0x26c0] sm:$0xff] }
 0x3b0   :  { %4205 = vmatpush.msrb.mxu1 %v1743_v35  ;;  %4228 = vmatpush.msrb.mxu2 %v304_v13  ;;  %v1635_v35 = vld [vmem:[#allocation6 + $0x2fc0] sm:$0xff]  ;;  %v3757_v13 = vpop.f32.mrf.mxu1 }
 0x3b1   :  { %4251 = vmatpush.msrb.mxu3 %v592_v11  ;;  %4183 = vmatpush.msrb.mxu0 %v1437_v30  ;;  %v3689_v11 = vadd.f32 %v8629_v14, %v1854_v63  ;;  %v3692_v30 = vadd.f32 %v3691_v40, %v1854_v63  ;;  %v160_v40 = vld [vmem:[#allocation6 + $0x1a8] sm:$0xff] }
 0x3b2   :  { %4206 = vmatpush.msrb.mxu1 %v1725_v55  ;;  %4229 = vmatpush.msrb.mxu2 %v286_v62  ;;  %v196_v55 = vld [vmem:[#allocation6 + $0x2c8] sm:$0xff] }
 0x3b3   :  { %4252 = vmatpush.msrb.mxu3 %v574_v39  ;;  %4184 = vmatpush.msrb.mxu0 %v1419_v56  ;;  %v484_v62 = vld [vmem:[#allocation6 + $0xbc8] sm:$0xff]  ;;  %v8640_v39 = vpop.permute.xlu0 %4487  ;;  %v1329_v56 = vld [vmem:[#allocation6 + $0x2630] sm:$0xff]  ;;  %v3712_v14 = vadd.f32 %v8631_v1, %v3689_v11 }
 0x3b4   :  { %4207 = vmatpush.msrb.mxu1 %v1707_v49  ;;  %4230 = vmatpush.msrb.mxu2 %v268_v58  ;;  %v1617_v49 = vld [vmem:[#allocation6 + $0x2f30] sm:$0xff]  ;;  %v178_v58 = vld [vmem:[#allocation6 + $0x238] sm:$0xff]  ;;  %v412_v11 = vld [vmem:[#allocation6 + $0x988] sm:$0xff] }
 0x3b5   :  { %4253 = vmatpush.msrb.mxu3 %v556_v8  ;;  %4101 = vmatmul.f32.vlgmr.msra.gmra.mxu0 %v8586_v22  ;;  %v466_v8 = vld [vmem:[#allocation6 + $0xb38] sm:$0xff]  ;;  %v3803_v63 = vpop.f32.mrf.mxu3  ;;  %v1581_v1 = vld [vmem:[#allocation6 + $0x2e10] sm:$0xff] }
 0x3b6   :  { %4185 = vmatpush.msrb.mxu0 %v1401_v16  ;;  %4208 = vmatpush.msrb.mxu1 %v1689_v17  ;;  %v3780_v16 = vpop.f32.mrf.mxu2  ;;  %v3715_v17 = vadd.f32 %v3714_v12, %v3692_v30  ;;  %v430_v12 = vld [vmem:[#allocation6 + $0xa18] sm:$0xff]  ;;  %v8646_v30 = vld [vmem:[#allocation3 + $0x40] sm:$0xff] }
 0x3b7   :  { %4231 = vmatpush.msrb.mxu2 %v250_v10  ;;  %4254 = vmatpush.msrb.mxu3 %v538_v7  ;;  %v1311_v10 = vld [vmem:[#allocation6 + $0x25a0] sm:$0xff] }
 0x3b8   :  { %4124 = vmatmul.f32.vlgmr.msra.gmra.mxu1 %v8591_v34  ;;  %4186 = vmatpush.msrb.mxu0 %v1383_v18  ;;  %v1599_v7 = vld [vmem:[#allocation6 + $0x2ea0] sm:$0xff]  ;;  %v3737_v18 = vpop.f32.mrf.mxu0 }
 0x3b9   :  { %4209 = vmatpush.msrb.mxu1 %v1671_v47  ;;  %4232 = vmatpush.msrb.mxu2 %v232_v52  ;;  %v448_v47 = vld [vmem:[#allocation6 + $0xaa8] sm:$0xff]  ;;  %v1293_v52 = vld [vmem:[#allocation6 + $0x2510] sm:$0xff] }
 0x3ba   :  { %4255 = vmatpush.msrb.mxu3 %v520_v37  ;;  %4187 = vmatpush.msrb.mxu0 %v1365_v5  ;;  %v142_v37 = vld [vmem:[#allocation6 + $0x118] sm:$0xff]  ;;  %v3735_v5 = vadd.f32 %v3734_v42, %v3712_v14 }
 0x3bb   :  { %4210 = vmatpush.msrb.mxu1 %v1653_v60  ;;  %4233 = vmatpush.msrb.mxu2 %v214_v21  ;;  %v3738_v60 = vadd.f32 %v3737_v18, %v3715_v17  ;;  %v1275_v21 = vld [vmem:[#allocation6 + $0x2480] sm:$0xff]  ;;  %v8651_v17 = vld [vmem:[#allocation3 + $0x48] sm:$0xff] }
 0x3bc   :  { %4256 = vmatpush.msrb.mxu3 %v502_v46  ;;  %4147 = vmatmul.f32.vlgmr.msra.gmra.mxu2 %v8616_v6  ;;  %v1563_v46 = vld [vmem:[#allocation6 + $0x2d80] sm:$0xff]  ;;  %v3758_v42 = vadd.f32 %v3757_v13, %v3735_v5  ;;  %v1240_v13 = vld [vmem:[#allocation6 + $0x2368] sm:$0xff] }
 0x3bd   :  { %4188 = vmatpush.msrb.mxu0 %v1347_v38  ;;  %4211 = vmatpush.msrb.mxu1 %v1635_v35  ;;  %v3760_v38 = vpop.f32.mrf.mxu1  ;;  %v124_v35 = vld [vmem:[#allocation6 + $0x88] sm:$0xff]  ;;  %v3806_v5 = vpop.f32.mrf.mxu3 }
 0x3be   :  { %4234 = vmatpush.msrb.mxu2 %v196_v55  ;;  %4257 = vmatpush.msrb.mxu3 %v484_v62  ;;  %v8649_v55 = vpop.permute.xlu0 %4485  ;;  %v970_v62 = vld [vmem:[#allocation6 + $0x1af8] sm:$0xff]  ;;  %v3783_v14 = vpop.f32.mrf.mxu2  ;;  %v1816_v18 = vld [vmem:[#allocation6 + $0x3568] sm:$0xff] }
 0x3bf   :  { %4104 = vmatmul.f32.gmra.mxu0 %v8601_v33  ;;  %4170 = vmatmul.f32.vlgmr.msra.gmra.mxu3 %v8622_v20 }
 0x3c0   :  { %4189 = vmatpush.msrb.mxu0 %v1329_v56  ;;  %4212 = vmatpush.msrb.mxu1 %v1617_v49  ;;  %v1258_v56 = vld [vmem:[#allocation6 + $0x23f8] sm:$0xff]  ;;  %v3761_v49 = vadd.f32 %v3760_v38, %v3738_v60  ;;  %v916_v60 = vld [vmem:[#allocation6 + $0x1948] sm:$0xff] }
 0x3c1   :  { %4235 = vmatpush.msrb.mxu2 %v178_v58  ;;  %4258 = vmatpush.msrb.mxu3 %v466_v8  ;;  %v1546_v58 = vld [vmem:[#allocation6 + $0x2cf8] sm:$0xff] }
 0x3c2   :  { %4127 = vmatmul.f32.gmra.mxu1 %v8609_v3  ;;  %4190 = vmatpush.msrb.mxu0 %v1311_v10  ;;  %v1834_v8 = vld [vmem:[#allocation6 + $0x35f8] sm:$0xff]  ;;  %v952_v10 = vld [vmem:[#allocation6 + $0x1a68] sm:$0xff] }
 0x3c3   :  { %4213 = vmatpush.msrb.mxu1 %v1599_v7  ;;  %4236 = vmatpush.msrb.mxu2 %v160_v40  ;;  %v1528_v7 = vld [vmem:[#allocation6 + $0x2c68] sm:$0xff]  ;;  %v3781_v40 = vadd.f32 %v3780_v16, %v3758_v42  ;;  %v898_v42 = vld [vmem:[#allocation6 + $0x18b8] sm:$0xff] }
 0x3c4   :  { %4259 = vmatpush.msrb.mxu3 %v448_v47  ;;  %4191 = vmatpush.msrb.mxu0 %v1293_v52  ;;  %v3784_v47 = vadd.f32 %v3783_v14, %v3761_v49  ;;  %v934_v52 = vld [vmem:[#allocation6 + $0x19d8] sm:$0xff]  ;;  %v1168_v14 = vld [vmem:[#allocation6 + $0x2128] sm:$0xff] }
 0x3c5   :  { %4214 = vmatpush.msrb.mxu1 %v1581_v1  ;;  %4237 = vmatpush.msrb.mxu2 %v142_v37  ;;  %v1222_v1 = vld [vmem:[#allocation6 + $0x22d8] sm:$0xff]  ;;  %v8658_v38 = vadd.f32 %v3803_v63, %v3781_v40  ;;  %v880_v63 = vld [vmem:[#allocation6 + $0x1828] sm:$0xff] }
 0x3c6   :  { %4260 = vmatpush.msrb.mxu3 %v430_v12  ;;  %4150 = vmatmul.f32.gmra.mxu2 %v8646_v30  ;;  %v1510_v37 = vld [vmem:[#allocation6 + $0x2bd8] sm:$0xff]  ;;  %v8656_v16 = vpop.permute.xlu0 %4780 }
 0x3c7   :  { %4192 = vmatpush.msrb.mxu0 %v1275_v21  ;;  %4215 = vmatpush.msrb.mxu1 %v1563_v46  ;;  %v1798_v12 = vld [vmem:[#allocation6 + $0x34d8] sm:$0xff]  ;;  %v1204_v21 = vld [vmem:[#allocation6 + $0x2248] sm:$0xff]  ;;  %9437 = vst [vmem:[#allocation18_spill] sm:$0xff] %v8658_v38 }
 0x3c8   :  { %4238 = vmatpush.msrb.mxu2 %v124_v35  ;;  %4261 = vmatpush.msrb.mxu3 %v412_v11  ;;  %v1492_v46 = vld [vmem:[#allocation6 + $0x2b48] sm:$0xff]  ;;  %v8660_v35 = vadd.f32 %v3806_v5, %v3784_v47  ;;  %v1762_v49 = vld [vmem:[#allocation6 + $0x33b8] sm:$0xff] }
 0x3c9   :  { %4173 = vmatmul.f32.gmra.mxu3 %v8651_v17  ;;  %4193 = vmatmul.f32.vlgmr.msrb.gmra.mxu0 %v8613_v44  ;;  %v1780_v11 = vld [vmem:[#allocation6 + $0x3448] sm:$0xff]  ;;  %v862_v40 = vld [vmem:[#allocation6 + $0x1798] sm:$0xff] }
 0x3ca   :  { %4269 = vmatpush.msra.mxu0 %v970_v62  ;;  %4292 = vmatpush.msra.mxu1 %v1258_v56  ;;  %9438 = vst [vmem:[#allocation20_spill] sm:$0xff] %v8660_v35  ;;  %v1186_v62 = vld [vmem:[#allocation6 + $0x21b8] sm:$0xff]  ;;  %v1420_v5 = vld [vmem:[#allocation6 + $0x2908] sm:$0xff] }
 0x3cb   :  { %4315 = vmatpush.msra.mxu2 %v1546_v58  ;;  %4338 = vmatpush.msra.mxu3 %v1834_v8  ;;  %v1474_v56 = vld [vmem:[#allocation6 + $0x2ab8] sm:$0xff]  ;;  %v8662_v58 = vld [vmem:[#allocation3 + $0x50] sm:$0xff]  ;;  %v7499_v8 = vpack.i.bf16 %v8660_v35, %v8658_v38 }
 0x3cc   :  { %4216 = vmatmul.f32.vlgmr.msrb.gmra.mxu1 %v8619_v57  ;;  %4270 = vmatpush.msra.mxu0 %v952_v10  ;;  %v1456_v10 = vld [vmem:[#allocation6 + $0x2a28] sm:$0xff]  ;;  %v1438_v47 = vld [vmem:[#allocation6 + $0x2998] sm:$0xff] }
 0x3cd   :  { %4293 = vmatpush.msra.mxu1 %v1240_v13  ;;  %4316 = vmatpush.msra.mxu2 %v1528_v7  ;;  %v1744_v13 = vld [vmem:[#allocation6 + $0x3328] sm:$0xff]  ;;  %v8667_v7 = vld [vmem:[#allocation3 + $0x58] sm:$0xff] }
 0x3ce   :  { %4339 = vmatpush.msra.mxu3 %v1816_v18  ;;  %4271 = vmatpush.msra.mxu0 %v934_v52  ;;  %v1150_v18 = vld [vmem:[#allocation6 + $0x2098] sm:$0xff] }
 0x3cf   :  { %4294 = vmatpush.msra.mxu1 %v1222_v1  ;;  %4317 = vmatpush.msra.mxu2 %v1510_v37  ;;  %v1726_v52 = vld [vmem:[#allocation6 + $0x3298] sm:$0xff]  ;;  %v844_v1 = vld [vmem:[#allocation6 + $0x1708] sm:$0xff] }
 0x3d0   :  { %4340 = vmatpush.msra.mxu3 %v1798_v12  ;;  %4272 = vmatpush.msra.mxu0 %v916_v60  ;;  %v1132_v37 = vld [vmem:[#allocation6 + $0x2008] sm:$0xff]  ;;  %v8671_v60 = vpop.permute.xlu0 %5014 }
 0x3d1   :  { %4295 = vmatpush.msra.mxu1 %v1204_v21  ;;  %4318 = vmatpush.msra.mxu2 %v1492_v46  ;;  %v1708_v12 = vld [vmem:[#allocation6 + $0x3208] sm:$0xff]  ;;  %v826_v21 = vld [vmem:[#allocation6 + $0x1678] sm:$0xff] }
 0x3d2   :  { %4341 = vmatpush.msra.mxu3 %v1780_v11  ;;  %4196 = vmatmul.f32.gmra.mxu0 %v8662_v58  ;;  %v1114_v46 = vld [vmem:[#allocation6 + $0x1f78] sm:$0xff] }
 0x3d3   :  { %4273 = vmatpush.msra.mxu0 %v898_v42  ;;  %4296 = vmatpush.msra.mxu1 %v1186_v62  ;;  %v1402_v11 = vld [vmem:[#allocation6 + $0x2878] sm:$0xff]  ;;  %v808_v62 = vld [vmem:[#allocation6 + $0x15e8] sm:$0xff] }
 0x3d4   :  { %4319 = vmatpush.msra.mxu2 %v1474_v56  ;;  %4342 = vmatpush.msra.mxu3 %v1762_v49  ;;  %v1690_v42 = vld [vmem:[#allocation6 + $0x3178] sm:$0xff]  ;;  %v1096_v56 = vld [vmem:[#allocation6 + $0x1ee8] sm:$0xff] }
 0x3d5   :  { %4219 = vmatmul.f32.gmra.mxu1 %v8667_v7  ;;  %4274 = vmatpush.msra.mxu0 %v880_v63  ;;  %v1384_v49 = vld [vmem:[#allocation6 + $0x27e8] sm:$0xff] }
 0x3d6   :  { %4297 = vmatpush.msra.mxu1 %v1168_v14  ;;  %4320 = vmatpush.msra.mxu2 %v1456_v10  ;;  %v1672_v63 = vld [vmem:[#allocation6 + $0x30e8] sm:$0xff]  ;;  %v1078_v14 = vld [vmem:[#allocation6 + $0x1e58] sm:$0xff] }
 0x3d7   :  { %4343 = vmatpush.msra.mxu3 %v1744_v13  ;;  %7500 = vrot.lane.b32.xlu2 %v7499_v8, %s7852_s2  ;;  %v790_v8 = vld [vmem:[#allocation6 + $0x1558] sm:$0xff] }
 0x3d8   :  { %4275 = vmatpush.msra.mxu0 %v862_v40  ;;  %4298 = vmatpush.msra.mxu1 %v1150_v18  ;;  %v1366_v10 = vld [vmem:[#allocation6 + $0x2758] sm:$0xff]  ;;  %v772_v40 = vld [vmem:[#allocation6 + $0x14c8] sm:$0xff] }
 0x3d9   :  { %4321 = vmatpush.msra.mxu2 %v1438_v47  ;;  %4344 = vmatpush.msra.mxu3 %v1726_v52  ;;  %v1654_v13 = vld [vmem:[#allocation6 + $0x3058] sm:$0xff]  ;;  %v1060_v18 = vld [vmem:[#allocation6 + $0x1dc8] sm:$0xff] }
 0x3da   :  { %4276 = vmatpush.msra.mxu0 %v844_v1  ;;  %4299 = vmatpush.msra.mxu1 %v1132_v37  ;;  %v1348_v47 = vld [vmem:[#allocation6 + $0x26c8] sm:$0xff]  ;;  %v754_v1 = vld [vmem:[#allocation6 + $0x1438] sm:$0xff] }
 0x3db   :  { %4322 = vmatpush.msra.mxu2 %v1420_v5  ;;  %4345 = vmatpush.msra.mxu3 %v1708_v12  ;;  %v1636_v52 = vld [vmem:[#allocation6 + $0x2fc8] sm:$0xff]  ;;  %v1042_v37 = vld [vmem:[#allocation6 + $0x1d38] sm:$0xff] }
 0x3dc   :  { %4239 = vmatmul.f32.vlgmr.msrb.gmra.mxu2 %v8586_v22  ;;  %4277 = vmatpush.msra.mxu0 %v826_v21  ;;  %v8675_v22 = vpop.permute.xlu0 %5280  ;;  %v1618_v5 = vld [vmem:[#allocation6 + $0x2f38] sm:$0xff]  ;;  %v736_v12 = vld [vmem:[#allocation6 + $0x13a8] sm:$0xff] }
 0x3dd   :  { %4300 = vmatpush.msra.mxu1 %v1114_v46  ;;  %4323 = vmatpush.msra.mxu2 %v1402_v11  ;;  %v1024_v21 = vld [vmem:[#allocation6 + $0x1ca8] sm:$0xff] }
 0x3de   :  { %4346 = vmatpush.msra.mxu3 %v1690_v42  ;;  %4278 = vmatpush.msra.mxu0 %v808_v62  ;;  %v1312_v46 = vld [vmem:[#allocation6 + $0x25a8] sm:$0xff]  ;;  %v718_v42 = vld [vmem:[#allocation6 + $0x1318] sm:$0xff] }
 0x3df   :  { %4262 = vmatmul.f32.vlgmr.msrb.gmra.mxu3 %v8591_v34  ;;  %4301 = vmatpush.msra.mxu1 %v1096_v56  ;;  %v1330_v34 = vld [vmem:[#allocation6 + $0x2638] sm:$0xff]  ;;  %v1600_v11 = vld [vmem:[#allocation6 + $0x2ea8] sm:$0xff] }
 0x3e0   :  { %4324 = vmatpush.msra.mxu2 %v1384_v49  ;;  %4347 = vmatpush.msra.mxu3 %v1672_v63  ;;  %v1006_v62 = vld [vmem:[#allocation6 + $0x1c18] sm:$0xff]  ;;  %v4514_v63 = vpop.permute.xlu1 %4513 }
 0x3e1   :  { %4279 = vmatpush.msra.mxu0 %v790_v8  ;;  %4302 = vmatpush.msra.mxu1 %v1078_v14  ;;  %v1294_v56 = vld [vmem:[#allocation6 + $0x2518] sm:$0xff]  ;;  %v700_v8 = vld [vmem:[#allocation6 + $0x1288] sm:$0xff] }
 0x3e2   :  { %4325 = vmatpush.msra.mxu2 %v1366_v10  ;;  %4348 = vmatpush.msra.mxu3 %v1654_v13  ;;  %v1582_v49 = vld [vmem:[#allocation6 + $0x2e18] sm:$0xff]  ;;  %v1276_v14 = vld [vmem:[#allocation6 + $0x2488] sm:$0xff] }
 0x3e3   :  { %4280 = vmatpush.msra.mxu0 %v772_v40  ;;  %4303 = vmatpush.msra.mxu1 %v1060_v18  ;;  %v1564_v10 = vld [vmem:[#allocation6 + $0x2d88] sm:$0xff] }
 0x3e4   :  { %4326 = vmatpush.msra.mxu2 %v1348_v47  ;;  %4349 = vmatpush.msra.mxu3 %v1636_v52  ;;  %v8679_v13 = vpop.permute.xlu0 %5306 }
 0x3e5   :  { %4242 = vmatmul.f32.gmra.mxu2 %v8601_v33  ;;  %4281 = vmatpush.msra.mxu0 %v754_v1  ;;  %v988_v33 = vld [vmem:[#allocation6 + $0x1b88] sm:$0xff] }
 0x3e6   :  { %4304 = vmatpush.msra.mxu1 %v1042_v37  ;;  %4327 = vmatpush.msra.mxu2 %v1330_v34 }
 0x3e7   :  { %4350 = vmatpush.msra.mxu3 %v1618_v5  ;;  %4282 = vmatpush.msra.mxu0 %v736_v12 }
 0x3e8   :  { %4265 = vmatmul.f32.gmra.mxu3 %v8609_v3  ;;  %4305 = vmatpush.msra.mxu1 %v1024_v21  ;;  %v4516_v3 = vpop.permute.xlu1 %4515 }
 0x3e9   :  { %4328 = vmatpush.msra.mxu2 %v1312_v46  ;;  %4351 = vmatpush.msra.mxu3 %v1600_v11 }
 0x3ea   :  { %4283 = vmatpush.msra.mxu0 %v718_v42  ;;  %4306 = vmatpush.msra.mxu1 %v1006_v62 }
 0x3eb   :  { %4329 = vmatpush.msra.mxu2 %v1294_v56  ;;  %4352 = vmatpush.msra.mxu3 %v1582_v49 }
 0x3ec   :  { %4284 = vmatpush.msra.mxu0 %v700_v8  ;;  %4307 = vmatpush.msra.mxu1 %v988_v33 }
 0x3ed   :  { %4330 = vmatpush.msra.mxu2 %v1276_v14  ;;  %4353 = vmatpush.msra.mxu3 %v1564_v10 }
 0x3ee   :  { %4285 = vmatmul.f32.vlgmr.msra.gmra.mxu0 %v8616_v6  ;;  %4308 = vmatmul.f32.vlgmr.msra.gmra.mxu1 %v8622_v20  ;;  %v5573_v6 = vpop.permute.xlu0 %5572  ;;  %v8716_v20 = vpop.f32.mrf.mxu1 }
 0x3ef   :  { %4331 = vmatmul.f32.vlgmr.msra.gmra.mxu2 %v8613_v44  ;;  %7411 = vmatpush.xpose.msk.msrb.mxu0 %vm4361_vm0, %v8262_v36 }
 0x3f0   :  { %7413 = vmatpush.xpose.msk.msrb.mxu1 %vm4361_vm0, %v8278_v25  ;;  %4455 = vmatpush.msrb.mxu2 %v8605_v54  ;;  %v9439_v25 = vld [vmem:[#allocation17_spill] sm:$0xff] }
 0x3f1   :  { %4478 = vmatpush.msrb.mxu3 %v8599_v50  ;;  %v4753_v50 = vpop.permute.xlu2 %4752 }
 0x3f2   :  { %4354 = vmatmul.f32.vlgmr.msra.gmra.mxu3 %v8619_v57 }
 0x3f3   :  { %7417 = vmatpush.xpose.msk.msra.mxu0 %vm4361_vm0, %v8640_v39 }
 0x3f4   :  { %7419 = vmatpush.xpose.msk.msra.mxu1 %vm4361_vm0, %v4516_v3 }
 0x3f6   :  { %4288 = vmatmul.f32.gmra.mxu0 %v8646_v30  ;;  %4311 = vmatmul.f32.gmra.mxu1 %v8651_v17  ;;  %v8698_v36 = vpop.permute.xlu0 %5806 }
 0x3f7   :  { %4334 = vmatmul.f32.gmra.mxu2 %v8662_v58 }
 0x3fa   :  { %4357 = vmatmul.f32.gmra.mxu3 %v8667_v7 }
 0x3fe   :  { %7412 = vmatmul.msk.f32.vlgmr.msrb.gmra.mxu0 %vm4361_vm0, %v8281_v41  ;;  %7414 = vmatmul.msk.f32.vlgmr.msrb.gmra.mxu1 %vm4361_vm0, %v9439_v25  ;;  %v4751_v41 = vpop.permute.xlu2 %4750 }
 0x3ff   :  { %7423 = vmatpush.xpose.msk.msrb.mxu0 %vm4361_vm0, %v8301_v9  ;;  %7425 = vmatpush.xpose.msk.msrb.mxu1 %vm4361_vm0, %v8313_v28  ;;  %v8714_v9 = vpop.f32.mrf.mxu0  ;;  %v4779_v28 = vpop.permute.xlu1 %4778 }
 0x405   :  { %v7496_v54 = vpop.permute.xlu0 %7495 }
 0x406   :  { %7418 = vmatmul.msk.f32.vlgmr.msra.gmra.mxu0 %vm4361_vm0, %v8649_v55  ;;  %7420 = vmatmul.msk.f32.vlgmr.msra.gmra.mxu1 %vm4361_vm0, %v4514_v63  ;;  %v7498_v44 = vunpack.i.h.bf16 %v7496_v54  ;;  %v7497_v57 = vunpack.i.l.bf16 %v7496_v54  ;;  %v5017_v39 = vpop.permute.xlu2 %5016 }
 0x407   :  { %7429 = vmatpush.xpose.msk.msra.mxu0 %vm4361_vm0, %v4753_v50  ;;  %7431 = vmatpush.xpose.msk.msra.mxu1 %vm4361_vm0, %v8656_v16  ;;  %v5045_v30 = vpop.permute.xlu1 %5044  ;;  %v8728_v55 = vpop.f32.mrf.mxu0 }
 0x408   :  { %4585 = vmatpush.msra.mxu2 %v7497_v57  ;;  %4612 = vmatpush.msra.mxu3 %v7498_v44 }
 0x40e   :  { %7424 = vmatmul.msk.f32.vlgmr.msrb.gmra.mxu0 %vm4361_vm0, %v8317_v51  ;;  %7426 = vmatmul.msk.f32.vlgmr.msrb.gmra.mxu1 %vm4361_vm0, %v8291_v0  ;;  %v8732_v51 = vpop.f32.mrf.mxu1  ;;  %v5043_v0 = vpop.permute.xlu2 %5042 }
 0x40f   :  { %7435 = vmatpush.xpose.msk.msrb.mxu0 %vm4361_vm0, %v8369_v19  ;;  %7437 = vmatpush.xpose.msk.msrb.mxu1 %vm4361_vm0, %v8378_v24  ;;  %v8742_v19 = vpop.f32.mrf.mxu0 }
 0x416   :  { %7430 = vmatmul.msk.f32.vlgmr.msra.gmra.mxu0 %vm4361_vm0, %v4751_v41  ;;  %7432 = vmatmul.msk.f32.vlgmr.msra.gmra.mxu1 %vm4361_vm0, %v4779_v28  ;;  %v8744_v24 = vpop.f32.mrf.mxu1  ;;  %v5309_v17 = vpop.permute.xlu2 %5308 }
 0x417   :  { %7441 = vmatpush.xpose.msk.msra.mxu0 %vm4361_vm0, %v5017_v39  ;;  %7443 = vmatpush.xpose.msk.msra.mxu1 %vm4361_vm0, %v5045_v30 }
 0x41e   :  { %7436 = vmatmul.msk.f32.vlgmr.msrb.gmra.mxu0 %vm4361_vm0, %v8330_v27  ;;  %7438 = vmatmul.msk.f32.vlgmr.msrb.gmra.mxu1 %vm4361_vm0, %v8381_v48  ;;  %v8752_v27 = vpop.f32.mrf.mxu0  ;;  %v5279_v48 = vpop.permute.xlu1 %5278 }
 0x41f   :  { %7447 = vmatpush.xpose.msk.msrb.mxu0 %vm4361_vm0, %v8405_v4  ;;  %7449 = vmatpush.xpose.msk.msrb.mxu1 %vm4361_vm0, %v8425_v61  ;;  %v8754_v4 = vpop.f32.mrf.mxu1 }
 0x426   :  { %7442 = vmatmul.msk.f32.vlgmr.msra.gmra.mxu0 %vm4361_vm0, %v8671_v60  ;;  %7444 = vmatmul.msk.f32.vlgmr.msra.gmra.mxu1 %vm4361_vm0, %v5043_v0  ;;  %v8764_v61 = vpop.f32.mrf.mxu0  ;;  %v5545_v16 = vpop.permute.xlu1 %5544 }
 0x427   :  { %7453 = vmatpush.xpose.msk.msra.mxu0 %vm4361_vm0, %v8675_v22  ;;  %7455 = vmatpush.xpose.msk.msra.mxu1 %vm4361_vm0, %v5309_v17  ;;  %v8766_v58 = vpop.f32.mrf.mxu1 }
 0x42e   :  { %7448 = vmatmul.msk.f32.vlgmr.msrb.gmra.mxu0 %vm4361_vm0, %v8391_v53  ;;  %7450 = vmatmul.msk.f32.vlgmr.msrb.gmra.mxu1 %vm4361_vm0, %v8429_v26  ;;  %v5543_v53 = vpop.permute.xlu2 %5542  ;;  %v8773_v26 = vpop.f32.mrf.mxu0 }
 0x42f   :  { %7459 = vmatpush.xpose.msk.msrb.mxu0 %vm4361_vm0, %v8473_v59  ;;  %7461 = vmatpush.xpose.msk.msrb.mxu1 %vm4361_vm0, %v8485_v29  ;;  %v5571_v59 = vpop.permute.xlu1 %5570  ;;  %v8775_v7 = vpop.f32.mrf.mxu1 }
 0x436   :  { %7454 = vmatmul.msk.f32.vlgmr.msra.gmra.mxu0 %vm4361_vm0, %v5279_v48  ;;  %7456 = vmatmul.msk.f32.vlgmr.msra.gmra.mxu1 %vm4361_vm0, %v8679_v13  ;;  %v5809_v29 = vpop.permute.xlu2 %5808  ;;  %v8785_v60 = vpop.f32.mrf.mxu0 }
 0x437   :  { %7465 = vmatpush.xpose.msk.msra.mxu0 %vm4361_vm0, %v5545_v16  ;;  %7467 = vmatpush.xpose.msk.msra.mxu1 %vm4361_vm0, %v5573_v6  ;;  %v5837_v40 = vpop.permute.xlu1 %5836  ;;  %v8787_v18 = vpop.f32.mrf.mxu1 }
 0x438   :  { %v8882_v16 = vpop.f32.mrf.mxu2 }
 0x43e   :  { %7460 = vmatmul.msk.f32.vlgmr.msrb.gmra.mxu0 %vm4361_vm0, %v8450_v43  ;;  %7462 = vmatmul.msk.f32.vlgmr.msrb.gmra.mxu1 %vm4361_vm0, %v8488_v45  ;;  %v8797_v43 = vpop.f32.mrf.mxu0 }
 0x43f   :  { %7471 = vmatpush.xpose.msk.msrb.mxu0 %vm4361_vm0, %v8532_v15  ;;  %7473 = vmatpush.xpose.msk.msrb.mxu1 %vm4361_vm0, %v8584_v31  ;;  %v8799_v45 = vpop.f32.mrf.mxu1  ;;  %v5835_v15 = vpop.permute.xlu2 %5834 }
 0x446   :  { %7466 = vmatmul.msk.f32.vlgmr.msra.gmra.mxu0 %vm4361_vm0, %v5543_v53  ;;  %7468 = vmatmul.msk.f32.vlgmr.msra.gmra.mxu1 %vm4361_vm0, %v5571_v59  ;;  %v8804_v31 = vpop.f32.mrf.mxu0 }
 0x447   :  { %7477 = vmatpush.xpose.msk.msra.mxu0 %vm4361_vm0, %v5809_v29  ;;  %7479 = vmatpush.xpose.msk.msra.mxu1 %vm4361_vm0, %v5837_v40  ;;  %9440 = vst [vmem:[#allocation24_spill] sm:$0xff] %v8804_v31 }
 0x449   :  { %v8806_v22 = vpop.f32.mrf.mxu1 }
 0x44a   :  { %9441 = vst [vmem:[#allocation25_spill] sm:$0xff] %v8806_v22 }
 0x44e   :  { %7472 = vmatmul.msk.f32.vlgmr.msrb.gmra.mxu0 %vm4361_vm0, %v8503_v2  ;;  %7474 = vmatmul.msk.f32.vlgmr.msrb.gmra.mxu1 %vm4361_vm0, %v8541_v32 }
 0x44f   :  { %v8808_v47 = vpop.f32.mrf.mxu0 }
 0x450   :  { %9442 = vst [vmem:[#allocation19_spill] sm:$0xff] %v8808_v47 }
 0x452   :  { %v8810_v2 = vpop.f32.mrf.mxu1 }
 0x453   :  { %9443 = vst [vmem:[#allocation21_spill] sm:$0xff] %v8810_v2 }
 0x456   :  { %7478 = vmatmul.msk.f32.vlgmr.msra.gmra.mxu0 %vm4361_vm0, %v8698_v36  ;;  %7480 = vmatmul.msk.f32.vlgmr.msra.gmra.mxu1 %vm4361_vm0, %v5835_v15 }
 0x46b   :  { %v8812_v52 = vpop.f32.mrf.mxu0  ;;  %v8814_v32 = vpop.f32.mrf.mxu1 }
 0x46c   :  { %9444 = vst [vmem:[#allocation22_spill] sm:$0xff] %v8812_v52 }
 0x46d   :  { %9445 = vst [vmem:[#allocation26_spill] sm:$0xff] %v8814_v32 }
 0x473   :  { %v8816_v1 = vpop.f32.mrf.mxu0  ;;  %v8818_v37 = vpop.f32.mrf.mxu1 }
 0x474   :  { %9446 = vst [vmem:[#allocation23_spill] sm:$0xff] %v8818_v37 }
 0x47b   :  { %v8820_v34 = vpop.f32.mrf.mxu0  ;;  %v8822_v5 = vpop.f32.mrf.mxu1 }
 0x47c   :  { %v4415_v12 = vsel %vm4414_vm1, %v8820_v34, -inf  ;;  %v4418_v21 = vsel %vm4414_vm1, %v8822_v5, -inf }
 0x47d   :  { %4416 = vmax.xlane.f32.xlu0 %v4415_v12  ;;  %4419 = vmax.xlane.f32.xlu1 %v4418_v21  ;;  %v8894_v12 = vpop.f32.mrf.mxu3 }
 0x483   :  { %v8828_v46 = vpop.f32.mrf.mxu0  ;;  %v8830_v11 = vpop.f32.mrf.mxu1 }
 0x484   :  { %v4541_v42 = vsel %vm4414_vm1, %v8828_v46, -inf  ;;  %v4544_v49 = vsel %vm4414_vm1, %v8830_v11, -inf }
 0x485   :  { %4542 = vmax.xlane.f32.xlu2 %v4541_v42  ;;  %v8898_v42 = vpop.f32.mrf.mxu2 }
 0x48b   :  { %v8834_v62 = vpop.f32.mrf.mxu0  ;;  %v8836_v56 = vpop.f32.mrf.mxu1 }
 0x48c   :  { %v4680_v63 = vsel %vm4414_vm1, %v8834_v62, -inf  ;;  %v4683_v8 = vsel %vm4414_vm1, %v8836_v56, -inf }
 0x48d   :  { %4545 = vmax.xlane.f32.xlu2 %v4544_v49  ;;  %4681 = vmax.xlane.f32.xlu0 %v4680_v63 }
 0x48e   :  { %4684 = vmax.xlane.f32.xlu1 %v4683_v8 }
 0x493   :  { %v8844_v33 = vpop.f32.mrf.mxu0  ;;  %v8846_v14 = vpop.f32.mrf.mxu1 }
 0x494   :  { %v4806_v10 = vsel %vm4414_vm1, %v8844_v33, -inf  ;;  %v4809_v13 = vsel %vm4414_vm1, %v8846_v14, -inf }
 0x495   :  { %4807 = vmax.xlane.f32.xlu2 %v4806_v10  ;;  %4810 = vmax.xlane.f32.xlu0 %v4809_v13  ;;  %v8906_v10 = vpop.f32.mrf.mxu3 }
 0x49b   :  { %v8852_v3 = vpop.f32.mrf.mxu0  ;;  %v8854_v6 = vpop.f32.mrf.mxu1 }
 0x49c   :  { %v4944_v36 = vsel %vm4414_vm1, %v8852_v3, -inf  ;;  %v4947_v25 = vsel %vm4414_vm1, %v8854_v6, -inf }
 0x49d   :  { %4945 = vmax.xlane.f32.xlu1 %v4944_v36  ;;  %4948 = vmax.xlane.f32.xlu2 %v4947_v25  ;;  %v3964_v36 = vpop.f32.mrf.mxu2 }
 0x4a3   :  { %v8860_v50 = vpop.f32.mrf.mxu0  ;;  %v8862_v54 = vpop.f32.mrf.mxu1 }
 0x4a4   :  { %v5070_v44 = vsel %vm4414_vm1, %v8860_v50, -inf  ;;  %v5073_v57 = vsel %vm4414_vm1, %v8862_v54, -inf }
 0x4a5   :  { %5071 = vmax.xlane.f32.xlu0 %v5070_v44  ;;  %5074 = vmax.xlane.f32.xlu1 %v5073_v57 }
 0x4ab   :  { %v8868_v41 = vpop.f32.mrf.mxu0  ;;  %v8870_v28 = vpop.f32.mrf.mxu1 }
 0x4ac   :  { %v5208_v39 = vsel %vm4414_vm1, %v8868_v41, -inf  ;;  %v5211_v30 = vsel %vm4414_vm1, %v8870_v28, -inf }
 0x4ad   :  { %5209 = vmax.xlane.f32.xlu2 %v5208_v39  ;;  %5212 = vmax.xlane.f32.xlu1 %v5211_v30  ;;  %v3987_v39 = vpop.f32.mrf.mxu3 }
 0x4b3   :  { %v8876_v0 = vpop.f32.mrf.mxu0  ;;  %v8878_v17 = vpop.f32.mrf.mxu1 }
 0x4b4   :  { %v5334_v48 = vsel %vm4414_vm1, %v8876_v0, -inf  ;;  %v5337_v29 = vsel %vm4414_vm1, %v8878_v17, -inf }
 0x4b5   :  { %5335 = vmax.xlane.f32.xlu2 %v5334_v48 }
 0x4bb   :  { %v8884_v53 = vpop.f32.mrf.mxu0  ;;  %v8886_v59 = vpop.f32.mrf.mxu1 }
 0x4bc   :  { %v5472_v40 = vsel %vm4414_vm1, %v8884_v53, -inf  ;;  %v5475_v15 = vsel %vm4414_vm1, %v8886_v59, -inf }
 0x4bd   :  { %5338 = vmax.xlane.f32.xlu2 %v5337_v29  ;;  %5473 = vmax.xlane.f32.xlu0 %v5472_v40  ;;  %v3967_v29 = vpop.f32.mrf.mxu2  ;;  %v1856_v40 = vperm.slane %v8634_v23, 7 }
 0x4be   :  { %5476 = vmax.xlane.f32.xlu1 %v5475_v15  ;;  %v3990_v15 = vpop.f32.mrf.mxu3 }
 0x4bf   :  { %v3968_v35 = vadd.f32 %v3967_v29, %v1856_v40 }
 0x4c1   :  { %v3991_v22 = vadd.f32 %v3990_v15, %v3968_v35 }
 0x4c3   :  { %v8896_v21 = vpop.f32.mrf.mxu0  ;;  %v8900_v49 = vpop.f32.mrf.mxu1 }
 0x4c4   :  { %v5598_v63 = vsel %vm4414_vm1, %v8896_v21, -inf  ;;  %v5601_v8 = vsel %vm4414_vm1, %v8900_v49, -inf }
 0x4c5   :  { %5599 = vmax.xlane.f32.xlu2 %v5598_v63 }
 0x4c6   :  { %5602 = vmax.xlane.f32.xlu1 %v5601_v8  ;;  %v3965_v8 = vadd.f32 %v3964_v36, %v1856_v40  ;;  %v4079_v2 = vpop.f32.mrf.mxu3  ;;  %v8929_v40 = vpop.permute.xlu2 %7500 }
 0x4cb   :  { %v8908_v13 = vpop.f32.mrf.mxu0  ;;  %v8910_v25 = vpop.f32.mrf.mxu1 }
 0x4cc   :  { %v5736_v44 = vsel %vm4414_vm1, %v8908_v13, -inf  ;;  %v5739_v57 = vsel %vm4414_vm1, %v8910_v25, -inf }
 0x4cd   :  { %5737 = vmax.xlane.f32.xlu0 %v5736_v44  ;;  %v4056_v44 = vpop.f32.mrf.mxu2 }
 0x4ce   :  { %5740 = vmax.xlane.f32.xlu1 %v5739_v57  ;;  %v3988_v57 = vadd.f32 %v3987_v39, %v3965_v8  ;;  %v4082_v29 = vpop.f32.mrf.mxu3 }
 0x4d0   :  { %v4011_v31 = vadd.f32 %v8764_v61, %v3988_v57 }
 0x4d3   :  { %v8916_v30 = vpop.f32.mrf.mxu0  ;;  %v8921_v63 = vpop.f32.mrf.mxu1 }
 0x4d4   :  { %9447 = vst [vmem:[#allocation27_spill] sm:$0xff] %v8916_v30  ;;  %v5862_v48 = vsel %vm4414_vm1, %v8916_v30, -inf  ;;  %v5865_v38 = vsel %vm4414_vm1, %v8921_v63, -inf  ;;  %v4014_v30 = vadd.f32 %v8773_v26, %v3991_v22 }
 0x4d5   :  { %v4059_v32 = vpop.f32.mrf.mxu2 }
 0x4d6   :  { %5863 = vmax.xlane.f32.xlu1 %v5862_v48  ;;  %v4034_v48 = vadd.f32 %v8766_v58, %v4011_v31  ;;  %v4037_v47 = vadd.f32 %v8775_v7, %v4014_v30 }
 0x4d8   :  { %v4057_v37 = vadd.f32 %v4056_v44, %v4034_v48  ;;  %v4060_v36 = vadd.f32 %v4059_v32, %v4037_v47  ;;  %v1855_v32 = vperm.slane %v8634_v23, 6 }
 0x4da   :  { %v8933_v39 = vadd.f32 %v4082_v29, %v4060_v36  ;;  %v3827_v30 = vadd.f32 %v8714_v9, %v1855_v32 }
 0x4dc   :  { %v3850_v48 = vadd.f32 %v8716_v20, %v3827_v30 }
 0x4de   :  { %5866 = vmax.xlane.f32.xlu1 %v5865_v38  ;;  %v8931_v38 = vadd.f32 %v4079_v2, %v4057_v37  ;;  %v3873_v36 = vadd.f32 %v8882_v16, %v3850_v48 }
 0x4e0   :  { %v7509_v58 = vpack.i.bf16 %v8933_v39, %v8931_v38 }
 0x4f0   :  { %v4417_v52 = vpop.xlane.xlu0 %4416  ;;  %v4420_v35 = vpop.xlane.xlu1 %4419 }
 0x4f1   :  { %v4421_v61 = vsub.f32 %v8820_v34, %v4417_v52  ;;  %v4422_v26 = vsub.f32 %v8822_v5, %v4420_v35  ;;  %v3830_v52 = vadd.f32 %v8728_v55, %v1855_v32 }
 0x4f3   :  { %v4423_v22 = vmul.f32 1.442695, %v4421_v61  ;;  %v4425_v7 = vmul.f32 1.442695, %v4422_v26  ;;  %v3853_v8 = vadd.f32 %v8732_v51, %v3830_v52  ;;  %v3896_v61 = vadd.f32 %v8894_v12, %v3873_v36 }
 0x4f5   :  { %7519 = vpow2.f32 %v4423_v22  ;;  %v3876_v23 = vadd.f32 %v8898_v42, %v3853_v8 }
 0x4f6   :  { %7521 = vpow2.f32 %v4425_v7 }
 0x4f7   :  { %7510 = vrot.lane.b32.xlu1 %v7509_v58, %s7852_s2 }
 0x4f8   :  { %v4543_v31 = vpop.xlane.xlu2 %4542 }
 0x4f9   :  { %v4547_v16 = vsub.f32 %v8828_v46, %v4543_v31 }
 0x4fb   :  { %v8940_v47 = vpop.eup %7519  ;;  %v4549_v12 = vmul.f32 1.442695, %v4547_v16 }
 0x4fc   :  { %v4427_v2 = vsel %vm4414_vm1, %v8940_v47, 0.0  ;;  %v8946_v5 = vpop.eup %7521 }
 0x4fd   :  { %4428 = vadd.xlane.f32.xlu0 %v4427_v2  ;;  %v4430_v57 = vsel %vm4414_vm1, %v8946_v5, 0.0 }
 0x500   :  { %v4546_v37 = vpop.xlane.xlu2 %4545  ;;  %v4682_v34 = vpop.xlane.xlu0 %4681 }
 0x501   :  { %v4686_v15 = vsub.f32 %v8834_v62, %v4682_v34  ;;  %v3899_v62 = vadd.f32 %v8906_v10, %v3876_v23  ;;  %v4685_v26 = vpop.xlane.xlu1 %4684 }
 0x502   :  { %v4687_v8 = vsub.f32 %v8836_v56, %v4685_v26 }
 0x503   :  { %v4688_v44 = vmul.f32 1.442695, %v4686_v15  ;;  %v3922_v22 = vadd.f32 %v8752_v27, %v3899_v62 }
 0x505   :  { %4431 = vadd.xlane.f32.xlu0 %v4430_v57  ;;  %7523 = vpow2.f32 %v4688_v44  ;;  %v8970_v7 = vadd.f32 %v8754_v4, %v3922_v22  ;;  %v4690_v57 = vmul.f32 1.442695, %v4687_v8 }
 0x508   :  { %v4808_v55 = vpop.xlane.xlu2 %4807  ;;  %v4811_v9 = vpop.xlane.xlu0 %4810 }
 0x509   :  { %v4812_v29 = vsub.f32 %v8844_v33, %v4808_v55  ;;  %v4813_v20 = vsub.f32 %v8846_v14, %v4811_v9  ;;  %v3919_v33 = vadd.f32 %v8742_v19, %v3896_v61  ;;  %v4548_v19 = vsub.f32 %v8830_v11, %v4546_v37 }
 0x50b   :  { %v4814_v35 = vmul.f32 1.442695, %v4812_v29  ;;  %v8958_v51 = vpop.eup %7523  ;;  %v4816_v10 = vmul.f32 1.442695, %v4813_v20  ;;  %v8975_v2 = vadd.f32 %v8744_v24, %v3919_v33  ;;  %v4551_v34 = vmul.f32 1.442695, %v4548_v19 }
 0x50c   :  { %v4692_v42 = vsel %vm4414_vm1, %v8958_v51, 0.0 }
 0x50d   :  { %7525 = vpow2.f32 %v4814_v35  ;;  %4693 = vadd.xlane.f32.xlu2 %v4692_v42  ;;  %v7504_v46 = vpack.i.bf16 %v8970_v7, %v8975_v2 }
 0x50e   :  { %7527 = vpow2.f32 %v4816_v10 }
 0x50f   :  { %7529 = vpow2.f32 %v4549_v12 }
 0x510   :  { %v4946_v27 = vpop.xlane.xlu1 %4945  ;;  %v4949_v31 = vpop.xlane.xlu2 %4948 }
 0x511   :  { %v4950_v55 = vsub.f32 %v8852_v3, %v4946_v27  ;;  %v4951_v35 = vsub.f32 %v8854_v6, %v4949_v31 }
 0x513   :  { %v8967_v58 = vpop.eup %7525  ;;  %v4952_v9 = vmul.f32 1.442695, %v4950_v55  ;;  %v4954_v22 = vmul.f32 1.442695, %v4951_v35 }
 0x514   :  { %v4818_v14 = vsel %vm4414_vm1, %v8967_v58, 0.0  ;;  %v8982_v52 = vpop.eup %7527 }
 0x515   :  { %4819 = vadd.xlane.f32.xlu2 %v4818_v14  ;;  %v8984_v30 = vpop.eup %7529  ;;  %v4821_v15 = vsel %vm4414_vm1, %v8982_v52, 0.0 }
 0x518   :  { %v5072_v32 = vpop.xlane.xlu0 %5071  ;;  %v5075_v11 = vpop.xlane.xlu1 %5074 }
 0x519   :  { %v5076_v4 = vsub.f32 %v8860_v50, %v5072_v32  ;;  %7505 = vrot.lane.b32.xlu0 %v7504_v46, %s7852_s2  ;;  %v4553_v50 = vsel %vm4414_vm1, %v8984_v30, 0.0  ;;  %v5077_v3 = vsub.f32 %v8862_v54, %v5075_v11  ;;  %v9016_v46 = vpop.f32.mrf.mxu2 }
 0x51b   :  { %v5078_v24 = vmul.f32 1.442695, %v5076_v4  ;;  %v5080_v10 = vmul.f32 1.442695, %v5077_v3 }
 0x51d   :  { %7531 = vpow2.f32 %v5078_v24  ;;  %4822 = vadd.xlane.f32.xlu2 %v4821_v15  ;;  %v9025_v24 = vpop.f32.mrf.mxu3 }
 0x51e   :  { %7533 = vpow2.f32 %v4551_v34 }
 0x51f   :  { %7535 = vpow2.f32 %v4690_v57 }
 0x520   :  { %v5210_v37 = vpop.xlane.xlu2 %5209  ;;  %v5213_v29 = vpop.xlane.xlu1 %5212  ;;  %7537 = vpow2.f32 %v4952_v9 }
 0x521   :  { %4554 = vadd.xlane.f32.xlu1 %v4553_v50  ;;  %v5214_v6 = vsub.f32 %v8868_v41, %v5210_v37  ;;  %v9038_v55 = vpop.f32.mrf.mxu2 }
 0x523   :  { %v8991_v44 = vpop.eup %7531  ;;  %v5216_v31 = vmul.f32 1.442695, %v5214_v6 }
 0x524   :  { %v5082_v48 = vsel %vm4414_vm1, %v8991_v44, 0.0  ;;  %v8995_v23 = vpop.eup %7533 }
 0x525   :  { %5083 = vadd.xlane.f32.xlu2 %v5082_v48  ;;  %v4556_v56 = vsel %vm4414_vm1, %v8995_v23, 0.0  ;;  %v9002_v62 = vpop.eup %7535 }
 0x526   :  { %v4695_v61 = vsel %vm4414_vm1, %v9002_v62, 0.0  ;;  %v9011_v33 = vpop.eup %7537 }
 0x527   :  { %v4956_v14 = vsel %vm4414_vm1, %v9011_v33, 0.0 }
 0x528   :  { %v9000_v36 = vpop.xlane.xlu2 %5335 }
 0x529   :  { %4557 = vadd.xlane.f32.xlu1 %v4556_v56  ;;  %v5340_v3 = vsub.f32 %v8876_v0, %v9000_v36 }
 0x530   :  { %v9007_v26 = vpop.xlane.xlu2 %5338  ;;  %v5474_v12 = vpop.xlane.xlu0 %5473 }
 0x531   :  { %v5477_v20 = vpop.xlane.xlu1 %5476  ;;  %4696 = vadd.xlane.f32.xlu1 %v4695_v61  ;;  %v5478_v54 = vsub.f32 %v8884_v53, %v5474_v12  ;;  %v9047_v61 = vpop.f32.mrf.mxu3  ;;  %v5342_v12 = vmul.f32 1.442695, %v5340_v3 }
 0x532   :  { %v5479_v42 = vsub.f32 %v8886_v59, %v5477_v20 }
 0x533   :  { %v5480_v15 = vmul.f32 1.442695, %v5478_v54 }
 0x534   :  { %v5482_v16 = vmul.f32 1.442695, %v5479_v42 }
 0x536   :  { %7539 = vpow2.f32 %v5482_v16 }
 0x537   :  { %7541 = vpow2.f32 %v4954_v22 }
 0x538   :  { %v5600_v27 = vpop.xlane.xlu2 %5599  ;;  %7543 = vpow2.f32 %v5080_v10  ;;  %v4240_v10 = vpop.f32.mrf.mxu2 }
 0x539   :  { %v5603_v59 = vpop.xlane.xlu1 %5602  ;;  %4957 = vadd.xlane.f32.xlu1 %v4956_v14  ;;  %v5604_v19 = vsub.f32 %v8896_v21, %v5600_v27  ;;  %v5215_v21 = vsub.f32 %v8870_v28, %v5213_v29  ;;  %v4263_v36 = vpop.f32.mrf.mxu3  ;;  %v5341_v27 = vsub.f32 %v8878_v17, %v9007_v26 }
 0x53a   :  { %v5605_v34 = vsub.f32 %v8900_v49, %v5603_v59 }
 0x53b   :  { %v5606_v32 = vmul.f32 1.442695, %v5604_v19  ;;  %v5218_v56 = vmul.f32 1.442695, %v5215_v21 }
 0x53c   :  { %v9020_v4 = vpop.eup %7539  ;;  %v5608_v11 = vmul.f32 1.442695, %v5605_v34 }
 0x53d   :  { %v9023_v41 = vpop.eup %7541  ;;  %7545 = vpow2.f32 %v5606_v32  ;;  %v5487_v8 = vsel %vm4414_vm1, %v9020_v4, 0.0  ;;  %v5344_v32 = vmul.f32 1.442695, %v5341_v27 }
 0x53e   :  { %5488 = vadd.xlane.f32.xlu2 %v5487_v8  ;;  %v9029_v53 = vpop.eup %7543  ;;  %7547 = vpow2.f32 %v5216_v31  ;;  %v4959_v50 = vsel %vm4414_vm1, %v9023_v41, 0.0 }
 0x53f   :  { %7549 = vpow2.f32 %v5480_v15  ;;  %v5085_v57 = vsel %vm4414_vm1, %v9029_v53, 0.0 }
 0x540   :  { %v5738_v37 = vpop.xlane.xlu0 %5737  ;;  %7551 = vpow2.f32 %v5608_v11  ;;  %v4243_v8 = vpop.f32.mrf.mxu2 }
 0x541   :  { %v5741_v49 = vpop.xlane.xlu1 %5740  ;;  %4960 = vadd.xlane.f32.xlu1 %v4959_v50  ;;  %v5742_v28 = vsub.f32 %v8908_v13, %v5738_v37  ;;  %7553 = vpow2.f32 %v5218_v56  ;;  %v4266_v26 = vpop.f32.mrf.mxu3 }
 0x542   :  { %v5743_v6 = vsub.f32 %v8910_v25, %v5741_v49 }
 0x543   :  { %v9036_v48 = vpop.eup %7545  ;;  %5086 = vadd.xlane.f32.xlu0 %v5085_v57  ;;  %v5744_v20 = vmul.f32 1.442695, %v5742_v28 }
 0x544   :  { %v5610_v29 = vsel %vm4414_vm1, %v9036_v48, 0.0  ;;  %v9043_v9 = vpop.eup %7547  ;;  %v5746_v54 = vmul.f32 1.442695, %v5743_v6 }
 0x545   :  { %v9045_v35 = vpop.eup %7549  ;;  %v5220_v42 = vsel %vm4414_vm1, %v9043_v9, 0.0  ;;  %7555 = vpow2.f32 %v5744_v20 }
 0x546   :  { %5611 = vadd.xlane.f32.xlu2 %v5610_v29  ;;  %v9055_v13 = vpop.eup %7551  ;;  %v5484_v16 = vsel %vm4414_vm1, %v9045_v35, 0.0  ;;  %7557 = vpow2.f32 %v5342_v12 }
 0x547   :  { %v9060_v14 = vpop.eup %7553  ;;  %v5613_v0 = vsel %vm4414_vm1, %v9055_v13, 0.0  ;;  %7559 = vpow2.f32 %v5746_v54 }
 0x548   :  { %v5223_v59 = vsel %vm4414_vm1, %v9060_v14, 0.0  ;;  %v4332_v3 = vpop.f32.mrf.mxu2 }
 0x549   :  { %v9053_v22 = vpop.xlane.xlu1 %5863  ;;  %5221 = vadd.xlane.f32.xlu1 %v5220_v42 }
 0x54b   :  { %5485 = vadd.xlane.f32.xlu0 %v5484_v16  ;;  %v9068_v31 = vpop.eup %7555 }
 0x54c   :  { %v9071_v15 = vpop.eup %7557  ;;  %v5748_v21 = vsel %vm4414_vm1, %v9068_v31, 0.0 }
 0x54d   :  { %v5346_v17 = vsel %vm4414_vm1, %v9071_v15, 0.0  ;;  %v9077_v11 = vpop.eup %7559 }
 0x54e   :  { %5614 = vadd.xlane.f32.xlu2 %v5613_v0  ;;  %v5751_v56 = vsel %vm4414_vm1, %v9077_v11, 0.0  ;;  %v4355_v0 = vpop.f32.mrf.mxu3 }
 0x551   :  { %v5867_v19 = vpop.xlane.xlu1 %5866  ;;  %5224 = vadd.xlane.f32.xlu1 %v5223_v59 }
 0x552   :  { %v5869_v25 = vsub.f32 %v8921_v63, %v5867_v19  ;;  %v1837_v63 = vld [vmem:[#allocation8 + $0x10] sm:$0x3] }
 0x553   :  { %v1858_v49 = vperm.slane %v1837_v63, 1  ;;  %v1857_v28 = vperm.slane %v1837_v63, 0  ;;  %v9450_v63 = vld [vmem:[#allocation26_spill] sm:$0xff] }
 0x554   :  { %v5872_v34 = vmul.f32 1.442695, %v5869_v25 }
 0x555   :  { %v4244_v29 = vadd.f32 %v4243_v8, %v1858_v49  ;;  %v4106_v20 = vadd.f32 %v8797_v43, %v1857_v28  ;;  %v4103_v16 = vadd.f32 %v8785_v60, %v1857_v28  ;;  %v4241_v12 = vadd.f32 %v4240_v10, %v1858_v49  ;;  %v9453_v28 = vld [vmem:[#allocation21_spill] sm:$0xff] }
 0x556   :  { %7561 = vpow2.f32 %v5872_v34  ;;  %5749 = vadd.xlane.f32.xlu2 %v5748_v21  ;;  %v9448_v34 = vld [vmem:[#allocation22_spill] sm:$0xff]  ;;  %v9449_v21 = vld [vmem:[#allocation23_spill] sm:$0xff] }
 0x557   :  { %7563 = vpow2.f32 %v5344_v32  ;;  %v4267_v6 = vadd.f32 %v4266_v26, %v4244_v29  ;;  %v4129_v27 = vadd.f32 %v8799_v45, %v4106_v20  ;;  %v4126_v54 = vadd.f32 %v8787_v18, %v4103_v16  ;;  %v4335_v32 = vpop.f32.mrf.mxu2  ;;  %v4358_v26 = vpop.f32.mrf.mxu3 }
 0x558   :  { %v4264_v59 = vadd.f32 %v4263_v36, %v4241_v12  ;;  %v9451_v36 = vld [vmem:[#allocation19_spill] sm:$0xff] }
 0x559   :  { %5347 = vadd.xlane.f32.xlu1 %v5346_v17  ;;  %v4290_v19 = vadd.f32 %v8816_v1, %v4267_v6  ;;  %v4152_v25 = vadd.f32 %v9038_v55, %v4129_v27  ;;  %v4149_v43 = vadd.f32 %v9016_v46, %v4126_v54  ;;  %v9452_v46 = vld [vmem:[#allocation24_spill] sm:$0xff]  ;;  %v9455_v6 = vld [vmem:[#allocation18_spill] sm:$0xff] }
 0x55a   :  { %v4287_v8 = vadd.f32 %v9448_v34, %v4264_v59  ;;  %v9456_v54 = vld [vmem:[#allocation20_spill] sm:$0xff] }
 0x55b   :  { %v4313_v17 = vadd.f32 %v9449_v21, %v4290_v19  ;;  %v4175_v60 = vadd.f32 %v9047_v61, %v4152_v25  ;;  %v4172_v45 = vadd.f32 %v9025_v24, %v4149_v43  ;;  %v9454_v24 = vld [vmem:[#allocation25_spill] sm:$0xff]  ;;  %v9457_v19 = vld [vmem:[#allocation27_spill] sm:$0xff] }
 0x55c   :  { %v9079_v50 = vpop.eup %7561  ;;  %v4310_v18 = vadd.f32 %v9450_v63, %v4287_v8 }
 0x55d   :  { %v9081_v37 = vpop.eup %7563  ;;  %v5877_v57 = vsel %vm4414_vm1, %v9079_v50, 0.0  ;;  %v4336_v10 = vadd.f32 %v4335_v32, %v4313_v17  ;;  %v4198_v49 = vadd.f32 %v9451_v36, %v4175_v60  ;;  %v7502_v17 = vunpack.i.l.bf16 %v8929_v40 }
 0x55e   :  { %5878 = vadd.xlane.f32.xlu0 %v5877_v57  ;;  %5752 = vadd.xlane.f32.xlu2 %v5751_v56  ;;  %v5349_v42 = vsel %vm4414_vm1, %v9081_v37, 0.0  ;;  %v4333_v1 = vadd.f32 %v4332_v3, %v4310_v18  ;;  %v4195_v56 = vadd.f32 %v9452_v46, %v4172_v45  ;;  %v7503_v18 = vunpack.i.h.bf16 %v8929_v40 }
 0x55f   :  { %v9102_v57 = vadd.f32 %v4358_v26, %v4336_v10  ;;  %v9108_v61 = vadd.f32 %v9453_v28, %v4198_v49 }
 0x560   :  { %v9110_v29 = vadd.f32 %v4355_v0, %v4333_v1  ;;  %v9113_v20 = vadd.f32 %v9454_v24, %v4195_v56 }
 0x561   :  { %5350 = vadd.xlane.f32.xlu1 %v5349_v42 }
 0x562   :  { %v7514_v42 = vpack.i.bf16 %v9108_v61, %v9113_v20 }
 0x569   :  { %v9126_v59 = vpop.permute.xlu1 %7510 }
 0x570   :  { %v4429_v55 = vpop.xlane.xlu0 %4428 }
 0x571   :  { %7565 = vrcp.f32 %v4429_v55 }
 0x572   :  { %5912 = vrot.lane.b32.xlu0 %v9102_v57, %s7852_s2 }
 0x576   :  { %5885 = vrot.lane.b32.xlu2 %v9110_v29, %s7852_s2 }
 0x577   :  { %v7566_v3 = vpop.eup %7565 }
 0x578   :  { %v4435_v16 = vmul.f32 %v7566_v3, %v8940_v47  ;;  %v4432_v12 = vpop.xlane.xlu0 %4431  ;;  %v5868_v47 = vsub.f32 %v9457_v19, %v9053_v22 }
 0x579   :  { %7567 = vrcp.f32 %v4432_v12 }
 0x57a   :  { %7515 = vrot.lane.b32.xlu1 %v7514_v42, %s7852_s2  ;;  %7415 = vmatmul.msk.f32.vlgmr.msrb.gmra.mxu2 %vm4414_vm1, %v4435_v16  ;;  %v5870_v43 = vmul.f32 1.442695, %v5868_v47 }
 0x57b   :  { %4720 = vmatpush.msrb.mxu2 %v9455_v6 }
 0x57f   :  { %v7568_v0 = vpop.eup %7567 }
 0x580   :  { %v4436_v27 = vmul.f32 %v7568_v0, %v8946_v5  ;;  %v4694_v25 = vpop.xlane.xlu2 %4693 }
 0x582   :  { %7416 = vmatmul.msk.f32.vlgmr.msrb.gmra.mxu3 %vm4414_vm1, %v4436_v27 }
 0x583   :  { %4743 = vmatpush.msrb.mxu3 %v9456_v54 }
 0x588   :  { %v4820_v8 = vpop.xlane.xlu2 %4819 }
 0x58b   :  { %v7506_v1 = vpop.permute.xlu0 %7505 }
 0x58c   :  { %v7507_v56 = vunpack.i.l.bf16 %v7506_v1 }
 0x590   :  { %v4823_v36 = vpop.xlane.xlu2 %4822 }
 0x594   :  { %v4555_v32 = vpop.xlane.xlu1 %4554 }
 0x595   :  { %7569 = vrcp.f32 %v4555_v32 }
 0x596   :  { %7571 = vpow2.f32 %v5870_v43 }
 0x597   :  { %7573 = vrcp.f32 %v4694_v25 }
 0x598   :  { %v5084_v40 = vpop.xlane.xlu2 %5083 }
 0x59b   :  { %v7570_v34 = vpop.eup %7569 }
 0x59c   :  { %v4561_v21 = vmul.f32 %v7570_v34, %v8984_v30  ;;  %v4558_v5 = vpop.xlane.xlu1 %4557  ;;  %v9133_v60 = vpop.eup %7571 }
 0x59d   :  { %7575 = vrcp.f32 %v4558_v5  ;;  %v7574_v22 = vpop.eup %7573  ;;  %v5874_v26 = vsel %vm4414_vm1, %v9133_v60, 0.0 }
 0x59e   :  { %7421 = vmatmul.msk.f32.vlgmr.msra.gmra.mxu2 %vm4414_vm1, %v4561_v21  ;;  %7577 = vrcp.f32 %v4820_v8  ;;  %v4700_v45 = vmul.f32 %v7574_v22, %v8958_v51 }
 0x59f   :  { %4850 = vmatpush.msra.mxu2 %v7502_v17 }
 0x5a3   :  { %v7576_v10 = vpop.eup %7575 }
 0x5a4   :  { %v4562_v63 = vmul.f32 %v7576_v10, %v8995_v23  ;;  %v4697_v30 = vpop.xlane.xlu1 %4696  ;;  %5875 = vadd.xlane.f32.xlu1 %v5874_v26  ;;  %v7578_v49 = vpop.eup %7577 }
 0x5a5   :  { %7579 = vrcp.f32 %v4697_v30  ;;  %v4826_v51 = vmul.f32 %v7578_v49, %v8967_v58 }
 0x5a6   :  { %7422 = vmatmul.msk.f32.vlgmr.msra.gmra.mxu3 %vm4414_vm1, %v4562_v63  ;;  %7427 = vmatmul.msk.f32.vlgmr.msrb.gmra.mxu2 %vm4414_vm1, %v4700_v45  ;;  %7581 = vrcp.f32 %v4823_v36 }
 0x5a7   :  { %4877 = vmatpush.msra.mxu3 %v7503_v18  ;;  %4984 = vmatpush.msrb.mxu2 %v8975_v2 }
 0x5ab   :  { %v7580_v55 = vpop.eup %7579 }
 0x5ac   :  { %v4701_v23 = vmul.f32 %v7580_v55, %v9002_v62  ;;  %v4958_v46 = vpop.xlane.xlu1 %4957  ;;  %v7582_v2 = vpop.eup %7581  ;;  %v7508_v62 = vunpack.i.h.bf16 %v7506_v1 }
 0x5ad   :  { %7583 = vrcp.f32 %v4958_v46  ;;  %v4827_v24 = vmul.f32 %v7582_v2, %v8982_v52 }
 0x5ae   :  { %7428 = vmatmul.msk.f32.vlgmr.msrb.gmra.mxu3 %vm4414_vm1, %v4701_v23  ;;  %7433 = vmatmul.msk.f32.vlgmr.msra.gmra.mxu2 %vm4414_vm1, %v4826_v51  ;;  %7585 = vrcp.f32 %v5084_v40 }
 0x5af   :  { %5007 = vmatpush.msrb.mxu3 %v8970_v7  ;;  %5114 = vmatpush.msra.mxu2 %v7507_v56 }
 0x5b1   :  { %v5489_v0 = vpop.xlane.xlu2 %5488 }
 0x5b3   :  { %v7584_v28 = vpop.eup %7583 }
 0x5b4   :  { %v4964_v58 = vmul.f32 %v7584_v28, %v9011_v33  ;;  %v4961_v3 = vpop.xlane.xlu1 %4960  ;;  %v7586_v42 = vpop.eup %7585  ;;  %v7512_v33 = vunpack.i.l.bf16 %v9126_v59 }
 0x5b5   :  { %7587 = vrcp.f32 %v4961_v3  ;;  %v5090_v12 = vmul.f32 %v7586_v42, %v8991_v44  ;;  %v6044_v3 = vld [vmem:[#allocation9 + $0x2a0] sm:$0xff]  ;;  %v6038_v42 = vld [vmem:[#allocation9 + $0x270] sm:$0xff] }
 0x5b6   :  { %7434 = vmatmul.msk.f32.vlgmr.msra.gmra.mxu3 %vm4414_vm1, %v4827_v24  ;;  %7439 = vmatmul.msk.f32.vlgmr.msrb.gmra.mxu2 %vm4414_vm1, %v4964_v58  ;;  %v5087_v7 = vpop.xlane.xlu0 %5086  ;;  %v6050_v58 = vld [vmem:[#allocation9 + $0x2d0] sm:$0xff] }
 0x5b7   :  { %5141 = vmatpush.msra.mxu3 %v7508_v62  ;;  %5248 = vmatpush.msrb.mxu2 %v8931_v38  ;;  %7589 = vrcp.f32 %v5087_v7 }
 0x5b8   :  { %6550 = vmatpush.msrb.mxu0 %v6050_v58  ;;  %v6338_v58 = vld [vmem:[#allocation9 + $0xbd0] sm:$0xff] }
 0x5b9   :  { %v5612_v47 = vpop.xlane.xlu2 %5611 }
 0x5ba   :  { %6551 = vmatpush.msrb.mxu0 %v6044_v3  ;;  %v6033_v3 = vld [vmem:[#allocation9 + $0x248] sm:$0xff] }
 0x5bb   :  { %v7588_v16 = vpop.eup %7587 }
 0x5bc   :  { %v4965_v52 = vmul.f32 %v7588_v16, %v9023_v41  ;;  %v5222_v6 = vpop.xlane.xlu1 %5221  ;;  %v7513_v41 = vunpack.i.h.bf16 %v9126_v59  ;;  %v6032_v16 = vld [vmem:[#allocation9 + $0x240] sm:$0xff]  ;;  %6552 = vmatpush.msrb.mxu0 %v6038_v42  ;;  %v6027_v42 = vld [vmem:[#allocation9 + $0x218] sm:$0xff] }
 0x5bd   :  { %7591 = vrcp.f32 %v5222_v6  ;;  %v7590_v38 = vpop.eup %7589  ;;  %v6014_v6 = vld [vmem:[#allocation9 + $0x1b0] sm:$0xff] }
 0x5be   :  { %7440 = vmatmul.msk.f32.vlgmr.msrb.gmra.mxu3 %vm4414_vm1, %v4965_v52  ;;  %7445 = vmatmul.msk.f32.vlgmr.msra.gmra.mxu2 %vm4414_vm1, %v5090_v12  ;;  %v5091_v54 = vmul.f32 %v7590_v38, %v9029_v53  ;;  %v5486_v53 = vpop.xlane.xlu0 %5485  ;;  %v6026_v12 = vld [vmem:[#allocation9 + $0x210] sm:$0xff]  ;;  %v6020_v52 = vld [vmem:[#allocation9 + $0x1e0] sm:$0xff] }
 0x5bf   :  { %5271 = vmatpush.msrb.mxu3 %v8933_v39  ;;  %5378 = vmatpush.msra.mxu2 %v7512_v33  ;;  %v6002_v38 = vld [vmem:[#allocation9 + $0x150] sm:$0xff] }
 0x5c0   :  { %6553 = vmatpush.msrb.mxu0 %v6032_v16  ;;  %v6434_v16 = vld [vmem:[#allocation9 + $0xed0] sm:$0xff] }
 0x5c1   :  { %v5615_v59 = vpop.xlane.xlu2 %5614 }
 0x5c2   :  { %6554 = vmatpush.msrb.mxu0 %v6026_v12  ;;  %v6326_v12 = vld [vmem:[#allocation9 + $0xb70] sm:$0xff] }
 0x5c3   :  { %v7592_v27 = vpop.eup %7591 }
 0x5c4   :  { %v5228_v44 = vmul.f32 %v7592_v27, %v9043_v9  ;;  %v5225_v19 = vpop.xlane.xlu1 %5224  ;;  %6555 = vmatpush.msrb.mxu0 %v6020_v52  ;;  %v6146_v27 = vld [vmem:[#allocation9 + $0x5d0] sm:$0xff]  ;;  %v6428_v52 = vld [vmem:[#allocation9 + $0xea0] sm:$0xff] }
 0x5c5   :  { %7593 = vrcp.f32 %v5225_v19  ;;  %6573 = vmatpush.msrb.mxu1 %v6146_v27  ;;  %v6134_v19 = vld [vmem:[#allocation9 + $0x570] sm:$0xff] }
 0x5c6   :  { %7446 = vmatmul.msk.f32.vlgmr.msra.gmra.mxu3 %vm4414_vm1, %v5091_v54  ;;  %7451 = vmatmul.msk.f32.vlgmr.msrb.gmra.mxu2 %vm4414_vm1, %v5228_v44  ;;  %v6140_v54 = vld [vmem:[#allocation9 + $0x5a0] sm:$0xff]  ;;  %v6314_v27 = vld [vmem:[#allocation9 + $0xb10] sm:$0xff] }
 0x5c7   :  { %5405 = vmatpush.msra.mxu3 %v7513_v41  ;;  %5512 = vmatpush.msrb.mxu2 %v9113_v20  ;;  %v5996_v44 = vld [vmem:[#allocation9 + $0x120] sm:$0xff]  ;;  %v5990_v41 = vld [vmem:[#allocation9 + $0xf0] sm:$0xff] }
 0x5c8   :  { %6556 = vmatpush.msrb.mxu0 %v6014_v6  ;;  %6574 = vmatpush.msrb.mxu1 %v6140_v54  ;;  %v6021_v6 = vld [vmem:[#allocation9 + $0x1e8] sm:$0xff]  ;;  %v6416_v54 = vld [vmem:[#allocation9 + $0xe40] sm:$0xff] }
 0x5c9   :  { %v5750_v5 = vpop.xlane.xlu2 %5749 }
 0x5ca   :  { %6575 = vmatpush.msrb.mxu1 %v6134_v19  ;;  %v6009_v19 = vld [vmem:[#allocation9 + $0x188] sm:$0xff] }
 0x5cb   :  { %v7594_v39 = vpop.eup %7593 }
 0x5cc   :  { %v5229_v25 = vmul.f32 %v7594_v39, %v9060_v14  ;;  %v5348_v32 = vpop.xlane.xlu1 %5347  ;;  %v5984_v39 = vld [vmem:[#allocation9 + $0xc0] sm:$0xff] }
 0x5cd   :  { %7595 = vrcp.f32 %v5348_v32  ;;  %v5978_v32 = vld [vmem:[#allocation9 + $0x90] sm:$0xff] }
 0x5ce   :  { %7452 = vmatmul.msk.f32.vlgmr.msrb.gmra.mxu3 %vm4414_vm1, %v5229_v25  ;;  %7597 = vrcp.f32 %v5486_v53  ;;  %v6128_v25 = vld [vmem:[#allocation9 + $0x540] sm:$0xff]  ;;  %v6122_v53 = vld [vmem:[#allocation9 + $0x510] sm:$0xff] }
 0x5cf   :  { %5535 = vmatpush.msrb.mxu3 %v9108_v61  ;;  %6576 = vmatpush.msrb.mxu1 %v6128_v25  ;;  %v6302_v25 = vld [vmem:[#allocation9 + $0xab0] sm:$0xff] }
 0x5d1   :  { %v5879_v22 = vpop.xlane.xlu0 %5878  ;;  %6577 = vmatpush.msrb.mxu1 %v6122_v53  ;;  %v5997_v53 = vld [vmem:[#allocation9 + $0x128] sm:$0xff] }
 0x5d3   :  { %v7596_v9 = vpop.eup %7595 }
 0x5d4   :  { %v5354_v43 = vmul.f32 %v7596_v9, %v9071_v15  ;;  %v5351_v34 = vpop.xlane.xlu1 %5350  ;;  %v7598_v20 = vpop.eup %7597  ;;  %v6242_v9 = vld [vmem:[#allocation9 + $0x8d0] sm:$0xff] }
 0x5d5   :  { %7599 = vrcp.f32 %v5351_v34  ;;  %v5492_v14 = vmul.f32 %v7598_v20, %v9045_v35  ;;  %v5753_v15 = vpop.xlane.xlu2 %5752  ;;  %v6116_v34 = vld [vmem:[#allocation9 + $0x4e0] sm:$0xff] }
 0x5d6   :  { %7457 = vmatmul.msk.f32.vlgmr.msra.gmra.mxu2 %vm4414_vm1, %v5354_v43  ;;  %7601 = vrcp.f32 %v5489_v0  ;;  %v6008_v0 = vld [vmem:[#allocation9 + $0x180] sm:$0xff]  ;;  %6578 = vmatpush.msrb.mxu1 %v6116_v34  ;;  %v6290_v34 = vld [vmem:[#allocation9 + $0xa50] sm:$0xff] }
 0x5d7   :  { %7603 = vrcp.f32 %v5612_v47  ;;  %6557 = vmatpush.msrb.mxu0 %v6008_v0  ;;  %v5972_v43 = vld [vmem:[#allocation9 + $0x60] sm:$0xff]  ;;  %v6422_v0 = vld [vmem:[#allocation9 + $0xe70] sm:$0xff] }
 0x5d8   :  { %7605 = vrcp.f32 %v5615_v59  ;;  %v6236_v59 = vld [vmem:[#allocation9 + $0x8a0] sm:$0xff] }
 0x5d9   :  { %7607 = vrcp.f32 %v5750_v5  ;;  %6558 = vmatpush.msrb.mxu0 %v6002_v38  ;;  %v6230_v5 = vld [vmem:[#allocation9 + $0x870] sm:$0xff]  ;;  %v6015_v38 = vld [vmem:[#allocation9 + $0x1b8] sm:$0xff] }
 0x5da   :  { %7609 = vrcp.f32 %v5753_v15  ;;  %v6224_v15 = vld [vmem:[#allocation9 + $0x840] sm:$0xff] }
 0x5db   :  { %v7600_v8 = vpop.eup %7599  ;;  %7611 = vrcp.f32 %v5879_v22  ;;  %6559 = vmatpush.msrb.mxu0 %v5996_v44  ;;  %v6098_v22 = vld [vmem:[#allocation9 + $0x450] sm:$0xff] }
 0x5dc   :  { %v5355_v21 = vmul.f32 %v7600_v8, %v9081_v37  ;;  %v7602_v61 = vpop.eup %7601 }
 0x5dd   :  { %v5493_v17 = vmul.f32 %v7602_v61, %v9020_v4  ;;  %v7604_v10 = vpop.eup %7603  ;;  %v5886_v4 = vpop.permute.xlu2 %5885  ;;  %6560 = vmatpush.msrb.mxu0 %v5990_v41  ;;  %v5960_v61 = vld [vmem:[#allocation9] sm:$0xff] }
 0x5de   :  { %7458 = vmatmul.msk.f32.vlgmr.msra.gmra.mxu3 %vm4414_vm1, %v5355_v21  ;;  %7463 = vmatmul.msk.f32.vlgmr.msrb.gmra.mxu2 %vm4414_vm1, %v5492_v14  ;;  %v7606_v26 = vpop.eup %7605  ;;  %v5618_v63 = vmul.f32 %v7604_v10, %v9036_v48  ;;  %v5966_v14 = vld [vmem:[#allocation9 + $0x30] sm:$0xff]  ;;  %v6308_v41 = vld [vmem:[#allocation9 + $0xae0] sm:$0xff] }
 0x5df   :  { %v5619_v30 = vmul.f32 %v7606_v26, %v9055_v13  ;;  %v7608_v36 = vpop.eup %7607  ;;  %6561 = vmatpush.msrb.mxu0 %v5984_v39  ;;  %v6110_v21 = vld [vmem:[#allocation9 + $0x4b0] sm:$0xff]  ;;  %v6092_v26 = vld [vmem:[#allocation9 + $0x420] sm:$0xff]  ;;  %v6003_v39 = vld [vmem:[#allocation9 + $0x158] sm:$0xff] }
 0x5e0   :  { %v7610_v49 = vpop.eup %7609  ;;  %v5756_v48 = vmul.f32 %v7608_v36, %v9068_v31  ;;  %6579 = vmatpush.msrb.mxu1 %v6110_v21  ;;  %v6218_v10 = vld [vmem:[#allocation9 + $0x810] sm:$0xff]  ;;  %v6284_v21 = vld [vmem:[#allocation9 + $0xa20] sm:$0xff] }
 0x5e1   :  { %v5757_v13 = vmul.f32 %v7610_v49, %v9077_v11  ;;  %v7612_v1 = vpop.eup %7611  ;;  %6562 = vmatpush.msrb.mxu0 %v5978_v32  ;;  %v6194_v36 = vld [vmem:[#allocation9 + $0x750] sm:$0xff]  ;;  %v6068_v49 = vld [vmem:[#allocation9 + $0x360] sm:$0xff] }
 0x5e2   :  { %v5883_v51 = vmul.f32 %v7612_v1, %v9079_v50  ;;  %v6404_v32 = vld [vmem:[#allocation9 + $0xde0] sm:$0xff] }
 0x5e3   :  { %6563 = vmatpush.msrb.mxu0 %v5972_v43  ;;  %v5991_v43 = vld [vmem:[#allocation9 + $0xf8] sm:$0xff] }
 0x5e4   :  { %v5913_v18 = vpop.permute.xlu0 %5912 }
 0x5e5   :  { %6564 = vmatpush.msrb.mxu0 %v5966_v14  ;;  %v6392_v14 = vld [vmem:[#allocation9 + $0xd80] sm:$0xff] }
 0x5e6   :  { %7464 = vmatmul.msk.f32.vlgmr.msrb.gmra.mxu3 %vm4414_vm1, %v5493_v17  ;;  %v6104_v17 = vld [vmem:[#allocation9 + $0x480] sm:$0xff] }
 0x5e7   :  { %6565 = vmatpush.msrb.mxu0 %v5960_v61  ;;  %6580 = vmatpush.msrb.mxu1 %v6104_v17  ;;  %v6386_v61 = vld [vmem:[#allocation9 + $0xd50] sm:$0xff] }
 0x5e8   :  { %v6278_v17 = vld [vmem:[#allocation9 + $0x9f0] sm:$0xff] }
 0x5e9   :  { %6581 = vmatpush.msrb.mxu1 %v6098_v22  ;;  %6642 = vmatpush.msra.mxu0 %v6434_v16  ;;  %v5973_v22 = vld [vmem:[#allocation9 + $0x68] sm:$0xff]  ;;  %v6195_v16 = vld [vmem:[#allocation9 + $0x758] sm:$0xff] }
 0x5eb   :  { %6582 = vmatpush.msrb.mxu1 %v6092_v26  ;;  %6643 = vmatpush.msra.mxu0 %v6428_v52  ;;  %v6374_v26 = vld [vmem:[#allocation9 + $0xcf0] sm:$0xff]  ;;  %v6189_v52 = vld [vmem:[#allocation9 + $0x728] sm:$0xff] }
 0x5ec   :  { %v7516_v35 = vpop.permute.xlu1 %7515 }
 0x5ed   :  { %v7518_v37 = vunpack.i.h.bf16 %v7516_v35  ;;  %v7517_v45 = vunpack.i.l.bf16 %v7516_v35  ;;  %6644 = vmatpush.msra.mxu0 %v6422_v0  ;;  %v6435_v0 = vld [vmem:[#allocation9 + $0xed8] sm:$0xff] }
 0x5ef   :  { %5642 = vmatpush.msra.mxu2 %v7517_v45  ;;  %5669 = vmatpush.msra.mxu3 %v7518_v37  ;;  %v6212_v37 = vld [vmem:[#allocation9 + $0x7e0] sm:$0xff]  ;;  %v6086_v45 = vld [vmem:[#allocation9 + $0x3f0] sm:$0xff] }
 0x5f0   :  { %7469 = vmatmul.msk.f32.vlgmr.msra.gmra.mxu2 %vm4414_vm1, %v5618_v63  ;;  %7470 = vmatmul.msk.f32.vlgmr.msra.gmra.mxu3 %vm4414_vm1, %v5619_v30  ;;  %v6206_v63 = vld [vmem:[#allocation9 + $0x7b0] sm:$0xff]  ;;  %v6080_v30 = vld [vmem:[#allocation9 + $0x3c0] sm:$0xff] }
 0x5f1   :  { %5776 = vmatpush.msrb.mxu2 %v9110_v29  ;;  %5799 = vmatpush.msrb.mxu3 %v9102_v57 }
 0x5f2   :  { %6583 = vmatpush.msrb.mxu1 %v6086_v45  ;;  %6645 = vmatpush.msra.mxu0 %v6416_v54  ;;  %v5961_v45 = vld [vmem:[#allocation9 + $0x8] sm:$0xff] }
 0x5f3   :  { %5906 = vmatpush.msra.mxu2 %v5886_v4  ;;  %5933 = vmatpush.msra.mxu3 %v5913_v18  ;;  %v6200_v4 = vld [vmem:[#allocation9 + $0x780] sm:$0xff]  ;;  %v6074_v18 = vld [vmem:[#allocation9 + $0x390] sm:$0xff] }
 0x5f4   :  { %6584 = vmatpush.msrb.mxu1 %v6080_v30  ;;  %v6260_v30 = vld [vmem:[#allocation9 + $0x960] sm:$0xff] }
 0x5f6   :  { %6585 = vmatpush.msrb.mxu1 %v6074_v18  ;;  %v6254_v18 = vld [vmem:[#allocation9 + $0x930] sm:$0xff] }
 0x5f8   :  { %7475 = vmatmul.msk.f32.vlgmr.msrb.gmra.mxu2 %vm4414_vm1, %v5756_v48  ;;  %7476 = vmatmul.msk.f32.vlgmr.msrb.gmra.mxu3 %vm4414_vm1, %v5757_v13  ;;  %v6188_v48 = vld [vmem:[#allocation9 + $0x720] sm:$0xff]  ;;  %v6062_v13 = vld [vmem:[#allocation9 + $0x330] sm:$0xff] }
 0x5f9   :  { %6596 = vmatpush.msrb.mxu2 %v6242_v9  ;;  %6586 = vmatpush.msrb.mxu1 %v6068_v49  ;;  %v6296_v9 = vld [vmem:[#allocation9 + $0xa80] sm:$0xff] }
 0x5fa   :  { %6619 = vmatpush.msrb.mxu3 %v6338_v58  ;;  %v6248_v49 = vld [vmem:[#allocation9 + $0x900] sm:$0xff]  ;;  %v6099_v58 = vld [vmem:[#allocation9 + $0x458] sm:$0xff] }
 0x5fb   :  { %6597 = vmatpush.msrb.mxu2 %v6236_v59  ;;  %6587 = vmatpush.msrb.mxu1 %v6062_v13  ;;  %v6398_v59 = vld [vmem:[#allocation9 + $0xdb0] sm:$0xff]  ;;  %v6147_v13 = vld [vmem:[#allocation9 + $0x5d8] sm:$0xff] }
 0x5fd   :  { %v4457_v55 = vpop.f32.mrf.mxu2  ;;  %6598 = vmatpush.msrb.mxu2 %v6230_v5  ;;  %v5979_v5 = vld [vmem:[#allocation9 + $0x98] sm:$0xff] }
 0x5fe   :  { %4483 = vst.msk [vmem:[#allocation2] sm:$0xff] %vm4361_vm0, %v4457_v55 }
 0x5ff   :  { %6599 = vmatpush.msrb.mxu2 %v6224_v15  ;;  %v6380_v15 = vld [vmem:[#allocation9 + $0xd20] sm:$0xff] }
 0x600   :  { %7482 = vmatmul.msk.f32.vlgmr.msra.gmra.mxu3 %vm4414_vm1, %v5883_v51  ;;  %v6182_v51 = vld [vmem:[#allocation9 + $0x6f0] sm:$0xff] }
 0x601   :  { %6600 = vmatpush.msrb.mxu2 %v6218_v10  ;;  %v6272_v10 = vld [vmem:[#allocation9 + $0x9c0] sm:$0xff] }
 0x603   :  { %6601 = vmatpush.msrb.mxu2 %v6212_v37  ;;  %v6266_v37 = vld [vmem:[#allocation9 + $0x990] sm:$0xff] }
 0x605   :  { %v4480_v57 = vpop.f32.mrf.mxu3  ;;  %6602 = vmatpush.msrb.mxu2 %v6206_v63  ;;  %v6368_v63 = vld [vmem:[#allocation9 + $0xcc0] sm:$0xff] }
 0x606   :  { %4484 = vst.msk [vmem:[#allocation2 + $0x30] sm:$0xff] %vm4361_vm0, %v4480_v57  ;;  %v6056_v57 = vld [vmem:[#allocation9 + $0x300] sm:$0xff] }
 0x607   :  { %6603 = vmatpush.msrb.mxu2 %v6200_v4  ;;  %6588 = vmatpush.msrb.mxu1 %v6056_v57  ;;  %v6362_v4 = vld [vmem:[#allocation9 + $0xc90] sm:$0xff]  ;;  %v6243_v57 = vld [vmem:[#allocation9 + $0x8d8] sm:$0xff] }
 0x609   :  { %6604 = vmatpush.msrb.mxu2 %v6194_v36  ;;  %v6356_v36 = vld [vmem:[#allocation9 + $0xc60] sm:$0xff] }
 0x60b   :  { %6605 = vmatpush.msrb.mxu2 %v6188_v48  ;;  %v6350_v48 = vld [vmem:[#allocation9 + $0xc30] sm:$0xff] }
 0x60d   :  { %6606 = vmatpush.msrb.mxu2 %v6182_v51  ;;  %v6141_v51 = vld [vmem:[#allocation9 + $0x5a8] sm:$0xff] }
 0x617   :  { %v5876_v29 = vpop.xlane.xlu1 %5875 }
 0x618   :  { %7613 = vrcp.f32 %v5876_v29  ;;  %v6176_v29 = vld [vmem:[#allocation9 + $0x6c0] sm:$0xff] }
 0x619   :  { %6607 = vmatpush.msrb.mxu2 %v6176_v29  ;;  %v6135_v29 = vld [vmem:[#allocation9 + $0x578] sm:$0xff] }
 0x61e   :  { %v7614_v31 = vpop.eup %7613 }
 0x61f   :  { %v5882_v11 = vmul.f32 %v7614_v31, %v9133_v60  ;;  %v6170_v31 = vld [vmem:[#allocation9 + $0x690] sm:$0xff] }
 0x620   :  { %6608 = vmatpush.msrb.mxu2 %v6170_v31  ;;  %v6237_v31 = vld [vmem:[#allocation9 + $0x8a8] sm:$0xff] }
 0x621   :  { %v4587_v23 = vpop.f32.mrf.mxu2  ;;  %7481 = vmatmul.msk.f32.vlgmr.msra.gmra.mxu2 %vm4414_vm1, %v5882_v11  ;;  %v6164_v11 = vld [vmem:[#allocation9 + $0x660] sm:$0xff] }
 0x622   :  { %4619 = vrot.lane.b32.xlu2 %v4587_v23, %s7852_s2  ;;  %6609 = vmatpush.msrb.mxu2 %v6164_v11  ;;  %v6129_v11 = vld [vmem:[#allocation9 + $0x548] sm:$0xff] }
 0x629   :  { %v9193_v46 = vpop.f32.mrf.mxu3  ;;  %v4722_v50 = vpop.f32.mrf.mxu2 }
 0x62a   :  { %4748 = vst.msk [vmem:[#allocation2 + $0x8] sm:$0xff] %vm4361_vm0, %v4722_v50  ;;  %v6158_v50 = vld [vmem:[#allocation9 + $0x630] sm:$0xff] }
 0x62b   :  { %6610 = vmatpush.msrb.mxu2 %v6158_v50  ;;  %v6225_v50 = vld [vmem:[#allocation9 + $0x848] sm:$0xff] }
 0x631   :  { %v4745_v56 = vpop.f32.mrf.mxu3  ;;  %v4852_v40 = vpop.f32.mrf.mxu2 }
 0x632   :  { %4749 = vst.msk [vmem:[#allocation2 + $0x38] sm:$0xff] %vm4361_vm0, %v4745_v56  ;;  %4884 = vrot.lane.b32.xlu2 %v4852_v40, %s7852_s2  ;;  %v6152_v40 = vld [vmem:[#allocation9 + $0x600] sm:$0xff] }
 0x633   :  { %6611 = vmatpush.msrb.mxu2 %v6152_v40  ;;  %v6219_v40 = vld [vmem:[#allocation9 + $0x818] sm:$0xff] }
 0x639   :  { %v9198_v2 = vpop.f32.mrf.mxu3  ;;  %v4986_v28 = vpop.f32.mrf.mxu2 }
 0x63a   :  { %5012 = vst.msk [vmem:[#allocation2 + $0x10] sm:$0xff] %vm4361_vm0, %v4986_v28  ;;  %v6045_v28 = vld [vmem:[#allocation9 + $0x2a8] sm:$0xff] }
 0x641   :  { %v5009_v60 = vpop.f32.mrf.mxu3  ;;  %v5116_v24 = vpop.f32.mrf.mxu2 }
 0x642   :  { %5013 = vst.msk [vmem:[#allocation2 + $0x40] sm:$0xff] %vm4361_vm0, %v5009_v60  ;;  %5148 = vrot.lane.b32.xlu0 %v5116_v24, %s7852_s2  ;;  %v6039_v60 = vld [vmem:[#allocation9 + $0x278] sm:$0xff] }
 0x649   :  { %v5143_v62 = vpop.f32.mrf.mxu3  ;;  %v5250_v7 = vpop.f32.mrf.mxu2 }
 0x64a   :  { %5276 = vst.msk [vmem:[#allocation2 + $0x18] sm:$0xff] %vm4361_vm0, %v5250_v7  ;;  %5150 = vrot.lane.b32.xlu1 %v5143_v62, %s7852_s2  ;;  %v6332_v7 = vld [vmem:[#allocation9 + $0xba0] sm:$0xff] }
 0x64b   :  { %6620 = vmatpush.msrb.mxu3 %v6332_v7  ;;  %v6201_v7 = vld [vmem:[#allocation9 + $0x788] sm:$0xff] }
 0x64d   :  { %6621 = vmatpush.msrb.mxu3 %v6326_v12  ;;  %v6087_v12 = vld [vmem:[#allocation9 + $0x3f8] sm:$0xff] }
 0x651   :  { %v5273_v33 = vpop.f32.mrf.mxu3 }
 0x652   :  { %5277 = vst.msk [vmem:[#allocation2 + $0x48] sm:$0xff] %vm4361_vm0, %v5273_v33  ;;  %v6320_v33 = vld [vmem:[#allocation9 + $0xb40] sm:$0xff] }
 0x653   :  { %6622 = vmatpush.msrb.mxu3 %v6320_v33  ;;  %v6183_v33 = vld [vmem:[#allocation9 + $0x6f8] sm:$0xff] }
 0x655   :  { %6623 = vmatpush.msrb.mxu3 %v6314_v27 }
 0x657   :  { %6624 = vmatpush.msrb.mxu3 %v6308_v41  ;;  %v6429_v41 = vld [vmem:[#allocation9 + $0xea8] sm:$0xff] }
 0x659   :  { %v5380_v47 = vpop.f32.mrf.mxu2  ;;  %6625 = vmatpush.msrb.mxu3 %v6302_v25  ;;  %v6423_v25 = vld [vmem:[#allocation9 + $0xe78] sm:$0xff] }
 0x65a   :  { %5412 = vrot.lane.b32.xlu0 %v5380_v47, %s7852_s2  ;;  %v6410_v47 = vld [vmem:[#allocation9 + $0xe10] sm:$0xff] }
 0x65b   :  { %6646 = vmatpush.msra.mxu0 %v6410_v47  ;;  %6626 = vmatpush.msrb.mxu3 %v6296_v9  ;;  %v6069_v47 = vld [vmem:[#allocation9 + $0x368] sm:$0xff] }
 0x65c   :  { %v6417_v9 = vld [vmem:[#allocation9 + $0xe48] sm:$0xff] }
 0x65d   :  { %6647 = vmatpush.msra.mxu0 %v6404_v32  ;;  %6627 = vmatpush.msrb.mxu3 %v6290_v34  ;;  %v6063_v32 = vld [vmem:[#allocation9 + $0x338] sm:$0xff] }
 0x65e   :  { %v6159_v34 = vld [vmem:[#allocation9 + $0x638] sm:$0xff] }
 0x65f   :  { %6648 = vmatpush.msra.mxu0 %v6398_v59  ;;  %6628 = vmatpush.msrb.mxu3 %v6284_v21  ;;  %v6057_v59 = vld [vmem:[#allocation9 + $0x308] sm:$0xff] }
 0x661   :  { %v5407_v20 = vpop.f32.mrf.mxu3  ;;  %v5514_v8 = vpop.f32.mrf.mxu2  ;;  %6649 = vmatpush.msra.mxu0 %v6392_v14  ;;  %6629 = vmatpush.msrb.mxu3 %v6278_v17  ;;  %v6524_v14 = vld [vmem:[#allocation9 + $0x11a0] sm:$0xff]  ;;  %v6399_v17 = vld [vmem:[#allocation9 + $0xdb8] sm:$0xff] }
 0x662   :  { %5540 = vst.msk [vmem:[#allocation2 + $0x20] sm:$0xff] %vm4361_vm0, %v5514_v8  ;;  %5414 = vrot.lane.b32.xlu2 %v5407_v20, %s7852_s2  ;;  %4621 = vrot.lane.b32.xlu0 %v9193_v46, %s7852_s2  ;;  %v5985_v8 = vld [vmem:[#allocation9 + $0xc8] sm:$0xff] }
 0x663   :  { %6650 = vmatpush.msra.mxu0 %v6386_v61  ;;  %6630 = vmatpush.msrb.mxu3 %v6272_v10  ;;  %v6405_v61 = vld [vmem:[#allocation9 + $0xde8] sm:$0xff]  ;;  %v6512_v10 = vld [vmem:[#allocation9 + $0x1140] sm:$0xff] }
 0x665   :  { %6651 = vmatpush.msra.mxu0 %v6380_v15  ;;  %6631 = vmatpush.msrb.mxu3 %v6266_v37  ;;  %v6518_v15 = vld [vmem:[#allocation9 + $0x1170] sm:$0xff] }
 0x667   :  { %6652 = vmatpush.msra.mxu0 %v6374_v26  ;;  %6632 = vmatpush.msrb.mxu3 %v6260_v30  ;;  %v6387_v26 = vld [vmem:[#allocation9 + $0xd58] sm:$0xff] }
 0x669   :  { %v5537_v35 = vpop.f32.mrf.mxu3  ;;  %6653 = vmatpush.msra.mxu0 %v6368_v63  ;;  %6633 = vmatpush.msrb.mxu3 %v6254_v18  ;;  %v6500_v63 = vld [vmem:[#allocation9 + $0x10e0] sm:$0xff]  ;;  %v6494_v18 = vld [vmem:[#allocation9 + $0x10b0] sm:$0xff] }
 0x66a   :  { %5541 = vst.msk [vmem:[#allocation2 + $0x50] sm:$0xff] %vm4361_vm0, %v5537_v35  ;;  %4886 = vrot.lane.b32.xlu0 %v9198_v2, %s7852_s2  ;;  %v6051_v2 = vld [vmem:[#allocation9 + $0x2d8] sm:$0xff] }
 0x66b   :  { %6688 = vmatpush.msra.mxu2 %v6051_v2  ;;  %v5967_v35 = vld [vmem:[#allocation9 + $0x38] sm:$0xff]  ;;  %6654 = vmatpush.msra.mxu0 %v6362_v4 }
 0x66c   :  { %6634 = vmatpush.msrb.mxu3 %v6248_v49  ;;  %v6111_v2 = vld [vmem:[#allocation9 + $0x4b8] sm:$0xff]  ;;  %v6488_v49 = vld [vmem:[#allocation9 + $0x1080] sm:$0xff] }
 0x66d   :  { %6689 = vmatpush.msra.mxu2 %v6045_v28  ;;  %6655 = vmatpush.msra.mxu0 %v6356_v36  ;;  %v6213_v28 = vld [vmem:[#allocation9 + $0x7e8] sm:$0xff]  ;;  %v6375_v4 = vld [vmem:[#allocation9 + $0xcf8] sm:$0xff] }
 0x66e   :  { %6711 = vmatpush.msra.mxu3 %v6147_v13  ;;  %v6369_v36 = vld [vmem:[#allocation9 + $0xcc8] sm:$0xff]  ;;  %v6531_v13 = vld [vmem:[#allocation9 + $0x11d8] sm:$0xff] }
 0x66f   :  { %6690 = vmatpush.msra.mxu2 %v6039_v60  ;;  %6656 = vmatpush.msra.mxu0 %v6350_v48  ;;  %v6105_v60 = vld [vmem:[#allocation9 + $0x488] sm:$0xff]  ;;  %v6363_v48 = vld [vmem:[#allocation9 + $0xc98] sm:$0xff] }
 0x670   :  { %6712 = vmatpush.msra.mxu3 %v6141_v51  ;;  %v6482_v51 = vld [vmem:[#allocation9 + $0x1050] sm:$0xff] }
 0x671   :  { %6691 = vmatpush.msra.mxu2 %v6033_v3 }
 0x672   :  { %6713 = vmatpush.msra.mxu3 %v6135_v29  ;;  %v6525_v29 = vld [vmem:[#allocation9 + $0x11a8] sm:$0xff] }
 0x673   :  { %v5644_v1 = vpop.f32.mrf.mxu2  ;;  %v5671_v55 = vpop.f32.mrf.mxu3  ;;  %6692 = vmatpush.msra.mxu2 %v6027_v42  ;;  %v6093_v42 = vld [vmem:[#allocation9 + $0x428] sm:$0xff] }
 0x674   :  { %5676 = vrot.lane.b32.xlu2 %v5644_v1, %s7852_s2  ;;  %6714 = vmatpush.msra.mxu3 %v6129_v11  ;;  %v6476_v11 = vld [vmem:[#allocation9 + $0x1020] sm:$0xff] }
 0x675   :  { %6693 = vmatpush.msra.mxu2 %v6021_v6  ;;  %v6081_v6 = vld [vmem:[#allocation9 + $0x3c8] sm:$0xff] }
 0x677   :  { %6694 = vmatpush.msra.mxu2 %v6015_v38  ;;  %v6075_v38 = vld [vmem:[#allocation9 + $0x398] sm:$0xff] }
 0x679   :  { %6695 = vmatpush.msra.mxu2 %v6009_v19  ;;  %v6177_v19 = vld [vmem:[#allocation9 + $0x6c8] sm:$0xff] }
 0x67b   :  { %v5778_v23 = vpop.f32.mrf.mxu2  ;;  %v5801_v46 = vpop.f32.mrf.mxu3  ;;  %6696 = vmatpush.msra.mxu2 %v6003_v39  ;;  %v6171_v39 = vld [vmem:[#allocation9 + $0x698] sm:$0xff] }
 0x67c   :  { %5804 = vst.msk [vmem:[#allocation2 + $0x28] sm:$0xff] %vm4361_vm0, %v5778_v23  ;;  %v4620_v56 = vpop.permute.xlu2 %4619  ;;  %5678 = vrot.lane.b32.xlu2 %v5671_v55, %s7852_s2  ;;  %v6344_v55 = vld [vmem:[#allocation9 + $0xc00] sm:$0xff]  ;;  %v6231_v23 = vld [vmem:[#allocation9 + $0x878] sm:$0xff] }
 0x67d   :  { %5805 = vst.msk [vmem:[#allocation2 + $0x58] sm:$0xff] %vm4361_vm0, %v5801_v46  ;;  %6697 = vmatpush.msra.mxu2 %v5997_v53  ;;  %6657 = vmatpush.msra.mxu0 %v6344_v55  ;;  %v6123_v46 = vld [vmem:[#allocation9 + $0x518] sm:$0xff]  ;;  %v6165_v53 = vld [vmem:[#allocation9 + $0x668] sm:$0xff] }
 0x67e   :  { %4626 = vst.msk [vmem:[#allocation2] sm:$0xff] %vm4625_vm2, %v4620_v56  ;;  %v6117_v56 = vld [vmem:[#allocation9 + $0x4e8] sm:$0xff]  ;;  %6715 = vmatpush.msra.mxu3 %v6123_v46  ;;  %v6519_v46 = vld [vmem:[#allocation9 + $0x1178] sm:$0xff] }
 0x67f   :  { %6698 = vmatpush.msra.mxu2 %v5991_v43  ;;  %v6530_v43 = vld [vmem:[#allocation9 + $0x11d0] sm:$0xff] }
 0x680   :  { %6716 = vmatpush.msra.mxu3 %v6117_v56  ;;  %6665 = vmatpush.msra.mxu1 %v6530_v43  ;;  %v6345_v56 = vld [vmem:[#allocation9 + $0xc08] sm:$0xff]  ;;  %v6202_v43 = vld [vmem:[#allocation9 + $0x790] sm:$0xff] }
 0x681   :  { %6699 = vmatpush.msra.mxu2 %v5985_v8  ;;  %v6411_v8 = vld [vmem:[#allocation9 + $0xe18] sm:$0xff] }
 0x682   :  { %6717 = vmatpush.msra.mxu3 %v6111_v2  ;;  %6666 = vmatpush.msra.mxu1 %v6524_v14  ;;  %v6244_v2 = vld [vmem:[#allocation9 + $0x8e0] sm:$0xff]  ;;  %v6333_v14 = vld [vmem:[#allocation9 + $0xba8] sm:$0xff] }
 0x683   :  { %v5935_v24 = vpop.f32.mrf.mxu3  ;;  %6700 = vmatpush.msra.mxu2 %v5979_v5  ;;  %v6153_v5 = vld [vmem:[#allocation9 + $0x608] sm:$0xff] }
 0x684   :  { %5942 = vrot.lane.b32.xlu1 %v5935_v24, %s7852_s2  ;;  %v6207_v24 = vld [vmem:[#allocation9 + $0x7b8] sm:$0xff]  ;;  %6718 = vmatpush.msra.mxu3 %v6105_v60 }
 0x685   :  { %v9220_v62 = vld [vmem:[#allocation2] sm:$0xff]  ;;  %6701 = vmatpush.msra.mxu2 %v5973_v22  ;;  %6667 = vmatpush.msra.mxu1 %v6518_v15  ;;  %v6471_v15 = vld [vmem:[#allocation9 + $0xff8] sm:$0xff] }
 0x686   :  { %6566 = vmatmul.f32.vlgmr.msrb.gmra.mxu0 %v9220_v62  ;;  %6719 = vmatpush.msra.mxu3 %v6099_v58  ;;  %v6393_v22 = vld [vmem:[#allocation9 + $0xd88] sm:$0xff]  ;;  %v6238_v58 = vld [vmem:[#allocation9 + $0x8b0] sm:$0xff] }
 0x687   :  { %6702 = vmatpush.msra.mxu2 %v5967_v35  ;;  %6734 = vmatpush.msrb.mxu0 %v6243_v57  ;;  %v6506_v35 = vld [vmem:[#allocation9 + $0x1110] sm:$0xff]  ;;  %v6357_v57 = vld [vmem:[#allocation9 + $0xc68] sm:$0xff] }
 0x688   :  { %6720 = vmatpush.msra.mxu3 %v6093_v42  ;;  %6668 = vmatpush.msra.mxu1 %v6512_v10  ;;  %v6458_v42 = vld [vmem:[#allocation9 + $0xf90] sm:$0xff] }
 0x689   :  { %6703 = vmatpush.msra.mxu2 %v5961_v45  ;;  %6735 = vmatpush.msrb.mxu0 %v6237_v31  ;;  %v6381_v45 = vld [vmem:[#allocation9 + $0xd28] sm:$0xff]  ;;  %v6022_v10 = vld [vmem:[#allocation9 + $0x1f0] sm:$0xff] }
 0x68a   :  { %6721 = vmatpush.msra.mxu3 %v6087_v12  ;;  %6669 = vmatpush.msra.mxu1 %v6506_v35  ;;  %v6501_v12 = vld [vmem:[#allocation9 + $0x10e8] sm:$0xff] }
 0x68b   :  { %6736 = vmatpush.msrb.mxu0 %v6231_v23  ;;  %v6351_v23 = vld [vmem:[#allocation9 + $0xc38] sm:$0xff]  ;;  %v6465_v35 = vld [vmem:[#allocation9 + $0xfc8] sm:$0xff] }
 0x68c   :  { %v4885_v44 = vpop.permute.xlu2 %4884  ;;  %6722 = vmatpush.msra.mxu3 %v6081_v6  ;;  %6670 = vmatpush.msra.mxu1 %v6500_v63  ;;  %v6226_v6 = vld [vmem:[#allocation9 + $0x850] sm:$0xff] }
 0x68d   :  { %4890 = vst.msk [vmem:[#allocation2 + $0x8] sm:$0xff] %vm4625_vm2, %v4885_v44  ;;  %6737 = vmatpush.msrb.mxu0 %v6225_v50  ;;  %v6470_v50 = vld [vmem:[#allocation9 + $0xff0] sm:$0xff] }
 0x68e   :  { %6723 = vmatpush.msra.mxu3 %v6075_v38  ;;  %6671 = vmatpush.msra.mxu1 %v6494_v18  ;;  %v6220_v38 = vld [vmem:[#allocation9 + $0x820] sm:$0xff]  ;;  %v6178_v63 = vld [vmem:[#allocation9 + $0x6d0] sm:$0xff] }
 0x68f   :  { %6738 = vmatpush.msrb.mxu0 %v6219_v40  ;;  %v6513_v40 = vld [vmem:[#allocation9 + $0x1148] sm:$0xff]  ;;  %v6010_v18 = vld [vmem:[#allocation9 + $0x190] sm:$0xff] }
 0x690   :  { %6724 = vmatpush.msra.mxu3 %v6069_v47  ;;  %6672 = vmatpush.msra.mxu1 %v6488_v49  ;;  %v6489_v47 = vld [vmem:[#allocation9 + $0x1088] sm:$0xff] }
 0x691   :  { %6739 = vmatpush.msrb.mxu0 %v6213_v28  ;;  %v6464_v28 = vld [vmem:[#allocation9 + $0xfc0] sm:$0xff]  ;;  %v6453_v49 = vld [vmem:[#allocation9 + $0xf68] sm:$0xff] }
 0x692   :  { %6725 = vmatpush.msra.mxu3 %v6063_v32  ;;  %6673 = vmatpush.msra.mxu1 %v6482_v51  ;;  %v6208_v32 = vld [vmem:[#allocation9 + $0x7c0] sm:$0xff]  ;;  %v6447_v51 = vld [vmem:[#allocation9 + $0xf38] sm:$0xff] }
 0x693   :  { %6740 = vmatpush.msrb.mxu0 %v6207_v24 }
 0x694   :  { %v9224_v20 = vld [vmem:[#allocation2 + $0x8] sm:$0xff]  ;;  %6726 = vmatpush.msra.mxu3 %v6057_v59  ;;  %6674 = vmatpush.msra.mxu1 %v6476_v11  ;;  %v6441_v11 = vld [vmem:[#allocation9 + $0xf08] sm:$0xff] }
 0x695   :  { %6589 = vmatmul.f32.vlgmr.msrb.gmra.mxu1 %v9224_v20  ;;  %6741 = vmatpush.msrb.mxu0 %v6201_v7  ;;  %v6339_v59 = vld [vmem:[#allocation9 + $0xbd8] sm:$0xff] }
 0x696   :  { %6675 = vmatpush.msra.mxu1 %v6470_v50  ;;  %v6154_v50 = vld [vmem:[#allocation9 + $0x610] sm:$0xff] }
 0x697   :  { %6742 = vmatpush.msrb.mxu0 %v6195_v16  ;;  %v6232_v16 = vld [vmem:[#allocation9 + $0x880] sm:$0xff] }
 0x698   :  { %6676 = vmatpush.msra.mxu1 %v6464_v28  ;;  %v6334_v28 = vld [vmem:[#allocation9 + $0xbb0] sm:$0xff] }
 0x699   :  { %6743 = vmatpush.msrb.mxu0 %v6189_v52  ;;  %v6452_v52 = vld [vmem:[#allocation9 + $0xf60] sm:$0xff] }
 0x69a   :  { %6677 = vmatpush.msra.mxu1 %v6458_v42  ;;  %v6297_v42 = vld [vmem:[#allocation9 + $0xa88] sm:$0xff] }
 0x69b   :  { %6744 = vmatpush.msrb.mxu0 %v6183_v33  ;;  %v6495_v33 = vld [vmem:[#allocation9 + $0x10b8] sm:$0xff] }
 0x69c   :  { %6678 = vmatpush.msra.mxu1 %v6452_v52  ;;  %v6322_v52 = vld [vmem:[#allocation9 + $0xb50] sm:$0xff] }
 0x69d   :  { %6745 = vmatpush.msrb.mxu0 %v6177_v19 }
 0x69f   :  { %6746 = vmatpush.msrb.mxu0 %v6171_v39  ;;  %v6046_v39 = vld [vmem:[#allocation9 + $0x2b0] sm:$0xff] }
 0x6a1   :  { %6747 = vmatpush.msrb.mxu0 %v6165_v53  ;;  %v6483_v53 = vld [vmem:[#allocation9 + $0x1058] sm:$0xff] }
 0x6a3   :  { %6748 = vmatpush.msrb.mxu0 %v6159_v34  ;;  %v6477_v34 = vld [vmem:[#allocation9 + $0x1028] sm:$0xff] }
 0x6a4   :  { %v5908_v1 = vpop.f32.mrf.mxu2 }
 0x6a5   :  { %5940 = vrot.lane.b32.xlu0 %v5908_v1, %s7852_s2  ;;  %6749 = vmatpush.msrb.mxu0 %v6153_v5 }
 0x6b4   :  { %v5149_v3 = vpop.permute.xlu0 %5148 }
 0x6b5   :  { %5154 = vst.msk [vmem:[#allocation2 + $0x10] sm:$0xff] %vm4625_vm2, %v5149_v3  ;;  %v6507_v3 = vld [vmem:[#allocation9 + $0x1118] sm:$0xff] }
 0x6bc   :  { %v5151_v27 = vpop.permute.xlu1 %5150  ;;  %v5415_v54 = vpop.permute.xlu2 %5414  ;;  %v9229_v44 = vld [vmem:[#allocation2 + $0x10] sm:$0xff] }
 0x6bd   :  { %5155 = vst.msk [vmem:[#allocation2 + $0x40] sm:$0xff] %vm4625_vm2, %v5151_v27  ;;  %6612 = vmatmul.f32.vlgmr.msrb.gmra.mxu2 %v9229_v44 }
 0x6be   :  { %5419 = vst.msk [vmem:[#allocation2 + $0x48] sm:$0xff] %vm4625_vm2, %v5415_v54  ;;  %6780 = vmatpush.msrb.mxu2 %v6435_v0  ;;  %v6446_v0 = vld [vmem:[#allocation9 + $0xf30] sm:$0xff]  ;;  %v6052_v54 = vld [vmem:[#allocation9 + $0x2e0] sm:$0xff] }
 0x6bf   :  { %6679 = vmatpush.msra.mxu1 %v6446_v0  ;;  %v6035_v0 = vld [vmem:[#allocation9 + $0x258] sm:$0xff] }
 0x6c0   :  { %6781 = vmatpush.msrb.mxu2 %v6429_v41  ;;  %v6214_v41 = vld [vmem:[#allocation9 + $0x7f0] sm:$0xff] }
 0x6c2   :  { %6782 = vmatpush.msrb.mxu2 %v6423_v25  ;;  %v6440_v25 = vld [vmem:[#allocation9 + $0xf00] sm:$0xff] }
 0x6c3   :  { %6680 = vmatpush.msra.mxu1 %v6440_v25  ;;  %v6430_v25 = vld [vmem:[#allocation9 + $0xeb0] sm:$0xff] }
 0x6c4   :  { %6783 = vmatpush.msrb.mxu2 %v6417_v9  ;;  %v9234_v21 = vld [vmem:[#allocation2 + $0x40] sm:$0xff]  ;;  %v6040_v9 = vld [vmem:[#allocation9 + $0x280] sm:$0xff] }
 0x6c5   :  { %6615 = vmatmul.f32.gmra.mxu2 %v9234_v21  ;;  %v9249_v7 = vld [vmem:[#allocation2 + $0x48] sm:$0xff]  ;;  %6757 = vmatpush.msrb.mxu1 %v6339_v59  ;;  %v6424_v59 = vld [vmem:[#allocation9 + $0xe80] sm:$0xff] }
 0x6c6   :  { %6784 = vmatpush.msrb.mxu2 %v6411_v8  ;;  %v6034_v8 = vld [vmem:[#allocation9 + $0x250] sm:$0xff] }
 0x6c7   :  { %6758 = vmatpush.msrb.mxu1 %v6333_v14  ;;  %v6292_v14 = vld [vmem:[#allocation9 + $0xa60] sm:$0xff] }
 0x6c8   :  { %6785 = vmatpush.msrb.mxu2 %v6405_v61  ;;  %v6028_v61 = vld [vmem:[#allocation9 + $0x220] sm:$0xff] }
 0x6ca   :  { %6786 = vmatpush.msrb.mxu2 %v6399_v17  ;;  %v6190_v17 = vld [vmem:[#allocation9 + $0x730] sm:$0xff] }
 0x6cc   :  { %6787 = vmatpush.msrb.mxu2 %v6393_v22  ;;  %v5413_v37 = vpop.permute.xlu0 %5412  ;;  %v6327_v22 = vld [vmem:[#allocation9 + $0xb78] sm:$0xff] }
 0x6cd   :  { %5418 = vst.msk [vmem:[#allocation2 + $0x18] sm:$0xff] %vm4625_vm2, %v5413_v37  ;;  %6704 = vmatmul.f32.vlgmr.msra.gmra.mxu2 %v9220_v62  ;;  %v6321_v37 = vld [vmem:[#allocation9 + $0xb48] sm:$0xff]  ;;  %6759 = vmatpush.msrb.mxu1 %v6327_v22  ;;  %v5999_v22 = vld [vmem:[#allocation9 + $0x138] sm:$0xff] }
 0x6ce   :  { %6788 = vmatpush.msrb.mxu2 %v6387_v26  ;;  %v5677_v30 = vpop.permute.xlu2 %5676  ;;  %v6184_v26 = vld [vmem:[#allocation9 + $0x700] sm:$0xff] }
 0x6cf   :  { %5682 = vst.msk [vmem:[#allocation2 + $0x20] sm:$0xff] %vm4625_vm2, %v5677_v30  ;;  %v6459_v30 = vld [vmem:[#allocation9 + $0xf98] sm:$0xff]  ;;  %6760 = vmatpush.msrb.mxu1 %v6321_v37 }
 0x6d0   :  { %6789 = vmatpush.msrb.mxu2 %v6381_v45  ;;  %v6016_v45 = vld [vmem:[#allocation9 + $0x1c0] sm:$0xff]  ;;  %v6267_v37 = vld [vmem:[#allocation9 + $0x998] sm:$0xff] }
 0x6d2   :  { %6790 = vmatpush.msrb.mxu2 %v6375_v4  ;;  %v6315_v4 = vld [vmem:[#allocation9 + $0xb18] sm:$0xff] }
 0x6d3   :  { %6761 = vmatpush.msrb.mxu1 %v6315_v4  ;;  %v6261_v4 = vld [vmem:[#allocation9 + $0x968] sm:$0xff] }
 0x6d4   :  { %6791 = vmatpush.msrb.mxu2 %v6369_v36  ;;  %v4622_v1 = vpop.permute.xlu0 %4621  ;;  %v9240_v55 = vld [vmem:[#allocation2 + $0x18] sm:$0xff] }
 0x6d5   :  { %4627 = vst.msk [vmem:[#allocation2 + $0x30] sm:$0xff] %vm4625_vm2, %v4622_v1  ;;  %6635 = vmatmul.f32.vlgmr.msrb.gmra.mxu3 %v9240_v55  ;;  %v6172_v36 = vld [vmem:[#allocation9 + $0x6a0] sm:$0xff] }
 0x6d6   :  { %6792 = vmatpush.msrb.mxu2 %v6363_v48  ;;  %v5679_v31 = vpop.permute.xlu2 %5678  ;;  %6803 = vmatpush.msrb.mxu3 %v6531_v13  ;;  %v9256_v19 = vld [vmem:[#allocation2 + $0x20] sm:$0xff]  ;;  %v6004_v48 = vld [vmem:[#allocation9 + $0x160] sm:$0xff] }
 0x6d7   :  { %5683 = vst.msk [vmem:[#allocation2 + $0x50] sm:$0xff] %vm4625_vm2, %v5679_v31  ;;  %v6166_v13 = vld [vmem:[#allocation9 + $0x670] sm:$0xff]  ;;  %v6160_v31 = vld [vmem:[#allocation9 + $0x640] sm:$0xff] }
 0x6d8   :  { %6793 = vmatpush.msrb.mxu2 %v6357_v57  ;;  %6804 = vmatpush.msrb.mxu3 %v6525_v29  ;;  %v6309_v57 = vld [vmem:[#allocation9 + $0xae8] sm:$0xff]  ;;  %v5998_v29 = vld [vmem:[#allocation9 + $0x130] sm:$0xff] }
 0x6d9   :  { %6762 = vmatpush.msrb.mxu1 %v6309_v57  ;;  %v6249_v57 = vld [vmem:[#allocation9 + $0x908] sm:$0xff] }
 0x6da   :  { %6794 = vmatpush.msrb.mxu2 %v6351_v23  ;;  %6805 = vmatpush.msrb.mxu3 %v6519_v46  ;;  %v6303_v23 = vld [vmem:[#allocation9 + $0xab8] sm:$0xff]  ;;  %v5992_v46 = vld [vmem:[#allocation9 + $0x100] sm:$0xff] }
 0x6db   :  { %6763 = vmatpush.msrb.mxu1 %v6303_v23  ;;  %v5969_v23 = vld [vmem:[#allocation9 + $0x48] sm:$0xff] }
 0x6dc   :  { %6795 = vmatpush.msrb.mxu2 %v6345_v56  ;;  %v4887_v60 = vpop.permute.xlu0 %4886  ;;  %v9245_v24 = vld [vmem:[#allocation2 + $0x30] sm:$0xff]  ;;  %6806 = vmatpush.msrb.mxu3 %v6513_v40  ;;  %v5986_v40 = vld [vmem:[#allocation9 + $0xd0] sm:$0xff] }
 0x6dd   :  { %4891 = vst.msk [vmem:[#allocation2 + $0x38] sm:$0xff] %vm4625_vm2, %v4887_v60  ;;  %6569 = vmatmul.f32.gmra.mxu0 %v9245_v24  ;;  %6638 = vmatmul.f32.gmra.mxu3 %v9249_v7  ;;  %v6340_v56 = vld [vmem:[#allocation9 + $0xbe0] sm:$0xff] }
 0x6de   :  { %6872 = vmatpush.msra.mxu2 %v6244_v2  ;;  %6807 = vmatpush.msrb.mxu3 %v6507_v3  ;;  %v9261_v5 = vld [vmem:[#allocation2 + $0x50] sm:$0xff]  ;;  %v6053_v2 = vld [vmem:[#allocation9 + $0x2e8] sm:$0xff] }
 0x6df   :  { %6707 = vmatmul.f32.gmra.mxu2 %v9245_v24  ;;  %v5980_v60 = vld [vmem:[#allocation9 + $0xa0] sm:$0xff]  ;;  %6764 = vmatpush.msrb.mxu1 %v6297_v42 }
 0x6e0   :  { %6873 = vmatpush.msra.mxu2 %v6238_v58  ;;  %6808 = vmatpush.msrb.mxu3 %v6501_v12  ;;  %v6047_v58 = vld [vmem:[#allocation9 + $0x2b8] sm:$0xff]  ;;  %v6328_v3 = vld [vmem:[#allocation9 + $0xb80] sm:$0xff]  ;;  %v6041_v12 = vld [vmem:[#allocation9 + $0x288] sm:$0xff] }
 0x6e2   :  { %6874 = vmatpush.msra.mxu2 %v6232_v16  ;;  %6809 = vmatpush.msrb.mxu3 %v6495_v33  ;;  %v5974_v16 = vld [vmem:[#allocation9 + $0x70] sm:$0xff]  ;;  %v5968_v33 = vld [vmem:[#allocation9 + $0x40] sm:$0xff] }
 0x6e4   :  { %6875 = vmatpush.msra.mxu2 %v6226_v6  ;;  %v9253_v27 = vld [vmem:[#allocation2 + $0x38] sm:$0xff]  ;;  %6810 = vmatpush.msrb.mxu3 %v6489_v47  ;;  %v6291_v6 = vld [vmem:[#allocation9 + $0xa58] sm:$0xff]  ;;  %v6310_v47 = vld [vmem:[#allocation9 + $0xaf0] sm:$0xff] }
 0x6e5   :  { %6592 = vmatmul.f32.gmra.mxu1 %v9253_v27  ;;  %6658 = vmatmul.f32.vlgmr.msra.gmra.mxu0 %v9256_v19 }
 0x6e6   :  { %6876 = vmatpush.msra.mxu2 %v6220_v38  ;;  %6727 = vmatmul.f32.vlgmr.msra.gmra.mxu3 %v9224_v20  ;;  %v6196_v20 = vld [vmem:[#allocation9 + $0x760] sm:$0xff]  ;;  %v5962_v38 = vld [vmem:[#allocation9 + $0x10] sm:$0xff] }
 0x6e7   :  { %6796 = vmatmul.f32.vlgmr.msrb.gmra.mxu2 %v9256_v19  ;;  %6826 = vmatpush.msra.mxu0 %v6052_v54  ;;  %v6029_v54 = vld [vmem:[#allocation9 + $0x228] sm:$0xff] }
 0x6e8   :  { %6877 = vmatpush.msra.mxu2 %v6214_v41  ;;  %6811 = vmatpush.msrb.mxu3 %v6483_v53  ;;  %v6436_v41 = vld [vmem:[#allocation9 + $0xee0] sm:$0xff]  ;;  %v6017_v53 = vld [vmem:[#allocation9 + $0x1c8] sm:$0xff] }
 0x6e9   :  { %6827 = vmatpush.msra.mxu0 %v6046_v39  ;;  %6765 = vmatpush.msrb.mxu1 %v6291_v6  ;;  %v6023_v39 = vld [vmem:[#allocation9 + $0x1f8] sm:$0xff] }
 0x6ea   :  { %6878 = vmatpush.msra.mxu2 %v6208_v32  ;;  %6812 = vmatpush.msrb.mxu3 %v6477_v34  ;;  %v6304_v32 = vld [vmem:[#allocation9 + $0xac0] sm:$0xff]  ;;  %v6011_v34 = vld [vmem:[#allocation9 + $0x198] sm:$0xff] }
 0x6eb   :  { %6828 = vmatpush.msra.mxu0 %v6040_v9  ;;  %v6285_v9 = vld [vmem:[#allocation9 + $0xa28] sm:$0xff]  ;;  %v6419_v6 = vld [vmem:[#allocation9 + $0xe58] sm:$0xff] }
 0x6ec   :  { %6879 = vmatpush.msra.mxu2 %v6202_v43  ;;  %6813 = vmatpush.msrb.mxu3 %v6471_v15  ;;  %v6298_v43 = vld [vmem:[#allocation9 + $0xa90] sm:$0xff] }
 0x6ed   :  { %6829 = vmatpush.msra.mxu0 %v6034_v8  ;;  %v6279_v8 = vld [vmem:[#allocation9 + $0x9f8] sm:$0xff]  ;;  %6766 = vmatpush.msrb.mxu1 %v6285_v9  ;;  %v6286_v15 = vld [vmem:[#allocation9 + $0xa30] sm:$0xff]  ;;  %v6233_v9 = vld [vmem:[#allocation9 + $0x888] sm:$0xff] }
 0x6ee   :  { %6880 = vmatpush.msra.mxu2 %v6196_v20  ;;  %6661 = vmatmul.f32.gmra.mxu0 %v9261_v5  ;;  %v6005_v20 = vld [vmem:[#allocation9 + $0x168] sm:$0xff] }
 0x6ef   :  { %6730 = vmatmul.f32.gmra.mxu3 %v9253_v27  ;;  %6799 = vmatmul.f32.gmra.mxu2 %v9261_v5 }
 0x6f0   :  { %6830 = vmatpush.msra.mxu0 %v6028_v61  ;;  %6881 = vmatpush.msra.mxu2 %v6190_v17  ;;  %v6273_v61 = vld [vmem:[#allocation9 + $0x9c8] sm:$0xff]  ;;  %v6412_v17 = vld [vmem:[#allocation9 + $0xe20] sm:$0xff] }
 0x6f1   :  { %6814 = vmatpush.msrb.mxu3 %v6465_v35  ;;  %6767 = vmatpush.msrb.mxu1 %v6279_v8  ;;  %v5993_v35 = vld [vmem:[#allocation9 + $0x108] sm:$0xff]  ;;  %v6227_v8 = vld [vmem:[#allocation9 + $0x858] sm:$0xff] }
 0x6f2   :  { %6831 = vmatpush.msra.mxu0 %v6022_v10  ;;  %6882 = vmatpush.msra.mxu2 %v6184_v26  ;;  %v6406_v10 = vld [vmem:[#allocation9 + $0xdf0] sm:$0xff]  ;;  %v6280_v26 = vld [vmem:[#allocation9 + $0xa00] sm:$0xff] }
 0x6f3   :  { %6815 = vmatpush.msrb.mxu3 %v6459_v30  ;;  %6768 = vmatpush.msrb.mxu1 %v6273_v61  ;;  %v5987_v30 = vld [vmem:[#allocation9 + $0xd8] sm:$0xff]  ;;  %v6221_v61 = vld [vmem:[#allocation9 + $0x828] sm:$0xff] }
 0x6f4   :  { %6832 = vmatpush.msra.mxu0 %v6016_v45  ;;  %6883 = vmatpush.msra.mxu2 %v6178_v63  ;;  %v6400_v45 = vld [vmem:[#allocation9 + $0xdc0] sm:$0xff]  ;;  %v6274_v63 = vld [vmem:[#allocation9 + $0x9d0] sm:$0xff] }
 0x6f5   :  { %6816 = vmatpush.msrb.mxu3 %v6453_v49  ;;  %6769 = vmatpush.msrb.mxu1 %v6267_v37  ;;  %v5981_v49 = vld [vmem:[#allocation9 + $0xa8] sm:$0xff] }
 0x6f6   :  { %6833 = vmatpush.msra.mxu0 %v6010_v18  ;;  %6884 = vmatpush.msra.mxu2 %v6172_v36  ;;  %v5943_v1 = vpop.permute.xlu1 %5942  ;;  %v6394_v18 = vld [vmem:[#allocation9 + $0xd90] sm:$0xff]  ;;  %v6268_v36 = vld [vmem:[#allocation9 + $0x9a0] sm:$0xff]  ;;  %v6377_v37 = vld [vmem:[#allocation9 + $0xd08] sm:$0xff] }
 0x6f7   :  { %6750 = vmatmul.f32.vlgmr.msrb.gmra.mxu0 %v9229_v44  ;;  %5947 = vst.msk [vmem:[#allocation2 + $0x58] sm:$0xff] %vm4625_vm2, %v5943_v1  ;;  %6817 = vmatpush.msrb.mxu3 %v6447_v51  ;;  %v6262_v1 = vld [vmem:[#allocation9 + $0x970] sm:$0xff]  ;;  %v5975_v51 = vld [vmem:[#allocation9 + $0x78] sm:$0xff] }
 0x6f8   :  { %6834 = vmatpush.msra.mxu0 %v6004_v48  ;;  %6885 = vmatpush.msra.mxu2 %v6166_v13  ;;  %v6255_v48 = vld [vmem:[#allocation9 + $0x938] sm:$0xff]  ;;  %v6388_v13 = vld [vmem:[#allocation9 + $0xd60] sm:$0xff] }
 0x6f9   :  { %6818 = vmatpush.msrb.mxu3 %v6441_v11  ;;  %6770 = vmatpush.msrb.mxu1 %v6261_v4  ;;  %v6371_v4 = vld [vmem:[#allocation9 + $0xcd8] sm:$0xff] }
 0x6fa   :  { %6835 = vmatpush.msra.mxu0 %v5998_v29  ;;  %6886 = vmatpush.msra.mxu2 %v6160_v31  ;;  %v6382_v29 = vld [vmem:[#allocation9 + $0xd30] sm:$0xff]  ;;  %v6256_v31 = vld [vmem:[#allocation9 + $0x940] sm:$0xff] }
 0x6fb   :  { %6895 = vmatpush.msra.mxu3 %v6340_v56  ;;  %6771 = vmatpush.msrb.mxu1 %v6255_v48  ;;  %v5963_v56 = vld [vmem:[#allocation9 + $0x18] sm:$0xff]  ;;  %v6365_v48 = vld [vmem:[#allocation9 + $0xca8] sm:$0xff] }
 0x6fc   :  { %6836 = vmatpush.msra.mxu0 %v5992_v46  ;;  %6887 = vmatpush.msra.mxu2 %v6154_v50  ;;  %v6376_v46 = vld [vmem:[#allocation9 + $0xd00] sm:$0xff]  ;;  %v6250_v50 = vld [vmem:[#allocation9 + $0x910] sm:$0xff] }
 0x6fd   :  { %6888 = vmatmul.f32.vlgmr.msra.gmra.mxu2 %v9229_v44  ;;  %6896 = vmatpush.msra.mxu3 %v6334_v28  ;;  %v6316_v44 = vld [vmem:[#allocation9 + $0xb20] sm:$0xff] }
 0x6fe   :  { %6837 = vmatpush.msra.mxu0 %v5986_v40  ;;  %6964 = vmatpush.msrb.mxu2 %v6053_v2  ;;  %v6370_v40 = vld [vmem:[#allocation9 + $0xcd0] sm:$0xff]  ;;  %v6437_v2 = vld [vmem:[#allocation9 + $0xee8] sm:$0xff]  ;;  %v6364_v28 = vld [vmem:[#allocation9 + $0xca0] sm:$0xff] }
 0x6ff   :  { %6753 = vmatmul.f32.gmra.mxu0 %v9234_v21  ;;  %6897 = vmatpush.msra.mxu3 %v6328_v3  ;;  %v6425_v3 = vld [vmem:[#allocation9 + $0xe88] sm:$0xff] }
 0x700   :  { %6838 = vmatpush.msra.mxu0 %v5980_v60  ;;  %6965 = vmatpush.msrb.mxu2 %v6047_v58  ;;  %v6431_v60 = vld [vmem:[#allocation9 + $0xeb8] sm:$0xff]  ;;  %v6358_v58 = vld [vmem:[#allocation9 + $0xc70] sm:$0xff] }
 0x701   :  { %6898 = vmatpush.msra.mxu3 %v6322_v52  ;;  %6772 = vmatpush.msrb.mxu1 %v6249_v57  ;;  %v6149_v52 = vld [vmem:[#allocation9 + $0x5e8] sm:$0xff]  ;;  %v6359_v57 = vld [vmem:[#allocation9 + $0xc78] sm:$0xff] }
 0x702   :  { %6839 = vmatpush.msra.mxu0 %v5974_v16  ;;  %6966 = vmatpush.msrb.mxu2 %v6041_v12  ;;  %v6148_v16 = vld [vmem:[#allocation9 + $0x5e0] sm:$0xff] }
 0x703   :  { %6899 = vmatpush.msra.mxu3 %v6316_v44  ;;  %v6352_v12 = vld [vmem:[#allocation9 + $0xc40] sm:$0xff]  ;;  %v6413_v44 = vld [vmem:[#allocation9 + $0xe28] sm:$0xff] }
 0x704   :  { %6840 = vmatpush.msra.mxu0 %v5968_v33  ;;  %6967 = vmatpush.msrb.mxu2 %v6035_v0  ;;  %v6142_v33 = vld [vmem:[#allocation9 + $0x5b0] sm:$0xff]  ;;  %v6143_v0 = vld [vmem:[#allocation9 + $0x5b8] sm:$0xff] }
 0x705   :  { %6891 = vmatmul.f32.gmra.mxu2 %v9234_v21  ;;  %6900 = vmatpush.msra.mxu3 %v6310_v47  ;;  %v6418_v21 = vld [vmem:[#allocation9 + $0xe50] sm:$0xff]  ;;  %v6407_v47 = vld [vmem:[#allocation9 + $0xdf8] sm:$0xff] }
 0x706   :  { %6841 = vmatpush.msra.mxu0 %v5962_v38  ;;  %6968 = vmatpush.msrb.mxu2 %v6029_v54  ;;  %v6136_v38 = vld [vmem:[#allocation9 + $0x580] sm:$0xff]  ;;  %v6245_v54 = vld [vmem:[#allocation9 + $0x8e8] sm:$0xff] }
 0x707   :  { %6842 = vmatmul.f32.vlgmr.msra.gmra.mxu0 %v9220_v62  ;;  %6901 = vmatpush.msra.mxu3 %v6304_v32  ;;  %v6131_v32 = vld [vmem:[#allocation9 + $0x558] sm:$0xff] }
 0x708   :  { %6918 = vmatpush.msrb.mxu0 %v6436_v41  ;;  %6969 = vmatpush.msrb.mxu2 %v6023_v39  ;;  %v6137_v41 = vld [vmem:[#allocation9 + $0x588] sm:$0xff]  ;;  %v6130_v39 = vld [vmem:[#allocation9 + $0x550] sm:$0xff] }
 0x709   :  { %6902 = vmatpush.msra.mxu3 %v6298_v43  ;;  %v6125_v43 = vld [vmem:[#allocation9 + $0x528] sm:$0xff] }
 0x70a   :  { %6919 = vmatpush.msrb.mxu0 %v6430_v25  ;;  %6970 = vmatpush.msrb.mxu2 %v6017_v53  ;;  %v6239_v25 = vld [vmem:[#allocation9 + $0x8b8] sm:$0xff]  ;;  %v6401_v53 = vld [vmem:[#allocation9 + $0xdc8] sm:$0xff] }
 0x70b   :  { %6903 = vmatpush.msra.mxu3 %v6292_v14  ;;  %v6119_v14 = vld [vmem:[#allocation9 + $0x4f8] sm:$0xff] }
 0x70c   :  { %6920 = vmatpush.msrb.mxu0 %v6424_v59  ;;  %6971 = vmatpush.msrb.mxu2 %v6011_v34  ;;  %v6124_v59 = vld [vmem:[#allocation9 + $0x520] sm:$0xff]  ;;  %v6395_v34 = vld [vmem:[#allocation9 + $0xd98] sm:$0xff] }
 0x70d   :  { %6904 = vmatpush.msra.mxu3 %v6286_v15  ;;  %v6113_v15 = vld [vmem:[#allocation9 + $0x4c8] sm:$0xff] }
 0x70e   :  { %6921 = vmatpush.msrb.mxu0 %v6418_v21  ;;  %6972 = vmatpush.msrb.mxu2 %v6005_v20  ;;  %v6118_v21 = vld [vmem:[#allocation9 + $0x4f0] sm:$0xff]  ;;  %v6389_v20 = vld [vmem:[#allocation9 + $0xd68] sm:$0xff] }
 0x70f   :  { %6845 = vmatmul.f32.gmra.mxu0 %v9245_v24  ;;  %6905 = vmatpush.msra.mxu3 %v6280_v26  ;;  %v6106_v26 = vld [vmem:[#allocation9 + $0x490] sm:$0xff] }
 0x710   :  { %6922 = vmatpush.msrb.mxu0 %v6412_v17  ;;  %6973 = vmatpush.msrb.mxu2 %v5999_v22  ;;  %v6112_v17 = vld [vmem:[#allocation9 + $0x4c0] sm:$0xff]  ;;  %v6383_v22 = vld [vmem:[#allocation9 + $0xd38] sm:$0xff] }
 0x711   :  { %6906 = vmatpush.msra.mxu3 %v6274_v63  ;;  %v6100_v63 = vld [vmem:[#allocation9 + $0x460] sm:$0xff] }
 0x712   :  { %6923 = vmatpush.msrb.mxu0 %v6406_v10  ;;  %6974 = vmatpush.msrb.mxu2 %v5993_v35  ;;  %v6215_v10 = vld [vmem:[#allocation9 + $0x7f8] sm:$0xff] }
 0x713   :  { %6907 = vmatpush.msra.mxu3 %v6268_v36  ;;  %v6107_v35 = vld [vmem:[#allocation9 + $0x498] sm:$0xff]  ;;  %v6094_v36 = vld [vmem:[#allocation9 + $0x430] sm:$0xff] }
 0x714   :  { %6924 = vmatpush.msrb.mxu0 %v6400_v45  ;;  %6975 = vmatpush.msrb.mxu2 %v5987_v30  ;;  %v6209_v45 = vld [vmem:[#allocation9 + $0x7c8] sm:$0xff] }
 0x715   :  { %6908 = vmatpush.msra.mxu3 %v6262_v1  ;;  %v6101_v30 = vld [vmem:[#allocation9 + $0x468] sm:$0xff]  ;;  %v6088_v1 = vld [vmem:[#allocation9 + $0x400] sm:$0xff] }
 0x716   :  { %6925 = vmatpush.msrb.mxu0 %v6394_v18  ;;  %6976 = vmatpush.msrb.mxu2 %v5981_v49  ;;  %v6203_v18 = vld [vmem:[#allocation9 + $0x798] sm:$0xff] }
 0x717   :  { %v5941_v11 = vpop.permute.xlu0 %5940  ;;  %6909 = vmatpush.msra.mxu3 %v6256_v31  ;;  %v6095_v49 = vld [vmem:[#allocation9 + $0x438] sm:$0xff]  ;;  %v6082_v31 = vld [vmem:[#allocation9 + $0x3d0] sm:$0xff] }
 0x718   :  { %6926 = vmatpush.msrb.mxu0 %v6388_v13  ;;  %6977 = vmatpush.msrb.mxu2 %v5975_v51  ;;  %5946 = vst.msk [vmem:[#allocation2 + $0x28] sm:$0xff] %vm4625_vm2, %v5941_v11  ;;  %v6197_v13 = vld [vmem:[#allocation9 + $0x768] sm:$0xff]  ;;  %v6083_v11 = vld [vmem:[#allocation9 + $0x3d8] sm:$0xff] }
 0x719   :  { %6910 = vmatpush.msra.mxu3 %v6250_v50  ;;  %v6089_v51 = vld [vmem:[#allocation9 + $0x408] sm:$0xff] }
 0x71a   :  { %6927 = vmatpush.msrb.mxu0 %v6382_v29  ;;  %6978 = vmatpush.msrb.mxu2 %v5969_v23  ;;  %v6191_v29 = vld [vmem:[#allocation9 + $0x738] sm:$0xff]  ;;  %v6353_v23 = vld [vmem:[#allocation9 + $0xc48] sm:$0xff] }
 0x71b   :  { %v6077_v50 = vld [vmem:[#allocation9 + $0x3a8] sm:$0xff] }
 0x71c   :  { %6928 = vmatpush.msrb.mxu0 %v6376_v46  ;;  %6979 = vmatpush.msrb.mxu2 %v5963_v56  ;;  %v6076_v46 = vld [vmem:[#allocation9 + $0x3a0] sm:$0xff]  ;;  %v6347_v56 = vld [vmem:[#allocation9 + $0xc18] sm:$0xff] }
 0x71d   :  { %6980 = vmatmul.f32.vlgmr.msrb.gmra.mxu2 %v9220_v62  ;;  %v6346_v62 = vld [vmem:[#allocation9 + $0xc10] sm:$0xff] }
 0x71e   :  { %6929 = vmatpush.msrb.mxu0 %v6370_v40  ;;  %7056 = vmatpush.msra.mxu2 %v6437_v2  ;;  %v6179_v40 = vld [vmem:[#allocation9 + $0x6d8] sm:$0xff]  ;;  %v6246_v2 = vld [vmem:[#allocation9 + $0x8f0] sm:$0xff] }
 0x71f   :  { %v9275_v42 = vld [vmem:[#allocation2 + $0x28] sm:$0xff] }
 0x720   :  { %6930 = vmatpush.msrb.mxu0 %v6364_v28  ;;  %7057 = vmatpush.msra.mxu2 %v6431_v60  ;;  %v6070_v28 = vld [vmem:[#allocation9 + $0x370] sm:$0xff]  ;;  %v6071_v60 = vld [vmem:[#allocation9 + $0x378] sm:$0xff] }
 0x721   :  { %6681 = vmatmul.f32.vlgmr.msra.gmra.mxu1 %v9275_v42  ;;  %6819 = vmatmul.f32.vlgmr.msrb.gmra.mxu3 %v9275_v42 }
 0x722   :  { %6931 = vmatpush.msrb.mxu0 %v6358_v58  ;;  %7058 = vmatpush.msra.mxu2 %v6425_v3  ;;  %v6173_v58 = vld [vmem:[#allocation9 + $0x6a8] sm:$0xff]  ;;  %v6240_v3 = vld [vmem:[#allocation9 + $0x8c0] sm:$0xff] }
 0x723   :  { %6849 = vmatpush.msra.mxu1 %v6148_v16  ;;  %6987 = vmatpush.msrb.mxu3 %v6149_v52  ;;  %v6064_v16 = vld [vmem:[#allocation9 + $0x340] sm:$0xff]  ;;  %v6167_v52 = vld [vmem:[#allocation9 + $0x678] sm:$0xff] }
 0x724   :  { %6932 = vmatpush.msrb.mxu0 %v6352_v12  ;;  %7059 = vmatpush.msra.mxu2 %v6419_v6  ;;  %v6065_v12 = vld [vmem:[#allocation9 + $0x348] sm:$0xff]  ;;  %v6234_v6 = vld [vmem:[#allocation9 + $0x890] sm:$0xff] }
 0x725   :  { %6850 = vmatpush.msra.mxu1 %v6142_v33  ;;  %6983 = vmatmul.f32.gmra.mxu2 %v9245_v24  ;;  %v9281_v24 = vld [vmem:[#allocation2 + $0x58] sm:$0xff]  ;;  %v6058_v33 = vld [vmem:[#allocation9 + $0x310] sm:$0xff] }
 0x726   :  { %6933 = vmatpush.msrb.mxu0 %v6346_v62  ;;  %6988 = vmatpush.msrb.mxu3 %v6143_v0  ;;  %v6532_v62 = vld [vmem:[#allocation9 + $0x11e0] sm:$0xff]  ;;  %v6161_v0 = vld [vmem:[#allocation9 + $0x648] sm:$0xff] }
 0x727   :  { %7060 = vmatpush.msra.mxu2 %v6413_v44  ;;  %6934 = vmatmul.f32.vlgmr.msrb.gmra.mxu0 %v9256_v19  ;;  %v6533_v44 = vld [vmem:[#allocation9 + $0x11e8] sm:$0xff] }
 0x728   :  { %6851 = vmatpush.msra.mxu1 %v6136_v38  ;;  %7010 = vmatpush.msra.mxu0 %v6245_v54  ;;  %v6526_v38 = vld [vmem:[#allocation9 + $0x11b0] sm:$0xff]  ;;  %v6155_v54 = vld [vmem:[#allocation9 + $0x618] sm:$0xff] }
 0x729   :  { %6989 = vmatpush.msrb.mxu3 %v6137_v41  ;;  %7061 = vmatpush.msra.mxu2 %v6407_v47  ;;  %v9291_v41 = vld [vmem:[#allocation2 + $0x8] sm:$0xff] }
 0x72a   :  { %6852 = vmatpush.msra.mxu1 %v6130_v39  ;;  %7011 = vmatpush.msra.mxu0 %v6239_v25  ;;  %v6527_v47 = vld [vmem:[#allocation9 + $0x11b8] sm:$0xff]  ;;  %v6222_v39 = vld [vmem:[#allocation9 + $0x830] sm:$0xff]  ;;  %v6520_v25 = vld [vmem:[#allocation9 + $0x1180] sm:$0xff] }
 0x72b   :  { %6990 = vmatpush.msrb.mxu3 %v6131_v32  ;;  %7062 = vmatpush.msra.mxu2 %v6401_v53  ;;  %v6054_v32 = vld [vmem:[#allocation9 + $0x2f0] sm:$0xff]  ;;  %v6521_v53 = vld [vmem:[#allocation9 + $0x1188] sm:$0xff] }
 0x72c   :  { %6684 = vmatmul.f32.gmra.mxu1 %v9281_v24  ;;  %7012 = vmatpush.msra.mxu0 %v6233_v9  ;;  %v6216_v9 = vld [vmem:[#allocation9 + $0x800] sm:$0xff] }
 0x72d   :  { %6822 = vmatmul.f32.gmra.mxu3 %v9281_v24  ;;  %6853 = vmatpush.msra.mxu1 %v6124_v59  ;;  %v6514_v59 = vld [vmem:[#allocation9 + $0x1150] sm:$0xff] }
 0x72e   :  { %6991 = vmatpush.msrb.mxu3 %v6125_v43  ;;  %7063 = vmatpush.msra.mxu2 %v6395_v34  ;;  %v9296_v43 = vld [vmem:[#allocation2 + $0x10] sm:$0xff] }
 0x72f   :  { %7013 = vmatpush.msra.mxu0 %v6227_v8  ;;  %6854 = vmatpush.msra.mxu1 %v6118_v21  ;;  %v6048_v34 = vld [vmem:[#allocation9 + $0x2c0] sm:$0xff]  ;;  %v6515_v8 = vld [vmem:[#allocation9 + $0x1158] sm:$0xff]  ;;  %v6210_v21 = vld [vmem:[#allocation9 + $0x7d0] sm:$0xff] }
 0x730   :  { %6992 = vmatpush.msrb.mxu3 %v6119_v14  ;;  %7064 = vmatpush.msra.mxu2 %v6389_v20  ;;  %v6508_v14 = vld [vmem:[#allocation9 + $0x1120] sm:$0xff]  ;;  %v6509_v20 = vld [vmem:[#allocation9 + $0x1128] sm:$0xff] }
 0x731   :  { %6937 = vmatmul.f32.gmra.mxu0 %v9261_v5  ;;  %6855 = vmatpush.msra.mxu1 %v6112_v17  ;;  %v6036_v17 = vld [vmem:[#allocation9 + $0x260] sm:$0xff] }
 0x732   :  { %7014 = vmatpush.msra.mxu0 %v6221_v61  ;;  %6993 = vmatpush.msrb.mxu3 %v6113_v15  ;;  %v6204_v61 = vld [vmem:[#allocation9 + $0x7a0] sm:$0xff]  ;;  %v6502_v15 = vld [vmem:[#allocation9 + $0x10f0] sm:$0xff] }
 0x733   :  { %7065 = vmatpush.msra.mxu2 %v6383_v22  ;;  %6856 = vmatpush.msra.mxu1 %v6106_v26  ;;  %v6503_v22 = vld [vmem:[#allocation9 + $0x10f8] sm:$0xff]  ;;  %v6030_v26 = vld [vmem:[#allocation9 + $0x230] sm:$0xff] }
 0x734   :  { %7015 = vmatpush.msra.mxu0 %v6215_v10  ;;  %6994 = vmatpush.msrb.mxu3 %v6107_v35  ;;  %v6198_v10 = vld [vmem:[#allocation9 + $0x770] sm:$0xff]  ;;  %v6496_v35 = vld [vmem:[#allocation9 + $0x10c0] sm:$0xff] }
 0x735   :  { %7066 = vmatpush.msra.mxu2 %v6377_v37  ;;  %6773 = vmatmul.f32.vlgmr.msrb.gmra.mxu1 %v9240_v55  ;;  %v6497_v37 = vld [vmem:[#allocation9 + $0x10c8] sm:$0xff] }
 0x736   :  { %7016 = vmatpush.msra.mxu0 %v6209_v45  ;;  %6857 = vmatpush.msra.mxu1 %v6100_v63  ;;  %v6192_v45 = vld [vmem:[#allocation9 + $0x740] sm:$0xff]  ;;  %v9301_v63 = vld [vmem:[#allocation2 + $0x40] sm:$0xff] }
 0x737   :  { %6911 = vmatmul.f32.vlgmr.msra.gmra.mxu3 %v9240_v55  ;;  %7067 = vmatpush.msra.mxu2 %v6371_v4  ;;  %v6185_v55 = vld [vmem:[#allocation9 + $0x708] sm:$0xff]  ;;  %v6490_v4 = vld [vmem:[#allocation9 + $0x1090] sm:$0xff] }
 0x738   :  { %6995 = vmatpush.msrb.mxu3 %v6101_v30  ;;  %7017 = vmatpush.msra.mxu0 %v6203_v18  ;;  %v6024_v30 = vld [vmem:[#allocation9 + $0x200] sm:$0xff]  ;;  %v6491_v18 = vld [vmem:[#allocation9 + $0x1098] sm:$0xff] }
 0x739   :  { %6858 = vmatpush.msra.mxu1 %v6094_v36  ;;  %7068 = vmatpush.msra.mxu2 %v6365_v48  ;;  %v6186_v36 = vld [vmem:[#allocation9 + $0x710] sm:$0xff]  ;;  %v6485_v48 = vld [vmem:[#allocation9 + $0x1068] sm:$0xff] }
 0x73a   :  { %6996 = vmatpush.msrb.mxu3 %v6095_v49  ;;  %7018 = vmatpush.msra.mxu0 %v6197_v13  ;;  %v6484_v49 = vld [vmem:[#allocation9 + $0x1060] sm:$0xff] }
 0x73b   :  { %6859 = vmatpush.msra.mxu1 %v6088_v1  ;;  %7069 = vmatpush.msra.mxu2 %v6359_v57  ;;  %v6180_v13 = vld [vmem:[#allocation9 + $0x6e0] sm:$0xff]  ;;  %v6479_v57 = vld [vmem:[#allocation9 + $0x1038] sm:$0xff] }
 0x73c   :  { %6997 = vmatpush.msrb.mxu3 %v6089_v51  ;;  %7019 = vmatpush.msra.mxu0 %v6191_v29  ;;  %v6012_v1 = vld [vmem:[#allocation9 + $0x1a0] sm:$0xff]  ;;  %v6478_v51 = vld [vmem:[#allocation9 + $0x1030] sm:$0xff] }
 0x73d   :  { %6860 = vmatpush.msra.mxu1 %v6082_v31  ;;  %7070 = vmatpush.msra.mxu2 %v6353_v23  ;;  %v6174_v29 = vld [vmem:[#allocation9 + $0x6b0] sm:$0xff]  ;;  %v6473_v23 = vld [vmem:[#allocation9 + $0x1008] sm:$0xff] }
 0x73e   :  { %6998 = vmatpush.msrb.mxu3 %v6083_v11  ;;  %7020 = vmatpush.msra.mxu0 %v6185_v55  ;;  %v6006_v31 = vld [vmem:[#allocation9 + $0x170] sm:$0xff]  ;;  %v6472_v11 = vld [vmem:[#allocation9 + $0x1000] sm:$0xff] }
 0x73f   :  { %6776 = vmatmul.f32.gmra.mxu1 %v9249_v7  ;;  %6914 = vmatmul.f32.gmra.mxu3 %v9249_v7  ;;  %v6059_v7 = vld [vmem:[#allocation9 + $0x318] sm:$0xff]  ;;  %v6168_v55 = vld [vmem:[#allocation9 + $0x680] sm:$0xff] }
 0x740   :  { %6861 = vmatpush.msra.mxu1 %v6076_v46  ;;  %6999 = vmatpush.msrb.mxu3 %v6077_v50  ;;  %v6000_v46 = vld [vmem:[#allocation9 + $0x140] sm:$0xff]  ;;  %v6466_v50 = vld [vmem:[#allocation9 + $0xfd0] sm:$0xff] }
 0x741   :  { %7071 = vmatpush.msra.mxu2 %v6347_v56  ;;  %7021 = vmatpush.msra.mxu0 %v6179_v40  ;;  %v6467_v56 = vld [vmem:[#allocation9 + $0xfd8] sm:$0xff]  ;;  %v6162_v40 = vld [vmem:[#allocation9 + $0x650] sm:$0xff] }
 0x742   :  { %7072 = vmatmul.f32.vlgmr.msra.gmra.mxu2 %v9256_v19  ;;  %6862 = vmatpush.msra.mxu1 %v6070_v28  ;;  %v6228_v19 = vld [vmem:[#allocation9 + $0x860] sm:$0xff] }
 0x743   :  { %7148 = vmatpush.msrb.mxu2 %v6246_v2  ;;  %7000 = vmatpush.msrb.mxu3 %v6071_v60  ;;  %v5994_v2 = vld [vmem:[#allocation9 + $0x110] sm:$0xff]  ;;  %v6460_v28 = vld [vmem:[#allocation9 + $0xfa0] sm:$0xff]  ;;  %v6461_v60 = vld [vmem:[#allocation9 + $0xfa8] sm:$0xff] }
 0x744   :  { %7022 = vmatpush.msra.mxu0 %v6173_v58  ;;  %6863 = vmatpush.msra.mxu1 %v6064_v16  ;;  %v6156_v58 = vld [vmem:[#allocation9 + $0x620] sm:$0xff]  ;;  %v6055_v16 = vld [vmem:[#allocation9 + $0x2f8] sm:$0xff] }
 0x745   :  { %7149 = vmatpush.msrb.mxu2 %v6240_v3  ;;  %7001 = vmatpush.msrb.mxu3 %v6065_v12  ;;  %v5988_v3 = vld [vmem:[#allocation9 + $0xe0] sm:$0xff]  ;;  %v6454_v12 = vld [vmem:[#allocation9 + $0xf70] sm:$0xff] }
 0x746   :  { %7023 = vmatpush.msra.mxu0 %v6167_v52  ;;  %6864 = vmatpush.msra.mxu1 %v6058_v33  ;;  %v6455_v52 = vld [vmem:[#allocation9 + $0xf78] sm:$0xff]  ;;  %v6049_v33 = vld [vmem:[#allocation9 + $0x2c8] sm:$0xff] }
 0x747   :  { %7150 = vmatpush.msrb.mxu2 %v6234_v6  ;;  %7002 = vmatpush.msrb.mxu3 %v6059_v7  ;;  %v5982_v6 = vld [vmem:[#allocation9 + $0xb0] sm:$0xff]  ;;  %v6448_v7 = vld [vmem:[#allocation9 + $0xf40] sm:$0xff] }
 0x748   :  { %6941 = vmatpush.msrb.mxu1 %v6532_v62  ;;  %7024 = vmatpush.msra.mxu0 %v6161_v0  ;;  %v6449_v62 = vld [vmem:[#allocation9 + $0xf48] sm:$0xff]  ;;  %v5976_v0 = vld [vmem:[#allocation9 + $0x80] sm:$0xff] }
 0x749   :  { %7079 = vmatpush.msra.mxu3 %v6533_v44  ;;  %7151 = vmatpush.msrb.mxu2 %v6228_v19  ;;  %v6043_v44 = vld [vmem:[#allocation9 + $0x298] sm:$0xff]  ;;  %v6442_v19 = vld [vmem:[#allocation9 + $0xf10] sm:$0xff] }
 0x74a   :  { %6865 = vmatmul.f32.vlgmr.msra.gmra.mxu1 %v9291_v41  ;;  %7003 = vmatmul.f32.vlgmr.msrb.gmra.mxu3 %v9291_v41 }
 0x74b   :  { %6942 = vmatpush.msrb.mxu1 %v6526_v38  ;;  %7025 = vmatpush.msra.mxu0 %v6155_v54  ;;  %v6443_v38 = vld [vmem:[#allocation9 + $0xf18] sm:$0xff]  ;;  %v6341_v54 = vld [vmem:[#allocation9 + $0xbe8] sm:$0xff] }
 0x74c   :  { %7075 = vmatmul.f32.gmra.mxu2 %v9261_v5  ;;  %7080 = vmatpush.msra.mxu3 %v6527_v47  ;;  %v6042_v5 = vld [vmem:[#allocation9 + $0x290] sm:$0xff] }
 0x74d   :  { %7152 = vmatpush.msrb.mxu2 %v6222_v39  ;;  %7026 = vmatmul.f32.vlgmr.msra.gmra.mxu0 %v9296_v43  ;;  %v5970_v47 = vld [vmem:[#allocation9 + $0x50] sm:$0xff] }
 0x74e   :  { %6943 = vmatpush.msrb.mxu1 %v6520_v25  ;;  %7102 = vmatpush.msrb.mxu0 %v6054_v32  ;;  %v6342_v39 = vld [vmem:[#allocation9 + $0xbf0] sm:$0xff]  ;;  %v6037_v25 = vld [vmem:[#allocation9 + $0x268] sm:$0xff]  ;;  %v6335_v32 = vld [vmem:[#allocation9 + $0xbb8] sm:$0xff] }
 0x74f   :  { %7081 = vmatpush.msra.mxu3 %v6521_v53  ;;  %7153 = vmatpush.msrb.mxu2 %v6216_v9  ;;  %v5964_v53 = vld [vmem:[#allocation9 + $0x20] sm:$0xff] }
 0x750   :  { %6944 = vmatpush.msrb.mxu1 %v6514_v59  ;;  %7103 = vmatpush.msrb.mxu0 %v6048_v34  ;;  %v6336_v9 = vld [vmem:[#allocation9 + $0xbc0] sm:$0xff]  ;;  %v6031_v59 = vld [vmem:[#allocation9 + $0x238] sm:$0xff]  ;;  %v6329_v34 = vld [vmem:[#allocation9 + $0xb88] sm:$0xff] }
 0x751   :  { %7082 = vmatpush.msra.mxu3 %v6515_v8  ;;  %7154 = vmatpush.msrb.mxu2 %v6210_v21  ;;  %v6438_v8 = vld [vmem:[#allocation9 + $0xef0] sm:$0xff] }
 0x752   :  { %6945 = vmatpush.msrb.mxu1 %v6508_v14  ;;  %7104 = vmatpush.msrb.mxu0 %v6042_v5  ;;  %v6330_v21 = vld [vmem:[#allocation9 + $0xb90] sm:$0xff]  ;;  %v6025_v14 = vld [vmem:[#allocation9 + $0x208] sm:$0xff]  ;;  %v6323_v5 = vld [vmem:[#allocation9 + $0xb58] sm:$0xff] }
 0x753   :  { %7083 = vmatpush.msra.mxu3 %v6509_v20  ;;  %7155 = vmatpush.msrb.mxu2 %v6204_v61  ;;  %v9308_v20 = vld [vmem:[#allocation2] sm:$0xff]  ;;  %v6324_v61 = vld [vmem:[#allocation9 + $0xb60] sm:$0xff] }
 0x754   :  { %6868 = vmatmul.f32.gmra.mxu1 %v9253_v27  ;;  %7006 = vmatmul.f32.gmra.mxu3 %v9253_v27  ;;  %v6018_v27 = vld [vmem:[#allocation9 + $0x1d0] sm:$0xff] }
 0x755   :  { %7105 = vmatpush.msrb.mxu0 %v6036_v17  ;;  %6946 = vmatpush.msrb.mxu1 %v6502_v15  ;;  %v6019_v17 = vld [vmem:[#allocation9 + $0x1d8] sm:$0xff]  ;;  %v6426_v15 = vld [vmem:[#allocation9 + $0xe90] sm:$0xff] }
 0x756   :  { %7084 = vmatpush.msra.mxu3 %v6503_v22  ;;  %7156 = vmatpush.msrb.mxu2 %v6198_v10  ;;  %v6317_v22 = vld [vmem:[#allocation9 + $0xb28] sm:$0xff] }
 0x757   :  { %7029 = vmatmul.f32.gmra.mxu0 %v9301_v63  ;;  %6947 = vmatpush.msrb.mxu1 %v6496_v35  ;;  %v6013_v10 = vld [vmem:[#allocation9 + $0x1a8] sm:$0xff]  ;;  %v6420_v35 = vld [vmem:[#allocation9 + $0xe60] sm:$0xff] }
 0x758   :  { %7106 = vmatpush.msrb.mxu0 %v6030_v26  ;;  %7085 = vmatpush.msra.mxu3 %v6497_v37  ;;  %v6318_v26 = vld [vmem:[#allocation9 + $0xb30] sm:$0xff]  ;;  %v6311_v37 = vld [vmem:[#allocation9 + $0xaf8] sm:$0xff] }
 0x759   :  { %7157 = vmatpush.msrb.mxu2 %v6192_v45  ;;  %6948 = vmatpush.msrb.mxu1 %v6490_v4  ;;  %v6007_v45 = vld [vmem:[#allocation9 + $0x178] sm:$0xff]  ;;  %v6414_v4 = vld [vmem:[#allocation9 + $0xe30] sm:$0xff] }
 0x75a   :  { %7107 = vmatpush.msrb.mxu0 %v6024_v30  ;;  %7086 = vmatpush.msra.mxu3 %v6491_v18  ;;  %v6312_v30 = vld [vmem:[#allocation9 + $0xb00] sm:$0xff]  ;;  %v6305_v18 = vld [vmem:[#allocation9 + $0xac8] sm:$0xff] }
 0x75b   :  { %7158 = vmatpush.msrb.mxu2 %v6186_v36  ;;  %6949 = vmatpush.msrb.mxu1 %v6484_v49  ;;  %v6306_v36 = vld [vmem:[#allocation9 + $0xad0] sm:$0xff]  ;;  %v9313_v49 = vld [vmem:[#allocation2 + $0x30] sm:$0xff] }
 0x75c   :  { %7108 = vmatpush.msrb.mxu0 %v6018_v27  ;;  %7087 = vmatpush.msra.mxu3 %v6485_v48  ;;  %v6001_v27 = vld [vmem:[#allocation9 + $0x148] sm:$0xff]  ;;  %v6408_v48 = vld [vmem:[#allocation9 + $0xe00] sm:$0xff] }
 0x75d   :  { %7159 = vmatpush.msrb.mxu2 %v6180_v13  ;;  %6950 = vmatpush.msrb.mxu1 %v6478_v51  ;;  %v6299_v13 = vld [vmem:[#allocation9 + $0xa98] sm:$0xff]  ;;  %v6402_v51 = vld [vmem:[#allocation9 + $0xdd0] sm:$0xff] }
 0x75e   :  { %7109 = vmatpush.msrb.mxu0 %v6012_v1  ;;  %7088 = vmatpush.msra.mxu3 %v6479_v57  ;;  %v5995_v1 = vld [vmem:[#allocation9 + $0x118] sm:$0xff]  ;;  %v6293_v57 = vld [vmem:[#allocation9 + $0xa68] sm:$0xff] }
 0x75f   :  { %7160 = vmatpush.msrb.mxu2 %v6174_v29  ;;  %6951 = vmatpush.msrb.mxu1 %v6472_v11  ;;  %v6294_v29 = vld [vmem:[#allocation9 + $0xa70] sm:$0xff]  ;;  %v6396_v11 = vld [vmem:[#allocation9 + $0xda0] sm:$0xff] }
 0x760   :  { %7110 = vmatpush.msrb.mxu0 %v6006_v31  ;;  %7089 = vmatpush.msra.mxu3 %v6473_v23  ;;  %v5989_v31 = vld [vmem:[#allocation9 + $0xe8] sm:$0xff]  ;;  %v6287_v23 = vld [vmem:[#allocation9 + $0xa38] sm:$0xff] }
 0x761   :  { %7161 = vmatpush.msrb.mxu2 %v6168_v55  ;;  %6952 = vmatpush.msrb.mxu1 %v6466_v50  ;;  %v6288_v55 = vld [vmem:[#allocation9 + $0xa40] sm:$0xff]  ;;  %v6390_v50 = vld [vmem:[#allocation9 + $0xd70] sm:$0xff] }
 0x762   :  { %7111 = vmatpush.msrb.mxu0 %v6000_v46  ;;  %7090 = vmatpush.msra.mxu3 %v6467_v56  ;;  %v5983_v46 = vld [vmem:[#allocation9 + $0xb8] sm:$0xff]  ;;  %v6281_v56 = vld [vmem:[#allocation9 + $0xa08] sm:$0xff] }
 0x763   :  { %7162 = vmatpush.msrb.mxu2 %v6162_v40  ;;  %6953 = vmatpush.msrb.mxu1 %v6460_v28  ;;  %v6282_v40 = vld [vmem:[#allocation9 + $0xa10] sm:$0xff]  ;;  %v6384_v28 = vld [vmem:[#allocation9 + $0xd40] sm:$0xff] }
 0x764   :  { %7112 = vmatpush.msrb.mxu0 %v5994_v2  ;;  %7091 = vmatpush.msra.mxu3 %v6461_v60  ;;  %v5977_v2 = vld [vmem:[#allocation9 + $0x88] sm:$0xff]  ;;  %v6275_v60 = vld [vmem:[#allocation9 + $0x9d8] sm:$0xff] }
 0x765   :  { %7163 = vmatpush.msrb.mxu2 %v6156_v58  ;;  %6954 = vmatpush.msrb.mxu1 %v6454_v12  ;;  %v6276_v58 = vld [vmem:[#allocation9 + $0x9e0] sm:$0xff]  ;;  %v6269_v12 = vld [vmem:[#allocation9 + $0x9a8] sm:$0xff] }
 0x766   :  { %7113 = vmatpush.msrb.mxu0 %v5988_v3  ;;  %7164 = vmatmul.f32.vlgmr.msrb.gmra.mxu2 %v9296_v43  ;;  %v5971_v3 = vld [vmem:[#allocation9 + $0x58] sm:$0xff] }
 0x767   :  { %7240 = vmatpush.msra.mxu2 %v6055_v16  ;;  %7092 = vmatpush.msra.mxu3 %v6455_v52  ;;  %v6378_v16 = vld [vmem:[#allocation9 + $0xd10] sm:$0xff] }
 0x768   :  { %7114 = vmatpush.msrb.mxu0 %v5982_v6  ;;  %6955 = vmatpush.msrb.mxu1 %v6448_v7  ;;  %v6270_v52 = vld [vmem:[#allocation9 + $0x9b0] sm:$0xff]  ;;  %v5965_v6 = vld [vmem:[#allocation9 + $0x28] sm:$0xff]  ;;  %v6567_v7 = vpop.f32.mrf.mxu0 }
 0x769   :  { %7241 = vmatpush.msra.mxu2 %v6049_v33  ;;  %7093 = vmatpush.msra.mxu3 %v6449_v62  ;;  %v6372_v33 = vld [vmem:[#allocation9 + $0xce0] sm:$0xff]  ;;  %v6439_v62 = vld [vmem:[#allocation9 + $0xef8] sm:$0xff] }
 0x76a   :  { %7115 = vmatpush.msrb.mxu0 %v5976_v0  ;;  %6956 = vmatpush.msrb.mxu1 %v6442_v19  ;;  %v6263_v0 = vld [vmem:[#allocation9 + $0x978] sm:$0xff]  ;;  %v6366_v19 = vld [vmem:[#allocation9 + $0xcb0] sm:$0xff] }
 0x76b   :  { %7242 = vmatpush.msra.mxu2 %v6043_v44  ;;  %7094 = vmatpush.msra.mxu3 %v6443_v38  ;;  %v6264_v44 = vld [vmem:[#allocation9 + $0x980] sm:$0xff]  ;;  %v6433_v38 = vld [vmem:[#allocation9 + $0xec8] sm:$0xff] }
 0x76c   :  { %6957 = vmatmul.f32.vlgmr.msrb.gmra.mxu1 %v9275_v42  ;;  %7095 = vmatmul.f32.vlgmr.msra.gmra.mxu3 %v9275_v42  ;;  %v6432_v42 = vld [vmem:[#allocation9 + $0xec0] sm:$0xff] }
 0x76d   :  { %7033 = vmatpush.msra.mxu1 %v6341_v54  ;;  %7116 = vmatpush.msrb.mxu0 %v5970_v47  ;;  %v6257_v54 = vld [vmem:[#allocation9 + $0x948] sm:$0xff]  ;;  %v6258_v47 = vld [vmem:[#allocation9 + $0x950] sm:$0xff] }
 0x76e   :  { %7171 = vmatpush.msrb.mxu3 %v6342_v39  ;;  %7243 = vmatpush.msra.mxu2 %v6037_v25  ;;  %v6360_v39 = vld [vmem:[#allocation9 + $0xc80] sm:$0xff]  ;;  %v6427_v25 = vld [vmem:[#allocation9 + $0xe98] sm:$0xff] }
 0x76f   :  { %7034 = vmatpush.msra.mxu1 %v6335_v32  ;;  %7117 = vmatpush.msrb.mxu0 %v5964_v53  ;;  %v6251_v32 = vld [vmem:[#allocation9 + $0x918] sm:$0xff]  ;;  %v6252_v53 = vld [vmem:[#allocation9 + $0x920] sm:$0xff] }
 0x770   :  { %7167 = vmatmul.f32.gmra.mxu2 %v9301_v63  ;;  %7172 = vmatpush.msrb.mxu3 %v6336_v9  ;;  %v9317_v9 = vld [vmem:[#allocation11] sm:$0x3f] }
 0x771   :  { %7244 = vmatpush.msra.mxu2 %v6031_v59  ;;  %7118 = vmatmul.f32.vlgmr.msrb.gmra.mxu0 %v9308_v20  ;;  %v6590_v59 = vpop.f32.mrf.mxu1 }
 0x772   :  { %7035 = vmatpush.msra.mxu1 %v6329_v34  ;;  %7194 = vmatpush.msra.mxu0 %v6438_v8  ;;  %v6613_v34 = vpop.f32.mrf.mxu2  ;;  %v6150_v8 = vld [vmem:[#allocation9 + $0x5f0] sm:$0xff] }
 0x773   :  { %7173 = vmatpush.msrb.mxu3 %v6330_v21  ;;  %7245 = vmatpush.msra.mxu2 %v6025_v14  ;;  %v6354_v21 = vld [vmem:[#allocation9 + $0xc50] sm:$0xff]  ;;  %v6151_v14 = vld [vmem:[#allocation9 + $0x5f8] sm:$0xff] }
 0x774   :  { %7036 = vmatpush.msra.mxu1 %v6323_v5  ;;  %7195 = vmatpush.msra.mxu0 %v6432_v42  ;;  %v6636_v5 = vpop.f32.mrf.mxu3  ;;  %v9319_v42 = vld [vmem:[#allocation2 + $0x18] sm:$0xff] }
 0x775   :  { %7174 = vmatpush.msrb.mxu3 %v6324_v61  ;;  %7246 = vmatpush.msra.mxu2 %v6019_v17  ;;  %v6421_v61 = vld [vmem:[#allocation9 + $0xe68] sm:$0xff]  ;;  %v6144_v17 = vld [vmem:[#allocation9 + $0x5c0] sm:$0xff] }
 0x776   :  { %6960 = vmatmul.f32.gmra.mxu1 %v9281_v24  ;;  %7196 = vmatpush.msra.mxu0 %v6426_v15  ;;  %v6538_v15 = vperm.slane %v9317_v9, 0 }
 0x777   :  { %7037 = vmatpush.msra.mxu1 %v6317_v22  ;;  %7098 = vmatmul.f32.gmra.mxu3 %v9281_v24  ;;  %v6300_v24 = vld [vmem:[#allocation9 + $0xaa0] sm:$0xff] }
 0x778   :  { %7247 = vmatpush.msra.mxu2 %v6013_v10  ;;  %7175 = vmatpush.msrb.mxu3 %v6318_v26  ;;  %v6348_v22 = vld [vmem:[#allocation9 + $0xc20] sm:$0xff]  ;;  %v6145_v10 = vld [vmem:[#allocation9 + $0x5c8] sm:$0xff]  ;;  %v6415_v26 = vld [vmem:[#allocation9 + $0xe38] sm:$0xff] }
 0x779   :  { %7197 = vmatpush.msra.mxu0 %v6420_v35  ;;  %7038 = vmatpush.msra.mxu1 %v6311_v37  ;;  %v6138_v35 = vld [vmem:[#allocation9 + $0x590] sm:$0xff]  ;;  %v6247_v37 = vld [vmem:[#allocation9 + $0x8f8] sm:$0xff] }
 0x77a   :  { %7248 = vmatpush.msra.mxu2 %v6007_v45  ;;  %7176 = vmatpush.msrb.mxu3 %v6312_v30  ;;  %v6139_v45 = vld [vmem:[#allocation9 + $0x598] sm:$0xff]  ;;  %v6568_v30 = vadd.f32 %v6567_v7, %v6538_v15 }
 0x77b   :  { %7121 = vmatmul.f32.gmra.mxu0 %v9313_v49  ;;  %7039 = vmatpush.msra.mxu1 %v6305_v18  ;;  %v6132_v18 = vld [vmem:[#allocation9 + $0x560] sm:$0xff] }
 0x77c   :  { %7198 = vmatpush.msra.mxu0 %v6414_v4  ;;  %7177 = vmatpush.msrb.mxu3 %v6306_v36  ;;  %v6409_v4 = vld [vmem:[#allocation9 + $0xe08] sm:$0xff]  ;;  %v6593_v36 = vpop.f32.mrf.mxu1  ;;  %v9332_v7 = vld [vmem:[#allocation2 + $0x50] sm:$0xff] }
 0x77d   :  { %7249 = vmatpush.msra.mxu2 %v6001_v27  ;;  %7040 = vmatpush.msra.mxu1 %v6299_v13  ;;  %v9325_v27 = vld [vmem:[#allocation2 + $0x20] sm:$0xff] }
 0x77e   :  { %7199 = vmatpush.msra.mxu0 %v6408_v48  ;;  %7178 = vmatpush.msrb.mxu3 %v6300_v24  ;;  %v6241_v48 = vld [vmem:[#allocation9 + $0x8c8] sm:$0xff]  ;;  %v6591_v24 = vadd.f32 %v6590_v59, %v6568_v30  ;;  %v6187_v30 = vld [vmem:[#allocation9 + $0x718] sm:$0xff] }
 0x77f   :  { %7250 = vmatpush.msra.mxu2 %v5995_v1  ;;  %7041 = vmatpush.msra.mxu1 %v6293_v57  ;;  %v6133_v13 = vld [vmem:[#allocation9 + $0x568] sm:$0xff]  ;;  %v6403_v1 = vld [vmem:[#allocation9 + $0xdd8] sm:$0xff]  ;;  %v6126_v57 = vld [vmem:[#allocation9 + $0x530] sm:$0xff] }
 0x780   :  { %7200 = vmatpush.msra.mxu0 %v6402_v51  ;;  %7179 = vmatpush.msrb.mxu3 %v6294_v29  ;;  %v6235_v51 = vld [vmem:[#allocation9 + $0x898] sm:$0xff]  ;;  %v6614_v29 = vadd.f32 %v6613_v34, %v6591_v24  ;;  %v6205_v59 = vld [vmem:[#allocation9 + $0x7a8] sm:$0xff]  ;;  %v6096_v34 = vld [vmem:[#allocation9 + $0x440] sm:$0xff] }
 0x781   :  { %7251 = vmatpush.msra.mxu2 %v5989_v31  ;;  %7042 = vmatpush.msra.mxu1 %v6287_v23  ;;  %v6397_v31 = vld [vmem:[#allocation9 + $0xda8] sm:$0xff] }
 0x782   :  { %7201 = vmatpush.msra.mxu0 %v6396_v11  ;;  %7180 = vmatpush.msrb.mxu3 %v6288_v55  ;;  %v6639_v11 = vpop.f32.mrf.mxu3  ;;  %v9328_v55 = vld [vmem:[#allocation2 + $0x48] sm:$0xff]  ;;  %v6349_v24 = vld [vmem:[#allocation9 + $0xc28] sm:$0xff] }
 0x783   :  { %7252 = vmatpush.msra.mxu2 %v5983_v46  ;;  %7043 = vmatpush.msra.mxu1 %v6281_v56  ;;  %v6127_v46 = vld [vmem:[#allocation9 + $0x538] sm:$0xff]  ;;  %v6637_v56 = vadd.f32 %v6636_v5, %v6614_v29 }
 0x784   :  { %7202 = vmatpush.msra.mxu0 %v6390_v50  ;;  %7181 = vmatpush.msrb.mxu3 %v6282_v40  ;;  %v6229_v50 = vld [vmem:[#allocation9 + $0x868] sm:$0xff]  ;;  %v6120_v40 = vld [vmem:[#allocation9 + $0x500] sm:$0xff]  ;;  %v6367_v5 = vld [vmem:[#allocation9 + $0xcb8] sm:$0xff] }
 0x785   :  { %7253 = vmatpush.msra.mxu2 %v5977_v2  ;;  %7044 = vmatpush.msra.mxu1 %v6275_v60  ;;  %v6391_v2 = vld [vmem:[#allocation9 + $0xd78] sm:$0xff]  ;;  %v6121_v60 = vld [vmem:[#allocation9 + $0x508] sm:$0xff] }
 0x786   :  { %7203 = vmatpush.msra.mxu0 %v6384_v28  ;;  %7182 = vmatpush.msrb.mxu3 %v6276_v58  ;;  %v6175_v29 = vld [vmem:[#allocation9 + $0x6b8] sm:$0xff] }
 0x787   :  { %7254 = vmatpush.msra.mxu2 %v5971_v3  ;;  %7045 = vmatpush.msra.mxu1 %v6269_v12  ;;  %v6223_v3 = vld [vmem:[#allocation9 + $0x838] sm:$0xff] }
 0x788   :  { %7204 = vmatpush.msra.mxu0 %v6378_v16  ;;  %7183 = vmatpush.msrb.mxu3 %v6270_v52  ;;  %v6114_v16 = vld [vmem:[#allocation9 + $0x4d0] sm:$0xff]  ;;  %v6115_v52 = vld [vmem:[#allocation9 + $0x4d8] sm:$0xff] }
 0x789   :  { %7255 = vmatpush.msra.mxu2 %v5965_v6  ;;  %7046 = vmatpush.msra.mxu1 %v6263_v0  ;;  %v6385_v6 = vld [vmem:[#allocation9 + $0xd48] sm:$0xff]  ;;  %v6108_v0 = vld [vmem:[#allocation9 + $0x4a0] sm:$0xff] }
 0x78a   :  { %7205 = vmatpush.msra.mxu0 %v6372_v33  ;;  %7256 = vmatmul.f32.vlgmr.msra.gmra.mxu2 %v9308_v20  ;;  %v6570_v20 = vpop.f32.mrf.mxu0 }
 0x78b   :  { %7332 = vmatpush.msrb.mxu2 %v6439_v62  ;;  %7184 = vmatpush.msrb.mxu3 %v6264_v44  ;;  %v6571_v28 = vadd.f32 %v6570_v20, %v6538_v15  ;;  %v6217_v62 = vld [vmem:[#allocation9 + $0x808] sm:$0xff]  ;;  %v6199_v20 = vld [vmem:[#allocation9 + $0x778] sm:$0xff] }
 0x78c   :  { %7206 = vmatpush.msra.mxu0 %v6366_v19  ;;  %7047 = vmatpush.msra.mxu1 %v6257_v54  ;;  %v6109_v19 = vld [vmem:[#allocation9 + $0x4a8] sm:$0xff]  ;;  %v6211_v54 = vld [vmem:[#allocation9 + $0x7d8] sm:$0xff] }
 0x78d   :  { %7333 = vmatpush.msrb.mxu2 %v6433_v38  ;;  %7185 = vmatpush.msrb.mxu3 %v6258_v47  ;;  %v6594_v12 = vadd.f32 %v6593_v36, %v6571_v28  ;;  %v6379_v38 = vld [vmem:[#allocation9 + $0xd18] sm:$0xff]  ;;  %v6102_v47 = vld [vmem:[#allocation9 + $0x470] sm:$0xff]  ;;  %v6539_v36 = vperm.slane %v9317_v9, 1  ;;  %v6061_v28 = vld [vmem:[#allocation9 + $0x328] sm:$0xff] }
 0x78e   :  { %7207 = vmatpush.msra.mxu0 %v6360_v39  ;;  %7048 = vmatpush.msra.mxu1 %v6251_v32  ;;  %v6103_v32 = vld [vmem:[#allocation9 + $0x478] sm:$0xff] }
 0x78f   :  { %7334 = vmatpush.msrb.mxu2 %v6427_v25  ;;  %7186 = vmatpush.msrb.mxu3 %v6252_v53  ;;  %v6373_v53 = vld [vmem:[#allocation9 + $0xce8] sm:$0xff]  ;;  %v6091_v15 = vld [vmem:[#allocation9 + $0x418] sm:$0xff] }
 0x790   :  { %7049 = vmatmul.f32.vlgmr.msra.gmra.mxu1 %v9319_v42  ;;  %7187 = vmatmul.f32.vlgmr.msrb.gmra.mxu3 %v9319_v42 }
 0x791   :  { %7125 = vmatpush.msrb.mxu1 %v6150_v8  ;;  %7208 = vmatpush.msra.mxu0 %v6354_v21  ;;  %v6728_v8 = vpop.f32.mrf.mxu3 }
 0x792   :  { %7263 = vmatpush.msra.mxu3 %v6151_v14  ;;  %7335 = vmatpush.msrb.mxu2 %v6421_v61  ;;  %v6659_v23 = vpop.f32.mrf.mxu0  ;;  %v6097_v14 = vld [vmem:[#allocation9 + $0x448] sm:$0xff]  ;;  %v6090_v61 = vld [vmem:[#allocation9 + $0x410] sm:$0xff] }
 0x793   :  { %7126 = vmatpush.msrb.mxu1 %v6144_v17  ;;  %7209 = vmatpush.msra.mxu0 %v6348_v22  ;;  %v6660_v58 = vadd.f32 %v6659_v23, %v6637_v56  ;;  %v6361_v22 = vld [vmem:[#allocation9 + $0xc88] sm:$0xff] }
 0x794   :  { %7259 = vmatmul.f32.gmra.mxu2 %v9313_v49  ;;  %7264 = vmatpush.msra.mxu3 %v6145_v10  ;;  %v6616_v49 = vpop.f32.mrf.mxu2  ;;  %v6193_v10 = vld [vmem:[#allocation9 + $0x748] sm:$0xff] }
 0x795   :  { %7336 = vmatpush.msrb.mxu2 %v6415_v26  ;;  %7210 = vmatmul.f32.vlgmr.msra.gmra.mxu0 %v9325_v27  ;;  %v6617_v25 = vadd.f32 %v6616_v49, %v6594_v12  ;;  %v6084_v26 = vld [vmem:[#allocation9 + $0x3e0] sm:$0xff]  ;;  %v6181_v49 = vld [vmem:[#allocation9 + $0x6e8] sm:$0xff] }
 0x796   :  { %7127 = vmatpush.msrb.mxu1 %v6138_v35  ;;  %7286 = vmatpush.msrb.mxu0 %v6247_v37  ;;  %v6085_v37 = vld [vmem:[#allocation9 + $0x3e8] sm:$0xff] }
 0x797   :  { %7265 = vmatpush.msra.mxu3 %v6139_v45  ;;  %7337 = vmatpush.msrb.mxu2 %v6409_v4  ;;  %v6640_v17 = vadd.f32 %v6639_v11, %v6617_v25  ;;  %v6355_v45 = vld [vmem:[#allocation9 + $0xc58] sm:$0xff]  ;;  %v6078_v4 = vld [vmem:[#allocation9 + $0x3b0] sm:$0xff]  ;;  %v6169_v56 = vld [vmem:[#allocation9 + $0x688] sm:$0xff] }
 0x798   :  { %7128 = vmatpush.msrb.mxu1 %v6132_v18  ;;  %7287 = vmatpush.msrb.mxu0 %v6241_v48 }
 0x799   :  { %7266 = vmatpush.msra.mxu3 %v6133_v13  ;;  %7338 = vmatpush.msrb.mxu2 %v6403_v1  ;;  %v6079_v13 = vld [vmem:[#allocation9 + $0x3b8] sm:$0xff]  ;;  %v6731_v11 = vpop.f32.mrf.mxu3 }
 0x79a   :  { %7052 = vmatmul.f32.gmra.mxu1 %v9328_v55  ;;  %7288 = vmatpush.msrb.mxu0 %v6235_v51  ;;  %v6662_v21 = vpop.f32.mrf.mxu0  ;;  %v6072_v51 = vld [vmem:[#allocation9 + $0x380] sm:$0xff] }
 0x79b   :  { %7129 = vmatpush.msrb.mxu1 %v6126_v57  ;;  %7190 = vmatmul.f32.gmra.mxu3 %v9328_v55  ;;  %v6663_v35 = vadd.f32 %v6662_v21, %v6640_v17  ;;  %v6073_v57 = vld [vmem:[#allocation9 + $0x388] sm:$0xff] }
 0x79c   :  { %7339 = vmatpush.msrb.mxu2 %v6397_v31  ;;  %7267 = vmatpush.msra.mxu3 %v6127_v46  ;;  %v6705_v39 = vpop.f32.mrf.mxu2  ;;  %v6066_v46 = vld [vmem:[#allocation9 + $0x350] sm:$0xff] }
 0x79d   :  { %7289 = vmatpush.msrb.mxu0 %v6229_v50  ;;  %7130 = vmatpush.msrb.mxu1 %v6120_v40  ;;  %v6706_v31 = vadd.f32 %v6705_v39, %v6539_v36  ;;  %v6067_v50 = vld [vmem:[#allocation9 + $0x358] sm:$0xff] }
 0x79e   :  { %7340 = vmatpush.msrb.mxu2 %v6391_v2  ;;  %v6682_v33 = vpop.f32.mrf.mxu1  ;;  %7268 = vmatpush.msra.mxu3 %v6121_v60  ;;  %v6060_v2 = vld [vmem:[#allocation9 + $0x320] sm:$0xff] }
 0x79f   :  { %7213 = vmatmul.f32.gmra.mxu0 %v9332_v7  ;;  %v6683_v44 = vadd.f32 %v6682_v33, %v6660_v58  ;;  %7131 = vmatpush.msrb.mxu1 %v6114_v16  ;;  %v6729_v40 = vadd.f32 %v6728_v8, %v6706_v31  ;;  %v6534_v58 = vld [vmem:[#allocation9 + $0x11f0] sm:$0xff]  ;;  %v6535_v16 = vld [vmem:[#allocation9 + $0x11f8] sm:$0xff]  ;;  %v6504_v8 = vld [vmem:[#allocation9 + $0x1100] sm:$0xff] }
 0x7a0   :  { %7290 = vmatpush.msrb.mxu0 %v6223_v3  ;;  %7269 = vmatpush.msra.mxu3 %v6115_v52  ;;  %v6163_v3 = vld [vmem:[#allocation9 + $0x658] sm:$0xff]  ;;  %v6528_v52 = vld [vmem:[#allocation9 + $0x11c0] sm:$0xff] }
 0x7a1   :  { %7341 = vmatpush.msrb.mxu2 %v6385_v6  ;;  %7378 = vst [vmem:[#allocation12] sm:$0xff] %v6683_v44  ;;  %7132 = vmatpush.msrb.mxu1 %v6108_v0  ;;  %v6157_v6 = vld [vmem:[#allocation9 + $0x628] sm:$0xff]  ;;  %v6522_v0 = vld [vmem:[#allocation9 + $0x1190] sm:$0xff]  ;;  %v6343_v31 = vld [vmem:[#allocation9 + $0xbf8] sm:$0xff] }
 0x7a2   :  { %7291 = vmatpush.msrb.mxu0 %v6217_v62  ;;  %7270 = vmatpush.msra.mxu3 %v6109_v19  ;;  %v6751_v23 = vpop.f32.mrf.mxu0  ;;  %v6529_v62 = vld [vmem:[#allocation9 + $0x11c8] sm:$0xff] }
 0x7a3   :  { %7342 = vmatpush.msrb.mxu2 %v6379_v38  ;;  %7133 = vmatpush.msrb.mxu1 %v6102_v47  ;;  %v6752_v60 = vadd.f32 %v6751_v23, %v6729_v40  ;;  %v6337_v23 = vld [vmem:[#allocation9 + $0xbc8] sm:$0xff] }
 0x7a4   :  { %7292 = vmatpush.msrb.mxu0 %v6211_v54  ;;  %7271 = vmatpush.msra.mxu3 %v6103_v32  ;;  %v6708_v48 = vpop.f32.mrf.mxu2  ;;  %v6820_v44 = vpop.f32.mrf.mxu3  ;;  %v6523_v54 = vld [vmem:[#allocation9 + $0x1198] sm:$0xff]  ;;  %v6517_v32 = vld [vmem:[#allocation9 + $0x1168] sm:$0xff] }
 0x7a5   :  { %7343 = vmatpush.msrb.mxu2 %v6373_v53  ;;  %7134 = vmatpush.msrb.mxu1 %v6096_v34  ;;  %v6709_v38 = vadd.f32 %v6708_v48, %v6539_v36  ;;  %v6510_v53 = vld [vmem:[#allocation9 + $0x1130] sm:$0xff]  ;;  %v7688_v34 = vld [vmem:[#allocation2 + $0x38] sm:$0xff] }
 0x7a6   :  { %7293 = vmatpush.msrb.mxu0 %v6205_v59  ;;  %7272 = vmatpush.msra.mxu3 %v6097_v14  ;;  %v6511_v59 = vld [vmem:[#allocation9 + $0x1138] sm:$0xff]  ;;  %v6505_v14 = vld [vmem:[#allocation9 + $0x1108] sm:$0xff]  ;;  %v6462_v48 = vld [vmem:[#allocation9 + $0xfb0] sm:$0xff] }
 0x7a7   :  { %7344 = vmatpush.msrb.mxu2 %v6367_v5  ;;  %7135 = vmatpush.msrb.mxu1 %v6090_v61  ;;  %v6732_v25 = vadd.f32 %v6731_v11, %v6709_v38  ;;  %v6499_v61 = vld [vmem:[#allocation9 + $0x10d8] sm:$0xff]  ;;  %v6469_v36 = vld [vmem:[#allocation9 + $0xfe8] sm:$0xff] }
 0x7a8   :  { %7294 = vmatpush.msrb.mxu0 %v6199_v20  ;;  %7273 = vmatpush.msra.mxu3 %v6091_v15  ;;  %v6498_v20 = vld [vmem:[#allocation9 + $0x10d0] sm:$0xff]  ;;  %v6492_v15 = vld [vmem:[#allocation9 + $0x10a0] sm:$0xff]  ;;  %v6289_v38 = vld [vmem:[#allocation9 + $0xa48] sm:$0xff] }
 0x7a9   :  { %7345 = vmatpush.msrb.mxu2 %v6361_v22  ;;  %v6685_v18 = vpop.f32.mrf.mxu1  ;;  %7136 = vmatpush.msrb.mxu1 %v6084_v26  ;;  %v7689_v11 = vld [vmem:[#allocation2 + $0x28] sm:$0xff] }
 0x7aa   :  { %7295 = vmatpush.msrb.mxu0 %v6193_v10  ;;  %v6686_v1 = vadd.f32 %v6685_v18, %v6663_v35  ;;  %7274 = vmatpush.msra.mxu3 %v6085_v37  ;;  %v6754_v47 = vpop.f32.mrf.mxu0  ;;  %v6493_v10 = vld [vmem:[#allocation9 + $0x10a8] sm:$0xff]  ;;  %v6486_v35 = vld [vmem:[#allocation9 + $0x1070] sm:$0xff]  ;;  %v6487_v37 = vld [vmem:[#allocation9 + $0x1078] sm:$0xff] }
 0x7ab   :  { %7346 = vmatpush.msrb.mxu2 %v6355_v45  ;;  %7137 = vmatpush.msrb.mxu1 %v6078_v4  ;;  %v6480_v45 = vld [vmem:[#allocation9 + $0x1040] sm:$0xff]  ;;  %v6474_v4 = vld [vmem:[#allocation9 + $0x1010] sm:$0xff]  ;;  %v6475_v18 = vld [vmem:[#allocation9 + $0x1018] sm:$0xff] }
 0x7ac   :  { %7296 = vmatpush.msrb.mxu0 %v6187_v30  ;;  %7384 = vst [vmem:[#allocation12 + $0x30] sm:$0xff] %v6686_v1  ;;  %7275 = vmatpush.msra.mxu3 %v6079_v13  ;;  %v6481_v30 = vld [vmem:[#allocation9 + $0x1048] sm:$0xff]  ;;  %v6463_v13 = vld [vmem:[#allocation9 + $0xfb8] sm:$0xff] }
 0x7ad   :  { %7347 = vmatpush.msrb.mxu2 %v6349_v24  ;;  %7138 = vmatpush.msrb.mxu1 %v6072_v51  ;;  %v6456_v24 = vld [vmem:[#allocation9 + $0xf80] sm:$0xff]  ;;  %v6457_v1 = vld [vmem:[#allocation9 + $0xf88] sm:$0xff]  ;;  %v6451_v51 = vld [vmem:[#allocation9 + $0xf58] sm:$0xff] }
 0x7ae   :  { %7297 = vmatpush.msrb.mxu0 %v6181_v49  ;;  %7348 = vmatmul.f32.vlgmr.msrb.gmra.mxu2 %v9325_v27  ;;  %v6797_v27 = vpop.f32.mrf.mxu2  ;;  %v6450_v49 = vld [vmem:[#allocation9 + $0xf50] sm:$0xff] }
 0x7af   :  { %7276 = vmatpush.msra.mxu3 %v6073_v57  ;;  %7139 = vmatpush.msrb.mxu1 %v6066_v46  ;;  %v6444_v57 = vld [vmem:[#allocation9 + $0xf20] sm:$0xff] }
 0x7b0   :  { %7298 = vmatpush.msrb.mxu0 %v6175_v29  ;;  %v6823_v22 = vpop.f32.mrf.mxu3  ;;  %v6445_v29 = vld [vmem:[#allocation9 + $0xf28] sm:$0xff] }
 0x7b1   :  { %7277 = vmatpush.msra.mxu3 %v6067_v50  ;;  %7140 = vmatpush.msrb.mxu1 %v6060_v2  ;;  %v6540_v50 = vperm.slane %v9317_v9, 2  ;;  %v6325_v2 = vld [vmem:[#allocation9 + $0xb68] sm:$0xff] }
 0x7b2   :  { %7299 = vmatpush.msrb.mxu0 %v6169_v56  ;;  %v6774_v12 = vpop.f32.mrf.mxu1  ;;  %7141 = vmatmul.f32.vlgmr.msrb.gmra.mxu1 %v9291_v41  ;;  %v6843_v46 = vpop.f32.mrf.mxu0  ;;  %v6331_v56 = vld [vmem:[#allocation9 + $0xb98] sm:$0xff] }
 0x7b3   :  { %7278 = vmatpush.msra.mxu3 %v6061_v28  ;;  %v6775_v33 = vadd.f32 %v6774_v12, %v6752_v60  ;;  %7217 = vmatpush.msra.mxu1 %v6534_v58  ;;  %v6844_v28 = vadd.f32 %v6843_v46, %v6540_v50  ;;  %v6319_v60 = vld [vmem:[#allocation9 + $0xb38] sm:$0xff] }
 0x7b4   :  { %7279 = vmatmul.f32.vlgmr.msra.gmra.mxu3 %v9291_v41  ;;  %7300 = vmatpush.msrb.mxu0 %v6163_v3  ;;  %v6516_v41 = vld [vmem:[#allocation9 + $0x1160] sm:$0xff]  ;;  %v6307_v12 = vld [vmem:[#allocation9 + $0xad8] sm:$0xff] }
 0x7b5   :  { %7355 = vmatpush.msrb.mxu3 %v6535_v16  ;;  %v6798_v19 = vadd.f32 %v6797_v27, %v6775_v33  ;;  %7218 = vmatpush.msra.mxu1 %v6528_v52  ;;  %v7690_v3 = vld [vmem:[#allocation2 + $0x58] sm:$0xff] }
 0x7b6   :  { %7351 = vmatmul.f32.gmra.mxu2 %v9332_v7  ;;  %7301 = vmatpush.msrb.mxu0 %v6157_v6  ;;  %v6755_v7 = vadd.f32 %v6754_v47, %v6732_v25  ;;  %v6800_v5 = vpop.f32.mrf.mxu2  ;;  %v6313_v16 = vld [vmem:[#allocation9 + $0xb08] sm:$0xff] }
 0x7b7   :  { %7356 = vmatpush.msrb.mxu3 %v6529_v62  ;;  %7302 = vmatmul.f32.vlgmr.msrb.gmra.mxu0 %v9296_v43  ;;  %v6821_v39 = vadd.f32 %v6820_v44, %v6798_v19  ;;  %v6301_v33 = vld [vmem:[#allocation9 + $0xaa8] sm:$0xff] }
 0x7b8   :  { %7219 = vmatpush.msra.mxu1 %v6522_v0  ;;  %v6295_v0 = vld [vmem:[#allocation9 + $0xa78] sm:$0xff]  ;;  %v6277_v25 = vld [vmem:[#allocation9 + $0x9e8] sm:$0xff] }
 0x7b9   :  { %7357 = vmatpush.msrb.mxu3 %v6523_v54  ;;  %7379 = vst [vmem:[#allocation12 + $0x8] sm:$0xff] %v6821_v39 }
 0x7ba   :  { %7220 = vmatpush.msra.mxu1 %v6516_v41  ;;  %v6846_v52 = vpop.f32.mrf.mxu0  ;;  %v6912_v44 = vpop.f32.mrf.mxu3  ;;  %v6283_v41 = vld [vmem:[#allocation9 + $0xa18] sm:$0xff] }
 0x7bb   :  { %7358 = vmatpush.msrb.mxu3 %v6517_v32  ;;  %7144 = vmatmul.f32.gmra.mxu1 %v7688_v34  ;;  %v6847_v19 = vadd.f32 %v6846_v52, %v6540_v50 }
 0x7bc   :  { %v6777_v21 = vpop.f32.mrf.mxu1  ;;  %7221 = vmatpush.msra.mxu1 %v6510_v53  ;;  %7282 = vmatmul.f32.gmra.mxu3 %v7688_v34  ;;  %v6271_v34 = vld [vmem:[#allocation9 + $0x9b8] sm:$0xff] }
 0x7bd   :  { %v6778_v43 = vadd.f32 %v6777_v21, %v6755_v7  ;;  %7359 = vmatpush.msrb.mxu3 %v6511_v59  ;;  %v6265_v21 = vld [vmem:[#allocation9 + $0x988] sm:$0xff] }
 0x7be   :  { %7222 = vmatpush.msra.mxu1 %v6504_v8  ;;  %v6889_v27 = vpop.f32.mrf.mxu2 }
 0x7bf   :  { %v6801_v17 = vadd.f32 %v6800_v5, %v6778_v43  ;;  %7360 = vmatpush.msrb.mxu3 %v6505_v14  ;;  %7305 = vmatmul.f32.gmra.mxu0 %v9301_v63  ;;  %v6468_v63 = vld [vmem:[#allocation9 + $0xfe0] sm:$0xff]  ;;  %v6259_v43 = vld [vmem:[#allocation9 + $0x958] sm:$0xff] }
 0x7c0   :  { %7223 = vmatpush.msra.mxu1 %v6498_v20  ;;  %v6253_v20 = vld [vmem:[#allocation9 + $0x928] sm:$0xff] }
 0x7c1   :  { %v6824_v26 = vadd.f32 %v6823_v22, %v6801_v17  ;;  %7361 = vmatpush.msrb.mxu3 %v6499_v61 }
 0x7c2   :  { %7224 = vmatpush.msra.mxu1 %v6492_v15  ;;  %v6935_v39 = vpop.f32.mrf.mxu0  ;;  %v6915_v14 = vpop.f32.mrf.mxu3 }
 0x7c3   :  { %7385 = vst [vmem:[#allocation12 + $0x38] sm:$0xff] %v6824_v26  ;;  %7362 = vmatpush.msrb.mxu3 %v6493_v10 }
 0x7c4   :  { %7225 = vmatpush.msra.mxu1 %v6486_v35  ;;  %v6541_v35 = vperm.slane %v9317_v9, 3 }
 0x7c5   :  { %7363 = vmatpush.msrb.mxu3 %v6487_v37 }
 0x7c6   :  { %7226 = vmatpush.msra.mxu1 %v6480_v45  ;;  %v6892_v53 = vpop.f32.mrf.mxu2 }
 0x7c7   :  { %7364 = vmatpush.msrb.mxu3 %v6481_v30  ;;  %v6866_v40 = vpop.f32.mrf.mxu1 }
 0x7c8   :  { %7227 = vmatpush.msra.mxu1 %v6474_v4  ;;  %v6867_v58 = vadd.f32 %v6866_v40, %v6844_v28  ;;  %v6542_v40 = vperm.slane %v9317_v9, 4 }
 0x7c9   :  { %7365 = vmatpush.msrb.mxu3 %v6475_v18 }
 0x7ca   :  { %7228 = vmatpush.msra.mxu1 %v6468_v63  ;;  %v6890_v6 = vadd.f32 %v6889_v27, %v6867_v58  ;;  %v6938_v61 = vpop.f32.mrf.mxu0 }
 0x7cb   :  { %7366 = vmatpush.msrb.mxu3 %v6469_v36 }
 0x7cc   :  { %7229 = vmatpush.msra.mxu1 %v6462_v48  ;;  %v6913_v54 = vadd.f32 %v6912_v44, %v6890_v6 }
 0x7cd   :  { %7367 = vmatpush.msrb.mxu3 %v6463_v13  ;;  %v7004_v26 = vpop.f32.mrf.mxu3 }
 0x7ce   :  { %7230 = vmatpush.msra.mxu1 %v6456_v24  ;;  %v6936_v32 = vadd.f32 %v6935_v39, %v6913_v54  ;;  %v6981_v10 = vpop.f32.mrf.mxu2 }
 0x7cf   :  { %7368 = vmatpush.msrb.mxu3 %v6457_v1  ;;  %v6982_v37 = vadd.f32 %v6981_v10, %v6541_v35 }
 0x7d0   :  { %7231 = vmatpush.msra.mxu1 %v6450_v49 }
 0x7d1   :  { %7369 = vmatpush.msrb.mxu3 %v6451_v51  ;;  %v6869_v62 = vpop.f32.mrf.mxu1  ;;  %v7005_v30 = vadd.f32 %v7004_v26, %v6982_v37 }
 0x7d2   :  { %7232 = vmatpush.msra.mxu1 %v6444_v57  ;;  %v6870_v47 = vadd.f32 %v6869_v62, %v6847_v19  ;;  %v7027_v18 = vpop.f32.mrf.mxu0 }
 0x7d3   :  { %7370 = vmatpush.msrb.mxu3 %v6445_v29  ;;  %7233 = vmatmul.f32.vlgmr.msra.gmra.mxu1 %v7689_v11  ;;  %v7028_v63 = vadd.f32 %v7027_v18, %v7005_v30 }
 0x7d4   :  { %7309 = vmatpush.msrb.mxu1 %v6343_v31  ;;  %7371 = vmatmul.f32.vlgmr.msrb.gmra.mxu3 %v7689_v11  ;;  %v6893_v59 = vadd.f32 %v6892_v53, %v6870_v47 }
 0x7d6   :  { %7310 = vmatpush.msrb.mxu1 %v6337_v23  ;;  %v6916_v5 = vadd.f32 %v6915_v14, %v6893_v59  ;;  %v6984_v45 = vpop.f32.mrf.mxu2 }
 0x7d7   :  { %v7007_v4 = vpop.f32.mrf.mxu3  ;;  %v6985_v24 = vadd.f32 %v6984_v45, %v6541_v35 }
 0x7d8   :  { %7311 = vmatpush.msrb.mxu1 %v6331_v56  ;;  %v6939_v17 = vadd.f32 %v6938_v61, %v6916_v5 }
 0x7d9   :  { %v7008_v49 = vadd.f32 %v7007_v4, %v6985_v24 }
 0x7da   :  { %7312 = vmatpush.msrb.mxu1 %v6325_v2 }
 0x7db   :  { %7236 = vmatmul.f32.gmra.mxu1 %v7690_v3 }
 0x7dc   :  { %7313 = vmatpush.msrb.mxu1 %v6319_v60  ;;  %7374 = vmatmul.f32.gmra.mxu3 %v7690_v3 }
 0x7de   :  { %7314 = vmatpush.msrb.mxu1 %v6313_v16  ;;  %v7073_v13 = vpop.f32.mrf.mxu2 }
 0x7e0   :  { %7315 = vmatpush.msrb.mxu1 %v6307_v12 }
 0x7e2   :  { %7316 = vmatpush.msrb.mxu1 %v6301_v33 }
 0x7e4   :  { %7317 = vmatpush.msrb.mxu1 %v6295_v0 }
 0x7e6   :  { %7318 = vmatpush.msrb.mxu1 %v6289_v38  ;;  %v7076_v11 = vpop.f32.mrf.mxu2 }
 0x7e8   :  { %7319 = vmatpush.msrb.mxu1 %v6283_v41 }
 0x7e9   :  { %v6958_v7 = vpop.f32.mrf.mxu1 }
 0x7ea   :  { %v6959_v8 = vadd.f32 %v6958_v7, %v6936_v32  ;;  %7320 = vmatpush.msrb.mxu1 %v6277_v25 }
 0x7ec   :  { %7380 = vst [vmem:[#allocation12 + $0x10] sm:$0xff] %v6959_v8  ;;  %7321 = vmatpush.msrb.mxu1 %v6271_v34  ;;  %v6543_v34 = vperm.slane %v9317_v9, 5 }
 0x7ee   :  { %7322 = vmatpush.msrb.mxu1 %v6265_v21  ;;  %v7165_v58 = vpop.f32.mrf.mxu2 }
 0x7f0   :  { %7323 = vmatpush.msrb.mxu1 %v6259_v43 }
 0x7f2   :  { %7324 = vmatpush.msrb.mxu1 %v6253_v20 }
 0x7f3   :  { %v6961_v15 = vpop.f32.mrf.mxu1  ;;  %7325 = vmatmul.f32.vlgmr.msrb.gmra.mxu1 %v9319_v42  ;;  %v7096_v42 = vpop.f32.mrf.mxu3 }
 0x7f4   :  { %v6962_v22 = vadd.f32 %v6961_v15, %v6939_v17 }
 0x7f6   :  { %7386 = vst [vmem:[#allocation12 + $0x40] sm:$0xff] %v6962_v22  ;;  %v7168_v0 = vpop.f32.mrf.mxu2 }
 0x7fb   :  { %7328 = vmatmul.f32.gmra.mxu1 %v9328_v55  ;;  %v7030_v55 = vpop.f32.mrf.mxu0  ;;  %v7099_v46 = vpop.f32.mrf.mxu3 }
 0x7fc   :  { %v7031_v57 = vadd.f32 %v7030_v55, %v7008_v49 }
 0x803   :  { %v7119_v56 = vpop.f32.mrf.mxu0 }
 0x804   :  { %v7120_v28 = vadd.f32 %v7119_v56, %v6542_v40 }
 0x80b   :  { %v7122_v3 = vpop.f32.mrf.mxu0 }
 0x80c   :  { %v7123_v52 = vadd.f32 %v7122_v3, %v6542_v40 }
 0x80d   :  { %v7050_v36 = vpop.f32.mrf.mxu1  ;;  %v7257_v7 = vpop.f32.mrf.mxu2 }
 0x80e   :  { %v7051_v48 = vadd.f32 %v7050_v36, %v7028_v63  ;;  %v7258_v21 = vadd.f32 %v7257_v7, %v6543_v34 }
 0x810   :  { %v7074_v1 = vadd.f32 %v7073_v13, %v7051_v48 }
 0x812   :  { %v7097_v51 = vadd.f32 %v7096_v42, %v7074_v1 }
 0x813   :  { %v7188_v12 = vpop.f32.mrf.mxu3  ;;  %v7211_v62 = vpop.f32.mrf.mxu0 }
 0x814   :  { %7381 = vst [vmem:[#allocation12 + $0x18] sm:$0xff] %v7097_v51 }
 0x817   :  { %v7053_v29 = vpop.f32.mrf.mxu1  ;;  %v7260_v8 = vpop.f32.mrf.mxu2 }
 0x818   :  { %v7054_v31 = vadd.f32 %v7053_v29, %v7031_v57  ;;  %v7261_v15 = vadd.f32 %v7260_v8, %v6543_v34 }
 0x81a   :  { %v7077_v23 = vadd.f32 %v7076_v11, %v7054_v31 }
 0x81c   :  { %v7100_v50 = vadd.f32 %v7099_v46, %v7077_v23  ;;  %v7214_v39 = vpop.f32.mrf.mxu0 }
 0x81e   :  { %7387 = vst [vmem:[#allocation12 + $0x48] sm:$0xff] %v7100_v50  ;;  %v7191_v47 = vpop.f32.mrf.mxu3 }
 0x82f   :  { %v7142_v2 = vpop.f32.mrf.mxu1 }
 0x830   :  { %v7143_v60 = vadd.f32 %v7142_v2, %v7120_v28 }
 0x831   :  { %v7349_v61 = vpop.f32.mrf.mxu2 }
 0x832   :  { %v7166_v16 = vadd.f32 %v7165_v58, %v7143_v60 }
 0x834   :  { %v7189_v33 = vadd.f32 %v7188_v12, %v7166_v16  ;;  %v7303_v5 = vpop.f32.mrf.mxu0 }
 0x836   :  { %v7212_v19 = vadd.f32 %v7211_v62, %v7189_v33 }
 0x837   :  { %v7280_v59 = vpop.f32.mrf.mxu3 }
 0x838   :  { %v7145_v27 = vpop.f32.mrf.mxu1  ;;  %v7281_v43 = vadd.f32 %v7280_v59, %v7258_v21 }
 0x839   :  { %v7146_v6 = vadd.f32 %v7145_v27, %v7123_v52  ;;  %v7352_v9 = vpop.f32.mrf.mxu2 }
 0x83a   :  { %v7304_v20 = vadd.f32 %v7303_v5, %v7281_v43 }
 0x83b   :  { %v7169_v44 = vadd.f32 %v7168_v0, %v7146_v6 }
 0x83c   :  { %v7306_v45 = vpop.f32.mrf.mxu0 }
 0x83d   :  { %v7192_v41 = vadd.f32 %v7191_v47, %v7169_v44 }
 0x83f   :  { %v7215_v25 = vadd.f32 %v7214_v39, %v7192_v41  ;;  %v7283_v14 = vpop.f32.mrf.mxu3 }
 0x840   :  { %v7284_v26 = vadd.f32 %v7283_v14, %v7261_v15 }
 0x842   :  { %v7307_v30 = vadd.f32 %v7306_v45, %v7284_v26 }
 0x850   :  { %v7234_v38 = vpop.f32.mrf.mxu1 }
 0x851   :  { %v7235_v54 = vadd.f32 %v7234_v38, %v7212_v19 }
 0x853   :  { %7382 = vst [vmem:[#allocation12 + $0x20] sm:$0xff] %v7235_v54 }
 0x857   :  { %v7372_v10 = vpop.f32.mrf.mxu3 }
 0x858   :  { %v7237_v32 = vpop.f32.mrf.mxu1 }
 0x859   :  { %v7238_v53 = vadd.f32 %v7237_v32, %v7215_v25 }
 0x85b   :  { %7388 = vst [vmem:[#allocation12 + $0x50] sm:$0xff] %v7238_v53 }
 0x85f   :  { %v7375_v36 = vpop.f32.mrf.mxu3 }
 0x870   :  { %v7326_v17 = vpop.f32.mrf.mxu1 }
 0x871   :  { %v7327_v22 = vadd.f32 %v7326_v17, %v7304_v20 }
 0x873   :  { %v7350_v35 = vadd.f32 %v7349_v61, %v7327_v22 }
 0x875   :  { %v7373_v37 = vadd.f32 %v7372_v10, %v7350_v35 }
 0x877   :  { %7383 = vst [vmem:[#allocation12 + $0x28] sm:$0xff] %v7373_v37 }
 0x878   :  { %v7329_v4 = vpop.f32.mrf.mxu1 }
 0x879   :  { %v7330_v18 = vadd.f32 %v7329_v4, %v7307_v30 }
 0x87b   :  { %v7353_v63 = vadd.f32 %v7352_v9, %v7330_v18 }
 0x87d   :  { %v7376_v48 = vadd.f32 %v7375_v36, %v7353_v63 }
 0x87f   :  { %7389 = vst [vmem:[#allocation12 + $0x58] sm:$0xff] %v7376_v48 }
 0x880   :  { %7402 = dma.vmem_to_hbm [thread:$0]  %s7395_s19, 1536, %s7397_s22, [#allocation5], %s7847_s1, %s7847_s1, %s7848_s8  }
 0x881   :  { %7841 = dma.done.wait [#allocation5], 1536  }
 0x882   :  { %7842 = vsyncadd [#allocation5], 4294965760 }
 0x883   :  { %7407 = vsyncpa [#allocation4], 1 }
 0x884   :  { %7408 = vsyncpa [#allocation7], 1 }
 0x885   :  { %7409 = vsyncpa [#allocation10], 1 }
 0x886   :  { %7410 = vsyncpa [#allocation5], 1 }

</bundles_post_ra>
